<compile_context>
chip_gen: v5e
topology: v5e:2x2
jax: 0.10.0
libtpu: 0.0.40
codegen_flags: <defaults>
</compile_context>

<pallas_src>
import math

import numpy as np
import jax
import jax.numpy as jnp
from jax.experimental import pallas as pl
from jax.experimental.pallas import tpu as pltpu

LOG2 = math.log(2.0)


def _ssp(x):
    # shifted softplus SSP(x) = softplus(x) - log(2), numerically stable
    return jnp.where(x > 20.0, x, jnp.log1p(jnp.exp(jnp.minimum(x, 20.0)))) - LOG2


# ---------------------------------------------------------------------------
# Fused kernel: distance basis + L SchNetSpinLayer updates, Bt batches / step
# ---------------------------------------------------------------------------
def _fused_schnet_kernel(
    de_ref, dn_ref,            # (Bt*N*N, 1), (Bt*N*M, 1) f32 distances
    mu_ref, isig2_ref,         # (1, E) f32 gaussian centers / 1/sigma^2
    x0_ref,                    # (N, D)  f32 initial embeddings (batch indep.)
    y_ref,                     # (M, K)  f32 nuclear embeddings
    msame_ref, manti_ref,      # (N, N)  f32 spin masks (same excludes diagonal)
    w1sa_ref, bsa_ref, w2sa_ref,   # (L,E,2mid) bf16, (L,1,2mid) f32, (L,2mid,2K) bf16
    wn1_ref, bn_ref, wn2_ref,      # (L,E,mid)  bf16, (L,1,mid)  f32, (L,mid,K)   bf16
    wh_ref,                        # (L,D,K)  bf16
    g_ref,                         # (L,3K,D) bf16  ([g_same; g_anti; g_n])
    out_ref,                       # (Bt*N, D) f32
):
    N = msame_ref.shape[0]
    M, K = y_ref.shape
    D = x0_ref.shape[1]
    Bt = out_ref.shape[0] // N
    L = wh_ref.shape[0]

    mu = mu_ref[...]
    isig2 = isig2_ref[...]

    def dist_basis(d):                      # d: (R, 1) f32
        env = d * d * jnp.exp(-d)           # 'nocusp' envelope
        return env * jnp.exp(-((d - mu) ** 2) * isig2)   # (R, E)

    # edges computed once, kept resident (bf16 for the MXU)
    ee = dist_basis(de_ref[...]).astype(jnp.bfloat16)     # (Bt*N*N, E)
    en = dist_basis(dn_ref[...]).astype(jnp.bfloat16)     # (Bt*N*M, E)

    ms = msame_ref[...]
    ma = manti_ref[...]
    # masks folded once into a lane-concatenated [same | anti] selector
    m_cat = jnp.concatenate(
        [jnp.broadcast_to(ms[:, :, None], (N, N, K)),
         jnp.broadcast_to(ma[:, :, None], (N, N, K))], axis=-1)   # (N, N, 2K)

    Y = y_ref[...]                                         # (M, K) f32
    x = jnp.concatenate([x0_ref[...]] * Bt, axis=0)        # (Bt*N, D) f32

    for l in range(L):                                     # L is small & static
        x_bf = x.astype(jnp.bfloat16)
        h = jnp.dot(x_bf, wh_ref[l], preferred_element_type=jnp.float32)  # (Bt*N, K)

        # fused same/anti pair MLP on the shared ee input
        t = jnp.dot(ee, w1sa_ref[l], preferred_element_type=jnp.float32) + bsa_ref[l]
        w_sa = jnp.dot(_ssp(t).astype(jnp.bfloat16), w2sa_ref[l],
                       preferred_element_type=jnp.float32)          # (Bt*N*N, 2K)

        # nuclear pair MLP
        tn = jnp.dot(en, wn1_ref[l], preferred_element_type=jnp.float32) + bn_ref[l]
        w_n = jnp.dot(_ssp(tn).astype(jnp.bfloat16), wn2_ref[l],
                      preferred_element_type=jnp.float32)           # (Bt*N*M, K)

        # spin-resolved masked pair sums (single broadcast-mult + sublane reduce)
        h3 = h.reshape(Bt, N, K)
        h2 = jnp.concatenate([h3, h3], axis=-1)                     # (Bt, N, 2K)
        wm = w_sa.reshape(Bt, N, N, 2 * K) * m_cat[None]            # premasked w
        z_sa = jnp.sum(wm * h2[:, None, :, :], axis=2)              # (Bt, N, 2K)

        z_nuc = jnp.sum(w_n.reshape(Bt, N, M, K) * Y[None, None], axis=2)  # (Bt,N,K)

        # single (Bt*N, 3K) x (3K, D) epilogue matmul, residual update
        z_cat = jnp.concatenate([z_sa, z_nuc], axis=-1).reshape(Bt * N, 3 * K)
        x = x + jnp.dot(z_cat.astype(jnp.bfloat16), g_ref[l],
                        preferred_element_type=jnp.float32)

    out_ref[...] = x


# ---------------------------------------------------------------------------
# Weight packing (wrapper-side, plain JAX, done once)
# ---------------------------------------------------------------------------
def _pack_layer_params(layers):
    def blockdiag(a, b):
        m1, k1 = a.shape
        m2, k2 = b.shape
        z = jnp.zeros((m1 + m2, k1 + k2), jnp.float32)
        z = z.at[:m1, :k1].set(a)
        z = z.at[m1:, k1:].set(b)
        return z

    W1sa, Bsa, W2sa, Wn1, Bn, Wn2, Wh, G = [], [], [], [], [], [], [], []
    for lp in layers:
        ws1, bs, ws2 = lp['w_same']
        wa1, ba, wa2 = lp['w_anti']
        wn1, bn, wn2 = lp['w_n']
        W1sa.append(jnp.concatenate([ws1, wa1], axis=1))       # (E, 2*mid)
        Bsa.append(jnp.concatenate([bs, ba], axis=1))          # (1, 2*mid)
        W2sa.append(blockdiag(ws2, wa2))                       # (2*mid, 2*K)
        Wn1.append(wn1)
        Bn.append(bn)
        Wn2.append(wn2)
        Wh.append(lp['h'])
        G.append(jnp.concatenate([lp['g_same'], lp['g_anti'], lp['g_n']], axis=0))

    f32 = lambda xs: jnp.stack(xs).astype(jnp.float32)
    bf16 = lambda xs: jnp.stack(xs).astype(jnp.bfloat16)
    return dict(w1sa=bf16(W1sa), bsa=f32(Bsa), w2sa=bf16(W2sa),
                wn1=bf16(Wn1), bn=f32(Bn), wn2=bf16(Wn2),
                wh=bf16(Wh), g=bf16(G))


# ---------------------------------------------------------------------------
# Forward wrapper: one pallas_call for basis + all interaction layers
# ---------------------------------------------------------------------------
def electronic_schnet_forward(params, dists_elec, dists_nuc, *, n_up, n_down,
                              batch_tile=None):
    B, N, M = dists_nuc.shape
    D = params['X'].shape[-1]
    K = params['Y'].shape[-1]
    E = params['mus'].shape[0]

    Bt = batch_tile or (2 if B % 2 == 0 else 1)
    assert B % Bt == 0, (B, Bt)

    # initial embeddings X[spin_idxs] (batch independent): (N, D)
    if n_up == n_down:
        x0 = jnp.broadcast_to(params['X'][0], (N, D))
    else:
        x0 = jnp.concatenate(
            [jnp.broadcast_to(params['X'][0], (n_up, D)),
             jnp.broadcast_to(params['X'][1], (n_down, D))], axis=0)
    x0 = x0.astype(jnp.float32)

    is_up = np.arange(N) < n_up
    m_same = jnp.asarray((is_up[:, None] == is_up[None, :]) & ~np.eye(N, dtype=bool),
                         jnp.float32)
    m_anti = jnp.asarray(is_up[:, None] != is_up[None, :], jnp.float32)

    mus = params['mus'].reshape(1, E).astype(jnp.float32)
    inv_sig2 = (1.0 / params['sigmas'] ** 2).reshape(1, E).astype(jnp.float32)

    # pre-flattened distances (wrapper-side layout plumbing, free)
    de = dists_elec.reshape(B * N * N, 1).astype(jnp.float32)
    dn = dists_nuc.reshape(B * N * M, 1).astype(jnp.float32)

    Y = params['Y'].astype(jnp.float32)
    packed = _pack_layer_params(params['layers'])

    bcast_args = (mus, inv_sig2, x0, Y, m_same, m_anti,
                  packed['w1sa'], packed['bsa'], packed['w2sa'],
                  packed['wn1'], packed['bn'], packed['wn2'],
                  packed['wh'], packed['g'])

    def bcast_spec(a):
        nd = a.ndim
        return pl.BlockSpec(a.shape, lambda b, nd=nd: (0,) * nd)

    in_specs = [
        pl.BlockSpec((Bt * N * N, 1), lambda b: (b, 0)),
        pl.BlockSpec((Bt * N * M, 1), lambda b: (b, 0)),
    ] + [bcast_spec(a) for a in bcast_args]

    out = pl.pallas_call(
        _fused_schnet_kernel,
        out_shape=jax.ShapeDtypeStruct((B * N, D), jnp.float32),
        grid=(B // Bt,),
        in_specs=in_specs,
        out_specs=pl.BlockSpec((Bt * N, D), lambda b: (b, 0)),
        compiler_params=pltpu.CompilerParams(dimension_semantics=("parallel",)),
    )(de, dn, *bcast_args)
    return out.reshape(B, N, D)


# ---------------------------------------------------------------------------
# Deterministic parameter initialization (shapes follow SubnetFactory/get_log_dnn)
# ---------------------------------------------------------------------------
def _log_dnn_dims(start, end, n_layers):
    return [int(round(start ** (1 - k / n_layers) * end ** (k / n_layers)))
            for k in range(n_layers + 1)]


def _init_linear(key, fan_in, fan_out, bias):
    bound = 1.0 / math.sqrt(fan_in)
    kw, kb = jax.random.split(key)
    W = jax.random.uniform(kw, (fan_in, fan_out), jnp.float32, -bound, bound)
    if bias:
        b = jax.random.uniform(kb, (1, fan_out), jnp.float32, -bound, bound)
        return W, b
    return W, None


def _init_w_subnet(key, E, K, n_layers=2):
    dims = _log_dnn_dims(E, K, n_layers)        # [E, mid, K]
    k1, k2 = jax.random.split(key)
    W1, b1 = _init_linear(k1, dims[0], dims[1], bias=True)
    W2, _ = _init_linear(k2, dims[1], dims[2], bias=False)   # last layer: no bias
    return (W1, b1, W2)


def init_params(key, *, n_up, n_down, n_nuclei, embedding_dim, dist_feat_dim,
                kernel_dim, n_interactions, dist_feat_cutoff):
    E, K, D = dist_feat_dim, kernel_dim, embedding_dim
    keys = jax.random.split(key, 2 + n_interactions)
    X = jax.random.normal(keys[0], (1 if n_up == n_down else 2, D), jnp.float32)
    Y = jax.random.normal(keys[1], (n_nuclei, K), jnp.float32)
    layers = []
    for li in range(n_interactions):
        lk = jax.random.split(keys[2 + li], 7)
        layers.append(dict(
            w_same=_init_w_subnet(lk[0], E, K),
            w_anti=_init_w_subnet(lk[1], E, K),
            w_n=_init_w_subnet(lk[2], E, K),
            h=_init_linear(lk[3], D, K, bias=False)[0],       # n_layers_h = 1
            g_same=_init_linear(lk[4], K, D, bias=False)[0],  # n_layers_g = 1
            g_anti=_init_linear(lk[5], K, D, bias=False)[0],
            g_n=_init_linear(lk[6], K, D, bias=False)[0],
        ))
    delta = 1.0 / (2 * E)
    qs = jnp.linspace(delta, 1 - delta, E)
    mus = dist_feat_cutoff * qs ** 2
    sigmas = (1 + dist_feat_cutoff * qs) / 7
    return dict(X=X, Y=Y, layers=layers, mus=mus, sigmas=sigmas)


# ---------------------------------------------------------------------------
# Pure-JAX f32 reference (mirrors the torch module, gather-based idx_pair_spin)
# ---------------------------------------------------------------------------
def _idx_pair_spin_np(n_up, n_down):
    n = n_up + n_down
    ij = np.array([(i, j) for i in range(n) for j in range(n) if j != i]).T
    mask = ij < n_up
    return [
        ('same', ij[:, mask[0] & mask[1]].reshape(2, n_up, max(n_up - 1, 0))),
        ('anti', ij[:, mask[0] & ~mask[1]].reshape(2, n_up, n_down)),
        ('anti', ij[:, ~mask[0] & mask[1]].reshape(2, n_down, n_up)),
        ('same', ij[:, ~mask[0] & ~mask[1]].reshape(2, n_down, max(n_down - 1, 0))),
    ]


def _dist_basis_ref(d, mus, sigmas):
    env = d ** 2 * jnp.exp(-d)
    return env[..., None] * jnp.exp(-((d[..., None] - mus) ** 2) / sigmas ** 2)


def _ref_layer(x, Y, edges_elec, edges_nuc, lp, n_up, n_down):
    def w_mlp(e, wp):
        W1, b, W2 = wp
        return _ssp(e @ W1 + b) @ W2

    h = x @ lp['h']
    zs = []
    for lbl, ij in _idx_pair_spin_np(n_up, n_down):
        i, j = ij
        w = w_mlp(edges_elec[:, i, j, :], lp['w_' + lbl])
        zs.append(jnp.sum(w * h[:, j, :], axis=-2))
    z_uu, z_ud, z_du, z_dd = zs
    z_same = jnp.concatenate([z_uu, z_dd], axis=-2)
    z_anti = jnp.concatenate([z_ud, z_du], axis=-2)
    z_nuc = jnp.sum(w_mlp(edges_nuc, lp['w_n']) * Y[None, None, :, :], axis=-2)
    return z_same @ lp['g_same'] + z_anti @ lp['g_anti'] + z_nuc @ lp['g_n']


def _ref_forward(params, dists_elec, dists_nuc, *, n_up, n_down):
    B, N, M = dists_nuc.shape
    D = params['X'].shape[-1]
    edges_nuc = _dist_basis_ref(dists_nuc, params['mus'], params['sigmas'])
    edges_elec = _dist_basis_ref(dists_elec, params['mus'], params['sigmas'])
    if n_up == n_down:
        spin_idxs = jnp.zeros((N,), jnp.int32)
    else:
        spin_idxs = jnp.concatenate(
            [jnp.zeros((n_up,), jnp.int32), jnp.ones((n_down,), jnp.int32)])
    x = jnp.broadcast_to(params['X'][spin_idxs], (B, N, D)).astype(jnp.float32)
    Y = params['Y'].astype(jnp.float32)
    for lp in params['layers']:
        x = x + _ref_layer(x, Y, edges_elec, edges_nuc, lp, n_up, n_down)
    return x


if __name__ == "__main__":
    # small config: 4 up + 4 down electrons, 8 nuclei, 32-dim features everywhere
    n_up, n_down = 4, 4
    N = n_up + n_down
    M = 8           # n_nuclei
    B = 4           # batch (walkers); tiled 2 per grid step -> grid=(2,) parallel
    D = 32          # embedding_dim
    E = 32          # dist_feat_dim
    K = 32          # kernel_dim
    L = 3           # n_interactions
    cutoff = 10.0   # dist_feat_cutoff

    key = jax.random.PRNGKey(0)
    kp, kd1, kd2 = jax.random.split(key, 3)
    params = init_params(kp, n_up=n_up, n_down=n_down, n_nuclei=M,
                         embedding_dim=D, dist_feat_dim=E, kernel_dim=K,
                         n_interactions=L, dist_feat_cutoff=cutoff)

    dists_nuc = jax.random.uniform(kd1, (B, N, M), jnp.float32, 0.5, 6.0)
    de = jax.random.uniform(kd2, (B, N, N), jnp.float32, 0.5, 6.0)
    de = 0.5 * (de + jnp.swapaxes(de, -1, -2))
    dists_elec = de * (1.0 - jnp.eye(N, dtype=jnp.float32))

    out = electronic_schnet_forward(params, dists_elec, dists_nuc,
                                    n_up=n_up, n_down=n_down, batch_tile=2)
    out = jax.block_until_ready(out)

    ref = _ref_forward(params, dists_elec, dists_nuc, n_up=n_up, n_down=n_down)
    assert out.shape == (B, N, D), out.shape
    max_err = float(jnp.max(jnp.abs(out - ref)))
    # tolerance loosened vs f32 reference because the kernel feeds bf16 operands
    # to the MXU (f32 accumulation), as recommended by the perf review
    assert jnp.allclose(out, ref, rtol=5e-2, atol=5e-2), max_err
    print("KERNEL_OK")
</pallas_src>

<mosaic_0001>
module attributes {stable_mosaic.version = 11 : i64} {
  func.func @_fused_schnet_kernel(%arg0: i32, %arg1: memref<128x1xf32, #tpu.memory_space<vmem>>, %arg2: memref<128x1xf32, #tpu.memory_space<vmem>>, %arg3: memref<1x32xf32, #tpu.memory_space<vmem>>, %arg4: memref<1x32xf32, #tpu.memory_space<vmem>>, %arg5: memref<8x32xf32, #tpu.memory_space<vmem>>, %arg6: memref<8x32xf32, #tpu.memory_space<vmem>>, %arg7: memref<8x8xf32, #tpu.memory_space<vmem>>, %arg8: memref<8x8xf32, #tpu.memory_space<vmem>>, %arg9: memref<3x32x64xbf16, #tpu.memory_space<vmem>>, %arg10: memref<3x1x64xf32, #tpu.memory_space<vmem>>, %arg11: memref<3x64x64xbf16, #tpu.memory_space<vmem>>, %arg12: memref<3x32x32xbf16, #tpu.memory_space<vmem>>, %arg13: memref<3x1x32xf32, #tpu.memory_space<vmem>>, %arg14: memref<3x32x32xbf16, #tpu.memory_space<vmem>>, %arg15: memref<3x32x32xbf16, #tpu.memory_space<vmem>>, %arg16: memref<3x96x32xbf16, #tpu.memory_space<vmem>>, %arg17: memref<16x32xf32, #tpu.memory_space<vmem>>) attributes {dimension_semantics = [#tpu.dimension_semantics<parallel>], iteration_bounds = array<i64: 2>, scalar_prefetch = 0 : i64, scratch_operands = 0 : i64, tpu.core_type = #tpu.core_type<tc>, window_params = [{transform_indices = @transform_0, window_bounds = array<i64: 128, 1>}, {transform_indices = @transform_1, window_bounds = array<i64: 128, 1>}, {pipeline_mode = #tpu.pipeline_mode<synchronous>, transform_indices = @transform_2, window_bounds = array<i64: 1, 32>}, {pipeline_mode = #tpu.pipeline_mode<synchronous>, transform_indices = @transform_3, window_bounds = array<i64: 1, 32>}, {pipeline_mode = #tpu.pipeline_mode<synchronous>, transform_indices = @transform_4, window_bounds = array<i64: 8, 32>}, {pipeline_mode = #tpu.pipeline_mode<synchronous>, transform_indices = @transform_5, window_bounds = array<i64: 8, 32>}, {pipeline_mode = #tpu.pipeline_mode<synchronous>, transform_indices = @transform_6, window_bounds = array<i64: 8, 8>}, {pipeline_mode = #tpu.pipeline_mode<synchronous>, transform_indices = @transform_7, window_bounds = array<i64: 8, 8>}, {pipeline_mode = #tpu.pipeline_mode<synchronous>, transform_indices = @transform_8, window_bounds = array<i64: 3, 32, 64>}, {pipeline_mode = #tpu.pipeline_mode<synchronous>, transform_indices = @transform_9, window_bounds = array<i64: 3, 1, 64>}, {pipeline_mode = #tpu.pipeline_mode<synchronous>, transform_indices = @transform_10, window_bounds = array<i64: 3, 64, 64>}, {pipeline_mode = #tpu.pipeline_mode<synchronous>, transform_indices = @transform_11, window_bounds = array<i64: 3, 32, 32>}, {pipeline_mode = #tpu.pipeline_mode<synchronous>, transform_indices = @transform_12, window_bounds = array<i64: 3, 1, 32>}, {pipeline_mode = #tpu.pipeline_mode<synchronous>, transform_indices = @transform_13, window_bounds = array<i64: 3, 32, 32>}, {pipeline_mode = #tpu.pipeline_mode<synchronous>, transform_indices = @transform_14, window_bounds = array<i64: 3, 32, 32>}, {pipeline_mode = #tpu.pipeline_mode<synchronous>, transform_indices = @transform_15, window_bounds = array<i64: 3, 96, 32>}, {transform_indices = @transform_16, window_bounds = array<i64: 16, 32>}]} {
    %c0 = arith.constant 0 : index
    %c0_0 = arith.constant 0 : index
    %0 = vector.load %arg3[%c0, %c0_0] : memref<1x32xf32, #tpu.memory_space<vmem>>, vector<1x32xf32>
    %c0_1 = arith.constant 0 : index
    %c0_2 = arith.constant 0 : index
    %1 = vector.load %arg4[%c0_1, %c0_2] : memref<1x32xf32, #tpu.memory_space<vmem>>, vector<1x32xf32>
    %c0_3 = arith.constant 0 : index
    %c0_4 = arith.constant 0 : index
    %2 = vector.load %arg1[%c0_3, %c0_4] : memref<128x1xf32, #tpu.memory_space<vmem>>, vector<128x1xf32>
    %3 = arith.mulf %2, %2 : vector<128x1xf32>
    %cst = arith.constant 0.000000e+00 : f32
    %4 = vector.broadcast %cst : f32 to vector<128x1xf32>
    %5 = arith.subf %4, %2 : vector<128x1xf32>
    %6 = math.exp %5 : vector<128x1xf32>
    %7 = arith.mulf %3, %6 : vector<128x1xf32>
    %8 = vector.broadcast %2 : vector<128x1xf32> to vector<128x32xf32>
    %9 = vector.broadcast %0 : vector<1x32xf32> to vector<128x32xf32>
    %10 = arith.subf %8, %9 : vector<128x32xf32>
    %11 = arith.mulf %10, %10 : vector<128x32xf32>
    %cst_5 = arith.constant 0.000000e+00 : f32
    %12 = vector.broadcast %cst_5 : f32 to vector<128x32xf32>
    %13 = arith.subf %12, %11 : vector<128x32xf32>
    %14 = vector.broadcast %1 : vector<1x32xf32> to vector<128x32xf32>
    %15 = arith.mulf %13, %14 : vector<128x32xf32>
    %16 = math.exp %15 : vector<128x32xf32>
    %17 = vector.broadcast %7 : vector<128x1xf32> to vector<128x32xf32>
    %18 = arith.mulf %17, %16 : vector<128x32xf32>
    %19 = arith.truncf %18 : vector<128x32xf32> to vector<128x32xbf16>
    %c0_6 = arith.constant 0 : index
    %c0_7 = arith.constant 0 : index
    %20 = vector.load %arg2[%c0_6, %c0_7] : memref<128x1xf32, #tpu.memory_space<vmem>>, vector<128x1xf32>
    %21 = arith.mulf %20, %20 : vector<128x1xf32>
    %cst_8 = arith.constant 0.000000e+00 : f32
    %22 = vector.broadcast %cst_8 : f32 to vector<128x1xf32>
    %23 = arith.subf %22, %20 : vector<128x1xf32>
    %24 = math.exp %23 : vector<128x1xf32>
    %25 = arith.mulf %21, %24 : vector<128x1xf32>
    %26 = vector.broadcast %20 : vector<128x1xf32> to vector<128x32xf32>
    %27 = vector.broadcast %0 : vector<1x32xf32> to vector<128x32xf32>
    %28 = arith.subf %26, %27 : vector<128x32xf32>
    %29 = arith.mulf %28, %28 : vector<128x32xf32>
    %cst_9 = arith.constant 0.000000e+00 : f32
    %30 = vector.broadcast %cst_9 : f32 to vector<128x32xf32>
    %31 = arith.subf %30, %29 : vector<128x32xf32>
    %32 = vector.broadcast %1 : vector<1x32xf32> to vector<128x32xf32>
    %33 = arith.mulf %31, %32 : vector<128x32xf32>
    %34 = math.exp %33 : vector<128x32xf32>
    %35 = vector.broadcast %25 : vector<128x1xf32> to vector<128x32xf32>
    %36 = arith.mulf %35, %34 : vector<128x32xf32>
    %37 = arith.truncf %36 : vector<128x32xf32> to vector<128x32xbf16>
    %c0_10 = arith.constant 0 : index
    %c0_11 = arith.constant 0 : index
    %38 = vector.load %arg7[%c0_10, %c0_11] : memref<8x8xf32, #tpu.memory_space<vmem>>, vector<8x8xf32>
    %c0_12 = arith.constant 0 : index
    %c0_13 = arith.constant 0 : index
    %39 = vector.load %arg8[%c0_12, %c0_13] : memref<8x8xf32, #tpu.memory_space<vmem>>, vector<8x8xf32>
    %40 = vector.shape_cast %38 : vector<8x8xf32> to vector<8x8x1xf32>
    %41 = vector.shape_cast %40 : vector<8x8x1xf32> to vector<8x8x1xf32>
    %42 = vector.broadcast %41 : vector<8x8x1xf32> to vector<8x8x32xf32>
    %43 = vector.shape_cast %39 : vector<8x8xf32> to vector<8x8x1xf32>
    %44 = vector.shape_cast %43 : vector<8x8x1xf32> to vector<8x8x1xf32>
    %45 = vector.broadcast %44 : vector<8x8x1xf32> to vector<8x8x32xf32>
    %46 = tpu.concatenate %42, %45 in 2 : vector<8x8x32xf32>, vector<8x8x32xf32> -> vector<8x8x64xf32>
    %c0_14 = arith.constant 0 : index
    %c0_15 = arith.constant 0 : index
    %47 = vector.load %arg6[%c0_14, %c0_15] : memref<8x32xf32, #tpu.memory_space<vmem>>, vector<8x32xf32>
    %c0_16 = arith.constant 0 : index
    %c0_17 = arith.constant 0 : index
    %48 = vector.load %arg5[%c0_16, %c0_17] : memref<8x32xf32, #tpu.memory_space<vmem>>, vector<8x32xf32>
    %49 = tpu.concatenate %48, %48 in 0 : vector<8x32xf32>, vector<8x32xf32> -> vector<16x32xf32>
    %50 = arith.truncf %49 : vector<16x32xf32> to vector<16x32xbf16>
    %c0_18 = arith.constant 0 : index
    %c0_19 = arith.constant 0 : index
    %c0_20 = arith.constant 0 : index
    %51 = vector.load %arg15[%c0_18, %c0_19, %c0_20] : memref<3x32x32xbf16, #tpu.memory_space<vmem>>, vector<1x32x32xbf16>
    %52 = vector.shape_cast %51 : vector<1x32x32xbf16> to vector<32x32xbf16>
    %cst_21 = arith.constant dense<0.000000e+00> : vector<16x32xf32>
    %53 = tpu.matmul %50, %52, %cst_21 {dimension_numbers = #tpu.dot_dimension_numbers<[1], [0], [0], [1], [0, 0, 1, 1], [], []>} : vector<16x32xbf16>, vector<32x32xbf16>, vector<16x32xf32> -> vector<16x32xf32>
    %c0_22 = arith.constant 0 : index
    %c0_23 = arith.constant 0 : index
    %c0_24 = arith.constant 0 : index
    %54 = vector.load %arg9[%c0_22, %c0_23, %c0_24] : memref<3x32x64xbf16, #tpu.memory_space<vmem>>, vector<1x32x64xbf16>
    %55 = vector.shape_cast %54 : vector<1x32x64xbf16> to vector<32x64xbf16>
    %cst_25 = arith.constant dense<0.000000e+00> : vector<128x64xf32>
    %56 = tpu.matmul %19, %55, %cst_25 {dimension_numbers = #tpu.dot_dimension_numbers<[1], [0], [0], [1], [0, 0, 1, 1], [], []>} : vector<128x32xbf16>, vector<32x64xbf16>, vector<128x64xf32> -> vector<128x64xf32>
    %c0_26 = arith.constant 0 : index
    %c0_27 = arith.constant 0 : index
    %c0_28 = arith.constant 0 : index
    %57 = vector.load %arg10[%c0_26, %c0_27, %c0_28] : memref<3x1x64xf32, #tpu.memory_space<vmem>>, vector<1x1x64xf32>
    %58 = vector.shape_cast %57 : vector<1x1x64xf32> to vector<1x64xf32>
    %59 = vector.broadcast %58 : vector<1x64xf32> to vector<128x64xf32>
    %60 = arith.addf %56, %59 : vector<128x64xf32>
    %cst_29 = arith.constant 2.000000e+01 : f32
    %61 = vector.broadcast %cst_29 : f32 to vector<128x64xf32>
    %62 = arith.cmpf ogt, %60, %61 : vector<128x64xf32>
    %cst_30 = arith.constant 2.000000e+01 : f32
    %63 = vector.broadcast %cst_30 : f32 to vector<128x64xf32>
    %64 = arith.minimumf %60, %63 : vector<128x64xf32>
    %65 = math.exp %64 : vector<128x64xf32>
    %66 = math.log1p %65 : vector<128x64xf32>
    %67 = arith.select %62, %60, %66 : vector<128x64xi1>, vector<128x64xf32>
    %cst_31 = arith.constant 0.693147182 : f32
    %68 = vector.broadcast %cst_31 : f32 to vector<128x64xf32>
    %69 = arith.subf %67, %68 : vector<128x64xf32>
    %70 = arith.truncf %69 : vector<128x64xf32> to vector<128x64xbf16>
    %c0_32 = arith.constant 0 : index
    %c0_33 = arith.constant 0 : index
    %c0_34 = arith.constant 0 : index
    %71 = vector.load %arg11[%c0_32, %c0_33, %c0_34] : memref<3x64x64xbf16, #tpu.memory_space<vmem>>, vector<1x64x64xbf16>
    %72 = vector.shape_cast %71 : vector<1x64x64xbf16> to vector<64x64xbf16>
    %cst_35 = arith.constant dense<0.000000e+00> : vector<128x64xf32>
    %73 = tpu.matmul %70, %72, %cst_35 {dimension_numbers = #tpu.dot_dimension_numbers<[1], [0], [0], [1], [0, 0, 1, 1], [], []>} : vector<128x64xbf16>, vector<64x64xbf16>, vector<128x64xf32> -> vector<128x64xf32>
    %c0_36 = arith.constant 0 : index
    %c0_37 = arith.constant 0 : index
    %c0_38 = arith.constant 0 : index
    %74 = vector.load %arg12[%c0_36, %c0_37, %c0_38] : memref<3x32x32xbf16, #tpu.memory_space<vmem>>, vector<1x32x32xbf16>
    %75 = vector.shape_cast %74 : vector<1x32x32xbf16> to vector<32x32xbf16>
    %cst_39 = arith.constant dense<0.000000e+00> : vector<128x32xf32>
    %76 = tpu.matmul %37, %75, %cst_39 {dimension_numbers = #tpu.dot_dimension_numbers<[1], [0], [0], [1], [0, 0, 1, 1], [], []>} : vector<128x32xbf16>, vector<32x32xbf16>, vector<128x32xf32> -> vector<128x32xf32>
    %c0_40 = arith.constant 0 : index
    %c0_41 = arith.constant 0 : index
    %c0_42 = arith.constant 0 : index
    %77 = vector.load %arg13[%c0_40, %c0_41, %c0_42] : memref<3x1x32xf32, #tpu.memory_space<vmem>>, vector<1x1x32xf32>
    %78 = vector.shape_cast %77 : vector<1x1x32xf32> to vector<1x32xf32>
    %79 = vector.broadcast %78 : vector<1x32xf32> to vector<128x32xf32>
    %80 = arith.addf %76, %79 : vector<128x32xf32>
    %cst_43 = arith.constant 2.000000e+01 : f32
    %81 = vector.broadcast %cst_43 : f32 to vector<128x32xf32>
    %82 = arith.cmpf ogt, %80, %81 : vector<128x32xf32>
    %cst_44 = arith.constant 2.000000e+01 : f32
    %83 = vector.broadcast %cst_44 : f32 to vector<128x32xf32>
    %84 = arith.minimumf %80, %83 : vector<128x32xf32>
    %85 = math.exp %84 : vector<128x32xf32>
    %86 = math.log1p %85 : vector<128x32xf32>
    %87 = arith.select %82, %80, %86 : vector<128x32xi1>, vector<128x32xf32>
    %cst_45 = arith.constant 0.693147182 : f32
    %88 = vector.broadcast %cst_45 : f32 to vector<128x32xf32>
    %89 = arith.subf %87, %88 : vector<128x32xf32>
    %90 = arith.truncf %89 : vector<128x32xf32> to vector<128x32xbf16>
    %c0_46 = arith.constant 0 : index
    %c0_47 = arith.constant 0 : index
    %c0_48 = arith.constant 0 : index
    %91 = vector.load %arg14[%c0_46, %c0_47, %c0_48] : memref<3x32x32xbf16, #tpu.memory_space<vmem>>, vector<1x32x32xbf16>
    %92 = vector.shape_cast %91 : vector<1x32x32xbf16> to vector<32x32xbf16>
    %cst_49 = arith.constant dense<0.000000e+00> : vector<128x32xf32>
    %93 = tpu.matmul %90, %92, %cst_49 {dimension_numbers = #tpu.dot_dimension_numbers<[1], [0], [0], [1], [0, 0, 1, 1], [], []>} : vector<128x32xbf16>, vector<32x32xbf16>, vector<128x32xf32> -> vector<128x32xf32>
    %94 = vector.shape_cast %53 : vector<16x32xf32> to vector<2x8x32xf32>
    %95 = tpu.concatenate %94, %94 in 2 : vector<2x8x32xf32>, vector<2x8x32xf32> -> vector<2x8x64xf32>
    %96 = vector.shape_cast %73 : vector<128x64xf32> to vector<2x8x8x64xf32>
    %97 = vector.shape_cast %46 : vector<8x8x64xf32> to vector<1x8x8x64xf32>
    %98 = vector.broadcast %97 : vector<1x8x8x64xf32> to vector<2x8x8x64xf32>
    %99 = arith.mulf %96, %98 : vector<2x8x8x64xf32>
    %100 = vector.shape_cast %95 : vector<2x8x64xf32> to vector<2x1x8x64xf32>
    %101 = vector.broadcast %100 : vector<2x1x8x64xf32> to vector<2x8x8x64xf32>
    %102 = arith.mulf %99, %101 : vector<2x8x8x64xf32>
    %cst_50 = arith.constant dense<0.000000e+00> : vector<2x8x64xf32>
    %103 = vector.multi_reduction <add>, %102, %cst_50 [2] : vector<2x8x8x64xf32> to vector<2x8x64xf32>
    %104 = vector.shape_cast %93 : vector<128x32xf32> to vector<2x8x8x32xf32>
    %105 = vector.shape_cast %47 : vector<8x32xf32> to vector<1x1x8x32xf32>
    %106 = vector.broadcast %105 : vector<1x1x8x32xf32> to vector<2x8x8x32xf32>
    %107 = arith.mulf %104, %106 : vector<2x8x8x32xf32>
    %cst_51 = arith.constant dense<0.000000e+00> : vector<2x8x32xf32>
    %108 = vector.multi_reduction <add>, %107, %cst_51 [2] : vector<2x8x8x32xf32> to vector<2x8x32xf32>
    %109 = tpu.concatenate %103, %108 in 2 : vector<2x8x64xf32>, vector<2x8x32xf32> -> vector<2x8x96xf32>
    %110 = vector.shape_cast %109 : vector<2x8x96xf32> to vector<16x96xf32>
    %111 = arith.truncf %110 : vector<16x96xf32> to vector<16x96xbf16>
    %c0_52 = arith.constant 0 : index
    %c0_53 = arith.constant 0 : index
    %c0_54 = arith.constant 0 : index
    %112 = vector.load %arg16[%c0_52, %c0_53, %c0_54] : memref<3x96x32xbf16, #tpu.memory_space<vmem>>, vector<1x96x32xbf16>
    %113 = vector.shape_cast %112 : vector<1x96x32xbf16> to vector<96x32xbf16>
    %cst_55 = arith.constant dense<0.000000e+00> : vector<16x32xf32>
    %114 = tpu.matmul %111, %113, %cst_55 {dimension_numbers = #tpu.dot_dimension_numbers<[1], [0], [0], [1], [0, 0, 1, 1], [], []>} : vector<16x96xbf16>, vector<96x32xbf16>, vector<16x32xf32> -> vector<16x32xf32>
    %115 = arith.addf %49, %114 : vector<16x32xf32>
    %116 = arith.truncf %115 : vector<16x32xf32> to vector<16x32xbf16>
    %c1 = arith.constant 1 : index
    %c0_56 = arith.constant 0 : index
    %c0_57 = arith.constant 0 : index
    %117 = vector.load %arg15[%c1, %c0_56, %c0_57] : memref<3x32x32xbf16, #tpu.memory_space<vmem>>, vector<1x32x32xbf16>
    %118 = vector.shape_cast %117 : vector<1x32x32xbf16> to vector<32x32xbf16>
    %cst_58 = arith.constant dense<0.000000e+00> : vector<16x32xf32>
    %119 = tpu.matmul %116, %118, %cst_58 {dimension_numbers = #tpu.dot_dimension_numbers<[1], [0], [0], [1], [0, 0, 1, 1], [], []>} : vector<16x32xbf16>, vector<32x32xbf16>, vector<16x32xf32> -> vector<16x32xf32>
    %c1_59 = arith.constant 1 : index
    %c0_60 = arith.constant 0 : index
    %c0_61 = arith.constant 0 : index
    %120 = vector.load %arg9[%c1_59, %c0_60, %c0_61] : memref<3x32x64xbf16, #tpu.memory_space<vmem>>, vector<1x32x64xbf16>
    %121 = vector.shape_cast %120 : vector<1x32x64xbf16> to vector<32x64xbf16>
    %cst_62 = arith.constant dense<0.000000e+00> : vector<128x64xf32>
    %122 = tpu.matmul %19, %121, %cst_62 {dimension_numbers = #tpu.dot_dimension_numbers<[1], [0], [0], [1], [0, 0, 1, 1], [], []>} : vector<128x32xbf16>, vector<32x64xbf16>, vector<128x64xf32> -> vector<128x64xf32>
    %c1_63 = arith.constant 1 : index
    %c0_64 = arith.constant 0 : index
    %c0_65 = arith.constant 0 : index
    %123 = vector.load %arg10[%c1_63, %c0_64, %c0_65] : memref<3x1x64xf32, #tpu.memory_space<vmem>>, vector<1x1x64xf32>
    %124 = vector.shape_cast %123 : vector<1x1x64xf32> to vector<1x64xf32>
    %125 = vector.broadcast %124 : vector<1x64xf32> to vector<128x64xf32>
    %126 = arith.addf %122, %125 : vector<128x64xf32>
    %cst_66 = arith.constant 2.000000e+01 : f32
    %127 = vector.broadcast %cst_66 : f32 to vector<128x64xf32>
    %128 = arith.cmpf ogt, %126, %127 : vector<128x64xf32>
    %cst_67 = arith.constant 2.000000e+01 : f32
    %129 = vector.broadcast %cst_67 : f32 to vector<128x64xf32>
    %130 = arith.minimumf %126, %129 : vector<128x64xf32>
    %131 = math.exp %130 : vector<128x64xf32>
    %132 = math.log1p %131 : vector<128x64xf32>
    %133 = arith.select %128, %126, %132 : vector<128x64xi1>, vector<128x64xf32>
    %cst_68 = arith.constant 0.693147182 : f32
    %134 = vector.broadcast %cst_68 : f32 to vector<128x64xf32>
    %135 = arith.subf %133, %134 : vector<128x64xf32>
    %136 = arith.truncf %135 : vector<128x64xf32> to vector<128x64xbf16>
    %c1_69 = arith.constant 1 : index
    %c0_70 = arith.constant 0 : index
    %c0_71 = arith.constant 0 : index
    %137 = vector.load %arg11[%c1_69, %c0_70, %c0_71] : memref<3x64x64xbf16, #tpu.memory_space<vmem>>, vector<1x64x64xbf16>
    %138 = vector.shape_cast %137 : vector<1x64x64xbf16> to vector<64x64xbf16>
    %cst_72 = arith.constant dense<0.000000e+00> : vector<128x64xf32>
    %139 = tpu.matmul %136, %138, %cst_72 {dimension_numbers = #tpu.dot_dimension_numbers<[1], [0], [0], [1], [0, 0, 1, 1], [], []>} : vector<128x64xbf16>, vector<64x64xbf16>, vector<128x64xf32> -> vector<128x64xf32>
    %c1_73 = arith.constant 1 : index
    %c0_74 = arith.constant 0 : index
    %c0_75 = arith.constant 0 : index
    %140 = vector.load %arg12[%c1_73, %c0_74, %c0_75] : memref<3x32x32xbf16, #tpu.memory_space<vmem>>, vector<1x32x32xbf16>
    %141 = vector.shape_cast %140 : vector<1x32x32xbf16> to vector<32x32xbf16>
    %cst_76 = arith.constant dense<0.000000e+00> : vector<128x32xf32>
    %142 = tpu.matmul %37, %141, %cst_76 {dimension_numbers = #tpu.dot_dimension_numbers<[1], [0], [0], [1], [0, 0, 1, 1], [], []>} : vector<128x32xbf16>, vector<32x32xbf16>, vector<128x32xf32> -> vector<128x32xf32>
    %c1_77 = arith.constant 1 : index
    %c0_78 = arith.constant 0 : index
    %c0_79 = arith.constant 0 : index
    %143 = vector.load %arg13[%c1_77, %c0_78, %c0_79] : memref<3x1x32xf32, #tpu.memory_space<vmem>>, vector<1x1x32xf32>
    %144 = vector.shape_cast %143 : vector<1x1x32xf32> to vector<1x32xf32>
    %145 = vector.broadcast %144 : vector<1x32xf32> to vector<128x32xf32>
    %146 = arith.addf %142, %145 : vector<128x32xf32>
    %cst_80 = arith.constant 2.000000e+01 : f32
    %147 = vector.broadcast %cst_80 : f32 to vector<128x32xf32>
    %148 = arith.cmpf ogt, %146, %147 : vector<128x32xf32>
    %cst_81 = arith.constant 2.000000e+01 : f32
    %149 = vector.broadcast %cst_81 : f32 to vector<128x32xf32>
    %150 = arith.minimumf %146, %149 : vector<128x32xf32>
    %151 = math.exp %150 : vector<128x32xf32>
    %152 = math.log1p %151 : vector<128x32xf32>
    %153 = arith.select %148, %146, %152 : vector<128x32xi1>, vector<128x32xf32>
    %cst_82 = arith.constant 0.693147182 : f32
    %154 = vector.broadcast %cst_82 : f32 to vector<128x32xf32>
    %155 = arith.subf %153, %154 : vector<128x32xf32>
    %156 = arith.truncf %155 : vector<128x32xf32> to vector<128x32xbf16>
    %c1_83 = arith.constant 1 : index
    %c0_84 = arith.constant 0 : index
    %c0_85 = arith.constant 0 : index
    %157 = vector.load %arg14[%c1_83, %c0_84, %c0_85] : memref<3x32x32xbf16, #tpu.memory_space<vmem>>, vector<1x32x32xbf16>
    %158 = vector.shape_cast %157 : vector<1x32x32xbf16> to vector<32x32xbf16>
    %cst_86 = arith.constant dense<0.000000e+00> : vector<128x32xf32>
    %159 = tpu.matmul %156, %158, %cst_86 {dimension_numbers = #tpu.dot_dimension_numbers<[1], [0], [0], [1], [0, 0, 1, 1], [], []>} : vector<128x32xbf16>, vector<32x32xbf16>, vector<128x32xf32> -> vector<128x32xf32>
    %160 = vector.shape_cast %119 : vector<16x32xf32> to vector<2x8x32xf32>
    %161 = tpu.concatenate %160, %160 in 2 : vector<2x8x32xf32>, vector<2x8x32xf32> -> vector<2x8x64xf32>
    %162 = vector.shape_cast %139 : vector<128x64xf32> to vector<2x8x8x64xf32>
    %163 = vector.shape_cast %46 : vector<8x8x64xf32> to vector<1x8x8x64xf32>
    %164 = vector.broadcast %163 : vector<1x8x8x64xf32> to vector<2x8x8x64xf32>
    %165 = arith.mulf %162, %164 : vector<2x8x8x64xf32>
    %166 = vector.shape_cast %161 : vector<2x8x64xf32> to vector<2x1x8x64xf32>
    %167 = vector.broadcast %166 : vector<2x1x8x64xf32> to vector<2x8x8x64xf32>
    %168 = arith.mulf %165, %167 : vector<2x8x8x64xf32>
    %cst_87 = arith.constant dense<0.000000e+00> : vector<2x8x64xf32>
    %169 = vector.multi_reduction <add>, %168, %cst_87 [2] : vector<2x8x8x64xf32> to vector<2x8x64xf32>
    %170 = vector.shape_cast %159 : vector<128x32xf32> to vector<2x8x8x32xf32>
    %171 = vector.shape_cast %47 : vector<8x32xf32> to vector<1x1x8x32xf32>
    %172 = vector.broadcast %171 : vector<1x1x8x32xf32> to vector<2x8x8x32xf32>
    %173 = arith.mulf %170, %172 : vector<2x8x8x32xf32>
    %cst_88 = arith.constant dense<0.000000e+00> : vector<2x8x32xf32>
    %174 = vector.multi_reduction <add>, %173, %cst_88 [2] : vector<2x8x8x32xf32> to vector<2x8x32xf32>
    %175 = tpu.concatenate %169, %174 in 2 : vector<2x8x64xf32>, vector<2x8x32xf32> -> vector<2x8x96xf32>
    %176 = vector.shape_cast %175 : vector<2x8x96xf32> to vector<16x96xf32>
    %177 = arith.truncf %176 : vector<16x96xf32> to vector<16x96xbf16>
    %c1_89 = arith.constant 1 : index
    %c0_90 = arith.constant 0 : index
    %c0_91 = arith.constant 0 : index
    %178 = vector.load %arg16[%c1_89, %c0_90, %c0_91] : memref<3x96x32xbf16, #tpu.memory_space<vmem>>, vector<1x96x32xbf16>
    %179 = vector.shape_cast %178 : vector<1x96x32xbf16> to vector<96x32xbf16>
    %cst_92 = arith.constant dense<0.000000e+00> : vector<16x32xf32>
    %180 = tpu.matmul %177, %179, %cst_92 {dimension_numbers = #tpu.dot_dimension_numbers<[1], [0], [0], [1], [0, 0, 1, 1], [], []>} : vector<16x96xbf16>, vector<96x32xbf16>, vector<16x32xf32> -> vector<16x32xf32>
    %181 = arith.addf %115, %180 : vector<16x32xf32>
    %182 = arith.truncf %181 : vector<16x32xf32> to vector<16x32xbf16>
    %c2 = arith.constant 2 : index
    %c0_93 = arith.constant 0 : index
    %c0_94 = arith.constant 0 : index
    %183 = vector.load %arg15[%c2, %c0_93, %c0_94] : memref<3x32x32xbf16, #tpu.memory_space<vmem>>, vector<1x32x32xbf16>
    %184 = vector.shape_cast %183 : vector<1x32x32xbf16> to vector<32x32xbf16>
    %cst_95 = arith.constant dense<0.000000e+00> : vector<16x32xf32>
    %185 = tpu.matmul %182, %184, %cst_95 {dimension_numbers = #tpu.dot_dimension_numbers<[1], [0], [0], [1], [0, 0, 1, 1], [], []>} : vector<16x32xbf16>, vector<32x32xbf16>, vector<16x32xf32> -> vector<16x32xf32>
    %c2_96 = arith.constant 2 : index
    %c0_97 = arith.constant 0 : index
    %c0_98 = arith.constant 0 : index
    %186 = vector.load %arg9[%c2_96, %c0_97, %c0_98] : memref<3x32x64xbf16, #tpu.memory_space<vmem>>, vector<1x32x64xbf16>
    %187 = vector.shape_cast %186 : vector<1x32x64xbf16> to vector<32x64xbf16>
    %cst_99 = arith.constant dense<0.000000e+00> : vector<128x64xf32>
    %188 = tpu.matmul %19, %187, %cst_99 {dimension_numbers = #tpu.dot_dimension_numbers<[1], [0], [0], [1], [0, 0, 1, 1], [], []>} : vector<128x32xbf16>, vector<32x64xbf16>, vector<128x64xf32> -> vector<128x64xf32>
    %c2_100 = arith.constant 2 : index
    %c0_101 = arith.constant 0 : index
    %c0_102 = arith.constant 0 : index
    %189 = vector.load %arg10[%c2_100, %c0_101, %c0_102] : memref<3x1x64xf32, #tpu.memory_space<vmem>>, vector<1x1x64xf32>
    %190 = vector.shape_cast %189 : vector<1x1x64xf32> to vector<1x64xf32>
    %191 = vector.broadcast %190 : vector<1x64xf32> to vector<128x64xf32>
    %192 = arith.addf %188, %191 : vector<128x64xf32>
    %cst_103 = arith.constant 2.000000e+01 : f32
    %193 = vector.broadcast %cst_103 : f32 to vector<128x64xf32>
    %194 = arith.cmpf ogt, %192, %193 : vector<128x64xf32>
    %cst_104 = arith.constant 2.000000e+01 : f32
    %195 = vector.broadcast %cst_104 : f32 to vector<128x64xf32>
    %196 = arith.minimumf %192, %195 : vector<128x64xf32>
    %197 = math.exp %196 : vector<128x64xf32>
    %198 = math.log1p %197 : vector<128x64xf32>
    %199 = arith.select %194, %192, %198 : vector<128x64xi1>, vector<128x64xf32>
    %cst_105 = arith.constant 0.693147182 : f32
    %200 = vector.broadcast %cst_105 : f32 to vector<128x64xf32>
    %201 = arith.subf %199, %200 : vector<128x64xf32>
    %202 = arith.truncf %201 : vector<128x64xf32> to vector<128x64xbf16>
    %c2_106 = arith.constant 2 : index
    %c0_107 = arith.constant 0 : index
    %c0_108 = arith.constant 0 : index
    %203 = vector.load %arg11[%c2_106, %c0_107, %c0_108] : memref<3x64x64xbf16, #tpu.memory_space<vmem>>, vector<1x64x64xbf16>
    %204 = vector.shape_cast %203 : vector<1x64x64xbf16> to vector<64x64xbf16>
    %cst_109 = arith.constant dense<0.000000e+00> : vector<128x64xf32>
    %205 = tpu.matmul %202, %204, %cst_109 {dimension_numbers = #tpu.dot_dimension_numbers<[1], [0], [0], [1], [0, 0, 1, 1], [], []>} : vector<128x64xbf16>, vector<64x64xbf16>, vector<128x64xf32> -> vector<128x64xf32>
    %c2_110 = arith.constant 2 : index
    %c0_111 = arith.constant 0 : index
    %c0_112 = arith.constant 0 : index
    %206 = vector.load %arg12[%c2_110, %c0_111, %c0_112] : memref<3x32x32xbf16, #tpu.memory_space<vmem>>, vector<1x32x32xbf16>
    %207 = vector.shape_cast %206 : vector<1x32x32xbf16> to vector<32x32xbf16>
    %cst_113 = arith.constant dense<0.000000e+00> : vector<128x32xf32>
    %208 = tpu.matmul %37, %207, %cst_113 {dimension_numbers = #tpu.dot_dimension_numbers<[1], [0], [0], [1], [0, 0, 1, 1], [], []>} : vector<128x32xbf16>, vector<32x32xbf16>, vector<128x32xf32> -> vector<128x32xf32>
    %c2_114 = arith.constant 2 : index
    %c0_115 = arith.constant 0 : index
    %c0_116 = arith.constant 0 : index
    %209 = vector.load %arg13[%c2_114, %c0_115, %c0_116] : memref<3x1x32xf32, #tpu.memory_space<vmem>>, vector<1x1x32xf32>
    %210 = vector.shape_cast %209 : vector<1x1x32xf32> to vector<1x32xf32>
    %211 = vector.broadcast %210 : vector<1x32xf32> to vector<128x32xf32>
    %212 = arith.addf %208, %211 : vector<128x32xf32>
    %cst_117 = arith.constant 2.000000e+01 : f32
    %213 = vector.broadcast %cst_117 : f32 to vector<128x32xf32>
    %214 = arith.cmpf ogt, %212, %213 : vector<128x32xf32>
    %cst_118 = arith.constant 2.000000e+01 : f32
    %215 = vector.broadcast %cst_118 : f32 to vector<128x32xf32>
    %216 = arith.minimumf %212, %215 : vector<128x32xf32>
    %217 = math.exp %216 : vector<128x32xf32>
    %218 = math.log1p %217 : vector<128x32xf32>
    %219 = arith.select %214, %212, %218 : vector<128x32xi1>, vector<128x32xf32>
    %cst_119 = arith.constant 0.693147182 : f32
    %220 = vector.broadcast %cst_119 : f32 to vector<128x32xf32>
    %221 = arith.subf %219, %220 : vector<128x32xf32>
    %222 = arith.truncf %221 : vector<128x32xf32> to vector<128x32xbf16>
    %c2_120 = arith.constant 2 : index
    %c0_121 = arith.constant 0 : index
    %c0_122 = arith.constant 0 : index
    %223 = vector.load %arg14[%c2_120, %c0_121, %c0_122] : memref<3x32x32xbf16, #tpu.memory_space<vmem>>, vector<1x32x32xbf16>
    %224 = vector.shape_cast %223 : vector<1x32x32xbf16> to vector<32x32xbf16>
    %cst_123 = arith.constant dense<0.000000e+00> : vector<128x32xf32>
    %225 = tpu.matmul %222, %224, %cst_123 {dimension_numbers = #tpu.dot_dimension_numbers<[1], [0], [0], [1], [0, 0, 1, 1], [], []>} : vector<128x32xbf16>, vector<32x32xbf16>, vector<128x32xf32> -> vector<128x32xf32>
    %226 = vector.shape_cast %185 : vector<16x32xf32> to vector<2x8x32xf32>
    %227 = tpu.concatenate %226, %226 in 2 : vector<2x8x32xf32>, vector<2x8x32xf32> -> vector<2x8x64xf32>
    %228 = vector.shape_cast %205 : vector<128x64xf32> to vector<2x8x8x64xf32>
    %229 = vector.shape_cast %46 : vector<8x8x64xf32> to vector<1x8x8x64xf32>
    %230 = vector.broadcast %229 : vector<1x8x8x64xf32> to vector<2x8x8x64xf32>
    %231 = arith.mulf %228, %230 : vector<2x8x8x64xf32>
    %232 = vector.shape_cast %227 : vector<2x8x64xf32> to vector<2x1x8x64xf32>
    %233 = vector.broadcast %232 : vector<2x1x8x64xf32> to vector<2x8x8x64xf32>
    %234 = arith.mulf %231, %233 : vector<2x8x8x64xf32>
    %cst_124 = arith.constant dense<0.000000e+00> : vector<2x8x64xf32>
    %235 = vector.multi_reduction <add>, %234, %cst_124 [2] : vector<2x8x8x64xf32> to vector<2x8x64xf32>
    %236 = vector.shape_cast %225 : vector<128x32xf32> to vector<2x8x8x32xf32>
    %237 = vector.shape_cast %47 : vector<8x32xf32> to vector<1x1x8x32xf32>
    %238 = vector.broadcast %237 : vector<1x1x8x32xf32> to vector<2x8x8x32xf32>
    %239 = arith.mulf %236, %238 : vector<2x8x8x32xf32>
    %cst_125 = arith.constant dense<0.000000e+00> : vector<2x8x32xf32>
    %240 = vector.multi_reduction <add>, %239, %cst_125 [2] : vector<2x8x8x32xf32> to vector<2x8x32xf32>
    %241 = tpu.concatenate %235, %240 in 2 : vector<2x8x64xf32>, vector<2x8x32xf32> -> vector<2x8x96xf32>
    %242 = vector.shape_cast %241 : vector<2x8x96xf32> to vector<16x96xf32>
    %243 = arith.truncf %242 : vector<16x96xf32> to vector<16x96xbf16>
    %c2_126 = arith.constant 2 : index
    %c0_127 = arith.constant 0 : index
    %c0_128 = arith.constant 0 : index
    %244 = vector.load %arg16[%c2_126, %c0_127, %c0_128] : memref<3x96x32xbf16, #tpu.memory_space<vmem>>, vector<1x96x32xbf16>
    %245 = vector.shape_cast %244 : vector<1x96x32xbf16> to vector<96x32xbf16>
    %cst_129 = arith.constant dense<0.000000e+00> : vector<16x32xf32>
    %246 = tpu.matmul %243, %245, %cst_129 {dimension_numbers = #tpu.dot_dimension_numbers<[1], [0], [0], [1], [0, 0, 1, 1], [], []>} : vector<16x96xbf16>, vector<96x32xbf16>, vector<16x32xf32> -> vector<16x32xf32>
    %247 = arith.addf %181, %246 : vector<16x32xf32>
    %c0_130 = arith.constant 0 : index
    %c0_131 = arith.constant 0 : index
    %248 = vector.load %arg17[%c0_130, %c0_131] : memref<16x32xf32, #tpu.memory_space<vmem>>, vector<16x32xf32>
    tpu.vector_store %arg17[%c0_130, %c0_131], %247 {strides = array<i32>} : memref<16x32xf32, #tpu.memory_space<vmem>>, vector<16x32xf32>,
    return
  }
  func.func @transform_0(%arg0: i32) -> (i32, i32) {
    %c0_i32 = arith.constant 0 : i32
    %c0_i32_0 = arith.constant 0 : i32
    return %arg0, %c0_i32 : i32, i32
  }
  func.func @transform_1(%arg0: i32) -> (i32, i32) {
    %c0_i32 = arith.constant 0 : i32
    %c0_i32_0 = arith.constant 0 : i32
    return %arg0, %c0_i32 : i32, i32
  }
  func.func @transform_2(%arg0: i32) -> (i32, i32) {
    %c0_i32 = arith.constant 0 : i32
    %c0_i32_0 = arith.constant 0 : i32
    %c0_i32_1 = arith.constant 0 : i32
    return %c0_i32, %c0_i32_0 : i32, i32
  }
  func.func @transform_3(%arg0: i32) -> (i32, i32) {
    %c0_i32 = arith.constant 0 : i32
    %c0_i32_0 = arith.constant 0 : i32
    %c0_i32_1 = arith.constant 0 : i32
    return %c0_i32, %c0_i32_0 : i32, i32
  }
  func.func @transform_4(%arg0: i32) -> (i32, i32) {
    %c0_i32 = arith.constant 0 : i32
    %c0_i32_0 = arith.constant 0 : i32
    %c0_i32_1 = arith.constant 0 : i32
    return %c0_i32, %c0_i32_0 : i32, i32
  }
  func.func @transform_5(%arg0: i32) -> (i32, i32) {
    %c0_i32 = arith.constant 0 : i32
    %c0_i32_0 = arith.constant 0 : i32
    %c0_i32_1 = arith.constant 0 : i32
    return %c0_i32, %c0_i32_0 : i32, i32
  }
  func.func @transform_6(%arg0: i32) -> (i32, i32) {
    %c0_i32 = arith.constant 0 : i32
    %c0_i32_0 = arith.constant 0 : i32
    %c0_i32_1 = arith.constant 0 : i32
    return %c0_i32, %c0_i32_0 : i32, i32
  }
  func.func @transform_7(%arg0: i32) -> (i32, i32) {
    %c0_i32 = arith.constant 0 : i32
    %c0_i32_0 = arith.constant 0 : i32
    %c0_i32_1 = arith.constant 0 : i32
    return %c0_i32, %c0_i32_0 : i32, i32
  }
  func.func @transform_8(%arg0: i32) -> (i32, i32, i32) {
    %c0_i32 = arith.constant 0 : i32
    %c0_i32_0 = arith.constant 0 : i32
    %c0_i32_1 = arith.constant 0 : i32
    %c0_i32_2 = arith.constant 0 : i32
    return %c0_i32, %c0_i32_0, %c0_i32_1 : i32, i32, i32
  }
  func.func @transform_9(%arg0: i32) -> (i32, i32, i32) {
    %c0_i32 = arith.constant 0 : i32
    %c0_i32_0 = arith.constant 0 : i32
    %c0_i32_1 = arith.constant 0 : i32
    %c0_i32_2 = arith.constant 0 : i32
    return %c0_i32, %c0_i32_0, %c0_i32_1 : i32, i32, i32
  }
  func.func @transform_10(%arg0: i32) -> (i32, i32, i32) {
    %c0_i32 = arith.constant 0 : i32
    %c0_i32_0 = arith.constant 0 : i32
    %c0_i32_1 = arith.constant 0 : i32
    %c0_i32_2 = arith.constant 0 : i32
    return %c0_i32, %c0_i32_0, %c0_i32_1 : i32, i32, i32
  }
  func.func @transform_11(%arg0: i32) -> (i32, i32, i32) {
    %c0_i32 = arith.constant 0 : i32
    %c0_i32_0 = arith.constant 0 : i32
    %c0_i32_1 = arith.constant 0 : i32
    %c0_i32_2 = arith.constant 0 : i32
    return %c0_i32, %c0_i32_0, %c0_i32_1 : i32, i32, i32
  }
  func.func @transform_12(%arg0: i32) -> (i32, i32, i32) {
    %c0_i32 = arith.constant 0 : i32
    %c0_i32_0 = arith.constant 0 : i32
    %c0_i32_1 = arith.constant 0 : i32
    %c0_i32_2 = arith.constant 0 : i32
    return %c0_i32, %c0_i32_0, %c0_i32_1 : i32, i32, i32
  }
  func.func @transform_13(%arg0: i32) -> (i32, i32, i32) {
    %c0_i32 = arith.constant 0 : i32
    %c0_i32_0 = arith.constant 0 : i32
    %c0_i32_1 = arith.constant 0 : i32
    %c0_i32_2 = arith.constant 0 : i32
    return %c0_i32, %c0_i32_0, %c0_i32_1 : i32, i32, i32
  }
  func.func @transform_14(%arg0: i32) -> (i32, i32, i32) {
    %c0_i32 = arith.constant 0 : i32
    %c0_i32_0 = arith.constant 0 : i32
    %c0_i32_1 = arith.constant 0 : i32
    %c0_i32_2 = arith.constant 0 : i32
    return %c0_i32, %c0_i32_0, %c0_i32_1 : i32, i32, i32
  }
  func.func @transform_15(%arg0: i32) -> (i32, i32, i32) {
    %c0_i32 = arith.constant 0 : i32
    %c0_i32_0 = arith.constant 0 : i32
    %c0_i32_1 = arith.constant 0 : i32
    %c0_i32_2 = arith.constant 0 : i32
    return %c0_i32, %c0_i32_0, %c0_i32_1 : i32, i32, i32
  }
  func.func @transform_16(%arg0: i32) -> (i32, i32) {
    %c0_i32 = arith.constant 0 : i32
    %c0_i32_0 = arith.constant 0 : i32
    return %arg0, %c0_i32 : i32, i32
  }
}

</mosaic_0001>

<bundles_post_ra>
// kernel: tpu_custom_call.1
= control target key start
LH: loop header
LB: loop body
LE: loop exit
PB: predicated region body
PF: predicated region fallthrough
CT: control target
= control target key end

     0   :  { %s8712_s0 = inlined_call_operand.vmem [shape: f32[256,1], index: 0, kind: input, shape index: {}]   ;;  %s8713_s1 = inlined_call_operand.vmem [shape: f32[256,1], index: 1, kind: input, shape index: {}]   ;;  %s8714_s2 = inlined_call_operand.vmem [shape: f32[1,32], index: 2, kind: input, shape index: {}]   ;;  %s8715_s3 = inlined_call_operand.vmem [shape: f32[1,32], index: 3, kind: input, shape index: {}]   ;;  %s8716_s4 = inlined_call_operand.vmem [shape: f32[8,32], index: 4, kind: input, shape index: {}]   ;;  %s8717_s5 = inlined_call_operand.vmem [shape: f32[8,32], index: 5, kind: input, shape index: {}]   ;;  %s8718_s6 = inlined_call_operand.vmem [shape: f32[8,8], index: 6, kind: input, shape index: {}]   ;;  %s8719_s7 = inlined_call_operand.vmem [shape: f32[8,8], index: 7, kind: input, shape index: {}]   ;;  %s8720_s8 = inlined_call_operand.vmem [shape: bf16[3,32,64], index: 8, kind: input, shape index: {}]   ;;  %s8721_s9 = inlined_call_operand.vmem [shape: f32[3,1,64], index: 9, kind: input, shape index: {}]   ;;  %s8722_s10 = inlined_call_operand.vmem [shape: bf16[3,64,64], index: 10, kind: input, shape index: {}]   ;;  %s8723_s11 = inlined_call_operand.vmem [shape: bf16[3,32,32], index: 11, kind: input, shape index: {}]   ;;  %s8724_s12 = inlined_call_operand.vmem [shape: f32[3,1,32], index: 12, kind: input, shape index: {}]   ;;  %s8725_s13 = inlined_call_operand.vmem [shape: bf16[3,32,32], index: 13, kind: input, shape index: {}]   ;;  %s8726_s14 = inlined_call_operand.vmem [shape: bf16[3,32,32], index: 14, kind: input, shape index: {}]   ;;  %s8727_s15 = inlined_call_operand.vmem [shape: bf16[3,96,32], index: 15, kind: input, shape index: {}]   ;;  %s8728_s16 = inlined_call_operand.hbm [shape: f32[32,32], index: 16, kind: output, shape index: {}]  }
   0x1   :  { %8735 = sst [smem:[#allocation8_spill]] %s8712_s0 }
   0x2   :  { %8736 = sst [smem:[#allocation9_spill]] %s8713_s1 }
   0x3   :  { %8737 = sst [smem:[#allocation10_spill]] %s8714_s2 }
   0x4   :  { %8738 = sst [smem:[#allocation11_spill]] %s8715_s3 }
   0x5   :  { %8739 = sst [smem:[#allocation12_spill]] %s8716_s4 }
   0x6   :  { %21 = vsyncpa [#allocation3], 0 }
   0x7   :  { %23 = vsyncpa [#allocation3 + $0x1], 0  ;;  %s6746_s21 = smov 0   ;;  %s6748_s22 = smov 0  }
   0x8   :  { %s6750_s23 = smov 0   ;;  %s6752_s24 = smov 0  }
   0x9 LB: > { %s5441_s25 = sadd.s32 4294967295, %s6654_s24   ;;  %s5442_s26 = sadd.s32 4294967294, %s6654_s24   ;;  %s6654_s24 = sphi %s6752_s24, %s8803_s24   ;;  %s6650_s23 = sphi %s6750_s23, %s8802_s23   ;;  %s6646_s22 = sphi %s6748_s22, %s8801_s22   ;;  %s6642_s21 = sphi %s6746_s21, %s8800_s21  }
   0xa   : > { %s6769_s27 = sadd.s32 1, %s6654_s24   ;;  %s382_s28 = sadd.s32 1, %s6650_s23 }
   0xb   : > { %s379_s29 = ssub.s32 %s6654_s24, %s6769_s27  ;;  %p392_p0 = scmp.ne.s32.totalorder %s6650_s23, %s6646_s22 }
   0xc   : > { %p380_p1 = scmp.eq.s32.totalorder %s379_s29, 0  ;;  %p393_p2 = scmp.eq.s32.totalorder %s5441_s25, 1 }
   0xd   : > { %p398_p3 = scmp.ne.s32.totalorder %s6646_s22, %s6642_s21  ;;  %p399_p4 = scmp.eq.s32.totalorder %s5442_s26, 1 }
   0xe   : > { %s6779_s30 = scalar_select %p380_p1, %s6650_s23, %s382_s28  }
   0xf   : > { %p6781_p5 = por %p393_p2, %p392_p0  ;;  %p6785_p6 = por %p399_p4, %p398_p3 }
  0x10   : > { %8740 = sst [smem:[#allocation5_spill]] %s6779_s30  ;;  %p5445_p7 = scmp.ge.s32.totalorder %s6654_s24, 1 }
  0x11   : > { %p477_p8 = scmp.lt.s32.totalorder %s6654_s24, 3 }
  0x13   : > { %p478_p9 = pnand %p5445_p7, %p477_p8 }
  0x15   : > { %481 = sbr.rel (%p478_p9) target bundleno = 1943 (0x797), region = 84 }
  0x1a   : > { %s6791_s18 = sshll.u32 %s5441_s25, 4  ;;  %v6656_v0 = vmov 0   ;;  %s8743_s1 = sld [smem:[#allocation9_spill]]  ;;  %vm1420_vm0 = vcmask 261120   ;;  %vm1838_vm13 = vcmask 523264  }
  0x1b   : > { %6046 = vset.pattern.permute.xlu1 %v6656_v0  ;;  %6045 = vset.pattern.permute.xlu0 %v6656_v0  ;;  %p533_p10 = scmp.lt.s32.totalorder %s6791_s18, 31  ;;  %s8744_s28 = sld [smem:[#allocation8_spill]] }
  0x1c   : > { %6047 = vset.pattern.permute.xlu2 %v6656_v0  ;;  %s8745_s2 = sld [smem:[#allocation10_spill]]  ;;  %s8729_s30 = smov 64  }
  0x1d   : > { %s6795_s19 = scalar_select %p533_p10, %s6791_s18, 31 }
  0x1e   : > { %s8746_s3 = sld [smem:[#allocation11_spill]]  ;;  %s8796_s25 = smov 64  }
  0x1f   : > { %s5448_s20 = sshll.u32 %s6795_s19, 3  ;;  %s8747_s4 = sld [smem:[#allocation12_spill]] }
  0x20   : > { %s6803_s29 = scalar_lea.vmem %s8743_s1, %s5448_s20 }
  0x21   : > { %v932_v1 = vld [vmem:[%s6803_s29 + $0x10] sm:$0xff]  ;;  %v930_v2 = vld [vmem:[%s6803_s29] sm:$0xff]  ;;  %v931_v4 = vld [vmem:[%s6803_s29 + $0x8] sm:$0xff]  ;;  %s6816_s1 = scalar_lea.vmem %s8744_s28, %s5448_s20  ;;  %s8731_s28 = smov 32  }
  0x22   : > { %1038 = vperm.xlu1 %6046, %v932_v1   ;;  %1028 = vperm.xlu0 %6045, %v930_v2   ;;  %v962_v3 = vsub.f32 0.0, %v930_v2  ;;  %v963_v5 = vsub.f32 0.0, %v931_v4  ;;  %v933_v7 = vld [vmem:[%s6803_s29 + $0x18] sm:$0xff]  ;;  %v946_v11 = vmul.f32 %v930_v2, %v930_v2  ;;  %v964_v12 = vsub.f32 0.0, %v932_v1  ;;  %v935_v16 = vld [vmem:[%s6803_s29 + $0x28] sm:$0xff]  ;;  %v934_v17 = vld [vmem:[%s6803_s29 + $0x20] sm:$0xff] }
  0x23   : > { %v965_v8 = vsub.f32 0.0, %v933_v7  ;;  %v947_v18 = vmul.f32 %v931_v4, %v931_v4  ;;  %v949_v20 = vmul.f32 %v933_v7, %v933_v7  ;;  %v967_v23 = vsub.f32 0.0, %v935_v16  ;;  %v548_v25 = vld [vmem:[%s6816_s1] sm:$0xff]  ;;  %v549_v29 = vld [vmem:[%s6816_s1 + $0x8] sm:$0xff]  ;;  %v936_v35 = vld [vmem:[%s6803_s29 + $0x30] sm:$0xff]  ;;  %s8788_s20 = smov 32  }
  0x24   : > { %v978_v6 = vmul.f32 1.442695, %v962_v3  ;;  %v980_v9 = vmul.f32 1.442695, %v963_v5  ;;  %v982_v15 = vmul.f32 1.442695, %v964_v12  ;;  %v948_v26 = vmul.f32 %v932_v1, %v932_v1 }
  0x25   : > { %v984_v10 = vmul.f32 1.442695, %v965_v8  ;;  %v988_v28 = vmul.f32 1.442695, %v967_v23  ;;  %v966_v30 = vsub.f32 0.0, %v934_v17  ;;  %v580_v31 = vsub.f32 0.0, %v548_v25 }
  0x26   : > { %6074 = vpow2.f32 %v978_v6  ;;  %v581_v33 = vsub.f32 0.0, %v549_v29  ;;  %v937_v36 = vld [vmem:[%s6803_s29 + $0x38] sm:$0xff]  ;;  %v951_v39 = vmul.f32 %v935_v16, %v935_v16  ;;  %v968_v41 = vsub.f32 0.0, %v936_v35  ;;  %v550_v43 = vld [vmem:[%s6816_s1 + $0x10] sm:$0xff]  ;;  %v939_v61 = vld [vmem:[%s6803_s29 + $0x48] sm:$0xff] }
  0x27   : > { %6076 = vpow2.f32 %v980_v9  ;;  %v986_v34 = vmul.f32 1.442695, %v966_v30  ;;  %v596_v37 = vmul.f32 1.442695, %v580_v31  ;;  %v950_v44 = vmul.f32 %v934_v17, %v934_v17  ;;  %v551_v57 = vld [vmem:[%s6816_s1 + $0x18] sm:$0xff]  ;;  %v938_v1 = vld [vmem:[%s6803_s29 + $0x40] sm:$0xff] }
  0x28   : > { %6078 = vpow2.f32 %v984_v10  ;;  %v598_v38 = vmul.f32 1.442695, %v581_v33  ;;  %v990_v46 = vmul.f32 1.442695, %v968_v41  ;;  %v564_v48 = vmul.f32 %v548_v25, %v548_v25  ;;  %v552_v5 = vld [vmem:[%s6816_s1 + $0x20] sm:$0xff]  ;;  %v555_v33 = vld [vmem:[%s6816_s1 + $0x38] sm:$0xff] }
  0x29   : > { %6080 = vpow2.f32 %v982_v15  ;;  %v565_v49 = vmul.f32 %v549_v29, %v549_v29  ;;  %v952_v54 = vmul.f32 %v936_v35, %v936_v35  ;;  %v969_v56 = vsub.f32 0.0, %v937_v36  ;;  %v940_v15 = vld [vmem:[%s6803_s29 + $0x50] sm:$0xff]  ;;  %v942_v41 = vld [vmem:[%s6803_s29 + $0x60] sm:$0xff] }
  0x2a   : > { %1043 = vperm.xlu1 %6046, %v933_v7   ;;  %1033 = vperm.xlu0 %6045, %v931_v4   ;;  %6082 = vpow2.f32 %v988_v28  ;;  %v583_v58 = vsub.f32 0.0, %v551_v57  ;;  %v582_v63 = vsub.f32 0.0, %v550_v43  ;;  %v971_v0 = vsub.f32 0.0, %v939_v61  ;;  %v553_v4 = vld [vmem:[%s6816_s1 + $0x28] sm:$0xff] }
  0x2b   : > { %6084 = vpow2.f32 %v986_v34  ;;  %v992_v60 = vmul.f32 1.442695, %v969_v56  ;;  %v970_v2 = vsub.f32 0.0, %v938_v1  ;;  %v953_v6 = vmul.f32 %v937_v36, %v937_v36 }
  0x2c   : > { %v6075_v13 = vpop.eup %6074  ;;  %6086 = vpow2.f32 %v596_v37  ;;  %v602_v62 = vmul.f32 1.442695, %v583_v58  ;;  %v600_v3 = vmul.f32 1.442695, %v582_v63  ;;  %v996_v7 = vmul.f32 1.442695, %v971_v0 }
  0x2d   : > { %v1010_v14 = vmul.f32 %v6075_v13, %v946_v11  ;;  %v6077_v19 = vpop.eup %6076  ;;  %6088 = vpow2.f32 %v598_v38  ;;  %v994_v9 = vmul.f32 1.442695, %v970_v2  ;;  %v567_v10 = vmul.f32 %v551_v57, %v551_v57  ;;  %v554_v37 = vld [vmem:[%s6816_s1 + $0x30] sm:$0xff]  ;;  %v5954_v0 = vld [vmem:[%s8723_s11] sm:$0xff] }
  0x2e   : > { %v6079_v21 = vpop.eup %6078  ;;  %v1011_v22 = vmul.f32 %v6077_v19, %v947_v18  ;;  %6090 = vpow2.f32 %v990_v46  ;;  %v584_v13 = vsub.f32 0.0, %v552_v5  ;;  %v585_v28 = vsub.f32 0.0, %v553_v4 }
  0x2f   : > { %1204 = vperm.xlu2 %6047, %v1010_v14   ;;  %v1013_v24 = vmul.f32 %v6079_v21, %v949_v20  ;;  %v6081_v27 = vpop.eup %6080  ;;  %6092 = vpow2.f32 %v992_v60  ;;  %v955_v20 = vmul.f32 %v939_v61, %v939_v61  ;;  %v954_v21 = vmul.f32 %v938_v1, %v938_v1 }
  0x30   : > { %v1012_v32 = vmul.f32 %v6081_v27, %v948_v26  ;;  %v6083_v40 = vpop.eup %6082  ;;  %6094 = vpow2.f32 %v602_v62  ;;  %v604_v18 = vmul.f32 1.442695, %v584_v13  ;;  %v568_v26 = vmul.f32 %v552_v5, %v552_v5 }
  0x31   : > { %v1015_v42 = vmul.f32 %v6083_v40, %v951_v39  ;;  %v6085_v45 = vpop.eup %6084  ;;  %6096 = vpow2.f32 %v600_v3  ;;  %v586_v38 = vsub.f32 0.0, %v554_v37  ;;  %v6833_v40 = vld [vmem:[%s6803_s29 + $0x68] sm:$0xff]  ;;  %v571_v56 = vmul.f32 %v555_v33, %v555_v33 }
  0x32   : > { %1053 = vperm.xlu1 %6046, %v935_v16   ;;  %1048 = vperm.xlu0 %6045, %v934_v17   ;;  %v6087_v47 = vpop.eup %6086  ;;  %v1014_v51 = vmul.f32 %v6085_v45, %v950_v44  ;;  %6098 = vpow2.f32 %v996_v7  ;;  %v566_v16 = vmul.f32 %v550_v43, %v550_v43  ;;  %v958_v2 = vmul.f32 %v942_v41, %v942_v41  ;;  %v557_v7 = vld [vmem:[%s6816_s1 + $0x48] sm:$0xff] }
  0x33   : > { %v6089_v50 = vpop.eup %6088  ;;  %v628_v53 = vmul.f32 %v6087_v47, %v564_v48  ;;  %6100 = vpow2.f32 %v994_v9  ;;  %v608_v45 = vmul.f32 1.442695, %v586_v38 }
  0x34   : > { %v629_v52 = vmul.f32 %v6089_v50, %v565_v49  ;;  %v6091_v55 = vpop.eup %6090  ;;  %6102 = vpow2.f32 %v604_v18  ;;  %v974_v49 = vsub.f32 0.0, %v942_v41 }
  0x35   : > { %v1016_v59 = vmul.f32 %v6091_v55, %v952_v54  ;;  %v6093_v8 = vpop.eup %6092 }
  0x36   : > { %v6095_v11 = vpop.eup %6094  ;;  %v1017_v12 = vmul.f32 %v6093_v8, %v953_v6  ;;  %v1002_v54 = vmul.f32 1.442695, %v974_v49  ;;  %v975_v6 = vsub.f32 0.0, %v6833_v40 }
  0x37   : > { %1209 = vperm.xlu2 %6047, %v1011_v22   ;;  %v631_v14 = vmul.f32 %v6095_v11, %v567_v10  ;;  %v6097_v17 = vpop.eup %6096  ;;  %v589_v10 = vsub.f32 0.0, %v557_v7 }
  0x38   : > { %v6099_v19 = vpop.eup %6098  ;;  %v630_v23 = vmul.f32 %v6097_v17, %v566_v16  ;;  %v6861_v16 = vld [vmem:[%s6803_s29 + $0x78] sm:$0xff] }
  0x39   : > { %v6101_v22 = vpop.eup %6100  ;;  %v614_v17 = vmul.f32 1.442695, %v589_v10  ;;  %v6909_v10 = vld [vmem:[%s6816_s1 + $0x60] sm:$0xff] }
  0x3a   : > { %1219 = vperm.xlu0 %6045, %v1013_v24   ;;  %646 = vperm.xlu1 %6046, %v548_v25   ;;  %v1019_v24 = vmul.f32 %v6099_v19, %v955_v20  ;;  %v1018_v25 = vmul.f32 %v6101_v22, %v954_v21  ;;  %v6103_v27 = vpop.eup %6102  ;;  %v6866_v19 = vld [vmem:[%s8746_s3] ss:$0 sm:$0xff] }
  0x3b   : > { %v632_v31 = vmul.f32 %v6103_v27, %v568_v26 }
  0x3f   : > { %1214 = vperm.xlu2 %6047, %v1012_v32   ;;  %v606_v32 = vmul.f32 1.442695, %v585_v28 }
  0x41   : > { %6104 = vpow2.f32 %v606_v32 }
  0x42   : > { %1058 = vperm.xlu0 %6045, %v936_v35   ;;  %1063 = vperm.xlu1 %6046, %v937_v36   ;;  %v972_v35 = vsub.f32 0.0, %v940_v15  ;;  %v587_v36 = vsub.f32 0.0, %v555_v33 }
  0x44   : > { %v998_v39 = vmul.f32 1.442695, %v972_v35  ;;  %v5949_v35 = vld [vmem:[%s8720_s8 + $0x8] sm:$0xff] }
  0x45   : > { %1515 = vmatpush.bf16.msra.mxu1 %v5949_v35 }
  0x47   : > { %651 = vperm.xlu2 %6047, %v549_v29   ;;  %v941_v29 = vld [vmem:[%s6803_s29 + $0x58] sm:$0xff]  ;;  %v6105_v44 = vpop.eup %6104 }
  0x48   : > { %v973_v30 = vsub.f32 0.0, %v941_v29  ;;  %v957_v46 = vmul.f32 %v941_v29, %v941_v29 }
  0x4a   : > { %1229 = vperm.xlu0 %6045, %v1015_v42   ;;  %656 = vperm.xlu1 %6046, %v550_v43   ;;  %v1000_v34 = vmul.f32 1.442695, %v973_v30  ;;  %v569_v42 = vmul.f32 %v553_v4, %v553_v4  ;;  %v610_v43 = vmul.f32 1.442695, %v587_v36  ;;  %v6878_v30 = vld [vmem:[%s6816_s1 + $0x50] sm:$0xff] }
  0x4c   : > { %6106 = vpow2.f32 %v1000_v34  ;;  %v633_v48 = vmul.f32 %v6105_v44, %v569_v42 }
  0x4d   : > { %6108 = vpow2.f32 %v998_v39  ;;  %v573_v39 = vmul.f32 %v557_v7, %v557_v7 }
  0x4e   : > { %6110 = vpow2.f32 %v610_v43  ;;  %v977_v43 = vsub.f32 0.0, %v6861_v16 }
  0x4f   : > { %1224 = vperm.xlu2 %6047, %v1014_v51   ;;  %6112 = vpow2.f32 %v608_v45  ;;  %v6838_v51 = vld [vmem:[%s6816_s1 + $0x40] sm:$0xff] }
  0x50   : > { %6114 = vpow2.f32 %v1002_v54  ;;  %v588_v22 = vsub.f32 0.0, %v6838_v51 }
  0x52   : > { %833 = vperm.xlu1 %6046, %v629_v52   ;;  %828 = vperm.xlu0 %6045, %v628_v53   ;;  %v6107_v47 = vpop.eup %6106  ;;  %v956_v52 = vmul.f32 %v940_v15, %v940_v15  ;;  %v612_v27 = vmul.f32 1.442695, %v588_v22 }
  0x53   : > { %v1021_v50 = vmul.f32 %v6107_v47, %v957_v46  ;;  %v6109_v53 = vpop.eup %6108 }
  0x54   : > { %v6111_v55 = vpop.eup %6110 }
  0x55   : > { %v6113_v60 = vpop.eup %6112  ;;  %v635_v62 = vmul.f32 %v6111_v55, %v571_v56  ;;  %v1008_v56 = vmul.f32 1.442695, %v977_v43  ;;  %v5946_v43 = vld [vmem:[%s8726_s14] sm:$0xff] }
  0x57   : > { %661 = vperm.xlu2 %6047, %v551_v57   ;;  %v570_v57 = vmul.f32 %v554_v37, %v554_v37 }
  0x59   : > { %v634_v63 = vmul.f32 %v6113_v60, %v570_v57  ;;  %v572_v57 = vmul.f32 %v6838_v51, %v6838_v51 }
  0x5a   : > { %1234 = vperm.xlu1 %6046, %v1016_v59   ;;  %1073 = vperm.xlu0 %6045, %v939_v61   ;;  %v5955_v59 = vld [vmem:[%s8723_s11 + $0x8] sm:$0xff]  ;;  %v1020_v61 = vmul.f32 %v6109_v53, %v956_v52  ;;  %v5948_v52 = vld [vmem:[%s8720_s8] sm:$0xff] }
  0x5b   : > { %1962 = vmatpush.bf16.msra.mxu3 %v5955_v59  ;;  %1516 = vmatpush.bf16.msra.mxu1 %v5948_v52 }
  0x5f   : > { %1068 = vperm.xlu2 %6047, %v938_v1   ;;  %1963 = vmatpush.bf16.msra.mxu3 %v5954_v0  ;;  %v6852_v1 = vld [vmem:[%s8745_s2] ss:$0 sm:$0xff]  ;;  %v590_v0 = vsub.f32 0.0, %v6878_v30 }
  0x62   : > { %671 = vperm.xlu1 %6046, %v553_v4   ;;  %666 = vperm.xlu0 %6045, %v552_v5   ;;  %v944_v4 = vld [vmem:[%s6803_s29 + $0x70] sm:$0xff]  ;;  %v6115_v5 = vpop.eup %6114 }
  0x63   : > { %v1022_v13 = vmul.f32 %v6115_v5, %v958_v2 }
  0x67   : > { %1239 = vperm.xlu2 %6047, %v1017_v12   ;;  %v976_v12 = vsub.f32 0.0, %v944_v4 }
  0x69   : > { %v1006_v18 = vmul.f32 1.442695, %v976_v12 }
  0x6a   : > { %1078 = vperm.xlu1 %6046, %v940_v15   ;;  %843 = vperm.xlu0 %6045, %v631_v14   ;;  %v1004_v14 = vmul.f32 1.442695, %v975_v6 }
  0x6c   : > { %6116 = vpow2.f32 %v1004_v14 }
  0x6d   : > { %6118 = vpow2.f32 %v614_v17  ;;  %v616_v17 = vmul.f32 1.442695, %v590_v0 }
  0x6e   : > { %6120 = vpow2.f32 %v1006_v18 }
  0x6f   : > { %838 = vperm.xlu2 %6047, %v630_v23   ;;  %6122 = vpow2.f32 %v612_v27 }
  0x72   : > { %1249 = vperm.xlu1 %6046, %v1019_v24   ;;  %1244 = vperm.xlu0 %6045, %v1018_v25  }
  0x77   : > { %1083 = vperm.xlu2 %6047, %v941_v29   ;;  %v6875_v29 = vld [vmem:[%s6816_s1 + $0x58] sm:$0xff] }
  0x7a   : > { %848 = vperm.xlu1 %6046, %v632_v31   ;;  %681 = vperm.xlu0 %6045, %v555_v33   ;;  %v959_v31 = vmul.f32 %v6833_v40, %v6833_v40  ;;  %v6117_v33 = vpop.eup %6116 }
  0x7b   : > { %v6119_v36 = vpop.eup %6118 }
  0x7c   : > { %v637_v55 = vmul.f32 %v6119_v36, %v573_v39 }
  0x7f   : > { %676 = vperm.xlu2 %6047, %v554_v37  }
  0x82   : > { %1093 = vperm.xlu1 %6046, %v6833_v40   ;;  %1088 = vperm.xlu0 %6045, %v942_v41   ;;  %v960_v41 = vmul.f32 %v944_v4, %v944_v4  ;;  %v6121_v40 = vpop.eup %6120 }
  0x83   : > { %v6123_v60 = vpop.eup %6122 }
  0x84   : > { %v1024_v54 = vmul.f32 %v6121_v40, %v960_v41 }
  0x87   : > { %853 = vperm.xlu2 %6047, %v633_v48   ;;  %v1023_v48 = vmul.f32 %v6117_v33, %v959_v31 }
  0x89   : > { %v6840_v58 = vpop.permute.xlu2 %1204 }
  0x8a   : > { %686 = vperm.xlu1 %6046, %v6838_v51   ;;  %1259 = vperm.xlu0 %6045, %v1021_v50   ;;  %v591_v50 = vsub.f32 0.0, %v6875_v29 }
  0x8f   : > { %1254 = vperm.xlu2 %6047, %v1020_v61  }
  0x91   : > { %v6854_v3 = vpop.permute.xlu2 %1209 }
  0x92   : > { %863 = vperm.xlu1 %6046, %v635_v62   ;;  %858 = vperm.xlu0 %6045, %v634_v63   ;;  %v618_v62 = vmul.f32 1.442695, %v591_v50  ;;  %v574_v50 = vmul.f32 %v6878_v30, %v6878_v30 }
  0x94   : > { %v1039_v8 = vpop.permute.xlu1 %1038  ;;  %v1029_v9 = vpop.permute.xlu0 %1028 }
  0x95   : > { %v1106_v11 = vsub.f32 %v1029_v9, %v6852_v1  ;;  %v1108_v37 = vsub.f32 %v1039_v8, %v6852_v1  ;;  %v636_v9 = vmul.f32 %v6123_v60, %v572_v57 }
  0x97   : > { %v1122_v15 = vmul.f32 %v1106_v11, %v1106_v11  ;;  %691 = vperm.xlu2 %6047, %v557_v7   ;;  %v1124_v53 = vmul.f32 %v1108_v37, %v1108_v37 }
  0x99   : > { %v1138_v20 = vsub.f32 0.0, %v1122_v15  ;;  %v6868_v21 = vpop.permute.xlu2 %1214  ;;  %v1140_v63 = vsub.f32 0.0, %v1124_v53 }
  0x9a   : > { %1264 = vperm.xlu1 %6046, %v1022_v13   ;;  %1103 = vperm.xlu0 %6045, %v6861_v16   ;;  %v592_v13 = vsub.f32 0.0, %v6909_v10 }
  0x9b   : > { %v1154_v26 = vmul.f32 %v6866_v19, %v1138_v20  ;;  %v1156_v15 = vmul.f32 %v6866_v19, %v1140_v63 }
  0x9c   : > { %v1044_v23 = vpop.permute.xlu1 %1043  ;;  %v1034_v24 = vpop.permute.xlu0 %1033  ;;  %v620_v33 = vmul.f32 1.442695, %v592_v13 }
  0x9d   : > { %v1107_v25 = vsub.f32 %v1034_v24, %v6852_v1  ;;  %v1109_v32 = vsub.f32 %v1044_v23, %v6852_v1  ;;  %v1170_v38 = vmul.f32 1.442695, %v1154_v26  ;;  %v961_v24 = vmul.f32 %v6861_v16, %v6861_v16 }
  0x9e   : > { %v575_v26 = vmul.f32 %v6875_v29, %v6875_v29  ;;  %v1174_v16 = vmul.f32 1.442695, %v1156_v15 }
  0x9f   : > { %v1123_v28 = vmul.f32 %v1107_v25, %v1107_v25  ;;  %1098 = vperm.xlu2 %6047, %v944_v4   ;;  %v1125_v45 = vmul.f32 %v1109_v32, %v1109_v32  ;;  %6124 = vpow2.f32 %v1170_v38  ;;  %v6902_v4 = vld [vmem:[%s6816_s1 + $0x68] sm:$0xff] }
  0xa0   : > { %v593_v51 = vsub.f32 0.0, %v6902_v4 }
  0xa1   : > { %v1139_v34 = vsub.f32 0.0, %v1123_v28  ;;  %v652_v42 = vpop.permute.xlu2 %651  ;;  %v1141_v59 = vsub.f32 0.0, %v1125_v45 }
  0xa2   : > { %701 = vperm.xlu1 %6046, %v6875_v29   ;;  %696 = vperm.xlu0 %6045, %v6878_v30   ;;  %v728_v61 = vsub.f32 %v652_v42, %v6852_v1  ;;  %v622_v23 = vmul.f32 1.442695, %v593_v51 }
  0xa3   : > { %v1155_v44 = vmul.f32 %v6866_v19, %v1139_v34  ;;  %v1157_v6 = vmul.f32 %v6866_v19, %v1141_v59 }
  0xa4   : > { %v1054_v46 = vpop.permute.xlu1 %1053  ;;  %v1049_v47 = vpop.permute.xlu0 %1048  ;;  %v744_v11 = vmul.f32 %v728_v61, %v728_v61  ;;  %v577_v61 = vmul.f32 %v6902_v4, %v6902_v4 }
  0xa5   : > { %v1172_v49 = vmul.f32 1.442695, %v1155_v44  ;;  %v6125_v5 = vpop.eup %6124  ;;  %v1176_v25 = vmul.f32 1.442695, %v1157_v6  ;;  %v1111_v31 = vsub.f32 %v1054_v46, %v6852_v1  ;;  %v1110_v34 = vsub.f32 %v1049_v47, %v6852_v1  ;;  %v6943_v47 = vld [vmem:[%s6816_s1 + $0x70] sm:$0xff] }
  0xa6   : > { %v1282_v20 = vmul.f32 %v6125_v5, %v6840_v58  ;;  %v760_v28 = vsub.f32 0.0, %v744_v11  ;;  %v6924_v58 = vld [vmem:[%s6816_s1 + $0x78] sm:$0xff]  ;;  %v594_v0 = vsub.f32 0.0, %v6943_v47 }
  0xa7   : > { %6126 = vpow2.f32 %v1172_v49  ;;  %1269 = vperm.xlu2 %6047, %v1023_v48   ;;  %v595_v41 = vsub.f32 0.0, %v6924_v58  ;;  %v1127_v40 = vmul.f32 %v1111_v31, %v1111_v31  ;;  %v1126_v44 = vmul.f32 %v1110_v34, %v1110_v34  ;;  %v1430_v48 = vld [vmem:[%s8747_s4] sm:$0xff] }
  0xa8   : > { %6128 = vpow2.f32 %v1008_v56  ;;  %v779_v42 = vmul.f32 %v6866_v19, %v760_v28  ;;  %v1431_v53 = vpack.c.bf16 %v1430_v48, %v1430_v48 }
  0xa9   : > { %v6899_v2 = vpop.permute.xlu2 %1224  ;;  %6130 = vpow2.f32 %v618_v62  ;;  %v626_v52 = vmul.f32 1.442695, %v595_v41  ;;  %v1143_v56 = vsub.f32 0.0, %v1127_v40  ;;  %v1142_v59 = vsub.f32 0.0, %v1126_v44 }
  0xaa   : > { %1274 = vperm.xlu1 %6046, %v1024_v54   ;;  %873 = vperm.xlu0 %6045, %v637_v55   ;;  %6132 = vpow2.f32 %v616_v17  ;;  %v796_v55 = vmul.f32 1.442695, %v779_v42  ;;  %v576_v62 = vmul.f32 %v6909_v10, %v6909_v10 }
  0xab   : > { %6134 = vpow2.f32 %v622_v23 }
  0xac   : > { %v6906_v7 = vpop.permute.xlu0 %1219  ;;  %v647_v8 = vpop.permute.xlu1 %646  ;;  %6136 = vpow2.f32 %v1176_v25 }
  0xad   : > { %v727_v12 = vsub.f32 %v647_v8, %v6852_v1  ;;  %v6127_v14 = vpop.eup %6126  ;;  %6138 = vpow2.f32 %v620_v33 }
  0xae   : > { %v1283_v22 = vmul.f32 %v6127_v14, %v6854_v3  ;;  %v6129_v27 = vpop.eup %6128  ;;  %v5947_v3 = vld [vmem:[%s8726_s14 + $0x8] sm:$0xff]  ;;  %6140 = vpow2.f32 %v1174_v16  ;;  %v624_v14 = vmul.f32 1.442695, %v594_v0 }
  0xaf   : > { %v743_v18 = vmul.f32 %v727_v12, %v727_v12  ;;  %868 = vperm.xlu2 %6047, %v636_v9   ;;  %v6131_v36 = vpop.eup %6130  ;;  %1457 = vmatpush.bf16.msra.mxu0 %v5947_v3  ;;  %v1025_v39 = vmul.f32 %v6129_v27, %v961_v24  ;;  %6142 = vpow2.f32 %v626_v52 }
  0xb0   : > { %v6921_v32 = vpack.c.bf16 %v1283_v22, %v1282_v20  ;;  %v639_v46 = vmul.f32 %v6131_v36, %v575_v26  ;;  %v6133_v49 = vpop.eup %6132  ;;  %6144 = vpow2.f32 %v796_v55 }
  0xb1   : > { %v759_v29 = vsub.f32 0.0, %v743_v18  ;;  %v6930_v35 = vpop.permute.xlu2 %661  ;;  %v6135_v54 = vpop.eup %6134  ;;  %v638_v8 = vmul.f32 %v6133_v49, %v574_v50 }
  0xb2   : > { %711 = vperm.xlu1 %6046, %v6902_v4   ;;  %706 = vperm.xlu0 %6045, %v6909_v10   ;;  %v6137_v57 = vpop.eup %6136  ;;  %v1159_v4 = vmul.f32 %v6866_v19, %v1143_v56  ;;  %v1158_v10 = vmul.f32 %v6866_v19, %v1142_v59  ;;  %v641_v11 = vmul.f32 %v6135_v54, %v577_v61 }
  0xb3   : > { %5524 = vmatmul.msk.bf16.vlgmr.msra.gmra.mxu3 %vm1420_vm0, %v6921_v32  ;;  %v778_v45 = vmul.f32 %v6866_v19, %v759_v29  ;;  %1458 = vmatpush.bf16.msra.mxu0 %v5946_v43  ;;  %v6139_v30 = vpop.eup %6138  ;;  %v1285_v9 = vmul.f32 %v6137_v57, %v6906_v7  ;;  %v730_v26 = vsub.f32 %v6930_v35, %v6852_v1 }
  0xb4   : > { %v1059_v37 = vpop.permute.xlu0 %1058  ;;  %v1064_v38 = vpop.permute.xlu1 %1063  ;;  %v640_v12 = vmul.f32 %v6139_v30, %v576_v62  ;;  %v1180_v17 = vmul.f32 1.442695, %v1159_v4  ;;  %v1178_v23 = vmul.f32 1.442695, %v1158_v10  ;;  %v578_v35 = vmul.f32 %v6943_v47, %v6943_v47 }
  0xb5   : > { %v794_v60 = vmul.f32 1.442695, %v778_v45  ;;  %v6141_v51 = vpop.eup %6140  ;;  %v1112_v15 = vsub.f32 %v1059_v37, %v6852_v1  ;;  %v1113_v7 = vsub.f32 %v1064_v38, %v6852_v1  ;;  %v746_v37 = vmul.f32 %v730_v26, %v730_v26 }
  0xb6   : > { %5459 = vmatmul.msk.bf16.vlgmr.msra.gmra.mxu0 %vm1420_vm0, %v1431_v53  ;;  %v1284_v13 = vmul.f32 %v6141_v51, %v6868_v21  ;;  %v6143_v22 = vpop.eup %6142  ;;  %v579_v21 = vmul.f32 %v6924_v58, %v6924_v58 }
  0xb7   : > { %1279 = vperm.xlu2 %6047, %v1025_v39   ;;  %6146 = vpow2.f32 %v794_v60  ;;  %v6145_v25 = vpop.eup %6144  ;;  %v1128_v28 = vmul.f32 %v1112_v15, %v1112_v15  ;;  %v1129_v29 = vmul.f32 %v1113_v7, %v1113_v7  ;;  %v762_v45 = vsub.f32 0.0, %v746_v37 }
  0xb8   : > { %v6964_v18 = vpack.c.bf16 %v1285_v9, %v1284_v13  ;;  %6148 = vpow2.f32 %v624_v14  ;;  %v643_v36 = vmul.f32 %v6143_v22, %v579_v21 }
  0xb9   : > { %v6954_v63 = vpop.permute.xlu2 %1068  ;;  %6150 = vpow2.f32 %v1180_v17  ;;  %v1144_v39 = vsub.f32 0.0, %v1128_v28  ;;  %v1145_v40 = vsub.f32 0.0, %v1129_v29  ;;  %v781_v55 = vmul.f32 %v6866_v19, %v762_v45 }
  0xba   : > { %716 = vperm.xlu1 %6046, %v6943_v47   ;;  %883 = vperm.xlu0 %6045, %v639_v46   ;;  %6152 = vpow2.f32 %v1178_v23  ;;  %v1114_v56 = vsub.f32 %v6954_v63, %v6852_v1 }
  0xbb   : > { %v1160_v48 = vmul.f32 %v6866_v19, %v1144_v39  ;;  %v800_v0 = vmul.f32 1.442695, %v781_v55 }
  0xbc   : > { %v1230_v5 = vpop.permute.xlu0 %1229  ;;  %v657_v6 = vpop.permute.xlu1 %656  ;;  %v1130_v51 = vmul.f32 %v1114_v56, %v1114_v56 }
  0xbd   : > { %v729_v20 = vsub.f32 %v657_v6, %v6852_v1  ;;  %v6147_v27 = vpop.eup %6146  ;;  %v1182_v57 = vmul.f32 1.442695, %v1160_v48 }
  0xbe   : > { %v6149_v41 = vpop.eup %6148  ;;  %v1146_v4 = vsub.f32 0.0, %v1130_v51 }
  0xbf   : > { %878 = vperm.xlu2 %6047, %v638_v8   ;;  %v745_v3 = vmul.f32 %v729_v20, %v729_v20  ;;  %v6151_v44 = vpop.eup %6150  ;;  %v642_v52 = vmul.f32 %v6149_v41, %v578_v35  ;;  %6154 = vpow2.f32 %v1182_v57 }
  0xc0   : > { %v6153_v46 = vpop.eup %6152  ;;  %v1287_v53 = vmul.f32 %v6151_v44, %v1230_v5  ;;  %v1162_v20 = vmul.f32 %v6866_v19, %v1146_v4 }
  0xc1   : > { %v6968_v24 = vpop.permute.xlu2 %1239  ;;  %v761_v42 = vsub.f32 0.0, %v745_v3  ;;  %v1286_v54 = vmul.f32 %v6153_v46, %v6899_v2 }
  0xc2   : > { %893 = vperm.xlu1 %6046, %v641_v11   ;;  %888 = vperm.xlu0 %6045, %v640_v12   ;;  %v1186_v3 = vmul.f32 1.442695, %v1162_v20 }
  0xc3   : > { %5525 = vmatmul.msk.bf16.gmra.mxu3 %vm1420_vm0, %v6964_v18  ;;  %v780_v47 = vmul.f32 %v6866_v19, %v761_v42  ;;  %v6990_v59 = vpack.c.bf16 %v1287_v53, %v1286_v54 }
  0xc4   : > { %v834_v31 = vpop.permute.xlu1 %833  ;;  %v829_v33 = vpop.permute.xlu0 %828 }
  0xc5   : > { %v907_v16 = vmul.f32 %v6145_v25, %v834_v31  ;;  %v906_v34 = vmul.f32 %v6147_v27, %v829_v33  ;;  %v798_v60 = vmul.f32 1.442695, %v780_v47  ;;  %v6155_v13 = vpop.eup %6154 }
  0xc7   : > { %v6976_v38 = vpack.c.bf16 %v907_v16, %v906_v34  ;;  %721 = vperm.xlu2 %6047, %v6924_v58   ;;  %v1161_v58 = vmul.f32 %v6866_v19, %v1145_v40  ;;  %6156 = vpow2.f32 %v798_v60 }
  0xc9   : > { %5468 = vmatmul.msk.bf16.vlgmr.msra.gmra.mxu1 %vm1420_vm0, %v6976_v38  ;;  %v839_v43 = vpop.permute.xlu2 %838  ;;  %v1184_v62 = vmul.f32 1.442695, %v1161_v58 }
  0xca   : > { %903 = vperm.xlu0 %6045, %v643_v36  }
  0xcb   : > { %6158 = vpow2.f32 %v1184_v62 }
  0xcc   : > { %v1235_v49 = vpop.permute.xlu1 %1234  ;;  %v1074_v50 = vpop.permute.xlu0 %1073  ;;  %6160 = vpow2.f32 %v800_v0 }
  0xcd   : > { %v1115_v61 = vsub.f32 %v1074_v50, %v6852_v1  ;;  %v6157_v17 = vpop.eup %6156  ;;  %v1288_v26 = vmul.f32 %v6155_v13, %v1235_v49  ;;  %6162 = vpow2.f32 %v1186_v3 }
  0xce   : > { %v908_v28 = vmul.f32 %v6157_v17, %v839_v43 }
  0xcf   : > { %898 = vperm.xlu2 %6047, %v642_v52   ;;  %v1131_v6 = vmul.f32 %v1115_v61, %v1115_v61 }
  0xd1   : > { %v1084_v30 = vpop.permute.xlu2 %1083  ;;  %v1147_v11 = vsub.f32 0.0, %v1131_v6  ;;  %v6159_v22 = vpop.eup %6158 }
  0xd2   : > { %v6161_v25 = vpop.eup %6160  ;;  %v1289_v16 = vmul.f32 %v6159_v22, %v6968_v24  ;;  %v1117_v42 = vsub.f32 %v1084_v30, %v6852_v1 }
  0xd3   : > { %5526 = vmatmul.msk.bf16.gmra.mxu3 %vm1420_vm0, %v6990_v59  ;;  %v1163_v27 = vmul.f32 %v6866_v19, %v1147_v11  ;;  %v6163_v48 = vpop.eup %6162 }
  0xd4   : > { %v672_v2 = vpop.permute.xlu1 %671  ;;  %v667_v5 = vpop.permute.xlu0 %666  ;;  %v7005_v37 = vpack.c.bf16 %v1289_v16, %v1288_v26  ;;  %v1133_v44 = vmul.f32 %v1117_v42, %v1117_v42 }
  0xd5   : > { %v732_v63 = vsub.f32 %v672_v2, %v6852_v1  ;;  %v731_v8 = vsub.f32 %v667_v5, %v6852_v1  ;;  %v1188_v39 = vmul.f32 1.442695, %v1163_v27 }
  0xd6   : > { %v1149_v53 = vsub.f32 0.0, %v1133_v44 }
  0xd7   : > { %v748_v9 = vmul.f32 %v732_v63, %v732_v63  ;;  %v747_v10 = vmul.f32 %v731_v8, %v731_v8 }
  0xd8   : > { %v1165_v0 = vmul.f32 %v6866_v19, %v1149_v53 }
  0xd9   : > { %v764_v12 = vsub.f32 0.0, %v748_v9  ;;  %v763_v14 = vsub.f32 0.0, %v747_v10  ;;  %v677_v15 = vpop.permute.xlu2 %676 }
  0xda   : > { %v733_v45 = vsub.f32 %v677_v15, %v6852_v1  ;;  %v1192_v9 = vmul.f32 1.442695, %v1165_v0 }
  0xdb   : > { %v783_v23 = vmul.f32 %v6866_v19, %v764_v12  ;;  %v782_v31 = vmul.f32 %v6866_v19, %v763_v14 }
  0xdc   : > { %v1079_v7 = vpop.permute.xlu1 %1078  ;;  %v844_v21 = vpop.permute.xlu0 %843  ;;  %v749_v58 = vmul.f32 %v733_v45, %v733_v45 }
  0xdd   : > { %v909_v33 = vmul.f32 %v6161_v25, %v844_v21  ;;  %v804_v34 = vmul.f32 1.442695, %v783_v23  ;;  %v1116_v29 = vsub.f32 %v1079_v7, %v6852_v1  ;;  %v802_v35 = vmul.f32 1.442695, %v782_v31 }
  0xde   : > { %v765_v5 = vsub.f32 0.0, %v749_v58 }
  0xdf   : > { %v7003_v36 = vpack.c.bf16 %v909_v33, %v908_v28  ;;  %6164 = vpow2.f32 %v804_v34  ;;  %v1132_v24 = vmul.f32 %v1116_v29, %v1116_v29 }
  0xe0   : > { %6166 = vpow2.f32 %v1188_v39  ;;  %v784_v12 = vmul.f32 %v6866_v19, %v765_v5 }
  0xe1   : > { %v854_v41 = vpop.permute.xlu2 %853  ;;  %5469 = vmatmul.msk.bf16.gmra.mxu1 %vm1420_vm0, %v7003_v36  ;;  %6168 = vpow2.f32 %v802_v35  ;;  %v1148_v46 = vsub.f32 0.0, %v1132_v24 }
  0xe2   : > { %v806_v22 = vmul.f32 1.442695, %v784_v12 }
  0xe3   : > { %5527 = vmatmul.msk.bf16.gmra.mxu3 %vm1420_vm0, %v7005_v37  ;;  %v1164_v54 = vmul.f32 %v6866_v19, %v1148_v46 }
  0xe4   : > { %v1250_v40 = vpop.permute.xlu1 %1249  ;;  %v1245_v43 = vpop.permute.xlu0 %1244 }
  0xe5   : > { %v6165_v49 = vpop.eup %6164  ;;  %v1290_v61 = vmul.f32 %v6163_v48, %v1245_v43  ;;  %v1190_v6 = vmul.f32 1.442695, %v1164_v54 }
  0xe6   : > { %v6167_v52 = vpop.eup %6166  ;;  %v911_v60 = vmul.f32 %v6165_v49, %v854_v41 }
  0xe7   : > { %v6169_v47 = vpop.eup %6168  ;;  %v1291_v55 = vmul.f32 %v6167_v52, %v1250_v40  ;;  %6170 = vpow2.f32 %v1190_v6 }
  0xe8   : > { %6172 = vpow2.f32 %v1192_v9 }
  0xe9   : > { %v1255_v50 = vpop.permute.xlu2 %1254  ;;  %v7018_v63 = vpack.c.bf16 %v1291_v55, %v1290_v61  ;;  %6174 = vpow2.f32 %v806_v22 }
  0xec   : > { %v849_v56 = vpop.permute.xlu1 %848  ;;  %v682_v57 = vpop.permute.xlu0 %681 }
  0xed   : > { %v910_v62 = vmul.f32 %v6169_v47, %v849_v56  ;;  %v734_v30 = vsub.f32 %v682_v57, %v6852_v1  ;;  %v6171_v25 = vpop.eup %6170 }
  0xee   : > { %v6173_v33 = vpop.eup %6172  ;;  %v1292_v3 = vmul.f32 %v6171_v25, %v1255_v50 }
  0xef   : > { %v7016_v51 = vpack.c.bf16 %v911_v60, %v910_v62  ;;  %v750_v2 = vmul.f32 %v734_v30, %v734_v30  ;;  %v6175_v40 = vpop.eup %6174 }
  0xf1   : > { %v766_v8 = vsub.f32 0.0, %v750_v2  ;;  %v692_v4 = vpop.permute.xlu2 %691  ;;  %5470 = vmatmul.msk.bf16.gmra.mxu1 %vm1420_vm0, %v7016_v51 }
  0xf2   : > { %v736_v41 = vsub.f32 %v692_v4, %v6852_v1 }
  0xf3   : > { %5528 = vmatmul.msk.bf16.gmra.mxu3 %vm1420_vm0, %v7018_v63  ;;  %v785_v15 = vmul.f32 %v6866_v19, %v766_v8 }
  0xf4   : > { %v1094_v10 = vpop.permute.xlu1 %1093  ;;  %v1089_v11 = vpop.permute.xlu0 %1088  ;;  %v752_v48 = vmul.f32 %v736_v41, %v736_v41 }
  0xf5   : > { %v1119_v13 = vsub.f32 %v1094_v10, %v6852_v1  ;;  %v1118_v14 = vsub.f32 %v1089_v11, %v6852_v1  ;;  %v808_v7 = vmul.f32 1.442695, %v785_v15 }
  0xf6   : > { %v768_v54 = vsub.f32 0.0, %v752_v48 }
  0xf7   : > { %v1135_v17 = vmul.f32 %v1119_v13, %v1119_v13  ;;  %v1134_v20 = vmul.f32 %v1118_v14, %v1118_v14  ;;  %6176 = vpow2.f32 %v808_v7 }
  0xf8   : > { %v787_v30 = vmul.f32 %v6866_v19, %v768_v54 }
  0xf9   : > { %v1151_v23 = vsub.f32 0.0, %v1135_v17  ;;  %v1150_v21 = vsub.f32 0.0, %v1134_v20  ;;  %v1099_v26 = vpop.permute.xlu2 %1098  ;;  %v1309_v20 = vlaneseq }
  0xfa   : > { %v1120_v24 = vsub.f32 %v1099_v26, %v6852_v1  ;;  %v812_v11 = vmul.f32 1.442695, %v787_v30 }
  0xfb   : > { %v1167_v27 = vmul.f32 %v6866_v19, %v1151_v23  ;;  %v1166_v16 = vmul.f32 %v6866_v19, %v1150_v21  ;;  %v1310_v21 = vshrl.u32 %v1309_v20, 7 }
  0xfc   : > { %v687_v28 = vpop.permute.xlu1 %686  ;;  %v1260_v31 = vpop.permute.xlu0 %1259  ;;  %v1136_v53 = vmul.f32 %v1120_v24, %v1120_v24 }
  0xfd   : > { %v1293_v34 = vmul.f32 %v6173_v33, %v1260_v31  ;;  %v1196_v29 = vmul.f32 1.442695, %v1167_v27  ;;  %v735_v39 = vsub.f32 %v687_v28, %v6852_v1  ;;  %v1194_v42 = vmul.f32 1.442695, %v1166_v16  ;;  %v6177_v43 = vpop.eup %6176  ;;  %6048 = vset.pattern.permute.xlu1 %v1310_v21  ;;  %6049 = vset.pattern.permute.xlu2 %v1310_v21 }
  0xfe   : > { %v1152_v56 = vsub.f32 0.0, %v1136_v53  ;;  %6050 = vset.pattern.permute.xlu0 %v1310_v21  ;;  %v7088_v21 = vld [vmem:[%s8724_s12] ss:$0 sm:$0xff] }
  0xff   : > { %v7031_v35 = vpack.c.bf16 %v1293_v34, %v1292_v3  ;;  %6178 = vpow2.f32 %v1196_v29  ;;  %v751_v44 = vmul.f32 %v735_v39, %v735_v39 }
 0x100   : > { %6180 = vpow2.f32 %v1194_v42  ;;  %v1168_v6 = vmul.f32 %v6866_v19, %v1152_v56 }
 0x101   : > { %v1270_v49 = vpop.permute.xlu2 %1269  ;;  %v767_v58 = vsub.f32 0.0, %v751_v44 }
 0x102   : > { %v1198_v13 = vmul.f32 1.442695, %v1168_v6 }
 0x103   : > { %5529 = vmatmul.msk.bf16.gmra.mxu3 %vm1420_vm0, %v7031_v35  ;;  %v786_v60 = vmul.f32 %v6866_v19, %v767_v58 }
 0x104   : > { %v864_v45 = vpop.permute.xlu1 %863  ;;  %v859_v46 = vpop.permute.xlu0 %858 }
 0x105   : > { %v913_v50 = vmul.f32 %v6177_v43, %v864_v45  ;;  %v912_v52 = vmul.f32 %v6175_v40, %v859_v46  ;;  %v6179_v55 = vpop.eup %6178  ;;  %v810_v10 = vmul.f32 1.442695, %v786_v60  ;;  %v7056_v43 = vld [vmem:[%s8718_s6] sm:$0xff] }
 0x106   : > { %v6181_v57 = vpop.eup %6180  ;;  %v1295_v0 = vmul.f32 %v6179_v55, %v1270_v49  ;;  %v1308_v45 = vperm.slane %v7056_v43, 0 }
 0x107   : > { %v7037_v47 = vpack.c.bf16 %v913_v50, %v912_v52  ;;  %6182 = vpow2.f32 %v810_v10 }
 0x108   : > { %6184 = vpow2.f32 %v812_v11  ;;  %1313 = vperm.xlu1 %6048, %v1308_v45  }
 0x109   : > { %5471 = vmatmul.msk.bf16.gmra.mxu1 %vm1420_vm0, %v7037_v47  ;;  %v869_v8 = vpop.permute.xlu2 %868  ;;  %6186 = vpow2.f32 %v1198_v13 }
 0x10c   : > { %v1265_v61 = vpop.permute.xlu1 %1264  ;;  %v1104_v62 = vpop.permute.xlu0 %1103 }
 0x10d   : > { %v1294_v2 = vmul.f32 %v6181_v57, %v1265_v61  ;;  %v1121_v5 = vsub.f32 %v1104_v62, %v6852_v1  ;;  %v6183_v31 = vpop.eup %6182  ;;  %v7073_v61 = vld [vmem:[%s8719_s7] sm:$0xff] }
 0x10e   : > { %v6185_v33 = vpop.eup %6184  ;;  %v914_v41 = vmul.f32 %v6183_v31, %v869_v8  ;;  %v1371_v62 = vperm.slane %v7073_v61, 1 }
 0x10f   : > { %v7045_v4 = vpack.c.bf16 %v1295_v0, %v1294_v2  ;;  %v1137_v9 = vmul.f32 %v1121_v5, %v1121_v5  ;;  %v6187_v16 = vpop.eup %6186 }
 0x110   : > { %1376 = vperm.xlu1 %6048, %v1371_v62   ;;  %v7122_v62 = vld [vmem:[%s8721_s9] ss:$0 sm:$0xff] }
 0x111   : > { %v1153_v12 = vsub.f32 0.0, %v1137_v9  ;;  %v1280_v27 = vpop.permute.xlu2 %1279 }
 0x113   : > { %v1169_v14 = vmul.f32 %v6866_v19, %v1153_v12  ;;  %5530 = vmatmul.msk.bf16.gmra.mxu3 %vm1420_vm0, %v7045_v4 }
 0x114   : > { %v702_v15 = vpop.permute.xlu1 %701  ;;  %v697_v17 = vpop.permute.xlu0 %696 }
 0x115   : > { %v1200_v22 = vmul.f32 1.442695, %v1169_v14  ;;  %v738_v23 = vsub.f32 %v702_v15, %v6852_v1  ;;  %v737_v7 = vsub.f32 %v697_v17, %v6852_v1 }
 0x117   : > { %6188 = vpow2.f32 %v1200_v22  ;;  %v754_v25 = vmul.f32 %v738_v23, %v738_v23  ;;  %v753_v26 = vmul.f32 %v737_v7, %v737_v7  ;;  %v1378_v23 = vperm.slane %v7073_v61, 2 }
 0x119   : > { %v769_v28 = vsub.f32 0.0, %v753_v26  ;;  %v770_v3 = vsub.f32 0.0, %v754_v25  ;;  %v879_v53 = vpop.permute.xlu2 %878  ;;  %1383 = vperm.xlu1 %6048, %v1378_v23  }
 0x11b   : > { %v788_v42 = vmul.f32 %v6866_v19, %v769_v28  ;;  %v789_v46 = vmul.f32 %v6866_v19, %v770_v3 }
 0x11c   : > { %v1275_v34 = vpop.permute.xlu1 %1274  ;;  %v874_v29 = vpop.permute.xlu0 %873 }
 0x11d   : > { %v6189_v39 = vpop.eup %6188  ;;  %v1296_v24 = vmul.f32 %v6187_v16, %v1275_v34  ;;  %v915_v40 = vmul.f32 %v6185_v33, %v874_v29  ;;  %v814_v50 = vmul.f32 1.442695, %v788_v42  ;;  %v816_v52 = vmul.f32 1.442695, %v789_v46  ;;  %v5956_v42 = vld [vmem:[%s8725_s13] sm:$0xff] }
 0x11e   : > { %v1297_v44 = vmul.f32 %v6189_v39, %v1280_v27  ;;  %v1315_v16 = vperm.slane %v7056_v43, 1 }
 0x11f   : > { %v7060_v48 = vpack.c.bf16 %v915_v40, %v914_v41  ;;  %6190 = vpow2.f32 %v814_v50 }
 0x120   : > { %v7062_v49 = vpack.c.bf16 %v1297_v44, %v1296_v24  ;;  %6192 = vpow2.f32 %v816_v52  ;;  %1320 = vperm.xlu2 %6049, %v1315_v16  }
 0x121   : > { %5472 = vmatmul.msk.bf16.gmra.mxu1 %vm1420_vm0, %v7060_v48  ;;  %v722_v11 = vpop.permute.xlu2 %721 }
 0x122   : > { %v742_v20 = vsub.f32 %v722_v11, %v6852_v1 }
 0x123   : > { %5531 = vmatmul.msk.bf16.gmra.mxu3 %vm1420_vm0, %v7062_v49 }
 0x124   : > { %v712_v58 = vpop.permute.xlu1 %711  ;;  %v707_v54 = vpop.permute.xlu0 %706  ;;  %v758_v25 = vmul.f32 %v742_v20, %v742_v20 }
 0x125   : > { %v740_v55 = vsub.f32 %v712_v58, %v6852_v1  ;;  %v739_v56 = vsub.f32 %v707_v54, %v6852_v1  ;;  %v6191_v2 = vpop.eup %6190  ;;  %v5953_v58 = vld [vmem:[%s8722_s10 + $0x18] sm:$0xff] }
 0x126   : > { %v6193_v10 = vpop.eup %6192  ;;  %v916_v12 = vmul.f32 %v6191_v2, %v879_v53  ;;  %v774_v33 = vsub.f32 0.0, %v758_v25  ;;  %1867 = vmatpush.bf16.msra.mxu2 %v5953_v58 }
 0x127   : > { %v756_v57 = vmul.f32 %v740_v55, %v740_v55  ;;  %v755_v60 = vmul.f32 %v739_v56, %v739_v56  ;;  %v1322_v56 = vperm.slane %v7056_v43, 2 }
 0x128   : > { %v793_v44 = vmul.f32 %v6866_v19, %v774_v33 }
 0x129   : > { %v772_v30 = vsub.f32 0.0, %v756_v57  ;;  %v771_v0 = vsub.f32 0.0, %v755_v60  ;;  %1327 = vperm.xlu2 %6049, %v1322_v56   ;;  %v899_v23 = vpop.permute.xlu2 %898 }
 0x12a   : > { %v824_v54 = vmul.f32 1.442695, %v793_v44 }
 0x12b   : > { %v791_v5 = vmul.f32 %v6866_v19, %v772_v30  ;;  %v790_v6 = vmul.f32 %v6866_v19, %v771_v0  ;;  %v5952_v30 = vld [vmem:[%s8722_s10 + $0x10] sm:$0xff] }
 0x12c   : > { %v717_v8 = vpop.permute.xlu1 %716  ;;  %v884_v9 = vpop.permute.xlu0 %883  ;;  %1868 = vmatpush.bf16.msra.mxu2 %v5952_v30 }
 0x12d   : > { %v820_v13 = vmul.f32 1.442695, %v791_v5  ;;  %v917_v14 = vmul.f32 %v6193_v10, %v884_v9  ;;  %v818_v15 = vmul.f32 1.442695, %v790_v6  ;;  %v741_v17 = vsub.f32 %v717_v8, %v6852_v1  ;;  %v5957_v1 = vld [vmem:[%s8725_s13 + $0x8] sm:$0xff] }
 0x12e   : > { %2299 = vmatpush.bf16.msrb.mxu0 %v5957_v1  ;;  %v5951_v9 = vld [vmem:[%s8722_s10 + $0x8] sm:$0xff]  ;;  %v1329_v10 = vperm.slane %v7056_v43, 3 }
 0x12f   : > { %v7080_v22 = vpack.c.bf16 %v917_v14, %v916_v12  ;;  %6194 = vpow2.f32 %v820_v13  ;;  %v757_v7 = vmul.f32 %v741_v17, %v741_v17 }
 0x130   : > { %6196 = vpow2.f32 %v818_v15  ;;  %1869 = vmatpush.bf16.msra.mxu2 %v5951_v9 }
 0x131   : > { %5473 = vmatmul.msk.bf16.gmra.mxu1 %vm1420_vm0, %v7080_v22  ;;  %v773_v27 = vsub.f32 0.0, %v757_v7  ;;  %1334 = vperm.xlu2 %6049, %v1329_v10  }
 0x132   : > { %2300 = vmatpush.bf16.msrb.mxu0 %v5956_v42 }
 0x133   : > { %v7098_v41 = vpop.f32.mrf.mxu0  ;;  %v792_v24 = vmul.f32 %v6866_v19, %v773_v27 }
 0x134   : > { %v894_v3 = vpop.permute.xlu1 %893  ;;  %v889_v29 = vpop.permute.xlu0 %888  ;;  %2344 = vrot.lane.b32.xlu1 %v7098_v41, %s8731_s28 }
 0x135   : > { %v6195_v31 = vpop.eup %6194  ;;  %v822_v52 = vmul.f32 1.442695, %v792_v24 }
 0x136   : > { %v1965_v26 = vpop.f32.mrf.mxu3  ;;  %v6197_v34 = vpop.eup %6196  ;;  %v919_v45 = vmul.f32 %v6195_v31, %v894_v3 }
 0x137   : > { %v7094_v28 = vadd.f32 %v7088_v21, %v1965_v26  ;;  %v918_v46 = vmul.f32 %v6197_v34, %v889_v29  ;;  %v5950_v26 = vld [vmem:[%s8722_s10] sm:$0xff] }
 0x138   : > { %1870 = vmatpush.bf16.msra.mxu2 %v5950_v26 }
 0x139   : > { %v2021_v39 = vmin.f32 %v7094_v28, 20.0  ;;  %v7113_v55 = vpack.c.bf16 %v919_v45, %v918_v46  ;;  %vm2005_vm2 = vcmp.gt.f32.partialorder %v7094_v28, 20.0 }
 0x13b   : > { %v2037_v40 = vmul.f32 1.442695, %v2021_v39 }
 0x13c   : > { %v904_v13 = vpop.permute.xlu0 %903 }
 0x13d   : > { %6198 = vpow2.f32 %v2037_v40 }
 0x13e   : > { %v1967_v50 = vpop.f32.mrf.mxu3  ;;  %6200 = vpow2.f32 %v822_v52 }
 0x13f   : > { %v7108_v53 = vadd.f32 %v7088_v21, %v1967_v50  ;;  %6202 = vpow2.f32 %v824_v54 }
 0x141   : > { %v2022_v19 = vmin.f32 %v7108_v53, 20.0  ;;  %5474 = vmatmul.msk.bf16.gmra.mxu1 %vm1420_vm0, %v7113_v55  ;;  %vm2006_vm4 = vcmp.gt.f32.partialorder %v7108_v53, 20.0 }
 0x143   : > { %v6199_v57 = vpop.eup %6198  ;;  %v2039_v60 = vmul.f32 1.442695, %v2022_v19 }
 0x144   : > { %v2069_v0 = vadd.f32 1.0, %v6199_v57  ;;  %v6201_v11 = vpop.eup %6200  ;;  %v2072_v12 = vmul.f32 -0.5, %v6199_v57  ;;  %v2075_v34 = vand.u32 2147483647, %v6199_v57 }
 0x145   : > { %6204 = vpow2.f32 %v2039_v60  ;;  %v6203_v17 = vpop.eup %6202  ;;  %v920_v27 = vmul.f32 %v6201_v11, %v899_v23 }
 0x146   : > { %6206 = vlog2.f32 %v2069_v0  ;;  %v1970_v2 = vpop.f32.mrf.mxu3  ;;  %v1518_v5 = vpop.f32.mrf.mxu1  ;;  %v921_v31 = vmul.f32 %v6203_v17, %v904_v13  ;;  %v2073_v3 = vadd.f32 1.0, %v2072_v12  ;;  %vm7151_vm1 = vcmp.lt.f32.partialorder %v2075_v34, 0.0004427343 }
 0x147   : > { %v7128_v6 = vadd.f32 %v7088_v21, %v1970_v2  ;;  %v7131_v8 = vadd.f32 %v7122_v62, %v1518_v5  ;;  %v7162_v13 = vpop.f32.mrf.mxu0 }
 0x148   : > { %v7148_v44 = vpack.c.bf16 %v921_v31, %v920_v27  ;;  %v2074_v45 = vmul.f32 %v6199_v57, %v2073_v3  ;;  %2346 = vrot.lane.b32.xlu2 %v7162_v13, %s8731_s28 }
 0x149   : > { %v2023_v14 = vmin.f32 %v7128_v6, 20.0  ;;  %v1574_v15 = vmin.f32 %v7131_v8, 20.0  ;;  %vm2007_vm5 = vcmp.gt.f32.partialorder %v7128_v6, 20.0  ;;  %vm1558_vm6 = vcmp.gt.f32.partialorder %v7131_v8, 20.0 }
 0x14b   : > { %v6205_v20 = vpop.eup %6204  ;;  %v2041_v7 = vmul.f32 1.442695, %v2023_v14  ;;  %v1590_v25 = vmul.f32 1.442695, %v1574_v15 }
 0x14c   : > { %v6207_v1 = vpop.eup %6206  ;;  %v2078_v33 = vadd.f32 1.0, %v6205_v20  ;;  %v2081_v16 = vmul.f32 -0.5, %v6205_v20  ;;  %v2084_v58 = vand.u32 2147483647, %v6205_v20 }
 0x14d   : > { %6208 = vpow2.f32 %v2041_v7  ;;  %v2071_v42 = vmul.f32 0.6931472, %v6207_v1 }
 0x14e   : > { %6210 = vlog2.f32 %v2078_v33  ;;  %v1972_v29 = vpop.f32.mrf.mxu3  ;;  %v1520_v39 = vpop.f32.mrf.mxu1  ;;  %v2082_v46 = vadd.f32 1.0, %v2081_v16  ;;  %vm2085_vm3 = vcmp.lt.f32.partialorder %v2084_v58, 0.0004427343 }
 0x14f   : > { %6212 = vpow2.f32 %v1590_v25  ;;  %v7143_v24 = vadd.f32 %v7088_v21, %v1972_v29  ;;  %v7146_v40 = vadd.f32 %v7122_v62, %v1520_v39  ;;  %v2077_v19 = vsel %vm7151_vm1, %v2074_v45, %v2071_v42 }
 0x150   : > { %v2083_v9 = vmul.f32 %v6205_v20, %v2082_v46  ;;  %v2213_v10 = vsel %vm2005_vm2, %v7094_v28, %v2077_v19 }
 0x151   : > { %v2024_v50 = vmin.f32 %v7143_v24, 20.0  ;;  %v1575_v54 = vmin.f32 %v7146_v40, 20.0  ;;  %5475 = vmatmul.msk.bf16.gmra.mxu1 %vm1420_vm0, %v7148_v44  ;;  %v5532_v28 = vadd.f32 -0.6931472, %v2213_v10  ;;  %vm2008_vm9 = vcmp.gt.f32.partialorder %v7143_v24, 20.0 }
 0x152   : > { %vm1559_vm10 = vcmp.gt.f32.partialorder %v7146_v40, 20.0 }
 0x153   : > { %v6209_v56 = vpop.eup %6208  ;;  %v2043_v60 = vmul.f32 1.442695, %v2024_v50  ;;  %v1592_v0 = vmul.f32 1.442695, %v1575_v54 }
 0x154   : > { %v6211_v30 = vpop.eup %6210  ;;  %v2087_v57 = vadd.f32 1.0, %v6209_v56  ;;  %v2090_v23 = vmul.f32 -0.5, %v6209_v56  ;;  %v2093_v34 = vand.u32 2147483647, %v6209_v56 }
 0x155   : > { %v6213_v2 = vpop.eup %6212  ;;  %v2080_v5 = vmul.f32 0.6931472, %v6211_v30  ;;  %6214 = vpow2.f32 %v2043_v60 }
 0x156   : > { %6216 = vlog2.f32 %v2087_v57  ;;  %v1622_v11 = vadd.f32 1.0, %v6213_v2  ;;  %v1975_v12 = vpop.f32.mrf.mxu3  ;;  %v1625_v7 = vmul.f32 -0.5, %v6213_v2  ;;  %v2091_v16 = vadd.f32 1.0, %v2090_v23 }
 0x157   : > { %v2086_v14 = vsel %vm2085_vm3, %v2083_v9, %v2080_v5  ;;  %6218 = vpow2.f32 %v1592_v0  ;;  %v7169_v17 = vadd.f32 %v7088_v21, %v1975_v12  ;;  %v1628_v50 = vand.u32 2147483647, %v6213_v2 }
 0x158   : > { %v2214_v15 = vsel %vm2006_vm4, %v7108_v53, %v2086_v14  ;;  %6220 = vlog2.f32 %v1622_v11  ;;  %v1626_v29 = vadd.f32 1.0, %v1625_v7  ;;  %v2092_v60 = vmul.f32 %v6209_v56, %v2091_v16 }
 0x159   : > { %v5533_v20 = vadd.f32 -0.6931472, %v2214_v15  ;;  %v2025_v25 = vmin.f32 %v7169_v17, 20.0  ;;  %vm7181_vm7 = vcmp.lt.f32.partialorder %v2093_v34, 0.0004427343  ;;  %v1364_v23 = vperm.slane %v7073_v61, 0 }
 0x15a   : > { %v1627_v57 = vmul.f32 %v6213_v2, %v1626_v29  ;;  %vm7189_vm8 = vcmp.lt.f32.partialorder %v1628_v50, 0.0004427343  ;;  %vm2009_vm15 = vcmp.gt.f32.partialorder %v7169_v17, 20.0 }
 0x15b   : > { %v6215_v26 = vpop.eup %6214  ;;  %v2245_v1 = vpack.c.bf16 %v5533_v20, %v5532_v28  ;;  %v2045_v31 = vmul.f32 1.442695, %v2025_v25  ;;  %1369 = vperm.xlu0 %6050, %v1364_v23  }
 0x15c   : > { %v6217_v27 = vpop.eup %6216  ;;  %v2096_v33 = vadd.f32 1.0, %v6215_v26  ;;  %v2099_v42 = vmul.f32 -0.5, %v6215_v26  ;;  %v2102_v10 = vand.u32 2147483647, %v6215_v26 }
 0x15d   : > { %v6219_v3 = vpop.eup %6218  ;;  %5556 = vmatmul.msk.bf16.vlgmr.msrb.gmra.mxu0 %vm1420_vm0, %v2245_v1  ;;  %6222 = vpow2.f32 %v2045_v31  ;;  %v2089_v46 = vmul.f32 0.6931472, %v6217_v27 }
 0x15e   : > { %v6221_v53 = vpop.eup %6220  ;;  %v1977_v39 = vpop.f32.mrf.mxu3  ;;  %v1631_v45 = vadd.f32 1.0, %v6219_v3  ;;  %6224 = vlog2.f32 %v2096_v33  ;;  %v2100_v9 = vadd.f32 1.0, %v2099_v42  ;;  %v1634_v11 = vmul.f32 -0.5, %v6219_v3 }
 0x15f   : > { %v7175_v52 = vadd.f32 %v7088_v21, %v1977_v39  ;;  %v1523_v58 = vpop.f32.mrf.mxu1  ;;  %v1624_v54 = vmul.f32 0.6931472, %v6221_v53  ;;  %v2095_v12 = vsel %vm7181_vm7, %v2092_v60, %v2089_v46  ;;  %v1637_v1 = vand.u32 2147483647, %v6219_v3 }
 0x160   : > { %v7179_v19 = vadd.f32 %v7122_v62, %v1523_v58  ;;  %6226 = vlog2.f32 %v1631_v45  ;;  %v1635_v20 = vadd.f32 1.0, %v1634_v11  ;;  %v2101_v16 = vmul.f32 %v6215_v26, %v2100_v9 }
 0x161   : > { %v2026_v0 = vmin.f32 %v7175_v52, 20.0  ;;  %v1630_v2 = vsel %vm7189_vm8, %v1627_v57, %v1624_v54  ;;  %vm2103_vm11 = vcmp.lt.f32.partialorder %v2102_v10, 0.0004427343  ;;  %v2215_v34 = vsel %vm2007_vm5, %v7128_v6, %v2095_v12 }
 0x162   : > { %v1576_v5 = vmin.f32 %v7179_v19, 20.0  ;;  %v1766_v29 = vsel %vm1558_vm6, %v7131_v8, %v1630_v2  ;;  %v1636_v46 = vmul.f32 %v6219_v3, %v1635_v20  ;;  %vm1638_vm12 = vcmp.lt.f32.partialorder %v1637_v1, 0.0004427343 }
 0x163   : > { %v2047_v56 = vmul.f32 1.442695, %v2026_v0  ;;  %v7194_v15 = vpop.eup %6222  ;;  %v5534_v8 = vadd.f32 -0.6931472, %v2215_v34  ;;  %v5476_v0 = vadd.f32 -0.6931472, %v1766_v29 }
 0x164   : > { %v1594_v28 = vmul.f32 1.442695, %v1576_v5  ;;  %v6225_v7 = vpop.eup %6224  ;;  %v2105_v25 = vadd.f32 1.0, %v7194_v15  ;;  %v2108_v50 = vmul.f32 -0.5, %v7194_v15  ;;  %vm2010_vm1 = vcmp.gt.f32.partialorder %v7175_v52, 20.0 }
 0x165   : > { %6228 = vpow2.f32 %v2047_v56  ;;  %v2098_v33 = vmul.f32 0.6931472, %v6225_v7  ;;  %vm1560_vm4 = vcmp.gt.f32.partialorder %v7179_v19, 20.0 }
 0x166   : > { %v6227_v27 = vpop.eup %6226  ;;  %6230 = vpow2.f32 %v1594_v28  ;;  %v1980_v31 = vpop.f32.mrf.mxu3  ;;  %v2111_v28 = vand.u32 2147483647, %v7194_v15 }
 0x167   : > { %6232 = vlog2.f32 %v2105_v25  ;;  %v7208_v53 = vadd.f32 %v7088_v21, %v1980_v31  ;;  %v1525_v39 = vpop.f32.mrf.mxu1  ;;  %v2104_v45 = vsel %vm2103_vm11, %v2101_v16, %v2098_v33  ;;  %v1633_v26 = vmul.f32 0.6931472, %v6227_v27 }
 0x168   : > { %v7211_v42 = vadd.f32 %v7122_v62, %v1525_v39  ;;  %v2216_v6 = vsel %vm2008_vm9, %v7143_v24, %v2104_v45  ;;  %v2109_v24 = vadd.f32 1.0, %v2108_v50  ;;  %vm7233_vm14 = vcmp.lt.f32.partialorder %v2111_v28, 0.0004427343 }
 0x169   : > { %v2027_v58 = vmin.f32 %v7208_v53, 20.0  ;;  %v5535_v60 = vadd.f32 -0.6931472, %v2216_v6  ;;  %v1639_v30 = vsel %vm1638_vm12, %v1636_v46, %v1633_v26  ;;  %vm2011_vm8 = vcmp.gt.f32.partialorder %v7208_v53, 20.0 }
 0x16a   : > { %v1577_v54 = vmin.f32 %v7211_v42, 20.0  ;;  %v1767_v3 = vsel %vm1559_vm10, %v7146_v40, %v1639_v30  ;;  %v2110_v31 = vmul.f32 %v7194_v15, %v2109_v24  ;;  %vm1561_vm5 = vcmp.gt.f32.partialorder %v7211_v42, 20.0 }
 0x16b   : > { %v6229_v57 = vpop.eup %6228  ;;  %v2049_v5 = vmul.f32 1.442695, %v2027_v58  ;;  %v2246_v11 = vpack.c.bf16 %v5535_v60, %v5534_v8  ;;  %v5477_v12 = vadd.f32 -0.6931472, %v1767_v3 }
 0x16c   : > { %v6231_v9 = vpop.eup %6230  ;;  %v1596_v10 = vmul.f32 1.442695, %v1577_v54  ;;  %v2114_v14 = vadd.f32 1.0, %v6229_v57  ;;  %v2117_v7 = vmul.f32 -0.5, %v6229_v57  ;;  %v2120_v8 = vand.u32 2147483647, %v6229_v57 }
 0x16d   : > { %v6233_v56 = vpop.eup %6232  ;;  %v1640_v2 = vadd.f32 1.0, %v6231_v9  ;;  %6234 = vpow2.f32 %v2049_v5  ;;  %5557 = vmatmul.msk.bf16.gmra.mxu0 %vm1420_vm0, %v2246_v11  ;;  %v1798_v20 = vpack.c.bf16 %v5477_v12, %v5476_v0  ;;  %v1643_v33 = vmul.f32 -0.5, %v6231_v9 }
 0x16e   : > { %6236 = vpow2.f32 %v1596_v10  ;;  %v1982_v23 = vpop.f32.mrf.mxu3  ;;  %v2107_v25 = vmul.f32 0.6931472, %v6233_v56  ;;  %v2118_v39 = vadd.f32 1.0, %v2117_v7  ;;  %v1646_v46 = vand.u32 2147483647, %v6231_v9 }
 0x16f   : > { %6238 = vlog2.f32 %v1640_v2  ;;  %v7225_v40 = vadd.f32 %v7088_v21, %v1982_v23  ;;  %v1528_v1 = vpop.f32.mrf.mxu1  ;;  %5508 = vmatmul.msk.bf16.vlgmr.msra.gmra.mxu2 %vm1838_vm13, %v1798_v20  ;;  %v1644_v60 = vadd.f32 1.0, %v1643_v33  ;;  %vm2121_vm3 = vcmp.lt.f32.partialorder %v2120_v8, 0.0004427343 }
 0x170   : > { %v7229_v27 = vadd.f32 %v7122_v62, %v1528_v1  ;;  %6240 = vlog2.f32 %v2114_v14  ;;  %v2113_v26 = vsel %vm7233_vm14, %v2110_v31, %v2107_v25  ;;  %v2119_v10 = vmul.f32 %v6229_v57, %v2118_v39 }
 0x171   : > { %v2028_v16 = vmin.f32 %v7225_v40, 20.0  ;;  %v2217_v5 = vsel %vm2009_vm15, %v7169_v17, %v2113_v26  ;;  %vm7249_vm2 = vcmp.lt.f32.partialorder %v1646_v46, 0.0004427343  ;;  %v1645_v17 = vmul.f32 %v6231_v9, %v1644_v60 }
 0x172   : > { %v1578_v29 = vmin.f32 %v7229_v27, 20.0  ;;  %v5536_v7 = vadd.f32 -0.6931472, %v2217_v5  ;;  %vm2012_vm10 = vcmp.gt.f32.partialorder %v7225_v40, 20.0  ;;  %vm1562_vm14 = vcmp.gt.f32.partialorder %v7229_v27, 20.0 }
 0x173   : > { %v7238_v45 = vpop.eup %6234  ;;  %v2051_v50 = vmul.f32 1.442695, %v2028_v16 }
 0x174   : > { %v6237_v58 = vpop.eup %6236  ;;  %v2123_v15 = vadd.f32 1.0, %v7238_v45  ;;  %v1598_v6 = vmul.f32 1.442695, %v1578_v29  ;;  %v2126_v57 = vmul.f32 -0.5, %v7238_v45  ;;  %v2129_v25 = vand.u32 2147483647, %v7238_v45 }
 0x175   : > { %v6239_v54 = vpop.eup %6238  ;;  %6242 = vpow2.f32 %v2051_v50  ;;  %v1649_v30 = vadd.f32 1.0, %v6237_v58  ;;  %v1652_v11 = vmul.f32 -0.5, %v6237_v58  ;;  %v1655_v46 = vand.u32 2147483647, %v6237_v58 }
 0x176   : > { %v6241_v0 = vpop.eup %6240  ;;  %6244 = vlog2.f32 %v2123_v15  ;;  %v1985_v3 = vpop.f32.mrf.mxu3  ;;  %v1642_v12 = vmul.f32 0.6931472, %v6239_v54  ;;  %vm7279_vm6 = vcmp.lt.f32.partialorder %v2129_v25, 0.0004427343 }
 0x177   : > { %6246 = vpow2.f32 %v1598_v6  ;;  %v7247_v14 = vadd.f32 %v7088_v21, %v1985_v3  ;;  %v1530_v56 = vpop.f32.mrf.mxu1  ;;  %v2116_v24 = vmul.f32 0.6931472, %v6241_v0  ;;  %v1653_v29 = vadd.f32 1.0, %v1652_v11 }
 0x178   : > { %v7254_v28 = vadd.f32 %v7122_v62, %v1530_v56  ;;  %6248 = vlog2.f32 %v1649_v30  ;;  %v1648_v16 = vsel %vm7249_vm2, %v1645_v17, %v1642_v12  ;;  %v2127_v6 = vadd.f32 1.0, %v2126_v57 }
 0x179   : > { %v2029_v20 = vmin.f32 %v7247_v14, 20.0  ;;  %v2122_v23 = vsel %vm2121_vm3, %v2119_v10, %v2116_v24  ;;  %v1768_v54 = vsel %vm1560_vm4, %v7179_v19, %v1648_v16  ;;  %v1654_v10 = vmul.f32 %v6237_v58, %v1653_v29 }
 0x17a   : > { %v1579_v1 = vmin.f32 %v7254_v28, 20.0  ;;  %v2218_v31 = vsel %vm2010_vm1, %v7175_v52, %v2122_v23  ;;  %vm1656_vm7 = vcmp.lt.f32.partialorder %v1655_v46, 0.0004427343  ;;  %v5478_v19 = vadd.f32 -0.6931472, %v1768_v54 }
 0x17b   : > { %v7263_v33 = vpop.eup %6242  ;;  %v2053_v9 = vmul.f32 1.442695, %v2029_v20  ;;  %v5537_v34 = vadd.f32 -0.6931472, %v2218_v31  ;;  %v2128_v56 = vmul.f32 %v7238_v45, %v2127_v6  ;;  %vm1563_vm1 = vcmp.gt.f32.partialorder %v7254_v28, 20.0 }
 0x17c   : > { %v6245_v39 = vpop.eup %6244  ;;  %v1600_v26 = vmul.f32 1.442695, %v1579_v1  ;;  %v2132_v50 = vadd.f32 1.0, %v7263_v33  ;;  %v2135_v0 = vmul.f32 -0.5, %v7263_v33  ;;  %v2138_v20 = vand.u32 2147483647, %v7263_v33 }
 0x17d   : > { %v7269_v15 = vpop.eup %6246  ;;  %6250 = vpow2.f32 %v2053_v9  ;;  %v2247_v52 = vpack.c.bf16 %v5537_v34, %v5536_v7  ;;  %v2125_v11 = vmul.f32 0.6931472, %v6245_v39  ;;  %v1385_v1 = vperm.slane %v7073_v61, 3 }
 0x17e   : > { %v6249_v8 = vpop.eup %6248  ;;  %v1658_v60 = vadd.f32 1.0, %v7269_v15  ;;  %6252 = vpow2.f32 %v1600_v26  ;;  %v1987_v30 = vpop.f32.mrf.mxu3  ;;  %v1661_v17 = vmul.f32 -0.5, %v7269_v15  ;;  %v2136_v57 = vadd.f32 1.0, %v2135_v0 }
 0x17f   : > { %5558 = vmatmul.msk.bf16.gmra.mxu0 %vm1420_vm0, %v2247_v52  ;;  %v7277_v5 = vadd.f32 %v7088_v21, %v1987_v30  ;;  %v1651_v3 = vmul.f32 0.6931472, %v6249_v8  ;;  %6254 = vlog2.f32 %v2132_v50  ;;  %v2131_v45 = vsel %vm7279_vm6, %v2128_v56, %v2125_v11  ;;  %1390 = vperm.xlu0 %6050, %v1385_v1  }
 0x180   : > { %6256 = vlog2.f32 %v1658_v60  ;;  %v1664_v16 = vand.u32 2147483647, %v7269_v15  ;;  %v1662_v46 = vadd.f32 1.0, %v1661_v17  ;;  %v2137_v8 = vmul.f32 %v7263_v33, %v2136_v57 }
 0x181   : > { %v2030_v24 = vmin.f32 %v7277_v5, 20.0  ;;  %v1657_v2 = vsel %vm1656_vm7, %v1654_v10, %v1651_v3  ;;  %vm2139_vm9 = vcmp.lt.f32.partialorder %v2138_v20, 0.0004427343  ;;  %v2219_v30 = vsel %vm2011_vm8, %v7208_v53, %v2131_v45 }
 0x182   : > { %v1769_v58 = vsel %vm1561_vm5, %v7211_v42, %v1657_v2  ;;  %vm7312_vm11 = vcmp.lt.f32.partialorder %v1664_v16, 0.0004427343  ;;  %v5538_v53 = vadd.f32 -0.6931472, %v2219_v30  ;;  %v1663_v17 = vmul.f32 %v7269_v15, %v1662_v46 }
 0x183   : > { %v7290_v23 = vpop.eup %6250  ;;  %v2055_v7 = vmul.f32 1.442695, %v2030_v24  ;;  %v5479_v25 = vadd.f32 -0.6931472, %v1769_v58  ;;  %vm2013_vm2 = vcmp.gt.f32.partialorder %v7247_v14, 20.0  ;;  %vm2014_vm4 = vcmp.gt.f32.partialorder %v7277_v5, 20.0 }
 0x184   : > { %v6253_v31 = vpop.eup %6252  ;;  %v2141_v9 = vadd.f32 1.0, %v7290_v23  ;;  %v2144_v0 = vmul.f32 -0.5, %v7290_v23 }
 0x185   : > { %v6255_v42 = vpop.eup %6254  ;;  %6258 = vpow2.f32 %v2055_v7  ;;  %v1799_v34 = vpack.c.bf16 %v5479_v25, %v5478_v19  ;;  %v1667_v29 = vadd.f32 1.0, %v6253_v31  ;;  %v1670_v39 = vmul.f32 -0.5, %v6253_v31 }
 0x186   : > { %v6257_v26 = vpop.eup %6256  ;;  %6260 = vlog2.f32 %v2141_v9  ;;  %v1990_v50 = vpop.f32.mrf.mxu3  ;;  %v2134_v52 = vmul.f32 0.6931472, %v6255_v42  ;;  %v1673_v24 = vand.u32 2147483647, %v6253_v31  ;;  %v2145_v7 = vadd.f32 1.0, %v2144_v0 }
 0x187   : > { %v1533_v6 = vpop.f32.mrf.mxu1  ;;  %5509 = vmatmul.msk.bf16.gmra.mxu2 %vm1838_vm13, %v1799_v34  ;;  %v7301_v54 = vadd.f32 %v7088_v21, %v1990_v50  ;;  %6262 = vlog2.f32 %v1667_v29  ;;  %v1660_v33 = vmul.f32 0.6931472, %v6257_v26  ;;  %v1671_v11 = vadd.f32 1.0, %v1670_v39 }
 0x188   : > { %v7304_v60 = vadd.f32 %v7122_v62, %v1533_v6  ;;  %v2140_v3 = vsel %vm2139_vm9, %v2137_v8, %v2134_v52  ;;  %v2147_v25 = vand.u32 2147483647, %v7290_v23  ;;  %vm7325_vm12 = vcmp.lt.f32.partialorder %v1673_v24, 0.0004427343 }
 0x189   : > { %v2031_v10 = vmin.f32 %v7301_v54, 20.0  ;;  %v2220_v56 = vsel %vm2012_vm10, %v7225_v40, %v2140_v3  ;;  %v1666_v9 = vsel %vm7312_vm11, %v1663_v17, %v1660_v33  ;;  %v1672_v42 = vmul.f32 %v6253_v31, %v1671_v11 }
 0x18a   : > { %v1580_v19 = vmin.f32 %v7304_v60, 20.0  ;;  %v5539_v57 = vadd.f32 -0.6931472, %v2220_v56  ;;  %v1392_v26 = vperm.slane %v7073_v61, 4  ;;  %v1770_v8 = vsel %vm1562_vm14, %v7229_v27, %v1666_v9 }
 0x18b   : > { %v7318_v2 = vpop.eup %6258  ;;  %v2057_v58 = vmul.f32 1.442695, %v2031_v10  ;;  %vm7342_vm15 = vcmp.lt.f32.partialorder %v2147_v25, 0.0004427343  ;;  %v2146_v3 = vmul.f32 %v7290_v23, %v2145_v7  ;;  %v1336_v11 = vperm.slane %v7056_v43, 4 }
 0x18c   : > { %v6261_v20 = vpop.eup %6260  ;;  %v1602_v1 = vmul.f32 1.442695, %v1580_v19  ;;  %v2150_v45 = vadd.f32 1.0, %v7318_v2  ;;  %v2248_v40 = vpack.c.bf16 %v5539_v57, %v5538_v53  ;;  %v2153_v31 = vmul.f32 -0.5, %v7318_v2  ;;  %1397 = vperm.xlu1 %6048, %v1392_v26  }
 0x18d   : > { %v6263_v16 = vpop.eup %6262  ;;  %6264 = vpow2.f32 %v2057_v58  ;;  %v2143_v6 = vmul.f32 0.6931472, %v6261_v20  ;;  %v5480_v53 = vadd.f32 -0.6931472, %v1770_v8  ;;  %1341 = vperm.xlu0 %6050, %v1336_v11   ;;  %vm2015_vm5 = vcmp.gt.f32.partialorder %v7301_v54, 20.0 }
 0x18e   : > { %6266 = vpow2.f32 %v1602_v1  ;;  %v1992_v34 = vpop.f32.mrf.mxu3  ;;  %v1669_v15 = vmul.f32 0.6931472, %v6263_v16  ;;  %v2154_v27 = vadd.f32 1.0, %v2153_v31  ;;  %vm1564_vm10 = vcmp.gt.f32.partialorder %v7304_v60, 20.0 }
 0x18f   : > { %v1535_v29 = vpop.f32.mrf.mxu1  ;;  %5559 = vmatmul.msk.bf16.gmra.mxu0 %vm1420_vm0, %v2248_v40  ;;  %v7332_v46 = vadd.f32 %v7088_v21, %v1992_v34  ;;  %6268 = vlog2.f32 %v2150_v45  ;;  %v2149_v17 = vsel %vm7342_vm15, %v2146_v3, %v2143_v6 }
 0x190   : > { %v7335_v50 = vadd.f32 %v7122_v62, %v1535_v29  ;;  %v1675_v52 = vsel %vm7325_vm12, %v1672_v42, %v1669_v15  ;;  %v2221_v1 = vsel %vm2013_vm2, %v7247_v14, %v2149_v17  ;;  %v2155_v16 = vmul.f32 %v7318_v2, %v2154_v27 }
 0x191   : > { %v2032_v0 = vmin.f32 %v7332_v46, 20.0  ;;  %v1771_v10 = vsel %vm1563_vm1, %v7254_v28, %v1675_v52  ;;  %v2156_v28 = vand.u32 2147483647, %v7318_v2  ;;  %v1399_v42 = vperm.slane %v7073_v61, 5 }
 0x192   : > { %v1581_v33 = vmin.f32 %v7335_v50, 20.0  ;;  %v5481_v56 = vadd.f32 -0.6931472, %v1771_v10  ;;  %v5540_v15 = vadd.f32 -0.6931472, %v2221_v1  ;;  %vm2016_vm7 = vcmp.gt.f32.partialorder %v7332_v46, 20.0 }
 0x193   : > { %v6265_v12 = vpop.eup %6264  ;;  %v2059_v19 = vmul.f32 1.442695, %v2032_v0  ;;  %vm2157_vm3 = vcmp.lt.f32.partialorder %v2156_v28, 0.0004427343  ;;  %vm1565_vm11 = vcmp.gt.f32.partialorder %v7335_v50, 20.0 }
 0x194   : > { %v7352_v24 = vpop.eup %6266  ;;  %v2159_v58 = vadd.f32 1.0, %v6265_v12  ;;  %v1604_v57 = vmul.f32 1.442695, %v1581_v33  ;;  %v1800_v7 = vpack.c.bf16 %v5481_v56, %v5480_v53  ;;  %v2162_v9 = vmul.f32 -0.5, %v6265_v12 }
 0x195   : > { %v6269_v23 = vpop.eup %6268  ;;  %v1676_v20 = vadd.f32 1.0, %v7352_v24  ;;  %6270 = vpow2.f32 %v2059_v19  ;;  %v1679_v6 = vmul.f32 -0.5, %v7352_v24  ;;  %1404 = vperm.xlu0 %6050, %v1399_v42   ;;  %v2165_v30 = vand.u32 2147483647, %v6265_v12 }
 0x196   : > { %6272 = vlog2.f32 %v2159_v58  ;;  %v1995_v25 = vpop.f32.mrf.mxu3  ;;  %v2152_v40 = vmul.f32 0.6931472, %v6269_v23  ;;  %v2163_v31 = vadd.f32 1.0, %v2162_v9 }
 0x197   : > { %v7361_v45 = vadd.f32 %v7088_v21, %v1995_v25  ;;  %6274 = vpow2.f32 %v1604_v57  ;;  %5510 = vmatmul.msk.bf16.gmra.mxu2 %vm1838_vm13, %v1800_v7  ;;  %v1680_v58 = vadd.f32 1.0, %v1679_v6  ;;  %vm7379_vm6 = vcmp.lt.f32.partialorder %v2165_v30, 0.0004427343 }
 0x198   : > { %6276 = vlog2.f32 %v1676_v20  ;;  %v2158_v29 = vsel %vm2157_vm3, %v2155_v16, %v2152_v40  ;;  %v2164_v17 = vmul.f32 %v6265_v12, %v2163_v31 }
 0x199   : > { %v2033_v34 = vmin.f32 %v7361_v45, 20.0  ;;  %v2222_v26 = vsel %vm2014_vm4, %v7277_v5, %v2158_v29  ;;  %v1682_v5 = vand.u32 2147483647, %v7352_v24  ;;  %vm2017_vm15 = vcmp.gt.f32.partialorder %v7361_v45, 20.0 }
 0x19a   : > { %v5541_v52 = vadd.f32 -0.6931472, %v2222_v26 }
 0x19b   : > { %v6271_v14 = vpop.eup %6270  ;;  %v2061_v39 = vmul.f32 1.442695, %v2033_v34  ;;  %vm7390_vm8 = vcmp.lt.f32.partialorder %v1682_v5, 0.0004427343  ;;  %v1350_v34 = vperm.slane %v7056_v43, 6 }
 0x19c   : > { %v6273_v2 = vpop.eup %6272  ;;  %v2168_v8 = vadd.f32 1.0, %v6271_v14  ;;  %v2171_v0 = vmul.f32 -0.5, %v6271_v14  ;;  %v2249_v10 = vpack.c.bf16 %v5541_v52, %v5540_v15  ;;  %v2174_v57 = vand.u32 2147483647, %v6271_v14 }
 0x19d   : > { %6278 = vpow2.f32 %v2061_v39  ;;  %v6275_v3 = vpop.eup %6274  ;;  %v2161_v33 = vmul.f32 0.6931472, %v6273_v2  ;;  %v1681_v15 = vmul.f32 %v7352_v24, %v1680_v58  ;;  %1355 = vperm.xlu1 %6048, %v1350_v34  }
 0x19e   : > { %v1997_v11 = vpop.f32.mrf.mxu3  ;;  %v1538_v19 = vpop.f32.mrf.mxu1  ;;  %6280 = vlog2.f32 %v2168_v8  ;;  %v1685_v23 = vadd.f32 1.0, %v6275_v3  ;;  %v2172_v7 = vadd.f32 1.0, %v2171_v0  ;;  %v1688_v42 = vmul.f32 -0.5, %v6275_v3 }
 0x19f   : > { %v6277_v56 = vpop.eup %6276  ;;  %v7373_v27 = vadd.f32 %v7088_v21, %v1997_v11  ;;  %v7376_v53 = vadd.f32 %v7122_v62, %v1538_v19  ;;  %5560 = vmatmul.msk.bf16.gmra.mxu0 %vm1420_vm0, %v2249_v10  ;;  %v2167_v25 = vsel %vm7379_vm6, %v2164_v17, %v2161_v33  ;;  %vm7397_vm9 = vcmp.lt.f32.partialorder %v2174_v57, 0.0004427343 }
 0x1a0   : > { %v1678_v1 = vmul.f32 0.6931472, %v6277_v56  ;;  %6282 = vlog2.f32 %v1685_v23  ;;  %v2223_v31 = vsel %vm2015_vm5, %v7301_v54, %v2167_v25  ;;  %v2173_v52 = vmul.f32 %v6271_v14, %v2172_v7 }
 0x1a1   : > { %v2034_v28 = vmin.f32 %v7373_v27, 20.0  ;;  %v1582_v12 = vmin.f32 %v7376_v53, 20.0  ;;  %v1689_v30 = vadd.f32 1.0, %v1688_v42  ;;  %v1691_v0 = vand.u32 2147483647, %v6275_v3 }
 0x1a2   : > { %v1684_v43 = vsel %vm7390_vm8, %v1681_v15, %v1678_v1  ;;  %v5542_v56 = vadd.f32 -0.6931472, %v2223_v31  ;;  %vm2018_vm1 = vcmp.gt.f32.partialorder %v7373_v27, 20.0  ;;  %vm1566_vm4 = vcmp.gt.f32.partialorder %v7376_v53, 20.0 }
 0x1a3   : > { %v7388_v16 = vpop.eup %6278  ;;  %v2063_v40 = vmul.f32 1.442695, %v2034_v28  ;;  %v1606_v26 = vmul.f32 1.442695, %v1582_v12  ;;  %v1772_v5 = vsel %vm1564_vm10, %v7304_v60, %v1684_v43  ;;  %v1690_v20 = vmul.f32 %v6275_v3, %v1689_v30 }
 0x1a4   : > { %v6281_v29 = vpop.eup %6280  ;;  %v2177_v39 = vadd.f32 1.0, %v7388_v16  ;;  %v2180_v11 = vmul.f32 -0.5, %v7388_v16  ;;  %vm7423_vm12 = vcmp.lt.f32.partialorder %v1691_v0, 0.0004427343  ;;  %v1413_v60 = vperm.slane %v7073_v61, 7 }
 0x1a5   : > { %6284 = vpow2.f32 %v2063_v40  ;;  %v2170_v6 = vmul.f32 0.6931472, %v6281_v29  ;;  %v2183_v15 = vand.u32 2147483647, %v7388_v16 }
 0x1a6   : > { %6286 = vlog2.f32 %v2177_v39  ;;  %v2000_v24 = vpop.f32.mrf.mxu3  ;;  %v1540_v8 = vpop.f32.mrf.mxu1  ;;  %v2181_v40 = vadd.f32 1.0, %v2180_v11  ;;  %1418 = vperm.xlu1 %6048, %v1413_v60  }
 0x1a7   : > { %6288 = vpow2.f32 %v1606_v26  ;;  %v7407_v33 = vadd.f32 %v7088_v21, %v2000_v24  ;;  %v7410_v10 = vadd.f32 %v7122_v62, %v1540_v8  ;;  %v2176_v54 = vsel %vm7397_vm9, %v2173_v52, %v2170_v6  ;;  %v6283_v14 = vpop.eup %6282 }
 0x1a8   : > { %v2224_v19 = vsel %vm2016_vm7, %v7332_v46, %v2176_v54  ;;  %v1687_v23 = vmul.f32 0.6931472, %v6283_v14  ;;  %v6586_v46 = vld [vmem:[%s8718_s6] sm:$0xff]  ;;  %v5482_v6 = vadd.f32 -0.6931472, %v1772_v5  ;;  %v2182_v8 = vmul.f32 %v7388_v16, %v2181_v40 }
 0x1a9   : > { %v2035_v17 = vmin.f32 %v7407_v33, 20.0  ;;  %v1583_v58 = vmin.f32 %v7410_v10, 20.0  ;;  %v5543_v57 = vadd.f32 -0.6931472, %v2224_v19  ;;  %v1343_v12 = vperm.slane %v6586_v46, 5 }
 0x1aa   : > { %v1693_v3 = vsel %vm7423_vm12, %v1690_v20, %v1687_v23  ;;  %vm7445_vm14 = vcmp.lt.f32.partialorder %v2183_v15, 0.0004427343  ;;  %v1357_v5 = vperm.slane %v6586_v46, 7  ;;  %vm2019_vm7 = vcmp.gt.f32.partialorder %v7407_v33, 20.0 }
 0x1ab   : > { %v6285_v7 = vpop.eup %6284  ;;  %v2065_v25 = vmul.f32 1.442695, %v2035_v17  ;;  %v1608_v1 = vmul.f32 1.442695, %v1583_v58  ;;  %v2250_v42 = vpack.c.bf16 %v5543_v57, %v5542_v56  ;;  %v1773_v39 = vsel %vm1565_vm11, %v7335_v50, %v1693_v3  ;;  %1348 = vperm.xlu2 %6049, %v1343_v12  }
 0x1ac   : > { %v6287_v9 = vpop.eup %6286  ;;  %v2186_v34 = vadd.f32 1.0, %v6285_v7  ;;  %v2189_v31 = vmul.f32 -0.5, %v6285_v7  ;;  %v5483_v52 = vadd.f32 -0.6931472, %v1773_v39  ;;  %v2192_v56 = vand.u32 2147483647, %v6285_v7  ;;  %1362 = vperm.xlu0 %6050, %v1357_v5  }
 0x1ad   : > { %v7433_v29 = vpop.eup %6288  ;;  %6290 = vpow2.f32 %v2065_v25  ;;  %v2179_v26 = vmul.f32 0.6931472, %v6287_v9  ;;  %vm1567_vm8 = vcmp.gt.f32.partialorder %v7410_v10, 20.0 }
 0x1ae   : > { %v1694_v61 = vadd.f32 1.0, %v7433_v29  ;;  %6292 = vpow2.f32 %v1608_v1  ;;  %v2002_v2 = vpop.f32.mrf.mxu3  ;;  %v1543_v24 = vpop.f32.mrf.mxu1  ;;  %v1801_v30 = vpack.c.bf16 %v5483_v52, %v5482_v6  ;;  %v2190_v14 = vadd.f32 1.0, %v2189_v31 }
 0x1af   : > { %v7441_v43 = vadd.f32 %v7088_v21, %v2002_v2  ;;  %6294 = vlog2.f32 %v2186_v34  ;;  %5561 = vmatmul.msk.bf16.gmra.mxu0 %vm1420_vm0, %v2250_v42  ;;  %v2185_v54 = vsel %vm7445_vm14, %v2182_v8, %v2179_v26  ;;  %v7453_v21 = vadd.f32 %v7122_v62, %v1543_v24 }
 0x1b0   : > { %6296 = vlog2.f32 %v1694_v61  ;;  %v1697_v16 = vmul.f32 -0.5, %v7433_v29  ;;  %5511 = vmatmul.msk.bf16.gmra.mxu2 %vm1838_vm13, %v1801_v30  ;;  %v2225_v23 = vsel %vm2017_vm15, %v7361_v45, %v2185_v54  ;;  %v2191_v25 = vmul.f32 %v6285_v7, %v2190_v14 }
 0x1b1   : > { %v2036_v0 = vmin.f32 %v7441_v43, 20.0  ;;  %v1584_v20 = vmin.f32 %v7453_v21, 20.0  ;;  %vm2193_vm2 = vcmp.lt.f32.partialorder %v2192_v56, 0.0004427343  ;;  %v5544_v40 = vadd.f32 -0.6931472, %v2225_v23 }
 0x1b2   : > { %v1698_v46 = vadd.f32 1.0, %v1697_v16  ;;  %v1700_v42 = vand.u32 2147483647, %v7433_v29  ;;  %vm2020_vm9 = vcmp.gt.f32.partialorder %v7441_v43, 20.0  ;;  %vm1568_vm12 = vcmp.gt.f32.partialorder %v7453_v21, 20.0 }
 0x1b3   : > { %v7455_v11 = vpop.eup %6290  ;;  %v2067_v19 = vmul.f32 1.442695, %v2036_v0  ;;  %v1610_v12 = vmul.f32 1.442695, %v1584_v20  ;;  %v6587_v0 = vld [vmem:[%s8719_s7] sm:$0xff] }
 0x1b4   : > { %v7459_v17 = vpop.eup %6292  ;;  %v2195_v58 = vadd.f32 1.0, %v7455_v11  ;;  %v2198_v34 = vmul.f32 -0.5, %v7455_v11  ;;  %v1699_v31 = vmul.f32 %v7433_v29, %v1698_v46  ;;  %v2201_v6 = vand.u32 2147483647, %v7455_v11 }
 0x1b5   : > { %v6295_v57 = vpop.eup %6294  ;;  %6298 = vpow2.f32 %v2067_v19  ;;  %v1703_v9 = vadd.f32 1.0, %v7459_v17  ;;  %v1706_v15 = vmul.f32 -0.5, %v7459_v17  ;;  %vm7479_vm3 = vcmp.lt.f32.partialorder %v1700_v42, 0.0004427343 }
 0x1b6   : > { %6300 = vlog2.f32 %v2195_v58  ;;  %v2188_v28 = vmul.f32 0.6931472, %v6295_v57  ;;  %v6297_v1 = vpop.eup %6296  ;;  %v1545_v60 = vpop.f32.mrf.mxu1  ;;  %v1406_v54 = vperm.slane %v6587_v0, 6  ;;  %v1709_v14 = vand.u32 2147483647, %v7459_v17 }
 0x1b7   : > { %v7469_v45 = vadd.f32 %v7122_v62, %v1545_v60  ;;  %6302 = vpow2.f32 %v1610_v12  ;;  %v1696_v39 = vmul.f32 0.6931472, %v6297_v1  ;;  %v1707_v30 = vadd.f32 1.0, %v1706_v15 }
 0x1b8   : > { %v2194_v3 = vsel %vm2193_vm2, %v2191_v25, %v2188_v28  ;;  %6304 = vlog2.f32 %v1703_v9  ;;  %1411 = vperm.xlu2 %6049, %v1406_v54   ;;  %vm7490_vm5 = vcmp.lt.f32.partialorder %v2201_v6, 0.0004427343  ;;  %v7500_v25 = vld [vmem:[%s8721_s9] ss:$0 sm:$0xff]  ;;  %vm1710_vm6 = vcmp.lt.f32.partialorder %v1709_v14, 0.0004427343 }
 0x1b9   : > { %v2226_v7 = vsel %vm2018_vm1, %v7373_v27, %v2194_v3  ;;  %v1585_v26 = vmin.f32 %v7469_v45, 20.0  ;;  %v2199_v27 = vadd.f32 1.0, %v2198_v34  ;;  %v1702_v29 = vsel %vm7479_vm3, %v1699_v31, %v1696_v39 }
 0x1ba   : > { %v5545_v61 = vadd.f32 -0.6931472, %v2226_v7  ;;  %v1774_v20 = vsel %vm1566_vm4, %v7376_v53, %v1702_v29  ;;  %v1708_v46 = vmul.f32 %v7459_v17, %v1707_v30  ;;  %vm1569_vm15 = vcmp.gt.f32.partialorder %v7469_v45, 20.0 }
 0x1bb   : > { %v6299_v2 = vpop.eup %6298  ;;  %v1612_v52 = vmul.f32 1.442695, %v1585_v26  ;;  %v2200_v28 = vmul.f32 %v7455_v11, %v2199_v27  ;;  %v5484_v34 = vadd.f32 -0.6931472, %v1774_v20 }
 0x1bc   : > { %v6301_v62 = vpop.eup %6300  ;;  %v2251_v24 = vpack.c.bf16 %v5545_v61, %v5544_v40  ;;  %v2204_v8 = vadd.f32 1.0, %v6299_v2  ;;  %v2207_v16 = vmul.f32 -0.5, %v6299_v2  ;;  %v2210_v40 = vand.u32 2147483647, %v6299_v2 }
 0x1bd   : > { %6306 = vpow2.f32 %v1612_v52  ;;  %v6303_v19 = vpop.eup %6302  ;;  %v2197_v56 = vmul.f32 0.6931472, %v6301_v62 }
 0x1be   : > { %v1548_v5 = vpop.f32.mrf.mxu1  ;;  %6308 = vlog2.f32 %v2204_v8  ;;  %v1712_v57 = vadd.f32 1.0, %v6303_v19  ;;  %v6305_v23 = vpop.eup %6304  ;;  %v2208_v60 = vadd.f32 1.0, %v2207_v16  ;;  %v1715_v53 = vmul.f32 -0.5, %v6303_v19 }
 0x1bf   : > { %5562 = vmatmul.msk.bf16.gmra.mxu0 %vm1420_vm0, %v2251_v24  ;;  %v7503_v1 = vadd.f32 %v7500_v25, %v1548_v5  ;;  %v1705_v12 = vmul.f32 0.6931472, %v6305_v23  ;;  %v2203_v9 = vsel %vm7490_vm5, %v2200_v28, %v2197_v56  ;;  %vm2211_vm10 = vcmp.lt.f32.partialorder %v2210_v40, 0.0004427343 }
 0x1c0   : > { %6310 = vlog2.f32 %v1712_v57  ;;  %v2227_v26 = vsel %vm2019_vm7, %v7407_v33, %v2203_v9  ;;  %v2209_v62 = vmul.f32 %v6299_v2, %v2208_v60  ;;  %v1716_v6 = vadd.f32 1.0, %v1715_v53 }
 0x1c1   : > { %v1586_v11 = vmin.f32 %v7503_v1, 20.0  ;;  %v1711_v3 = vsel %vm1710_vm6, %v1708_v46, %v1705_v12  ;;  %v5546_v0 = vadd.f32 -0.6931472, %v2227_v26  ;;  %vm1570_vm3 = vcmp.gt.f32.partialorder %v7503_v1, 20.0 }
 0x1c2   : > { %v1775_v15 = vsel %vm1567_vm8, %v7410_v10, %v1711_v3  ;;  %v1718_v10 = vand.u32 2147483647, %v6303_v19  ;;  %v1717_v16 = vmul.f32 %v6303_v19, %v1716_v6 }
 0x1c3   : > { %v6307_v42 = vpop.eup %6306  ;;  %v1614_v7 = vmul.f32 1.442695, %v1586_v11  ;;  %v5485_v61 = vadd.f32 -0.6931472, %v1775_v15 }
 0x1c4   : > { %v6309_v17 = vpop.eup %6308  ;;  %v1721_v39 = vadd.f32 1.0, %v6307_v42  ;;  %v1724_v24 = vmul.f32 -0.5, %v6307_v42  ;;  %v1727_v58 = vand.u32 2147483647, %v6307_v42  ;;  %vm1719_vm11 = vcmp.lt.f32.partialorder %v1718_v10, 0.0004427343 }
 0x1c5   : > { %v2206_v31 = vmul.f32 0.6931472, %v6309_v17  ;;  %6312 = vpow2.f32 %v1614_v7  ;;  %v1802_v50 = vpack.c.bf16 %v5485_v61, %v5484_v34 }
 0x1c6   : > { %v1550_v52 = vpop.f32.mrf.mxu1  ;;  %v6311_v8 = vpop.eup %6310  ;;  %6314 = vlog2.f32 %v1721_v39  ;;  %v1725_v14 = vadd.f32 1.0, %v1724_v24  ;;  %vm1728_vm14 = vcmp.lt.f32.partialorder %v1727_v58, 0.0004427343 }
 0x1c7   : > { %v7515_v27 = vadd.f32 %v7500_v25, %v1550_v52  ;;  %v2212_v30 = vsel %vm2211_vm10, %v2209_v62, %v2206_v31  ;;  %v1714_v54 = vmul.f32 0.6931472, %v6311_v8  ;;  %5512 = vmatmul.msk.bf16.gmra.mxu2 %vm1838_vm13, %v1802_v50  ;;  %v7539_v52 = vld [vmem:[%s8717_s5] sm:$0xff]  ;;  %vm2642_vm10 = vcmask 1042434  }
 0x1c8   : > { %v2228_v33 = vsel %vm2020_vm9, %v7441_v43, %v2212_v30  ;;  %v1726_v43 = vmul.f32 %v6307_v42, %v1725_v14  ;;  %vm2640_vm9 = vcmask 1041409  }
 0x1c9   : > { %v1587_v2 = vmin.f32 %v7515_v27, 20.0  ;;  %v5547_v29 = vadd.f32 -0.6931472, %v2228_v33  ;;  %v1720_v20 = vsel %vm1719_vm11, %v1717_v16, %v1714_v54  ;;  %vm1571_vm4 = vcmp.gt.f32.partialorder %v7515_v27, 20.0 }
 0x1ca   : > { %v1776_v19 = vsel %vm1568_vm12, %v7453_v21, %v1720_v20  ;;  %vm2644_vm11 = vcmask 1043459   ;;  %vm2646_vm12 = vcmask 1044484  }
 0x1cb   : > { %v1616_v56 = vmul.f32 1.442695, %v1587_v2  ;;  %v2252_v5 = vpack.c.bf16 %v5547_v29, %v5546_v0  ;;  %v6313_v57 = vpop.eup %6312  ;;  %v5486_v3 = vadd.f32 -0.6931472, %v1776_v19  ;;  %v7541_v0 = vpop.permute.xlu1 %1313 }
 0x1cc   : > { %v6315_v23 = vpop.eup %6314  ;;  %v1730_v28 = vadd.f32 1.0, %v6313_v57  ;;  %v1733_v17 = vmul.f32 -0.5, %v6313_v57  ;;  %v1736_v62 = vand.u32 2147483647, %v6313_v57 }
 0x1cd   : > { %6316 = vpow2.f32 %v1616_v56  ;;  %v1723_v12 = vmul.f32 0.6931472, %v6315_v23 }
 0x1ce   : > { %v1553_v46 = vpop.f32.mrf.mxu1  ;;  %6318 = vlog2.f32 %v1730_v28  ;;  %v1734_v21 = vadd.f32 1.0, %v1733_v17  ;;  %vm1737_vm1 = vcmp.lt.f32.partialorder %v1736_v62, 0.0004427343 }
 0x1cf   : > { %5563 = vmatmul.msk.bf16.gmra.mxu0 %vm1420_vm0, %v2252_v5  ;;  %v7525_v60 = vadd.f32 %v7500_v25, %v1553_v46  ;;  %v1729_v9 = vsel %vm1728_vm14, %v1726_v43, %v1723_v12  ;;  %vm2648_vm14 = vcmask 1045509  }
 0x1d0   : > { %v1777_v11 = vsel %vm1569_vm15, %v7469_v45, %v1729_v9  ;;  %v1735_v10 = vmul.f32 %v6313_v57, %v1734_v21  ;;  %v5967_v9 = vld [vmem:[%s8720_s8 + $0x18] sm:$0xff]  ;;  %vm2650_vm15 = vcmask 1046534  }
 0x1d1   : > { %v1588_v53 = vmin.f32 %v7525_v60, 20.0  ;;  %v5487_v40 = vadd.f32 -0.6931472, %v1777_v11  ;;  %2833 = vmatpush.bf16.msrb.mxu2 %v5967_v9  ;;  %vm1572_vm7 = vcmp.gt.f32.partialorder %v7525_v60, 20.0  ;;  %v1370_v9 = vpop.permute.xlu0 %1369 }
 0x1d3   : > { %v6317_v42 = vpop.eup %6316  ;;  %v1618_v34 = vmul.f32 1.442695, %v1588_v53  ;;  %v1803_v15 = vpack.c.bf16 %v5487_v40, %v5486_v3  ;;  %v1377_v40 = vpop.permute.xlu1 %1376 }
 0x1d4   : > { %v1739_v7 = vadd.f32 1.0, %v6317_v42  ;;  %v1742_v39 = vmul.f32 -0.5, %v6317_v42  ;;  %v6319_v26 = vpop.eup %6318  ;;  %v1745_v50 = vand.u32 2147483647, %v6317_v42 }
 0x1d5   : > { %6320 = vpow2.f32 %v1618_v34  ;;  %v1732_v6 = vmul.f32 0.6931472, %v6319_v26 }
 0x1d6   : > { %v1555_v61 = vpop.f32.mrf.mxu1  ;;  %6322 = vlog2.f32 %v1739_v7  ;;  %v1743_v8 = vadd.f32 1.0, %v1742_v39  ;;  %vm1746_vm2 = vcmp.lt.f32.partialorder %v1745_v50, 0.0004427343  ;;  %v5966_v39 = vld [vmem:[%s8720_s8 + $0x10] sm:$0xff] }
 0x1d7   : > { %v7532_v31 = vadd.f32 %v7500_v25, %v1555_v61  ;;  %5513 = vmatmul.msk.bf16.gmra.mxu2 %vm1838_vm13, %v1803_v15  ;;  %v1738_v29 = vsel %vm1737_vm1, %v1735_v10, %v1732_v6  ;;  %vm2652_vm1 = vcmask 1047559  }
 0x1d8   : > { %v1744_v16 = vmul.f32 %v6317_v42, %v1743_v8  ;;  %v1778_v5 = vsel %vm1570_vm3, %v7503_v1, %v1738_v29  ;;  %2834 = vmatpush.bf16.msrb.mxu2 %v5966_v39 }
 0x1d9   : > { %v1589_v45 = vmin.f32 %v7532_v31, 20.0  ;;  %v5488_v43 = vadd.f32 -0.6931472, %v1778_v5  ;;  %vm1573_vm8 = vcmp.gt.f32.partialorder %v7532_v31, 20.0 }
 0x1da   : > { %v2302_v24 = vpop.f32.mrf.mxu0 }
 0x1db   : > { %v6321_v30 = vpop.eup %6320  ;;  %v1620_v25 = vmul.f32 1.442695, %v1589_v45  ;;  %v2496_v2 = vmul.f32 %v2302_v24, %v7539_v52 }
 0x1dc   : > { %v6323_v33 = vpop.eup %6322  ;;  %v1748_v54 = vadd.f32 1.0, %v6321_v30  ;;  %v1751_v28 = vmul.f32 -0.5, %v6321_v30  ;;  %v1754_v34 = vand.u32 2147483647, %v6321_v30 }
 0x1dd   : > { %6324 = vpow2.f32 %v1620_v25  ;;  %v1741_v14 = vmul.f32 0.6931472, %v6323_v33  ;;  %v2512_v58 = vsel %vm1420_vm0, %v2496_v2, 0.0 }
 0x1de   : > { %6326 = vlog2.f32 %v1748_v54  ;;  %v2513_v19 = vrot.slane %v2512_v58, 4  ;;  %v1752_v17 = vadd.f32 1.0, %v1751_v28  ;;  %vm7558_vm5 = vcmp.lt.f32.partialorder %v1754_v34, 0.0004427343 }
 0x1df   : > { %v1747_v56 = vsel %vm1746_vm2, %v1744_v16, %v1741_v14  ;;  %v1384_v14 = vpop.permute.xlu1 %1383 }
 0x1e0   : > { %v1779_v57 = vsel %vm1571_vm4, %v7515_v27, %v1747_v56  ;;  %v2514_v7 = vadd.f32 %v2513_v19, %v2512_v58  ;;  %v1753_v62 = vmul.f32 %v6321_v30, %v1752_v17  ;;  %v1321_v17 = vpop.permute.xlu2 %1320 }
 0x1e1   : > { %v5489_v20 = vadd.f32 -0.6931472, %v1779_v57 }
 0x1e2   : > { %v2304_v23 = vpop.f32.mrf.mxu0  ;;  %v2515_v8 = vrot.slane %v2514_v7, 2 }
 0x1e3   : > { %v2497_v46 = vmul.f32 %v2304_v23, %v7539_v52  ;;  %v6325_v12 = vpop.eup %6324  ;;  %v1804_v3 = vpack.c.bf16 %v5489_v20, %v5488_v43 }
 0x1e4   : > { %v1757_v11 = vadd.f32 1.0, %v6325_v12  ;;  %v6327_v1 = vpop.eup %6326  ;;  %v1760_v27 = vmul.f32 -0.5, %v6325_v12  ;;  %v1763_v45 = vand.u32 2147483647, %v6325_v12  ;;  %v2516_v16 = vadd.f32 %v2515_v8, %v2514_v7 }
 0x1e5   : > { %v2519_v53 = vsel %vm1420_vm0, %v2497_v46, 0.0  ;;  %v1750_v26 = vmul.f32 0.6931472, %v6327_v1  ;;  %v7577_v7 = vsel %vm1420_vm0, %v1321_v17, %v1377_v40 }
 0x1e6   : > { %v2520_v42 = vrot.slane %v2519_v53, 4  ;;  %6328 = vlog2.f32 %v1757_v11  ;;  %v1761_v21 = vadd.f32 1.0, %v1760_v27  ;;  %vm1764_vm6 = vcmp.lt.f32.partialorder %v1763_v45, 0.0004427343 }
 0x1e7   : > { %5514 = vmatmul.msk.bf16.gmra.mxu2 %vm1838_vm13, %v1804_v3  ;;  %v1756_v25 = vsel %vm7558_vm5, %v1753_v62, %v1750_v26  ;;  %v2517_v19 = vrot.slane %v2516_v16, 1  ;;  %v2345_v26 = vpop.permute.xlu1 %2344 }
 0x1e8   : > { %v2521_v15 = vadd.f32 %v2520_v42, %v2519_v53  ;;  %v1762_v29 = vmul.f32 %v6325_v12, %v1761_v21  ;;  %v1780_v5 = vsel %vm1572_vm7, %v7525_v60, %v1756_v25  ;;  %v7586_v40 = vsel %vm1420_vm0, %v7098_v41, %v2345_v26 }
 0x1e9   : > { %v5490_v12 = vadd.f32 -0.6931472, %v1780_v5  ;;  %v2518_v34 = vadd.f32 %v2517_v19, %v2516_v16 }
 0x1ea   : > { %v2522_v61 = vrot.slane %v2521_v15, 2  ;;  %v2307_v6 = vpop.f32.mrf.mxu0 }
 0x1eb   : > { %v2498_v50 = vmul.f32 %v2307_v6, %v7539_v52 }
 0x1ec   : > { %v6329_v10 = vpop.eup %6328  ;;  %v2523_v33 = vadd.f32 %v2522_v61, %v2521_v15 }
 0x1ed   : > { %v2526_v54 = vsel %vm1420_vm0, %v2498_v50, 0.0  ;;  %v1759_v2 = vmul.f32 0.6931472, %v6329_v10 }
 0x1ee   : > { %v2527_v30 = vrot.slane %v2526_v54, 4  ;;  %v2524_v23 = vrot.slane %v2523_v33, 1 }
 0x1ef   : > { %v1765_v56 = vsel %vm1764_vm6, %v1762_v29, %v1759_v2  ;;  %v1328_v29 = vpop.permute.xlu2 %1327 }
 0x1f0   : > { %v2528_v58 = vadd.f32 %v2527_v30, %v2526_v54  ;;  %v1781_v57 = vsel %vm1573_vm8, %v7532_v31, %v1765_v56  ;;  %v2525_v1 = vadd.f32 %v2524_v23, %v2523_v33  ;;  %v7574_v31 = vsel %vm1420_vm0, %v7541_v0, %v1370_v9 }
 0x1f1   : > { %v5491_v20 = vadd.f32 -0.6931472, %v1781_v57 }
 0x1f2   : > { %v2529_v28 = vrot.slane %v2528_v58, 2  ;;  %v1872_v46 = vpop.f32.mrf.mxu2  ;;  %v2309_v43 = vpop.f32.mrf.mxu0  ;;  %v2679_v61 = vsel %vm2640_vm9, %v2525_v1, %v2518_v34 }
 0x1f3   : > { %v2499_v53 = vmul.f32 %v2309_v43, %v7539_v52  ;;  %v1805_v3 = vpack.c.bf16 %v5491_v20, %v5490_v12  ;;  %v2352_v21 = vmul.f32 %v1872_v46, %v7574_v31  ;;  %v7597_v12 = vsel %vm1420_vm0, %v1328_v29, %v1384_v14 }
 0x1f4   : > { %v2530_v11 = vadd.f32 %v2529_v28, %v2528_v58 }
 0x1f5   : > { %v2533_v42 = vsel %vm1420_vm0, %v2499_v53, 0.0  ;;  %v2368_v50 = vmul.f32 %v2352_v21, %v7586_v40 }
 0x1f6   : > { %v2531_v60 = vrot.slane %v2530_v11, 1  ;;  %v2534_v27 = vrot.slane %v2533_v42, 4 }
 0x1f7   : > { %5515 = vmatmul.msk.bf16.gmra.mxu2 %vm1838_vm13, %v1805_v3  ;;  %v2384_v30 = vsel %vm1838_vm13, %v2368_v50, 0.0  ;;  %v1391_v3 = vpop.permute.xlu0 %1390  ;;  %v1335_v34 = vpop.permute.xlu2 %1334 }
 0x1f8   : > { %v2532_v15 = vadd.f32 %v2531_v60, %v2530_v11  ;;  %v2535_v39 = vadd.f32 %v2534_v27, %v2533_v42  ;;  %v2385_v57 = vrot.slane %v2384_v30, 4  ;;  %v7609_v50 = vsel %vm1420_vm0, %v1335_v34, %v1391_v3 }
 0x1fa   : > { %v2680_v62 = vsel %vm2642_vm10, %v2532_v15, %v2679_v61  ;;  %v2536_v0 = vrot.slane %v2535_v39, 2  ;;  %v1874_v6 = vpop.f32.mrf.mxu2  ;;  %v2386_v53 = vadd.f32 %v2385_v57, %v2384_v30 }
 0x1fb   : > { %v2353_v45 = vmul.f32 %v1874_v6, %v7577_v7 }
 0x1fc   : > { %v2312_v24 = vpop.f32.mrf.mxu0  ;;  %v2537_v25 = vadd.f32 %v2536_v0, %v2535_v39  ;;  %v2387_v26 = vrot.slane %v2386_v53, 2 }
 0x1fd   : > { %v2500_v8 = vmul.f32 %v2312_v24, %v7539_v52  ;;  %v2369_v10 = vmul.f32 %v2353_v45, %v7586_v40 }
 0x1fe   : > { %v2538_v56 = vrot.slane %v2537_v25, 1 }
 0x1ff   : > { %v2540_v33 = vsel %vm1420_vm0, %v2500_v8, 0.0  ;;  %v2391_v54 = vsel %vm1838_vm13, %v2369_v10, 0.0  ;;  %v2388_v10 = vadd.f32 %v2387_v26, %v2386_v53 }
 0x200   : > { %v2541_v2 = vrot.slane %v2540_v33, 4  ;;  %v2392_v5 = vrot.slane %v2391_v54, 4  ;;  %v2539_v28 = vadd.f32 %v2538_v56, %v2537_v25 }
 0x202   : > { %v2542_v16 = vadd.f32 %v2541_v2, %v2540_v33  ;;  %v2393_v46 = vadd.f32 %v2392_v5, %v2391_v54  ;;  %v2681_v60 = vsel %vm2644_vm11, %v2539_v28, %v2680_v62 }
 0x204   : > { %v2543_v41 = vrot.slane %v2542_v16, 2  ;;  %v2314_v58 = vpop.f32.mrf.mxu0  ;;  %v2394_v27 = vrot.slane %v2393_v46, 2 }
 0x205   : > { %v2501_v23 = vmul.f32 %v2314_v58, %v7539_v52  ;;  %v2389_v58 = vrot.slane %v2388_v10, 1 }
 0x206   : > { %v2544_v20 = vadd.f32 %v2543_v41, %v2542_v16  ;;  %v2395_v0 = vadd.f32 %v2394_v27, %v2393_v46  ;;  %v1342_v41 = vpop.permute.xlu0 %1341  ;;  %v1398_v46 = vpop.permute.xlu1 %1397 }
 0x207   : > { %v2547_v43 = vsel %vm1420_vm0, %v2501_v23, 0.0  ;;  %5615 = vmatmul.msk.bf16.vlgmr.msrb.gmra.mxu2 %vm1420_vm0, %v6976_v38  ;;  %v7615_v23 = vpop.permute.xlu2 %2346  ;;  %v7619_v3 = vsel %vm1420_vm0, %v1342_v41, %v1398_v46 }
 0x208   : > { %v2545_v19 = vrot.slane %v2544_v20, 1  ;;  %v2548_v9 = vrot.slane %v2547_v43, 4  ;;  %v2396_v2 = vrot.slane %v2395_v0, 1 }
 0x20a   : > { %v2546_v11 = vadd.f32 %v2545_v19, %v2544_v20  ;;  %v2549_v1 = vadd.f32 %v2548_v9, %v2547_v43  ;;  %v1877_v42 = vpop.f32.mrf.mxu2  ;;  %v2397_v43 = vadd.f32 %v2396_v2, %v2395_v0 }
 0x20b   : > { %v2354_v17 = vmul.f32 %v1877_v42, %v7597_v12  ;;  %v2390_v42 = vadd.f32 %v2389_v58, %v2388_v10 }
 0x20c   : > { %v2550_v14 = vrot.slane %v2549_v1, 2  ;;  %v2317_v15 = vpop.f32.mrf.mxu0  ;;  %v2682_v39 = vsel %vm2646_vm12, %v2546_v11, %v2681_v60 }
 0x20d   : > { %v2370_v61 = vmul.f32 %v2354_v17, %v7586_v40  ;;  %v2502_v21 = vmul.f32 %v2317_v15, %v7539_v52  ;;  %v2641_v34 = vsel %vm2640_vm9, %v2397_v43, %v2390_v42  ;;  %v5963_v42 = vld [vmem:[%s8727_s15 + $0x28] sm:$0xff] }
 0x20e   : > { %v2551_v24 = vadd.f32 %v2550_v14, %v2549_v1  ;;  %2756 = vmatpush.bf16.msrb.mxu1 %v5963_v42 }
 0x20f   : > { %v2398_v6 = vsel %vm1838_vm13, %v2370_v61, 0.0  ;;  %v2554_v45 = vsel %vm1420_vm0, %v2502_v21, 0.0 }
 0x210   : > { %v2399_v62 = vrot.slane %v2398_v6, 4  ;;  %v2555_v8 = vrot.slane %v2554_v45, 4  ;;  %v2552_v30 = vrot.slane %v2551_v24, 1 }
 0x212   : > { %v2400_v25 = vadd.f32 %v2399_v62, %v2398_v6  ;;  %v2556_v33 = vadd.f32 %v2555_v8, %v2554_v45  ;;  %v1879_v54 = vpop.f32.mrf.mxu2  ;;  %v2553_v9 = vadd.f32 %v2552_v30, %v2551_v24  ;;  %v1349_v24 = vpop.permute.xlu2 %1348 }
 0x213   : > { %v2355_v29 = vmul.f32 %v1879_v54, %v7609_v50  ;;  %v1405_v62 = vpop.permute.xlu0 %1404 }
 0x214   : > { %v2401_v16 = vrot.slane %v2400_v25, 2  ;;  %v2557_v56 = vrot.slane %v2556_v33, 2  ;;  %v7612_v5 = vpop.f32.mrf.mxu0  ;;  %v2683_v21 = vsel %vm2648_vm14, %v2553_v9, %v2682_v39 }
 0x215   : > { %v2371_v57 = vmul.f32 %v2355_v29, %v7586_v40 }
 0x216   : > { %v2402_v20 = vadd.f32 %v2401_v16, %v2400_v25  ;;  %v2558_v28 = vadd.f32 %v2557_v56, %v2556_v33  ;;  %v7633_v33 = vsel %vm1420_vm0, %v1349_v24, %v1405_v62 }
 0x217   : > { %v2405_v19 = vsel %vm1838_vm13, %v2371_v57, 0.0  ;;  %5616 = vmatmul.msk.bf16.gmra.mxu2 %vm1420_vm0, %v7003_v36 }
 0x218   : > { %v2403_v53 = vrot.slane %v2402_v20, 1  ;;  %v2559_v11 = vrot.slane %v2558_v28, 1  ;;  %v2406_v1 = vrot.slane %v2405_v19, 4 }
 0x21a   : > { %v2404_v60 = vadd.f32 %v2403_v53, %v2402_v20  ;;  %v2560_v27 = vadd.f32 %v2559_v11, %v2558_v28  ;;  %v2407_v17 = vadd.f32 %v2406_v1, %v2405_v19  ;;  %v1882_v14 = vpop.f32.mrf.mxu2  ;;  %v1356_v53 = vpop.permute.xlu1 %1355 }
 0x21b   : > { %v2356_v61 = vmul.f32 %v1882_v14, %v7619_v3  ;;  %v1412_v11 = vpop.permute.xlu2 %1411 }
 0x21c   : > { %v2643_v15 = vsel %vm2642_vm10, %v2404_v60, %v2641_v34  ;;  %v2408_v26 = vrot.slane %v2407_v17, 2  ;;  %v2322_v0 = vpop.f32.mrf.mxu0  ;;  %v7628_v6 = vsel %vm2650_vm15, %v2560_v27, %v2683_v21  ;;  %v7646_v60 = vsel %vm1420_vm0, %v1356_v53, %v1412_v11 }
 0x21d   : > { %v2372_v45 = vmul.f32 %v2356_v61, %v7586_v40 }
 0x21e   : > { %v2409_v8 = vadd.f32 %v2408_v26, %v2407_v17  ;;  %v1363_v61 = vpop.permute.xlu0 %1362 }
 0x21f   : > { %v2412_v10 = vsel %vm1838_vm13, %v2372_v45, 0.0 }
 0x220   : > { %v2413_v25 = vrot.slane %v2412_v10, 4  ;;  %v2410_v29 = vrot.slane %v2409_v8, 1 }
 0x222   : > { %v2414_v54 = vadd.f32 %v2413_v25, %v2412_v10  ;;  %v1884_v2 = vpop.f32.mrf.mxu2  ;;  %v2411_v41 = vadd.f32 %v2410_v29, %v2409_v8  ;;  %v1419_v26 = vpop.permute.xlu1 %1418 }
 0x223   : > { %v2357_v39 = vmul.f32 %v1884_v2, %v7633_v33  ;;  %v7654_v62 = vsel %vm1420_vm0, %v1363_v61, %v1419_v26 }
 0x224   : > { %v2415_v30 = vrot.slane %v2414_v54, 2  ;;  %v2324_v16 = vpop.f32.mrf.mxu0  ;;  %v2645_v28 = vsel %vm2644_vm11, %v2411_v41, %v2643_v15  ;;  %v2504_v41 = vmul.f32 %v2322_v0, %v7539_v52 }
 0x225   : > { %v2373_v58 = vmul.f32 %v2357_v39, %v7586_v40  ;;  %v2505_v29 = vmul.f32 %v2324_v16, %v7539_v52 }
 0x226   : > { %v2416_v56 = vadd.f32 %v2415_v30, %v2414_v54  ;;  %v2568_v0 = vsel %vm1420_vm0, %v2504_v41, 0.0 }
 0x227   : > { %5617 = vmatmul.msk.bf16.gmra.mxu2 %vm1420_vm0, %v7016_v51  ;;  %v2419_v46 = vsel %vm1838_vm13, %v2373_v58, 0.0  ;;  %v2575_v16 = vsel %vm1420_vm0, %v2505_v29, 0.0 }
 0x228   : > { %v2417_v57 = vrot.slane %v2416_v56, 1  ;;  %v2420_v9 = vrot.slane %v2419_v46, 4 }
 0x22a   : > { %v2418_v20 = vadd.f32 %v2417_v57, %v2416_v56  ;;  %v2421_v1 = vadd.f32 %v2420_v9, %v2419_v46  ;;  %v2503_v56 = vmul.f32 %v7612_v5, %v7539_v52 }
 0x22c   : > { %v2647_v43 = vsel %vm2646_vm12, %v2418_v20, %v2645_v28  ;;  %v2327_v19 = vpop.f32.mrf.mxu0  ;;  %v2422_v34 = vrot.slane %v2421_v1, 2  ;;  %v2561_v5 = vsel %vm1420_vm0, %v2503_v56, 0.0 }
 0x22d   : > { %v2506_v39 = vmul.f32 %v2327_v19, %v7539_v52 }
 0x22e   : > { %v2423_v21 = vadd.f32 %v2422_v34, %v2421_v1  ;;  %v2576_v34 = vrot.slane %v2575_v16, 4 }
 0x22f   : > { %v2582_v19 = vsel %vm1420_vm0, %v2506_v39, 0.0 }
 0x230   : > { %v2424_v54 = vrot.slane %v2423_v21, 1 }
 0x232   : > { %v2425_v28 = vadd.f32 %v2424_v54, %v2423_v21 }
 0x233   : > { %v1887_v17 = vpop.f32.mrf.mxu2 }
 0x234   : > { %v2329_v27 = vpop.f32.mrf.mxu0  ;;  %v2358_v14 = vmul.f32 %v1887_v17, %v7646_v60  ;;  %v2649_v26 = vsel %vm2648_vm14, %v2425_v28, %v2647_v43 }
 0x235   : > { %v2507_v20 = vmul.f32 %v2329_v27, %v7539_v52 }
 0x236   : > { %v2374_v15 = vmul.f32 %v2358_v14, %v7586_v40  ;;  %v2583_v14 = vrot.slane %v2582_v19, 4 }
 0x237   : > { %5618 = vmatmul.msk.bf16.gmra.mxu2 %vm1420_vm0, %v7037_v47  ;;  %v2589_v42 = vsel %vm1420_vm0, %v2507_v20, 0.0 }
 0x238   : > { %v2426_v45 = vsel %vm1838_vm13, %v2374_v15, 0.0  ;;  %v2584_v29 = vadd.f32 %v2583_v14, %v2582_v19  ;;  %v7686_v19 = vsel %vm1420_vm0, %v7162_v13, %v7615_v23 }
 0x239   : > { %v2427_v24 = vrot.slane %v2426_v45, 4 }
 0x23b   : > { %v2428_v10 = vadd.f32 %v2427_v24, %v2426_v45  ;;  %v1889_v25 = vpop.f32.mrf.mxu2  ;;  %v2562_v24 = vrot.slane %v2561_v5, 4 }
 0x23c   : > { %v2332_v8 = vpop.f32.mrf.mxu0  ;;  %v2359_v2 = vmul.f32 %v1889_v25, %v7654_v62 }
 0x23d   : > { %v2429_v30 = vrot.slane %v2428_v10, 2  ;;  %v2508_v9 = vmul.f32 %v2332_v8, %v7539_v52  ;;  %v2569_v8 = vrot.slane %v2568_v0, 4  ;;  %v2563_v56 = vadd.f32 %v2562_v24, %v2561_v5 }
 0x23e   : > { %v2375_v58 = vmul.f32 %v2359_v2, %v7586_v40  ;;  %v2577_v2 = vadd.f32 %v2576_v34, %v2575_v16  ;;  %v5962_v16 = vld [vmem:[%s8727_s15 + $0x20] sm:$0xff] }
 0x23f   : > { %v2430_v57 = vadd.f32 %v2429_v30, %v2428_v10  ;;  %v2596_v15 = vsel %vm1420_vm0, %v2508_v9, 0.0  ;;  %v2590_v10 = vrot.slane %v2589_v42, 4  ;;  %v2570_v41 = vadd.f32 %v2569_v8, %v2568_v0  ;;  %2757 = vmatpush.bf16.msrb.mxu1 %v5962_v16 }
 0x240   : > { %v2433_v46 = vsel %vm1838_vm13, %v2375_v58, 0.0  ;;  %v2597_v54 = vrot.slane %v2596_v15, 4  ;;  %v2564_v34 = vrot.slane %v2563_v56, 2 }
 0x241   : > { %v2431_v53 = vrot.slane %v2430_v57, 1  ;;  %v2434_v11 = vrot.slane %v2433_v46, 4  ;;  %v2591_v43 = vadd.f32 %v2590_v10, %v2589_v42 }
 0x242   : > { %v2598_v28 = vadd.f32 %v2597_v54, %v2596_v15 }
 0x243   : > { %v2432_v40 = vadd.f32 %v2431_v53, %v2430_v57  ;;  %v2435_v27 = vadd.f32 %v2434_v11, %v2433_v46  ;;  %v2578_v53 = vrot.slane %v2577_v2, 2  ;;  %v2585_v11 = vrot.slane %v2584_v29, 2 }
 0x244   : > { %v2334_v1 = vpop.f32.mrf.mxu0  ;;  %v2592_v42 = vrot.slane %v2591_v43, 2  ;;  %v2599_v14 = vrot.slane %v2598_v28, 2 }
 0x245   : > { %v2509_v17 = vmul.f32 %v2334_v1, %v7539_v52  ;;  %v2436_v61 = vrot.slane %v2435_v27, 2  ;;  %v2651_v45 = vsel %vm2650_vm15, %v2432_v40, %v2649_v26  ;;  %v2571_v40 = vrot.slane %v2570_v41, 2 }
 0x246   : > { %v2579_v15 = vadd.f32 %v2578_v53, %v2577_v2  ;;  %v2586_v26 = vadd.f32 %v2585_v11, %v2584_v29  ;;  %v2593_v13 = vadd.f32 %v2592_v42, %v2591_v43 }
 0x247   : > { %v2603_v21 = vsel %vm1420_vm0, %v2509_v17, 0.0  ;;  %v2437_v25 = vadd.f32 %v2436_v61, %v2435_v27  ;;  %5619 = vmatmul.msk.bf16.gmra.mxu2 %vm1420_vm0, %v7060_v48  ;;  %v2572_v24 = vadd.f32 %v2571_v40, %v2570_v41 }
 0x248   : > { %v2604_v39 = vrot.slane %v2603_v21, 4 }
 0x249   : > { %v2438_v30 = vrot.slane %v2437_v25, 1  ;;  %v2573_v43 = vrot.slane %v2572_v24, 1 }
 0x24a   : > { %v1892_v58 = vpop.f32.mrf.mxu2  ;;  %v2605_v1 = vadd.f32 %v2604_v39, %v2603_v21 }
 0x24b   : > { %v2439_v20 = vadd.f32 %v2438_v30, %v2437_v25  ;;  %v2360_v46 = vmul.f32 %v1892_v58, %v7574_v31  ;;  %v2600_v25 = vadd.f32 %v2599_v14, %v2598_v28  ;;  %v2565_v30 = vadd.f32 %v2564_v34, %v2563_v56 }
 0x24c   : > { %v2337_v57 = vpop.f32.mrf.mxu0  ;;  %v2606_v61 = vrot.slane %v2605_v1, 2  ;;  %v2580_v58 = vrot.slane %v2579_v15, 1 }
 0x24d   : > { %v2510_v9 = vmul.f32 %v2337_v57, %v7539_v52  ;;  %v7690_v0 = vsel %vm2652_vm1, %v2439_v20, %v2651_v45  ;;  %v2376_v27 = vmul.f32 %v2360_v46, %v7686_v19  ;;  %v2587_v57 = vrot.slane %v2586_v26, 1 }
 0x24e   : > { %v2607_v20 = vadd.f32 %v2606_v61, %v2605_v1  ;;  %v2601_v11 = vrot.slane %v2600_v25, 1  ;;  %v2566_v1 = vrot.slane %v2565_v30, 1 }
 0x24f   : > { %v2610_v5 = vsel %vm1420_vm0, %v2510_v9, 0.0  ;;  %v2440_v23 = vsel %vm1838_vm13, %v2376_v27, 0.0  ;;  %v2594_v9 = vrot.slane %v2593_v13, 1  ;;  %v2588_v40 = vadd.f32 %v2587_v57, %v2586_v26 }
 0x250   : > { %v2611_v17 = vrot.slane %v2610_v5, 4  ;;  %v2441_v2 = vrot.slane %v2440_v23, 4  ;;  %v2608_v56 = vrot.slane %v2607_v20, 1  ;;  %v2567_v57 = vadd.f32 %v2566_v1, %v2565_v30 }
 0x251   : > { %v2595_v34 = vadd.f32 %v2594_v9, %v2593_v13 }
 0x252   : > { %v2612_v21 = vadd.f32 %v2611_v17, %v2610_v5  ;;  %v1894_v10 = vpop.f32.mrf.mxu2  ;;  %v2442_v42 = vadd.f32 %v2441_v2, %v2440_v23  ;;  %v2574_v17 = vadd.f32 %v2573_v43, %v2572_v24  ;;  %v2685_v30 = vsel %vm2652_vm1, %v2567_v57, %v7628_v6 }
 0x253   : > { %v2361_v54 = vmul.f32 %v1894_v10, %v7577_v7 }
 0x254   : > { %v2613_v8 = vrot.slane %v2612_v21, 2  ;;  %v2339_v45 = vpop.f32.mrf.mxu0  ;;  %v2443_v23 = vrot.slane %v2442_v42, 2 }
 0x255   : > { %v2511_v39 = vmul.f32 %v2339_v45, %v7539_v52  ;;  %v2377_v46 = vmul.f32 %v2361_v54, %v7686_v19  ;;  %v2581_v52 = vadd.f32 %v2580_v58, %v2579_v15  ;;  %v2609_v54 = vadd.f32 %v2608_v56, %v2607_v20  ;;  %v5961_v58 = vld [vmem:[%s8727_s15 + $0x18] sm:$0xff] }
 0x256   : > { %v2614_v29 = vadd.f32 %v2613_v8, %v2612_v21  ;;  %v2602_v8 = vadd.f32 %v2601_v11, %v2600_v25  ;;  %2758 = vmatpush.bf16.msrb.mxu1 %v5961_v58  ;;  %v2444_v11 = vadd.f32 %v2443_v23, %v2442_v42 }
 0x257   : > { %v2617_v41 = vsel %vm1420_vm0, %v2511_v39, 0.0  ;;  %v2447_v28 = vsel %vm1838_vm13, %v2377_v46, 0.0  ;;  %5620 = vmatmul.msk.bf16.gmra.mxu2 %vm1420_vm0, %v7080_v22  ;;  %v2686_v45 = vsel %vm2640_vm9, %v2581_v52, %v2574_v17 }
 0x258   : > { %v2618_v53 = vrot.slane %v2617_v41, 4  ;;  %v2448_v16 = vrot.slane %v2447_v28, 4  ;;  %v2615_v27 = vrot.slane %v2614_v29, 1  ;;  %v2687_v26 = vsel %vm2642_vm10, %v2588_v40, %v2686_v45 }
 0x259   : > { %v2688_v25 = vsel %vm2644_vm11, %v2595_v34, %v2687_v26 }
 0x25a   : > { %v2619_v5 = vadd.f32 %v2618_v53, %v2617_v41  ;;  %v2449_v14 = vadd.f32 %v2448_v16, %v2447_v28  ;;  %v1897_v21 = vpop.f32.mrf.mxu2  ;;  %v2616_v24 = vadd.f32 %v2615_v27, %v2614_v29  ;;  %v2689_v41 = vsel %vm2646_vm12, %v2602_v8, %v2688_v25 }
 0x25b   : > { %v2362_v10 = vmul.f32 %v1897_v21, %v7597_v12  ;;  %v2690_v53 = vsel %vm2648_vm14, %v2609_v54, %v2689_v41  ;;  %v2445_v27 = vrot.slane %v2444_v11, 1 }
 0x25c   : > { %v2620_v61 = vrot.slane %v2619_v5, 2  ;;  %v2450_v39 = vrot.slane %v2449_v14, 2  ;;  %v2691_v28 = vsel %vm2650_vm15, %v2616_v24, %v2690_v53 }
 0x25d   : > { %v2378_v13 = vmul.f32 %v2362_v10, %v7686_v19  ;;  %v2446_v21 = vadd.f32 %v2445_v27, %v2444_v11 }
 0x25e   : > { %v2621_v15 = vadd.f32 %v2620_v61, %v2619_v5  ;;  %v2451_v46 = vadd.f32 %v2450_v39, %v2449_v14 }
 0x25f   : > { %v2454_v20 = vsel %vm1838_vm13, %v2378_v13, 0.0 }
 0x260   : > { %v2622_v2 = vrot.slane %v2621_v15, 1  ;;  %v2455_v9 = vrot.slane %v2454_v20, 4  ;;  %v2452_v16 = vrot.slane %v2451_v46, 1 }
 0x262   : > { %v2623_v43 = vadd.f32 %v2622_v2, %v2621_v15  ;;  %v2456_v29 = vadd.f32 %v2455_v9, %v2454_v20  ;;  %v1899_v52 = vpop.f32.mrf.mxu2  ;;  %v2453_v34 = vadd.f32 %v2452_v16, %v2451_v46  ;;  %v5960_v2 = vld [vmem:[%s8727_s15 + $0x10] sm:$0xff] }
 0x263   : > { %v2363_v5 = vmul.f32 %v1899_v52, %v7609_v50  ;;  %2759 = vmatpush.bf16.msrb.mxu1 %v5960_v2  ;;  %v5970_v16 = vld [vmem:[%s8722_s10 + $0x30] sm:$0xff] }
 0x264   : > { %v2692_v56 = vsel %vm2652_vm1, %v2623_v43, %v2691_v28  ;;  %v2457_v40 = vrot.slane %v2456_v29, 2  ;;  %v2654_v54 = vsel %vm2640_vm9, %v2453_v34, %v2446_v21 }
 0x265   : > { %v6051_v1 = vpack.i.bf16 %v2692_v56, %v2685_v30  ;;  %v2379_v17 = vmul.f32 %v2363_v5, %v7686_v19  ;;  %v5971_v30 = vld [vmem:[%s8722_s10 + $0x38] sm:$0xff]  ;;  %v7742_v56 = vld [vmem:[%s8721_s9 + $0x1] ss:$0 sm:$0xff] }
 0x266   : > { %v2458_v42 = vadd.f32 %v2457_v40, %v2456_v29  ;;  %3185 = vmatpush.bf16.msra.mxu0 %v5971_v30  ;;  %v5969_v40 = vld [vmem:[%s8722_s10 + $0x28] sm:$0xff] }
 0x267   : > { %6052 = vrot.lane.b32.xlu2 %v6051_v1, %s8729_s30  ;;  %v2461_v14 = vsel %vm1838_vm13, %v2379_v17, 0.0  ;;  %5621 = vmatmul.msk.bf16.gmra.mxu2 %vm1420_vm0, %v7113_v55  ;;  %s5364_s30 = scalar_lea.hbm %s8728_s16, %s6791_s18  ;;  %s6612_s18 = scalar_lea.hbm %s8728_s16, 32 }
 0x268   : > { %v2459_v6 = vrot.slane %v2458_v42, 1  ;;  %v2462_v61 = vrot.slane %v2461_v14, 4  ;;  %s5367_s29 = sshll.u32 %s5364_s30, 4  ;;  %s5368_s29 = int_to_ptr.hbm [resolvable:$true] %s5367_s29 }
 0x269   : > { %s6606_s3 = sshra.s32 %s5368_s29, 4  ;;  %s6607_s3 = int_to_ptr.hbm [resolvable:$true] %s6606_s3 }
 0x26a   : > { %v2460_v8 = vadd.f32 %v2459_v6, %v2458_v42  ;;  %v2463_v10 = vadd.f32 %v2462_v61, %v2461_v14  ;;  %v1902_v45 = vpop.f32.mrf.mxu2  ;;  %3186 = vmatpush.bf16.msra.mxu0 %v5970_v16  ;;  %v5968_v42 = vld [vmem:[%s8722_s10 + $0x20] sm:$0xff]  ;;  %v5959_v61 = vld [vmem:[%s8727_s15 + $0x8] sm:$0xff]  ;;  %p6613_p0 = scmp.lt.s32.totalorder %s6607_s3, %s8728_s16 }
 0x26b   : > { %v2364_v39 = vmul.f32 %v1902_v45, %v7619_v3  ;;  %2760 = vmatpush.bf16.msrb.mxu1 %v5959_v61  ;;  %v5958_v16 = vld [vmem:[%s8727_s15] sm:$0xff] }
 0x26c   : > { %v2655_v15 = vsel %vm2642_vm10, %v2460_v8, %v2654_v54  ;;  %v2464_v58 = vrot.slane %v2463_v10, 2 }
 0x26d   : > { %v2380_v26 = vmul.f32 %v2364_v39, %v7686_v19 }
 0x26e   : > { %v2465_v23 = vadd.f32 %v2464_v58, %v2463_v10  ;;  %3187 = vmatpush.bf16.msra.mxu0 %v5969_v40 }
 0x26f   : > { %v2468_v24 = vsel %vm1838_vm13, %v2380_v26, 0.0  ;;  %2761 = vmatpush.bf16.msrb.mxu1 %v5958_v16 }
 0x270   : > { %v2469_v13 = vrot.slane %v2468_v24, 4  ;;  %v2466_v46 = vrot.slane %v2465_v23, 1 }
 0x272   : > { %v2470_v57 = vadd.f32 %v2469_v13, %v2468_v24  ;;  %v1904_v25 = vpop.f32.mrf.mxu2  ;;  %v2467_v43 = vadd.f32 %v2466_v46, %v2465_v23  ;;  %3188 = vmatpush.bf16.msra.mxu0 %v5968_v42 }
 0x273   : > { %v2365_v54 = vmul.f32 %v1904_v25, %v7633_v33 }
 0x274   : > { %v2471_v20 = vrot.slane %v2470_v57, 2  ;;  %v2656_v28 = vsel %vm2644_vm11, %v2467_v43, %v2655_v15 }
 0x275   : > { %v2381_v13 = vmul.f32 %v2365_v54, %v7686_v19 }
 0x276   : > { %v2472_v41 = vadd.f32 %v2471_v20, %v2470_v57 }
 0x277   : > { %5622 = vmatmul.msk.bf16.gmra.mxu2 %vm1420_vm0, %v7148_v44 }
 0x278   : > { %v2473_v9 = vrot.slane %v2472_v41, 1 }
 0x27a   : > { %v2474_v53 = vadd.f32 %v2473_v9, %v2472_v41  ;;  %v1907_v11 = vpop.f32.mrf.mxu2 }
 0x27b   : > { %v2366_v15 = vmul.f32 %v1907_v11, %v7646_v60  ;;  %v2475_v11 = vsel %vm1838_vm13, %v2381_v13, 0.0 }
 0x27c   : > { %v7734_v29 = vsel %vm2646_vm12, %v2474_v53, %v2656_v28 }
 0x27d   : > { %v2382_v46 = vmul.f32 %v2366_v15, %v7686_v19 }
 0x27f   : > { %v2482_v30 = vsel %vm1838_vm13, %v2382_v46, 0.0 }
 0x280   : > { %v2483_v61 = vrot.slane %v2482_v30, 4 }
 0x282   : > { %v1909_v52 = vpop.f32.mrf.mxu2 }
 0x283   : > { %v2367_v58 = vmul.f32 %v1909_v52, %v7654_v62 }
 0x285   : > { %v2383_v25 = vmul.f32 %v2367_v58, %v7686_v19 }
 0x287   : > { %v2489_v19 = vsel %vm1838_vm13, %v2383_v25, 0.0 }
 0x288   : > { %v2490_v54 = vrot.slane %v2489_v19, 4 }
 0x28a   : > { %v2836_v5 = vpop.f32.mrf.mxu2 }
 0x28b   : > { %v7748_v1 = vadd.f32 %v7742_v56, %v2836_v5 }
 0x28d   : > { %v2892_v27 = vmin.f32 %v7748_v1, 20.0  ;;  %vm2876_vm3 = vcmp.gt.f32.partialorder %v7748_v1, 20.0 }
 0x28f   : > { %v2908_v17 = vmul.f32 1.442695, %v2892_v27 }
 0x291   : > { %6330 = vpow2.f32 %v2908_v17  ;;  %v2476_v17 = vrot.slane %v2475_v11, 4 }
 0x292   : > { %v2838_v34 = vpop.f32.mrf.mxu2 }
 0x293   : > { %v7758_v14 = vadd.f32 %v7742_v56, %v2838_v34 }
 0x295   : > { %v2893_v6 = vmin.f32 %v7758_v14, 20.0  ;;  %vm2877_vm5 = vcmp.gt.f32.partialorder %v7758_v14, 20.0 }
 0x297   : > { %v6331_v21 = vpop.eup %6330  ;;  %v2910_v8 = vmul.f32 1.442695, %v2893_v6 }
 0x298   : > { %v2940_v10 = vadd.f32 1.0, %v6331_v21  ;;  %v2943_v26 = vmul.f32 -0.5, %v6331_v21  ;;  %v2946_v9 = vand.u32 2147483647, %v6331_v21 }
 0x299   : > { %6332 = vpow2.f32 %v2910_v8 }
 0x29a   : > { %6334 = vlog2.f32 %v2940_v10  ;;  %v2841_v45 = vpop.f32.mrf.mxu2  ;;  %v2944_v41 = vadd.f32 1.0, %v2943_v26  ;;  %vm7784_vm2 = vcmp.lt.f32.partialorder %v2946_v9, 0.0004427343  ;;  %v2477_v26 = vadd.f32 %v2476_v17, %v2475_v11 }
 0x29b   : > { %v7766_v39 = vadd.f32 %v7742_v56, %v2841_v45 }
 0x29c   : > { %v2945_v5 = vmul.f32 %v6331_v21, %v2944_v41 }
 0x29d   : > { %v2894_v23 = vmin.f32 %v7766_v39, 20.0  ;;  %vm2878_vm7 = vcmp.gt.f32.partialorder %v7766_v39, 20.0 }
 0x29f   : > { %v6333_v24 = vpop.eup %6332  ;;  %v2912_v57 = vmul.f32 1.442695, %v2894_v23 }
 0x2a0   : > { %v6335_v2 = vpop.eup %6334  ;;  %v2949_v20 = vadd.f32 1.0, %v6333_v24  ;;  %v2952_v43 = vmul.f32 -0.5, %v6333_v24  ;;  %v2955_v34 = vand.u32 2147483647, %v6333_v24 }
 0x2a1   : > { %6336 = vpow2.f32 %v2912_v57  ;;  %v2942_v28 = vmul.f32 0.6931472, %v6335_v2  ;;  %v2484_v57 = vadd.f32 %v2483_v61, %v2482_v30 }
 0x2a2   : > { %6338 = vlog2.f32 %v2949_v20  ;;  %v2843_v53 = vpop.f32.mrf.mxu2  ;;  %v2953_v40 = vadd.f32 1.0, %v2952_v43  ;;  %vm2956_vm4 = vcmp.lt.f32.partialorder %v2955_v34, 0.0004427343  ;;  %v2491_v20 = vadd.f32 %v2490_v54, %v2489_v19  ;;  %v5972_v54 = vld [vmem:[%s8723_s11 + $0x10] sm:$0xff] }
 0x2a3   : > { %v7776_v52 = vadd.f32 %v7742_v56, %v2843_v53  ;;  %v2948_v8 = vsel %vm7784_vm2, %v2945_v5, %v2942_v28  ;;  %v2478_v53 = vrot.slane %v2477_v26, 2  ;;  %v2485_v11 = vrot.slane %v2484_v57, 2 }
 0x2a4   : > { %v2954_v58 = vmul.f32 %v6333_v24, %v2953_v40  ;;  %v3084_v23 = vsel %vm2876_vm3, %v7748_v1, %v2948_v8  ;;  %v2492_v5 = vrot.slane %v2491_v20, 2  ;;  %vm2750_vm3 = vcmask 785408  }
 0x2a5   : > { %v2895_v27 = vmin.f32 %v7776_v52, 20.0  ;;  %v5623_v41 = vadd.f32 -0.6931472, %v3084_v23  ;;  %v2479_v17 = vadd.f32 %v2478_v53, %v2477_v26  ;;  %v2486_v61 = vadd.f32 %v2485_v11, %v2484_v57 }
 0x2a6   : > { %vm2879_vm2 = vcmp.gt.f32.partialorder %v7776_v52, 20.0 }
 0x2a7   : > { %v6337_v6 = vpop.eup %6336  ;;  %v2914_v10 = vmul.f32 1.442695, %v2895_v27  ;;  %v5973_v27 = vld [vmem:[%s8723_s11 + $0x18] sm:$0xff]  ;;  %v2480_v23 = vrot.slane %v2479_v17, 1 }
 0x2a8   : > { %v6339_v45 = vpop.eup %6338  ;;  %v2958_v15 = vadd.f32 1.0, %v6337_v6  ;;  %v2961_v24 = vmul.f32 -0.5, %v6337_v6  ;;  %v2964_v42 = vand.u32 2147483647, %v6337_v6  ;;  %3258 = vmatpush.bf16.msra.mxu1 %v5973_v27 }
 0x2a9   : > { %v2951_v21 = vmul.f32 0.6931472, %v6339_v45  ;;  %6340 = vpow2.f32 %v2914_v10  ;;  %v2493_v45 = vadd.f32 %v2492_v5, %v2491_v20  ;;  %v2481_v53 = vadd.f32 %v2480_v23, %v2479_v17 }
 0x2aa   : > { %6342 = vlog2.f32 %v2958_v15  ;;  %v2846_v13 = vpop.f32.mrf.mxu2  ;;  %v2962_v19 = vadd.f32 1.0, %v2961_v24  ;;  %vm7809_vm6 = vcmp.lt.f32.partialorder %v2964_v42, 0.0004427343 }
 0x2ab   : > { %v2957_v2 = vsel %vm2956_vm4, %v2954_v58, %v2951_v21  ;;  %v7794_v46 = vadd.f32 %v7742_v56, %v2846_v13 }
 0x2ac   : > { %v3085_v25 = vsel %vm2877_vm5, %v7758_v14, %v2957_v2  ;;  %v2963_v15 = vmul.f32 %v6337_v6, %v2962_v19  ;;  %3259 = vmatpush.bf16.msra.mxu1 %v5972_v54  ;;  %v2487_v2 = vrot.slane %v2486_v61, 1 }
 0x2ad   : > { %v5624_v43 = vadd.f32 -0.6931472, %v3085_v25  ;;  %v2896_v9 = vmin.f32 %v7794_v46, 20.0  ;;  %vm2880_vm5 = vcmp.gt.f32.partialorder %v7794_v46, 20.0 }
 0x2af   : > { %v6341_v1 = vpop.eup %6340  ;;  %v3116_v28 = vpack.c.bf16 %v5624_v43, %v5623_v41  ;;  %v2916_v16 = vmul.f32 1.442695, %v2896_v9  ;;  %v2494_v43 = vrot.slane %v2493_v45, 1 }
 0x2b0   : > { %v6343_v30 = vpop.eup %6342  ;;  %v2967_v40 = vadd.f32 1.0, %v6341_v1  ;;  %v2970_v14 = vmul.f32 -0.5, %v6341_v1  ;;  %v2973_v13 = vand.u32 2147483647, %v6341_v1 }
 0x2b1   : > { %6344 = vpow2.f32 %v2916_v16  ;;  %5663 = vmatmul.msk.bf16.vlgmr.msra.gmra.mxu0 %vm1838_vm13, %v3116_v28  ;;  %v2960_v8 = vmul.f32 0.6931472, %v6343_v30  ;;  %v2488_v16 = vadd.f32 %v2487_v2, %v2486_v61 }
 0x2b2   : > { %v2848_v34 = vpop.f32.mrf.mxu2  ;;  %6346 = vlog2.f32 %v2967_v40  ;;  %v2971_v58 = vadd.f32 1.0, %v2970_v14  ;;  %vm2974_vm8 = vcmp.lt.f32.partialorder %v2973_v13, 0.0004427343  ;;  %v2495_v40 = vadd.f32 %v2494_v43, %v2493_v45 }
 0x2b3   : > { %v7803_v10 = vadd.f32 %v7742_v56, %v2848_v34  ;;  %v2966_v20 = vsel %vm7809_vm6, %v2963_v15, %v2960_v8 }
 0x2b4   : > { %v2972_v9 = vmul.f32 %v6341_v1, %v2971_v58  ;;  %v3086_v11 = vsel %vm2878_vm7, %v7766_v39, %v2966_v20  ;;  %v2658_v39 = vsel %vm2648_vm14, %v2481_v53, %v7734_v29 }
 0x2b5   : > { %v2897_v21 = vmin.f32 %v7803_v10, 20.0  ;;  %v5625_v19 = vadd.f32 -0.6931472, %v3086_v11  ;;  %v2659_v8 = vsel %vm2650_vm15, %v2488_v16, %v2658_v39  ;;  %vm2881_vm7 = vcmp.gt.f32.partialorder %v7803_v10, 20.0 }
 0x2b6   : > { %v2660_v45 = vsel %vm2652_vm1, %v2495_v40, %v2659_v8 }
 0x2b7   : > { %v6345_v57 = vpop.eup %6344  ;;  %v2918_v25 = vmul.f32 1.442695, %v2897_v21 }
 0x2b8   : > { %v6347_v41 = vpop.eup %6346  ;;  %v2976_v24 = vadd.f32 1.0, %v6345_v57  ;;  %v2979_v14 = vmul.f32 -0.5, %v6345_v57  ;;  %v2982_v13 = vand.u32 2147483647, %v6345_v57 }
 0x2b9   : > { %6348 = vpow2.f32 %v2918_v25  ;;  %v2969_v6 = vmul.f32 0.6931472, %v6347_v41 }
 0x2ba   : > { %6350 = vlog2.f32 %v2976_v24  ;;  %v2851_v28 = vpop.f32.mrf.mxu2  ;;  %v2980_v23 = vadd.f32 1.0, %v2979_v14  ;;  %vm2983_vm4 = vcmp.lt.f32.partialorder %v2982_v13, 0.0004427343 }
 0x2bb   : > { %v7819_v30 = vadd.f32 %v7742_v56, %v2851_v28  ;;  %v2975_v5 = vsel %vm2974_vm8, %v2972_v9, %v2969_v6 }
 0x2bc   : > { %v3087_v27 = vsel %vm2879_vm2, %v7776_v52, %v2975_v5  ;;  %v2981_v24 = vmul.f32 %v6345_v57, %v2980_v23 }
 0x2bd   : > { %v2898_v1 = vmin.f32 %v7819_v30, 20.0  ;;  %v5626_v17 = vadd.f32 -0.6931472, %v3087_v27  ;;  %vm2882_vm2 = vcmp.gt.f32.partialorder %v7819_v30, 20.0 }
 0x2bf   : > { %v6349_v42 = vpop.eup %6348  ;;  %v2920_v34 = vmul.f32 1.442695, %v2898_v1  ;;  %v3117_v54 = vpack.c.bf16 %v5626_v17, %v5625_v19 }
 0x2c0   : > { %v6351_v15 = vpop.eup %6350  ;;  %v2985_v52 = vadd.f32 1.0, %v6349_v42  ;;  %v2988_v26 = vmul.f32 -0.5, %v6349_v42  ;;  %v2991_v53 = vand.u32 2147483647, %v6349_v42 }
 0x2c1   : > { %v6053_v61 = vpop.permute.xlu2 %6052  ;;  %6352 = vpow2.f32 %v2920_v34  ;;  %5664 = vmatmul.msk.bf16.gmra.mxu0 %vm1838_vm13, %v3117_v54  ;;  %v2978_v25 = vmul.f32 0.6931472, %v6351_v15 }
 0x2c2   : > { %v6055_v21 = vunpack.i.h.bf16 %v6053_v61  ;;  %v6054_v58 = vunpack.i.l.bf16 %v6053_v61  ;;  %v2853_v20 = vpop.f32.mrf.mxu2  ;;  %6354 = vlog2.f32 %v2985_v52  ;;  %v2989_v9 = vadd.f32 1.0, %v2988_v26 }
 0x2c3   : > { %v7832_v43 = vadd.f32 %v7742_v56, %v2853_v20  ;;  %v2984_v28 = vsel %vm2983_vm4, %v2981_v24, %v2978_v25  ;;  %vm2992_vm6 = vcmp.lt.f32.partialorder %v2991_v53, 0.0004427343 }
 0x2c4   : > { %v2699_v29 = vsel %vm1838_vm13, %v7690_v0, %v6054_v58  ;;  %v2700_v2 = vsel %vm1838_vm13, %v2660_v45, %v6055_v21  ;;  %v2990_v27 = vmul.f32 %v6349_v42, %v2989_v9  ;;  %v3088_v19 = vsel %vm2880_vm5, %v7794_v46, %v2984_v28 }
 0x2c5   : > { %v2701_v41 = vpack.c.bf16 %v2700_v2, %v2699_v29  ;;  %v2899_v6 = vmin.f32 %v7832_v43, 20.0  ;;  %v5627_v39 = vadd.f32 -0.6931472, %v3088_v19  ;;  %vm2883_vm5 = vcmp.gt.f32.partialorder %v7832_v43, 20.0 }
 0x2c7   : > { %5588 = vmatmul.msk.bf16.vlgmr.msrb.gmra.mxu1 %vm2750_vm3, %v2701_v41  ;;  %v6353_v11 = vpop.eup %6352  ;;  %v2922_v0 = vmul.f32 1.442695, %v2899_v6 }
 0x2c8   : > { %v6355_v16 = vpop.eup %6354  ;;  %v2994_v5 = vadd.f32 1.0, %v6353_v11  ;;  %v2997_v34 = vmul.f32 -0.5, %v6353_v11  ;;  %v3000_v52 = vand.u32 2147483647, %v6353_v11 }
 0x2c9   : > { %6356 = vpow2.f32 %v2922_v0  ;;  %v2987_v40 = vmul.f32 0.6931472, %v6355_v16 }
 0x2ca   : > { %6358 = vlog2.f32 %v2994_v5  ;;  %v2856_v57 = vpop.f32.mrf.mxu2  ;;  %v2998_v58 = vadd.f32 1.0, %v2997_v34  ;;  %vm3001_vm8 = vcmp.lt.f32.partialorder %v3000_v52, 0.0004427343 }
 0x2cb   : > { %v7840_v14 = vadd.f32 %v7742_v56, %v2856_v57  ;;  %v2993_v1 = vsel %vm2992_vm6, %v2990_v27, %v2987_v40 }
 0x2cc   : > { %v3089_v17 = vsel %vm2881_vm7, %v7803_v10, %v2993_v1  ;;  %v2999_v13 = vmul.f32 %v6353_v11, %v2998_v58 }
 0x2cd   : > { %v2900_v61 = vmin.f32 %v7840_v14, 20.0  ;;  %v5628_v8 = vadd.f32 -0.6931472, %v3089_v17  ;;  %vm2884_vm7 = vcmp.gt.f32.partialorder %v7840_v14, 20.0 }
 0x2cf   : > { %v6357_v54 = vpop.eup %6356  ;;  %v2924_v42 = vmul.f32 1.442695, %v2900_v61  ;;  %v3118_v15 = vpack.c.bf16 %v5628_v8, %v5627_v39 }
 0x2d0   : > { %v6359_v46 = vpop.eup %6358  ;;  %v3003_v21 = vadd.f32 1.0, %v6357_v54  ;;  %v3006_v45 = vmul.f32 -0.5, %v6357_v54  ;;  %v3009_v20 = vand.u32 2147483647, %v6357_v54 }
 0x2d1   : > { %6360 = vpow2.f32 %v2924_v42  ;;  %5665 = vmatmul.msk.bf16.gmra.mxu0 %vm1838_vm13, %v3118_v15  ;;  %v2996_v26 = vmul.f32 0.6931472, %v6359_v46 }
 0x2d2   : > { %6362 = vlog2.f32 %v3003_v21  ;;  %v2858_v23 = vpop.f32.mrf.mxu2  ;;  %v3007_v29 = vadd.f32 1.0, %v3006_v45  ;;  %vm3010_vm4 = vcmp.lt.f32.partialorder %v3009_v20, 0.0004427343 }
 0x2d3   : > { %v7846_v10 = vadd.f32 %v7742_v56, %v2858_v23  ;;  %v3002_v41 = vsel %vm3001_vm8, %v2999_v13, %v2996_v26 }
 0x2d4   : > { %v3008_v28 = vmul.f32 %v6357_v54, %v3007_v29  ;;  %v3090_v11 = vsel %vm2882_vm2, %v7819_v30, %v3002_v41  ;;  %v5965_v30 = vld [vmem:[%s8726_s14 + $0x18] sm:$0xff] }
 0x2d5   : > { %v2901_v2 = vmin.f32 %v7846_v10, 20.0  ;;  %v5629_v27 = vadd.f32 -0.6931472, %v3090_v11  ;;  %2797 = vmatpush.bf16.msrb.mxu3 %v5965_v30  ;;  %vm2885_vm2 = vcmp.gt.f32.partialorder %v7846_v10, 20.0 }
 0x2d7   : > { %5684 = vmatmul.msk.bf16.vlgmr.msra.gmra.mxu1 %vm1420_vm0, %v6921_v32  ;;  %v6361_v25 = vpop.eup %6360  ;;  %v2926_v24 = vmul.f32 1.442695, %v2901_v2 }
 0x2d8   : > { %v6363_v6 = vpop.eup %6362  ;;  %v3012_v9 = vadd.f32 1.0, %v6361_v25  ;;  %v3015_v57 = vmul.f32 -0.5, %v6361_v25 }
 0x2d9   : > { %v3005_v53 = vmul.f32 0.6931472, %v6363_v6  ;;  %6364 = vpow2.f32 %v2926_v24 }
 0x2da   : > { %6366 = vlog2.f32 %v3012_v9  ;;  %v2861_v0 = vpop.f32.mrf.mxu2  ;;  %v3016_v54 = vadd.f32 1.0, %v3015_v57 }
 0x2db   : > { %v3011_v16 = vsel %vm3010_vm4, %v3008_v28, %v3005_v53  ;;  %v7855_v5 = vadd.f32 %v7742_v56, %v2861_v0 }
 0x2dc   : > { %v3091_v40 = vsel %vm2883_vm5, %v7832_v43, %v3011_v16  ;;  %v3018_v43 = vand.u32 2147483647, %v6361_v25  ;;  %v3017_v58 = vmul.f32 %v6361_v25, %v3016_v54 }
 0x2dd   : > { %v5630_v19 = vadd.f32 -0.6931472, %v3091_v40  ;;  %v2902_v1 = vmin.f32 %v7855_v5, 20.0  ;;  %vm2886_vm5 = vcmp.gt.f32.partialorder %v7855_v5, 20.0 }
 0x2de   : > { %vm3019_vm6 = vcmp.lt.f32.partialorder %v3018_v43, 0.0004427343 }
 0x2df   : > { %v6365_v17 = vpop.eup %6364  ;;  %v2928_v39 = vmul.f32 1.442695, %v2902_v1  ;;  %v3119_v34 = vpack.c.bf16 %v5630_v19, %v5629_v27 }
 0x2e0   : > { %v6367_v61 = vpop.eup %6366  ;;  %v3021_v8 = vadd.f32 1.0, %v6365_v17  ;;  %v3024_v42 = vmul.f32 -0.5, %v6365_v17  ;;  %v3027_v23 = vand.u32 2147483647, %v6365_v17 }
 0x2e1   : > { %6368 = vpow2.f32 %v2928_v39  ;;  %5666 = vmatmul.msk.bf16.gmra.mxu0 %vm1838_vm13, %v3119_v34  ;;  %v3014_v46 = vmul.f32 0.6931472, %v6367_v61 }
 0x2e2   : > { %6370 = vlog2.f32 %v3021_v8  ;;  %v2863_v15 = vpop.f32.mrf.mxu2  ;;  %v3025_v45 = vadd.f32 1.0, %v3024_v42  ;;  %vm3028_vm8 = vcmp.lt.f32.partialorder %v3027_v23, 0.0004427343 }
 0x2e3   : > { %v7864_v21 = vadd.f32 %v7742_v56, %v2863_v15  ;;  %v3020_v13 = vsel %vm3019_vm6, %v3017_v58, %v3014_v46 }
 0x2e4   : > { %v3026_v24 = vmul.f32 %v6365_v17, %v3025_v45  ;;  %v3092_v25 = vsel %vm2884_vm7, %v7840_v14, %v3020_v13 }
 0x2e5   : > { %v2903_v52 = vmin.f32 %v7864_v21, 20.0  ;;  %v5631_v11 = vadd.f32 -0.6931472, %v3092_v25  ;;  %vm2887_vm7 = vcmp.gt.f32.partialorder %v7864_v21, 20.0 }
 0x2e7   : > { %5685 = vmatmul.msk.bf16.gmra.mxu1 %vm1420_vm0, %v6964_v18  ;;  %v6369_v26 = vpop.eup %6368  ;;  %v2930_v29 = vmul.f32 1.442695, %v2903_v52 }
 0x2e8   : > { %v6371_v2 = vpop.eup %6370  ;;  %v3030_v20 = vadd.f32 1.0, %v6369_v26  ;;  %v3033_v16 = vmul.f32 -0.5, %v6369_v26  ;;  %v3036_v34 = vand.u32 2147483647, %v6369_v26 }
 0x2e9   : > { %v3023_v41 = vmul.f32 0.6931472, %v6371_v2  ;;  %6372 = vpow2.f32 %v2930_v29 }
 0x2ea   : > { %6374 = vlog2.f32 %v3030_v20  ;;  %v2866_v6 = vpop.f32.mrf.mxu2  ;;  %v3034_v17 = vadd.f32 1.0, %v3033_v16  ;;  %vm3037_vm4 = vcmp.lt.f32.partialorder %v3036_v34, 0.0004427343  ;;  %v5964_v34 = vld [vmem:[%s8726_s14 + $0x10] sm:$0xff] }
 0x2eb   : > { %v3029_v9 = vsel %vm3028_vm8, %v3026_v24, %v3023_v41  ;;  %v7873_v53 = vadd.f32 %v7742_v56, %v2866_v6  ;;  %2798 = vmatpush.bf16.msrb.mxu3 %v5964_v34  ;;  %v6589_v34 = vld [vmem:[%s8747_s4] sm:$0xff]  ;;  %s6608_s4 = scalar_lea.hbm %s6607_s3, 16 }
 0x2ec   : > { %v3093_v28 = vsel %vm2885_vm2, %v7846_v10, %v3029_v9  ;;  %v3035_v8 = vmul.f32 %v6369_v26, %v3034_v17  ;;  %p6609_p11 = scmp.ne.s32.totalorder %s6607_s3, %s6608_s4  ;;  %p6614_p1 = scmp.lt.s32.totalorder %s6612_s18, %s6608_s4 }
 0x2ed   : > { %v5632_v0 = vadd.f32 -0.6931472, %v3093_v28  ;;  %v2904_v40 = vmin.f32 %v7873_v53, 20.0  ;;  %vm2888_vm2 = vcmp.gt.f32.partialorder %v7873_v53, 20.0 }
 0x2ee   : > { %p6610_p12 = pnand %p6609_p11, %p6781_p5  ;;  %p6615_p2 = por %p6614_p1, %p6613_p0 }
 0x2ef   : > { %v6373_v27 = vpop.eup %6372  ;;  %v2932_v19 = vmul.f32 1.442695, %v2904_v40  ;;  %v3120_v57 = vpack.c.bf16 %v5632_v0, %v5631_v11 }
 0x2f0   : > { %v6375_v14 = vpop.eup %6374  ;;  %v3039_v1 = vadd.f32 1.0, %v6373_v27  ;;  %v3042_v39 = vmul.f32 -0.5, %v6373_v27  ;;  %v3045_v43 = vand.u32 2147483647, %v6373_v27  ;;  %p6611_p13 = pneg %p6610_p12 }
 0x2f1   : > { %6376 = vpow2.f32 %v2932_v19  ;;  %5667 = vmatmul.msk.bf16.gmra.mxu0 %vm1838_vm13, %v3120_v57  ;;  %v3032_v61 = vmul.f32 0.6931472, %v6375_v14 }
 0x2f2   : > { %6378 = vlog2.f32 %v3039_v1  ;;  %v2868_v30 = vpop.f32.mrf.mxu2  ;;  %v3043_v54 = vadd.f32 1.0, %v3042_v39  ;;  %vm3046_vm6 = vcmp.lt.f32.partialorder %v3045_v43, 0.0004427343  ;;  %p6616_p3 = pnand %p6615_p2, %p6611_p13 }
 0x2f3   : > { %v7879_v10 = vadd.f32 %v7742_v56, %v2868_v30  ;;  %v3038_v46 = vsel %vm3037_vm4, %v3035_v8, %v3032_v61 }
 0x2f4   : > { %v3044_v13 = vmul.f32 %v6373_v27, %v3043_v54  ;;  %v3094_v26 = vsel %vm2886_vm5, %v7855_v5, %v3038_v46 }
 0x2f5   : > { %v2905_v42 = vmin.f32 %v7879_v10, 20.0  ;;  %v5633_v24 = vadd.f32 -0.6931472, %v3094_v26  ;;  %vm2889_vm5 = vcmp.gt.f32.partialorder %v7879_v10, 20.0 }
 0x2f7   : > { %5686 = vmatmul.msk.bf16.gmra.mxu1 %vm1420_vm0, %v6990_v59  ;;  %v6377_v15 = vpop.eup %6376  ;;  %v2934_v58 = vmul.f32 1.442695, %v2905_v42 }
 0x2f8   : > { %v6379_v45 = vpop.eup %6378  ;;  %v3048_v52 = vadd.f32 1.0, %v6377_v15  ;;  %v3051_v6 = vmul.f32 -0.5, %v6377_v15  ;;  %v3054_v19 = vand.u32 2147483647, %v6377_v15 }
 0x2f9   : > { %v3041_v23 = vmul.f32 0.6931472, %v6379_v45  ;;  %6380 = vpow2.f32 %v2934_v58 }
 0x2fa   : > { %6382 = vlog2.f32 %v3048_v52  ;;  %v2871_v29 = vpop.f32.mrf.mxu2  ;;  %v3052_v40 = vadd.f32 1.0, %v3051_v6  ;;  %vm3055_vm8 = vcmp.lt.f32.partialorder %v3054_v19, 0.0004427343 }
 0x2fb   : > { %v3047_v2 = vsel %vm3046_vm6, %v3044_v13, %v3041_v23  ;;  %v7888_v20 = vadd.f32 %v7742_v56, %v2871_v29 }
 0x2fc   : > { %v3095_v41 = vsel %vm2887_vm7, %v7864_v21, %v3047_v2  ;;  %v3053_v1 = vmul.f32 %v6377_v15, %v3052_v40 }
 0x2fd   : > { %v5634_v25 = vadd.f32 -0.6931472, %v3095_v41  ;;  %v2906_v9 = vmin.f32 %v7888_v20, 20.0  ;;  %vm2890_vm7 = vcmp.gt.f32.partialorder %v7888_v20, 20.0 }
 0x2ff   : > { %v6381_v28 = vpop.eup %6380  ;;  %v3121_v11 = vpack.c.bf16 %v5634_v25, %v5633_v24  ;;  %v2936_v0 = vmul.f32 1.442695, %v2906_v9 }
 0x300   : > { %v6383_v5 = vpop.eup %6382  ;;  %v3057_v16 = vadd.f32 1.0, %v6381_v28  ;;  %v3060_v27 = vmul.f32 -0.5, %v6381_v28  ;;  %v3063_v30 = vand.u32 2147483647, %v6381_v28 }
 0x301   : > { %6384 = vpow2.f32 %v2936_v0  ;;  %5668 = vmatmul.msk.bf16.gmra.mxu0 %vm1838_vm13, %v3121_v11  ;;  %v3050_v14 = vmul.f32 0.6931472, %v6383_v5 }
 0x302   : > { %6386 = vlog2.f32 %v3057_v16  ;;  %v2873_v57 = vpop.f32.mrf.mxu2  ;;  %v3061_v17 = vadd.f32 1.0, %v3060_v27  ;;  %vm3064_vm4 = vcmp.lt.f32.partialorder %v3063_v30, 0.0004427343 }
 0x303   : > { %v2874_v21 = vadd.f32 %v7742_v56, %v2873_v57  ;;  %v3056_v8 = vsel %vm3055_vm8, %v3053_v1, %v3050_v14 }
 0x304   : > { %v3062_v15 = vmul.f32 %v6381_v28, %v3061_v17  ;;  %v3096_v46 = vsel %vm2888_vm2, %v7873_v53, %v3056_v8  ;;  %v5985_v17 = vld [vmem:[%s8720_s8 + $0x28] sm:$0xff] }
 0x305   : > { %v2907_v39 = vmin.f32 %v2874_v21, 20.0  ;;  %v5635_v52 = vadd.f32 -0.6931472, %v3096_v46  ;;  %vm2891_vm2 = vcmp.gt.f32.partialorder %v2874_v21, 20.0  ;;  %4123 = vmatpush.bf16.msrb.mxu1 %v5985_v17 }
 0x307   : > { %5687 = vmatmul.msk.bf16.gmra.mxu1 %vm1420_vm0, %v7005_v37  ;;  %v6385_v61 = vpop.eup %6384  ;;  %v2938_v54 = vmul.f32 1.442695, %v2907_v39 }
 0x308   : > { %v6387_v42 = vpop.eup %6386  ;;  %v3066_v43 = vadd.f32 1.0, %v6385_v61  ;;  %v3069_v13 = vmul.f32 -0.5, %v6385_v61  ;;  %v3072_v6 = vand.u32 2147483647, %v6385_v61 }
 0x309   : > { %v3059_v56 = vmul.f32 0.6931472, %v6387_v42  ;;  %6388 = vpow2.f32 %v2938_v54  ;;  %v7934_v54 = vld [vmem:[%s8724_s12 + $0x1] ss:$0 sm:$0xff] }
 0x30a   : > { %6390 = vlog2.f32 %v3066_v43  ;;  %v3070_v24 = vadd.f32 1.0, %v3069_v13  ;;  %vm3073_vm6 = vcmp.lt.f32.partialorder %v3072_v6, 0.0004427343 }
 0x30b   : > { %v3065_v58 = vsel %vm3064_vm4, %v3062_v15, %v3059_v56  ;;  %v5975_v56 = vld [vmem:[%s8725_s13 + $0x18] sm:$0xff] }
 0x30c   : > { %v3097_v45 = vsel %vm2889_vm5, %v7879_v10, %v3065_v58  ;;  %v3071_v9 = vmul.f32 %v6385_v61, %v3070_v24  ;;  %3596 = vmatpush.bf16.msra.mxu3 %v5975_v56  ;;  %v5974_v58 = vld [vmem:[%s8725_s13 + $0x10] sm:$0xff] }
 0x30d   : > { %v5636_v23 = vadd.f32 -0.6931472, %v3097_v45 }
 0x30f   : > { %v6389_v26 = vpop.eup %6388  ;;  %v3122_v29 = vpack.c.bf16 %v5636_v23, %v5635_v52 }
 0x310   : > { %v6391_v2 = vpop.eup %6390  ;;  %v3075_v41 = vadd.f32 1.0, %v6389_v26  ;;  %v3078_v25 = vmul.f32 -0.5, %v6389_v26  ;;  %v3081_v10 = vand.u32 2147483647, %v6389_v26  ;;  %3597 = vmatpush.bf16.msra.mxu3 %v5974_v58 }
 0x311   : > { %5669 = vmatmul.msk.bf16.gmra.mxu0 %vm1838_vm13, %v3122_v29  ;;  %v3068_v53 = vmul.f32 0.6931472, %v6391_v2 }
 0x312   : > { %6392 = vlog2.f32 %v3075_v41  ;;  %v3079_v28 = vadd.f32 1.0, %v3078_v25  ;;  %vm3082_vm8 = vcmp.lt.f32.partialorder %v3081_v10, 0.0004427343 }
 0x313   : > { %v3074_v11 = vsel %vm3073_vm6, %v3071_v9, %v3068_v53 }
 0x314   : > { %v3080_v16 = vmul.f32 %v6389_v26, %v3079_v28  ;;  %v3098_v40 = vsel %vm2890_vm7, %v7888_v20, %v3074_v11  ;;  %v5984_v20 = vld [vmem:[%s8720_s8 + $0x20] sm:$0xff] }
 0x315   : > { %v5637_v57 = vadd.f32 -0.6931472, %v3098_v40  ;;  %4124 = vmatpush.bf16.msrb.mxu1 %v5984_v20 }
 0x317   : > { %5688 = vmatmul.msk.bf16.gmra.mxu1 %vm1420_vm0, %v7018_v63 }
 0x318   : > { %v6393_v0 = vpop.eup %6392 }
 0x319   : > { %v3077_v5 = vmul.f32 0.6931472, %v6393_v0 }
 0x31b   : > { %v3083_v27 = vsel %vm3082_vm8, %v3080_v16, %v3077_v5 }
 0x31c   : > { %v3099_v19 = vsel %vm2891_vm2, %v2874_v21, %v3083_v27 }
 0x31d   : > { %v5638_v14 = vadd.f32 -0.6931472, %v3099_v19 }
 0x31f   : > { %v3123_v1 = vpack.c.bf16 %v5638_v14, %v5637_v57 }
 0x321   : > { %5670 = vmatmul.msk.bf16.gmra.mxu0 %vm1838_vm13, %v3123_v1 }
 0x327   : > { %5689 = vmatmul.msk.bf16.gmra.mxu1 %vm1420_vm0, %v7031_v35 }
 0x337   : > { %5690 = vmatmul.msk.bf16.gmra.mxu1 %vm1420_vm0, %v7045_v4 }
 0x344   : > { %v2763_v21 = vpop.f32.mrf.mxu1 }
 0x345   : > { %v7924_v30 = vadd.f32 %v6589_v34, %v2763_v21 }
 0x347   : > { %5691 = vmatmul.msk.bf16.gmra.mxu1 %vm1420_vm0, %v7062_v49  ;;  %8786 = vst [vmem:[#allocation6_spill] sm:$0xff] %v7924_v30 }
 0x34c   : > { %v2765_v39 = vpop.f32.mrf.mxu1 }
 0x34d   : > { %v7926_v61 = vadd.f32 %v6589_v34, %v2765_v39 }
 0x34f   : > { %8787 = vst [vmem:[#allocation7_spill] sm:$0xff] %v7926_v61  ;;  %v2770_v8 = vpack.c.bf16 %v7926_v61, %v7924_v30 }
 0x351   : > { %5601 = vmatmul.msk.bf16.vlgmr.msrb.gmra.mxu3 %vm1420_vm0, %v2770_v8 }
 0x354   : > { %v3261_v42 = vpop.f32.mrf.mxu1 }
 0x355   : > { %v3262_v43 = vadd.f32 %v7934_v54, %v3261_v42 }
 0x357   : > { %v3317_v15 = vmin.f32 %v3262_v43, 20.0  ;;  %5791 = vmatmul.msk.bf16.vlgmr.msrb.gmra.mxu1 %vm1420_vm0, %v6976_v38  ;;  %vm3301_vm5 = vcmp.gt.f32.partialorder %v3262_v43, 20.0 }
 0x359   : > { %v3333_v46 = vmul.f32 1.442695, %v3317_v15 }
 0x35b   : > { %6394 = vpow2.f32 %v3333_v46 }
 0x35c   : > { %v3263_v45 = vpop.f32.mrf.mxu1 }
 0x35d   : > { %v3264_v52 = vadd.f32 %v7934_v54, %v3263_v45 }
 0x35f   : > { %v3318_v23 = vmin.f32 %v3264_v52, 20.0  ;;  %vm3302_vm7 = vcmp.gt.f32.partialorder %v3264_v52, 20.0 }
 0x361   : > { %v6395_v13 = vpop.eup %6394  ;;  %v3335_v26 = vmul.f32 1.442695, %v3318_v23 }
 0x362   : > { %v3365_v29 = vadd.f32 1.0, %v6395_v13  ;;  %v3368_v41 = vmul.f32 -0.5, %v6395_v13  ;;  %v3371_v11 = vand.u32 2147483647, %v6395_v13 }
 0x363   : > { %6396 = vpow2.f32 %v3335_v26 }
 0x364   : > { %6398 = vlog2.f32 %v3365_v29  ;;  %v3266_v2 = vpop.f32.mrf.mxu1  ;;  %v3369_v28 = vadd.f32 1.0, %v3368_v41  ;;  %vm3372_vm4 = vcmp.lt.f32.partialorder %v3371_v11, 0.0004427343 }
 0x365   : > { %v7947_v38 = vadd.f32 %v7934_v54, %v3266_v2 }
 0x366   : > { %v3370_v40 = vmul.f32 %v6395_v13, %v3369_v28 }
 0x367   : > { %v3319_v24 = vmin.f32 %v7947_v38, 20.0  ;;  %5792 = vmatmul.msk.bf16.gmra.mxu1 %vm1420_vm0, %v7003_v36  ;;  %vm3303_vm2 = vcmp.gt.f32.partialorder %v7947_v38, 20.0 }
 0x369   : > { %v6397_v25 = vpop.eup %6396  ;;  %v3337_v6 = vmul.f32 1.442695, %v3319_v24 }
 0x36a   : > { %v6399_v53 = vpop.eup %6398  ;;  %v3374_v9 = vadd.f32 1.0, %v6397_v25  ;;  %v3377_v10 = vmul.f32 -0.5, %v6397_v25  ;;  %v3380_v36 = vand.u32 2147483647, %v6397_v25 }
 0x36b   : > { %6400 = vpow2.f32 %v3337_v6  ;;  %v3367_v5 = vmul.f32 0.6931472, %v6399_v53 }
 0x36c   : > { %6402 = vlog2.f32 %v3374_v9  ;;  %v3268_v0 = vpop.f32.mrf.mxu1  ;;  %v3378_v27 = vadd.f32 1.0, %v3377_v10  ;;  %vm3381_vm6 = vcmp.lt.f32.partialorder %v3380_v36, 0.0004427343 }
 0x36d   : > { %v7953_v16 = vadd.f32 %v7934_v54, %v3268_v0  ;;  %v3373_v14 = vsel %vm3372_vm4, %v3370_v40, %v3367_v5 }
 0x36e   : > { %v3379_v39 = vmul.f32 %v6397_v25, %v3378_v27  ;;  %v3509_v34 = vsel %vm3301_vm5, %v3262_v43, %v3373_v14 }
 0x36f   : > { %v3320_v19 = vmin.f32 %v7953_v16, 20.0  ;;  %v5692_v46 = vadd.f32 -0.6931472, %v3509_v34  ;;  %vm3304_vm5 = vcmp.gt.f32.partialorder %v7953_v16, 20.0 }
 0x371   : > { %v6401_v57 = vpop.eup %6400  ;;  %v3339_v1 = vmul.f32 1.442695, %v3320_v19 }
 0x372   : > { %v6403_v17 = vpop.eup %6402  ;;  %v3383_v20 = vadd.f32 1.0, %v6401_v57  ;;  %v3386_v45 = vmul.f32 -0.5, %v6401_v57  ;;  %v3389_v25 = vand.u32 2147483647, %v6401_v57 }
 0x373   : > { %v3376_v21 = vmul.f32 0.6931472, %v6403_v17  ;;  %6404 = vpow2.f32 %v3339_v1 }
 0x374   : > { %6406 = vlog2.f32 %v3383_v20  ;;  %v3271_v8 = vpop.f32.mrf.mxu1  ;;  %v3387_v41 = vadd.f32 1.0, %v3386_v45  ;;  %vm3390_vm8 = vcmp.lt.f32.partialorder %v3389_v25, 0.0004427343 }
 0x375   : > { %v3382_v42 = vsel %vm3381_vm6, %v3379_v39, %v3376_v21  ;;  %v7957_v56 = vadd.f32 %v7934_v54, %v3271_v8 }
 0x376   : > { %v3510_v15 = vsel %vm3302_vm7, %v3264_v52, %v3382_v42  ;;  %v3388_v9 = vmul.f32 %v6401_v57, %v3387_v41 }
 0x377   : > { %v5693_v58 = vadd.f32 -0.6931472, %v3510_v15  ;;  %v3321_v23 = vmin.f32 %v7957_v56, 20.0  ;;  %5793 = vmatmul.msk.bf16.gmra.mxu1 %vm1420_vm0, %v7016_v51  ;;  %vm3305_vm7 = vcmp.gt.f32.partialorder %v7957_v56, 20.0 }
 0x379   : > { %v6405_v13 = vpop.eup %6404  ;;  %v3541_v26 = vpack.c.bf16 %v5693_v58, %v5692_v46  ;;  %v3341_v43 = vmul.f32 1.442695, %v3321_v23 }
 0x37a   : > { %v6407_v29 = vpop.eup %6406  ;;  %v3392_v2 = vadd.f32 1.0, %v6405_v13  ;;  %v3395_v24 = vmul.f32 -0.5, %v6405_v13  ;;  %v3398_v10 = vand.u32 2147483647, %v6405_v13 }
 0x37b   : > { %6408 = vpow2.f32 %v3341_v43  ;;  %5720 = vmatmul.msk.bf16.vlgmr.msra.gmra.mxu3 %vm1420_vm0, %v3541_v26  ;;  %v3385_v6 = vmul.f32 0.6931472, %v6407_v29 }
 0x37c   : > { %v3273_v52 = vpop.f32.mrf.mxu1  ;;  %6410 = vlog2.f32 %v3392_v2  ;;  %v3396_v28 = vadd.f32 1.0, %v3395_v24  ;;  %vm3399_vm4 = vcmp.lt.f32.partialorder %v3398_v10, 0.0004427343 }
 0x37d   : > { %v7964_v53 = vadd.f32 %v7934_v54, %v3273_v52  ;;  %v3391_v0 = vsel %vm3390_vm8, %v3388_v9, %v3385_v6 }
 0x37e   : > { %v3397_v36 = vmul.f32 %v6405_v13, %v3396_v28  ;;  %v3511_v14 = vsel %vm3303_vm2, %v7947_v38, %v3391_v0 }
 0x37f   : > { %v3322_v51 = vmin.f32 %v7964_v53, 20.0  ;;  %v5694_v21 = vadd.f32 -0.6931472, %v3511_v14  ;;  %vm3306_vm2 = vcmp.gt.f32.partialorder %v7964_v53, 20.0 }
 0x381   : > { %v6409_v11 = vpop.eup %6408  ;;  %v3343_v5 = vmul.f32 1.442695, %v3322_v51 }
 0x382   : > { %v6411_v40 = vpop.eup %6410  ;;  %v3401_v27 = vadd.f32 1.0, %v6409_v11  ;;  %v3404_v39 = vmul.f32 -0.5, %v6409_v11  ;;  %v3407_v13 = vand.u32 2147483647, %v6409_v11 }
 0x383   : > { %6412 = vpow2.f32 %v3343_v5  ;;  %v3394_v19 = vmul.f32 0.6931472, %v6411_v40 }
 0x384   : > { %6414 = vlog2.f32 %v3401_v27  ;;  %v3276_v1 = vpop.f32.mrf.mxu1  ;;  %v3405_v45 = vadd.f32 1.0, %v3404_v39  ;;  %vm3408_vm6 = vcmp.lt.f32.partialorder %v3407_v13, 0.0004427343 }
 0x385   : > { %v7971_v57 = vadd.f32 %v7934_v54, %v3276_v1  ;;  %v3400_v17 = vsel %vm3399_vm4, %v3397_v36, %v3394_v19 }
 0x386   : > { %v3512_v20 = vsel %vm3304_vm5, %v7953_v16, %v3400_v17  ;;  %v3406_v29 = vmul.f32 %v6409_v11, %v3405_v45 }
 0x387   : > { %v3323_v34 = vmin.f32 %v7971_v57, 20.0  ;;  %5794 = vmatmul.msk.bf16.gmra.mxu1 %vm1420_vm0, %v7037_v47  ;;  %v5695_v8 = vadd.f32 -0.6931472, %v3512_v20  ;;  %vm3307_vm5 = vcmp.gt.f32.partialorder %v7971_v57, 20.0 }
 0x389   : > { %v6413_v38 = vpop.eup %6412  ;;  %v3345_v42 = vmul.f32 1.442695, %v3323_v34  ;;  %v3542_v15 = vpack.c.bf16 %v5695_v8, %v5694_v21 }
 0x38a   : > { %v6415_v46 = vpop.eup %6414  ;;  %v3410_v58 = vadd.f32 1.0, %v6413_v38  ;;  %v3413_v23 = vmul.f32 -0.5, %v6413_v38  ;;  %v3416_v41 = vand.u32 2147483647, %v6413_v38 }
 0x38b   : > { %6416 = vpow2.f32 %v3345_v42  ;;  %5721 = vmatmul.msk.bf16.gmra.mxu3 %vm1420_vm0, %v3542_v15  ;;  %v3403_v26 = vmul.f32 0.6931472, %v6415_v46 }
 0x38c   : > { %v3278_v16 = vpop.f32.mrf.mxu1  ;;  %6418 = vlog2.f32 %v3410_v58  ;;  %v3414_v2 = vadd.f32 1.0, %v3413_v23  ;;  %vm3417_vm8 = vcmp.lt.f32.partialorder %v3416_v41, 0.0004427343 }
 0x38d   : > { %v7979_v43 = vadd.f32 %v7934_v54, %v3278_v16  ;;  %v3409_v25 = vsel %vm3408_vm6, %v3406_v29, %v3403_v26 }
 0x38e   : > { %v3415_v28 = vmul.f32 %v6413_v38, %v3414_v2  ;;  %v3513_v10 = vsel %vm3305_vm7, %v7957_v56, %v3409_v25 }
 0x38f   : > { %v3324_v47 = vmin.f32 %v7979_v43, 20.0  ;;  %v5696_v27 = vadd.f32 -0.6931472, %v3513_v10  ;;  %vm3308_vm7 = vcmp.gt.f32.partialorder %v7979_v43, 20.0 }
 0x391   : > { %v6417_v24 = vpop.eup %6416  ;;  %v3347_v52 = vmul.f32 1.442695, %v3324_v47 }
 0x392   : > { %v6419_v6 = vpop.eup %6418  ;;  %v3419_v9 = vadd.f32 1.0, %v6417_v24  ;;  %v3422_v19 = vmul.f32 -0.5, %v6417_v24  ;;  %v3425_v8 = vand.u32 2147483647, %v6417_v24 }
 0x393   : > { %6420 = vpow2.f32 %v3347_v52  ;;  %v3412_v51 = vmul.f32 0.6931472, %v6419_v6 }
 0x394   : > { %6422 = vlog2.f32 %v3419_v9  ;;  %v3281_v0 = vpop.f32.mrf.mxu1  ;;  %v3423_v39 = vadd.f32 1.0, %v3422_v19  ;;  %vm3426_vm4 = vcmp.lt.f32.partialorder %v3425_v8, 0.0004427343 }
 0x395   : > { %v7986_v11 = vadd.f32 %v7934_v54, %v3281_v0  ;;  %v3418_v5 = vsel %vm3417_vm8, %v3415_v28, %v3412_v51 }
 0x396   : > { %v3514_v40 = vsel %vm3306_vm2, %v7964_v53, %v3418_v5  ;;  %v3424_v15 = vmul.f32 %v6417_v24, %v3423_v39 }
 0x397   : > { %v3325_v36 = vmin.f32 %v7986_v11, 20.0  ;;  %5795 = vmatmul.msk.bf16.gmra.mxu1 %vm1420_vm0, %v7060_v48  ;;  %v5697_v14 = vadd.f32 -0.6931472, %v3514_v40  ;;  %vm3309_vm2 = vcmp.gt.f32.partialorder %v7986_v11, 20.0 }
 0x399   : > { %v6421_v56 = vpop.eup %6420  ;;  %v3349_v1 = vmul.f32 1.442695, %v3325_v36  ;;  %v3543_v17 = vpack.c.bf16 %v5697_v14, %v5696_v27 }
 0x39a   : > { %v6423_v20 = vpop.eup %6422  ;;  %v3428_v21 = vadd.f32 1.0, %v6421_v56  ;;  %v3431_v34 = vmul.f32 -0.5, %v6421_v56  ;;  %v3434_v58 = vand.u32 2147483647, %v6421_v56 }
 0x39b   : > { %6424 = vpow2.f32 %v3349_v1  ;;  %5722 = vmatmul.msk.bf16.gmra.mxu3 %vm1420_vm0, %v3543_v17  ;;  %v3421_v38 = vmul.f32 0.6931472, %v6423_v20 }
 0x39c   : > { %6426 = vlog2.f32 %v3428_v21  ;;  %v3283_v53 = vpop.f32.mrf.mxu1  ;;  %v3432_v48 = vadd.f32 1.0, %v3431_v34  ;;  %vm3435_vm6 = vcmp.lt.f32.partialorder %v3434_v58, 0.0004427343 }
 0x39d   : > { %v7994_v42 = vadd.f32 %v7934_v54, %v3283_v53  ;;  %v3427_v23 = vsel %vm3426_vm4, %v3424_v15, %v3421_v38 }
 0x39e   : > { %v3433_v47 = vmul.f32 %v6421_v56, %v3432_v48  ;;  %v3515_v2 = vsel %vm3307_vm5, %v7971_v57, %v3427_v23 }
 0x39f   : > { %v3326_v46 = vmin.f32 %v7994_v42, 20.0  ;;  %v5698_v6 = vadd.f32 -0.6931472, %v3515_v2  ;;  %vm3310_vm5 = vcmp.gt.f32.partialorder %v7994_v42, 20.0 }
 0x3a1   : > { %v6425_v45 = vpop.eup %6424  ;;  %v3351_v13 = vmul.f32 1.442695, %v3326_v46 }
 0x3a2   : > { %v6427_v16 = vpop.eup %6426  ;;  %v3437_v26 = vadd.f32 1.0, %v6425_v45  ;;  %v3440_v51 = vmul.f32 -0.5, %v6425_v45  ;;  %v3443_v36 = vand.u32 2147483647, %v6425_v45 }
 0x3a3   : > { %v3430_v29 = vmul.f32 0.6931472, %v6427_v16  ;;  %6428 = vpow2.f32 %v3351_v13 }
 0x3a4   : > { %6430 = vlog2.f32 %v3437_v26  ;;  %v3286_v41 = vpop.f32.mrf.mxu1  ;;  %v3441_v27 = vadd.f32 1.0, %v3440_v51  ;;  %vm3444_vm8 = vcmp.lt.f32.partialorder %v3443_v36, 0.0004427343 }
 0x3a5   : > { %v3436_v24 = vsel %vm3435_vm6, %v3433_v47, %v3430_v29  ;;  %v8001_v25 = vadd.f32 %v7934_v54, %v3286_v41 }
 0x3a6   : > { %v3516_v52 = vsel %vm3308_vm7, %v7979_v43, %v3436_v24  ;;  %v3442_v1 = vmul.f32 %v6425_v45, %v3441_v27 }
 0x3a7   : > { %v5699_v9 = vadd.f32 -0.6931472, %v3516_v52  ;;  %v3327_v28 = vmin.f32 %v8001_v25, 20.0  ;;  %5796 = vmatmul.msk.bf16.gmra.mxu1 %vm1420_vm0, %v7080_v22  ;;  %vm3311_vm7 = vcmp.gt.f32.partialorder %v8001_v25, 20.0 }
 0x3a9   : > { %v6429_v57 = vpop.eup %6428  ;;  %v3353_v10 = vmul.f32 1.442695, %v3327_v28  ;;  %v3544_v0 = vpack.c.bf16 %v5699_v9, %v5698_v6 }
 0x3aa   : > { %v6431_v5 = vpop.eup %6430  ;;  %v3446_v40 = vadd.f32 1.0, %v6429_v57  ;;  %v3449_v19 = vmul.f32 -0.5, %v6429_v57  ;;  %v3452_v20 = vand.u32 2147483647, %v6429_v57 }
 0x3ab   : > { %6432 = vpow2.f32 %v3353_v10  ;;  %5723 = vmatmul.msk.bf16.gmra.mxu3 %vm1420_vm0, %v3544_v0  ;;  %v3439_v14 = vmul.f32 0.6931472, %v6431_v5 }
 0x3ac   : > { %6434 = vlog2.f32 %v3446_v40  ;;  %v3288_v43 = vpop.f32.mrf.mxu1  ;;  %v3450_v17 = vadd.f32 1.0, %v3449_v19  ;;  %vm3453_vm4 = vcmp.lt.f32.partialorder %v3452_v20, 0.0004427343 }
 0x3ad   : > { %v8009_v56 = vadd.f32 %v7934_v54, %v3288_v43  ;;  %v3445_v39 = vsel %vm3444_vm8, %v3442_v1, %v3439_v14 }
 0x3ae   : > { %v3451_v15 = vmul.f32 %v6429_v57, %v3450_v17  ;;  %v3517_v48 = vsel %vm3309_vm2, %v7986_v11, %v3445_v39 }
 0x3af   : > { %v3328_v22 = vmin.f32 %v8009_v56, 20.0  ;;  %v5700_v13 = vadd.f32 -0.6931472, %v3517_v48  ;;  %vm3312_vm2 = vcmp.gt.f32.partialorder %v8009_v56, 20.0 }
 0x3b1   : > { %v6433_v21 = vpop.eup %6432  ;;  %v3355_v34 = vmul.f32 1.442695, %v3328_v22 }
 0x3b2   : > { %v6435_v8 = vpop.eup %6434  ;;  %v3455_v53 = vadd.f32 1.0, %v6433_v21  ;;  %v3458_v26 = vmul.f32 -0.5, %v6433_v21  ;;  %v3461_v9 = vand.u32 2147483647, %v6433_v21 }
 0x3b3   : > { %v3448_v38 = vmul.f32 0.6931472, %v6435_v8  ;;  %6436 = vpow2.f32 %v3355_v34 }
 0x3b4   : > { %6438 = vlog2.f32 %v3455_v53  ;;  %v3291_v46 = vpop.f32.mrf.mxu1  ;;  %v3459_v52 = vadd.f32 1.0, %v3458_v26  ;;  %vm3462_vm6 = vcmp.lt.f32.partialorder %v3461_v9, 0.0004427343 }
 0x3b5   : > { %v3454_v58 = vsel %vm3453_vm4, %v3451_v15, %v3448_v38  ;;  %v8016_v45 = vadd.f32 %v7934_v54, %v3291_v46 }
 0x3b6   : > { %v3518_v23 = vsel %vm3310_vm5, %v7994_v42, %v3454_v58  ;;  %v3460_v57 = vmul.f32 %v6433_v21, %v3459_v52 }
 0x3b7   : > { %v5701_v16 = vadd.f32 -0.6931472, %v3518_v23  ;;  %v3329_v29 = vmin.f32 %v8016_v45, 20.0  ;;  %5797 = vmatmul.msk.bf16.gmra.mxu1 %vm1420_vm0, %v7113_v55  ;;  %vm3313_vm5 = vcmp.gt.f32.partialorder %v8016_v45, 20.0 }
 0x3b9   : > { %v6437_v11 = vpop.eup %6436  ;;  %v3357_v47 = vmul.f32 1.442695, %v3329_v29  ;;  %v3545_v2 = vpack.c.bf16 %v5701_v16, %v5700_v13 }
 0x3ba   : > { %v6439_v41 = vpop.eup %6438  ;;  %v3464_v24 = vadd.f32 1.0, %v6437_v11  ;;  %v3467_v6 = vmul.f32 -0.5, %v6437_v11  ;;  %v3470_v0 = vand.u32 2147483647, %v6437_v11 }
 0x3bb   : > { %6440 = vpow2.f32 %v3357_v47  ;;  %5724 = vmatmul.msk.bf16.gmra.mxu3 %vm1420_vm0, %v3545_v2  ;;  %v3457_v51 = vmul.f32 0.6931472, %v6439_v41 }
 0x3bc   : > { %6442 = vlog2.f32 %v3464_v24  ;;  %v3293_v42 = vpop.f32.mrf.mxu1  ;;  %v3468_v10 = vadd.f32 1.0, %v3467_v6  ;;  %vm3471_vm8 = vcmp.lt.f32.partialorder %v3470_v0, 0.0004427343  ;;  %v8048_v6 = vld [vmem:[%s8721_s9 + $0x2] ss:$0 sm:$0xff] }
 0x3bd   : > { %v8024_v28 = vadd.f32 %v7934_v54, %v3293_v42  ;;  %v3463_v40 = vsel %vm3462_vm6, %v3460_v57, %v3457_v51  ;;  %v5988_v42 = vld [vmem:[%s8722_s10 + $0x50] sm:$0xff] }
 0x3be   : > { %v3469_v14 = vmul.f32 %v6437_v11, %v3468_v10  ;;  %v3519_v1 = vsel %vm3311_vm7, %v8001_v25, %v3463_v40 }
 0x3bf   : > { %v3330_v55 = vmin.f32 %v8024_v28, 20.0  ;;  %v5702_v39 = vadd.f32 -0.6931472, %v3519_v1  ;;  %vm3314_vm7 = vcmp.gt.f32.partialorder %v8024_v28, 20.0 }
 0x3c1   : > { %v6441_v5 = vpop.eup %6440  ;;  %v3359_v27 = vmul.f32 1.442695, %v3330_v55 }
 0x3c2   : > { %v6443_v19 = vpop.eup %6442  ;;  %v3473_v36 = vadd.f32 1.0, %v6441_v5  ;;  %v3476_v8 = vmul.f32 -0.5, %v6441_v5  ;;  %v3479_v13 = vand.u32 2147483647, %v6441_v5 }
 0x3c3   : > { %v3466_v43 = vmul.f32 0.6931472, %v6443_v19  ;;  %6444 = vpow2.f32 %v3359_v27 }
 0x3c4   : > { %6446 = vlog2.f32 %v3473_v36  ;;  %v3296_v17 = vpop.f32.mrf.mxu1  ;;  %v3477_v58 = vadd.f32 1.0, %v3476_v8  ;;  %vm3480_vm4 = vcmp.lt.f32.partialorder %v3479_v13, 0.0004427343 }
 0x3c5   : > { %v3472_v22 = vsel %vm3471_vm8, %v3469_v14, %v3466_v43  ;;  %v8031_v20 = vadd.f32 %v7934_v54, %v3296_v17 }
 0x3c6   : > { %v3520_v21 = vsel %vm3312_vm2, %v8009_v56, %v3472_v22  ;;  %v3478_v29 = vmul.f32 %v6441_v5, %v3477_v58 }
 0x3c7   : > { %v5703_v34 = vadd.f32 -0.6931472, %v3520_v21  ;;  %v3331_v53 = vmin.f32 %v8031_v20, 20.0  ;;  %5798 = vmatmul.msk.bf16.gmra.mxu1 %vm1420_vm0, %v7148_v44  ;;  %v5989_v44 = vld [vmem:[%s8722_s10 + $0x58] sm:$0xff]  ;;  %vm3315_vm2 = vcmp.gt.f32.partialorder %v8031_v20, 20.0 }
 0x3c8   : > { %4475 = vmatpush.bf16.msrb.mxu3 %v5989_v44 }
 0x3c9   : > { %v6445_v25 = vpop.eup %6444  ;;  %v3546_v38 = vpack.c.bf16 %v5703_v34, %v5702_v39  ;;  %v3361_v15 = vmul.f32 1.442695, %v3331_v53  ;;  %v5986_v34 = vld [vmem:[%s8722_s10 + $0x40] sm:$0xff] }
 0x3ca   : > { %v6447_v48 = vpop.eup %6446  ;;  %v3482_v46 = vadd.f32 1.0, %v6445_v25  ;;  %v3485_v23 = vmul.f32 -0.5, %v6445_v25  ;;  %v3488_v2 = vand.u32 2147483647, %v6445_v25 }
 0x3cb   : > { %6448 = vpow2.f32 %v3361_v15  ;;  %5725 = vmatmul.msk.bf16.gmra.mxu3 %vm1420_vm0, %v3546_v38  ;;  %v3475_v16 = vmul.f32 0.6931472, %v6447_v48 }
 0x3cc   : > { %6450 = vlog2.f32 %v3482_v46  ;;  %v3298_v56 = vpop.f32.mrf.mxu1  ;;  %v3486_v11 = vadd.f32 1.0, %v3485_v23  ;;  %vm3489_vm6 = vcmp.lt.f32.partialorder %v3488_v2, 0.0004427343  ;;  %4476 = vmatpush.bf16.msrb.mxu3 %v5988_v42 }
 0x3cd   : > { %v8039_v26 = vadd.f32 %v7934_v54, %v3298_v56  ;;  %v3481_v24 = vsel %vm3480_vm4, %v3478_v29, %v3475_v16 }
 0x3ce   : > { %v3487_v57 = vmul.f32 %v6445_v25, %v3486_v11  ;;  %v3521_v10 = vsel %vm3313_vm5, %v8016_v45, %v3481_v24  ;;  %v5987_v45 = vld [vmem:[%s8722_s10 + $0x48] sm:$0xff] }
 0x3cf   : > { %v3332_v47 = vmin.f32 %v8039_v26, 20.0  ;;  %v5704_v19 = vadd.f32 -0.6931472, %v3521_v10  ;;  %vm3316_vm5 = vcmp.gt.f32.partialorder %v8039_v26, 20.0 }
 0x3d0   : > { %4477 = vmatpush.bf16.msrb.mxu3 %v5987_v45 }
 0x3d1   : > { %v6449_v41 = vpop.eup %6448  ;;  %v3363_v52 = vmul.f32 1.442695, %v3332_v47 }
 0x3d2   : > { %v6451_v54 = vpop.eup %6450  ;;  %v3491_v9 = vadd.f32 1.0, %v6449_v41  ;;  %v3494_v43 = vmul.f32 -0.5, %v6449_v41  ;;  %v3497_v53 = vand.u32 2147483647, %v6449_v41 }
 0x3d3   : > { %v3484_v51 = vmul.f32 0.6931472, %v6451_v54  ;;  %6452 = vpow2.f32 %v3363_v52 }
 0x3d4   : > { %6454 = vlog2.f32 %v3491_v9  ;;  %v8055_v55 = vpop.f32.mrf.mxu3  ;;  %v4126_v0 = vpop.f32.mrf.mxu1  ;;  %4478 = vmatpush.bf16.msrb.mxu3 %v5986_v34  ;;  %vm3498_vm8 = vcmp.lt.f32.partialorder %v3497_v53, 0.0004427343 }
 0x3d5   : > { %v3490_v5 = vsel %vm3489_vm6, %v3487_v57, %v3484_v51  ;;  %v8059_v40 = vadd.f32 %v8048_v6, %v4126_v0  ;;  %3641 = vrot.lane.b32.xlu0 %v8055_v55, %s8788_s20 }
 0x3d6   : > { %v3522_v27 = vsel %vm3314_vm7, %v8024_v28, %v3490_v5  ;;  %v3495_v28 = vadd.f32 1.0, %v3494_v43 }
 0x3d7   : > { %v5705_v36 = vadd.f32 -0.6931472, %v3522_v27  ;;  %v4182_v14 = vmin.f32 %v8059_v40, 20.0  ;;  %vm4166_vm7 = vcmp.gt.f32.partialorder %v8059_v40, 20.0 }
 0x3d8   : > { %v3496_v46 = vmul.f32 %v6449_v41, %v3495_v28 }
 0x3d9   : > { %v6453_v1 = vpop.eup %6452  ;;  %v3547_v17 = vpack.c.bf16 %v5705_v36, %v5704_v19  ;;  %v4198_v22 = vmul.f32 1.442695, %v4182_v14 }
 0x3da   : > { %v6455_v21 = vpop.eup %6454  ;;  %v3500_v39 = vadd.f32 1.0, %v6453_v1  ;;  %v3503_v8 = vmul.f32 -0.5, %v6453_v1  ;;  %v3506_v13 = vand.u32 2147483647, %v6453_v1 }
 0x3db   : > { %6456 = vpow2.f32 %v4198_v22  ;;  %5726 = vmatmul.msk.bf16.gmra.mxu3 %vm1420_vm0, %v3547_v17  ;;  %v3493_v15 = vmul.f32 0.6931472, %v6455_v21 }
 0x3dc   : > { %6458 = vlog2.f32 %v3500_v39  ;;  %v8072_v25 = vpop.f32.mrf.mxu3  ;;  %v4128_v38 = vpop.f32.mrf.mxu1  ;;  %v3504_v58 = vadd.f32 1.0, %v3503_v8  ;;  %vm3507_vm4 = vcmp.lt.f32.partialorder %v3506_v13, 0.0004427343 }
 0x3dd   : > { %v8075_v48 = vadd.f32 %v8048_v6, %v4128_v38  ;;  %3643 = vrot.lane.b32.xlu1 %v8072_v25, %s8788_s20  ;;  %v3499_v16 = vsel %vm3498_vm8, %v3496_v46, %v3493_v15 }
 0x3de   : > { %v3505_v2 = vmul.f32 %v6453_v1, %v3504_v58  ;;  %v3523_v24 = vsel %vm3315_vm2, %v8031_v20, %v3499_v16 }
 0x3df   : > { %v4183_v23 = vmin.f32 %v8075_v48, 20.0  ;;  %v5706_v42 = vadd.f32 -0.6931472, %v3523_v24  ;;  %vm4167_vm2 = vcmp.gt.f32.partialorder %v8075_v48, 20.0 }
 0x3e1   : > { %v6457_v56 = vpop.eup %6456  ;;  %v4200_v44 = vmul.f32 1.442695, %v4183_v23 }
 0x3e2   : > { %v6459_v29 = vpop.eup %6458  ;;  %v4230_v11 = vadd.f32 1.0, %v6457_v56  ;;  %v4233_v57 = vmul.f32 -0.5, %v6457_v56  ;;  %v4236_v43 = vand.u32 2147483647, %v6457_v56 }
 0x3e3   : > { %v3502_v47 = vmul.f32 0.6931472, %v6459_v29  ;;  %6460 = vpow2.f32 %v4200_v44 }
 0x3e4   : > { %6462 = vlog2.f32 %v4230_v11  ;;  %v4131_v41 = vpop.f32.mrf.mxu1  ;;  %v4234_v19 = vadd.f32 1.0, %v4233_v57  ;;  %vm4237_vm6 = vcmp.lt.f32.partialorder %v4236_v43, 0.0004427343 }
 0x3e5   : > { %v3508_v52 = vsel %vm3507_vm4, %v3505_v2, %v3502_v47  ;;  %v8084_v54 = vadd.f32 %v8048_v6, %v4131_v41 }
 0x3e6   : > { %v3524_v9 = vsel %vm3316_vm5, %v8039_v26, %v3508_v52  ;;  %v4235_v17 = vmul.f32 %v6457_v56, %v4234_v19 }
 0x3e7   : > { %v5707_v51 = vadd.f32 -0.6931472, %v3524_v9  ;;  %v4184_v10 = vmin.f32 %v8084_v54, 20.0  ;;  %vm4168_vm5 = vcmp.gt.f32.partialorder %v8084_v54, 20.0 }
 0x3e9   : > { %v6461_v0 = vpop.eup %6460  ;;  %v3548_v5 = vpack.c.bf16 %v5707_v51, %v5706_v42  ;;  %v4202_v27 = vmul.f32 1.442695, %v4184_v10 }
 0x3ea   : > { %v6463_v20 = vpop.eup %6462  ;;  %v4239_v45 = vadd.f32 1.0, %v6461_v0  ;;  %v4242_v36 = vmul.f32 -0.5, %v6461_v0  ;;  %v4245_v39 = vand.u32 2147483647, %v6461_v0 }
 0x3eb   : > { %6464 = vpow2.f32 %v4202_v27  ;;  %5727 = vmatmul.msk.bf16.gmra.mxu3 %vm1420_vm0, %v3548_v5  ;;  %v4232_v1 = vmul.f32 0.6931472, %v6463_v20 }
 0x3ec   : > { %6466 = vlog2.f32 %v4239_v45  ;;  %v4133_v14 = vpop.f32.mrf.mxu1  ;;  %v4243_v22 = vadd.f32 1.0, %v4242_v36  ;;  %vm4246_vm8 = vcmp.lt.f32.partialorder %v4245_v39, 0.0004427343  ;;  %v8109_v45 = vld [vmem:[%s8717_s5] sm:$0xff] }
 0x3ed   : > { %v8090_v26 = vadd.f32 %v8048_v6, %v4133_v14  ;;  %v4238_v28 = vsel %vm4237_vm6, %v4235_v17, %v4232_v1 }
 0x3ee   : > { %v4244_v46 = vmul.f32 %v6461_v0, %v4243_v22  ;;  %v4374_v58 = vsel %vm4166_vm7, %v8059_v40, %v4238_v28 }
 0x3ef   : > { %v4185_v21 = vmin.f32 %v8090_v26, 20.0  ;;  %v5799_v44 = vadd.f32 -0.6931472, %v4374_v58  ;;  %vm4169_vm7 = vcmp.gt.f32.partialorder %v8090_v26, 20.0 }
 0x3f1   : > { %v6465_v34 = vpop.eup %6464  ;;  %v4204_v8 = vmul.f32 1.442695, %v4185_v21 }
 0x3f2   : > { %v6467_v53 = vpop.eup %6466  ;;  %v4248_v38 = vadd.f32 1.0, %v6465_v34  ;;  %v4251_v11 = vmul.f32 -0.5, %v6465_v34  ;;  %v4254_v51 = vand.u32 2147483647, %v6465_v34 }
 0x3f3   : > { %v4241_v15 = vmul.f32 0.6931472, %v6467_v53  ;;  %6468 = vpow2.f32 %v4204_v8 }
 0x3f4   : > { %6470 = vlog2.f32 %v4248_v38  ;;  %v4136_v23 = vpop.f32.mrf.mxu1  ;;  %v4252_v9 = vadd.f32 1.0, %v4251_v11  ;;  %vm4255_vm4 = vcmp.lt.f32.partialorder %v4254_v51, 0.0004427343 }
 0x3f5   : > { %v4247_v13 = vsel %vm4246_vm8, %v4244_v46, %v4241_v15  ;;  %v8097_v56 = vadd.f32 %v8048_v6, %v4136_v23 }
 0x3f6   : > { %v4375_v16 = vsel %vm4167_vm2, %v8075_v48, %v4247_v13  ;;  %v4253_v5 = vmul.f32 %v6465_v34, %v4252_v9 }
 0x3f7   : > { %v5800_v29 = vadd.f32 -0.6931472, %v4375_v16  ;;  %v4186_v47 = vmin.f32 %v8097_v56, 20.0  ;;  %vm4170_vm2 = vcmp.gt.f32.partialorder %v8097_v56, 20.0 }
 0x3f9   : > { %v6469_v2 = vpop.eup %6468  ;;  %v4406_v24 = vpack.c.bf16 %v5800_v29, %v5799_v44  ;;  %v4206_v41 = vmul.f32 1.442695, %v4186_v47 }
 0x3fa   : > { %v6471_v40 = vpop.eup %6470  ;;  %v4257_v52 = vadd.f32 1.0, %v6469_v2  ;;  %v4260_v42 = vmul.f32 -0.5, %v6469_v2  ;;  %v4263_v36 = vand.u32 2147483647, %v6469_v2 }
 0x3fb   : > { %6472 = vpow2.f32 %v4206_v41  ;;  %5839 = vmatmul.msk.bf16.vlgmr.msrb.gmra.mxu3 %vm1838_vm13, %v4406_v24  ;;  %v4250_v10 = vmul.f32 0.6931472, %v6471_v40 }
 0x3fc   : > { %6474 = vlog2.f32 %v4257_v52  ;;  %v4138_v57 = vpop.f32.mrf.mxu1  ;;  %v4261_v27 = vadd.f32 1.0, %v4260_v42  ;;  %vm4264_vm6 = vcmp.lt.f32.partialorder %v4263_v36, 0.0004427343 }
 0x3fd   : > { %v8103_v48 = vadd.f32 %v8048_v6, %v4138_v57  ;;  %v4256_v14 = vsel %vm4255_vm4, %v4253_v5, %v4250_v10 }
 0x3fe   : > { %v3599_v0 = vpop.f32.mrf.mxu3  ;;  %v4262_v28 = vmul.f32 %v6469_v2, %v4261_v27  ;;  %v4376_v8 = vsel %vm4168_vm5, %v8084_v54, %v4256_v14 }
 0x3ff   : > { %v4187_v20 = vmin.f32 %v8103_v48, 20.0  ;;  %v3793_v19 = vmul.f32 %v8109_v45, %v3599_v0  ;;  %v5801_v16 = vadd.f32 -0.6931472, %v4376_v8  ;;  %vm4171_vm4 = vcmp.gt.f32.partialorder %v8103_v48, 20.0 }
 0x401   : > { %v6473_v43 = vpop.eup %6472  ;;  %v4208_v1 = vmul.f32 1.442695, %v4187_v20  ;;  %v3809_v17 = vsel %vm1420_vm0, %v3793_v19, 0.0 }
 0x402   : > { %v6475_v22 = vpop.eup %6474  ;;  %v4266_v21 = vadd.f32 1.0, %v6473_v43  ;;  %v3810_v39 = vrot.slane %v3809_v17, 4  ;;  %v4269_v46 = vmul.f32 -0.5, %v6473_v43  ;;  %v4272_v9 = vand.u32 2147483647, %v6473_v43 }
 0x403   : > { %v4259_v34 = vmul.f32 0.6931472, %v6475_v22  ;;  %6476 = vpow2.f32 %v4208_v1 }
 0x404   : > { %6478 = vlog2.f32 %v4266_v21  ;;  %v3811_v53 = vadd.f32 %v3810_v39, %v3809_v17  ;;  %v4141_v38 = vpop.f32.mrf.mxu1  ;;  %v4270_v24 = vadd.f32 1.0, %v4269_v46  ;;  %vm4273_vm8 = vcmp.lt.f32.partialorder %v4272_v9, 0.0004427343 }
 0x405   : > { %v4265_v15 = vsel %vm4264_vm6, %v4262_v28, %v4259_v34  ;;  %v8117_v58 = vadd.f32 %v8048_v6, %v4141_v38 }
 0x406   : > { %v4377_v23 = vsel %vm4169_vm7, %v8090_v26, %v4265_v15  ;;  %v3601_v13 = vpop.f32.mrf.mxu3  ;;  %v3812_v11 = vrot.slane %v3811_v53, 2  ;;  %v4271_v5 = vmul.f32 %v6473_v43, %v4270_v24 }
 0x407   : > { %v5802_v44 = vadd.f32 -0.6931472, %v4377_v23  ;;  %v4188_v29 = vmin.f32 %v8117_v58, 20.0  ;;  %v3794_v54 = vmul.f32 %v8109_v45, %v3601_v13  ;;  %vm4172_vm7 = vcmp.gt.f32.partialorder %v8117_v58, 20.0 }
 0x408   : > { %v3813_v10 = vadd.f32 %v3812_v11, %v3811_v53 }
 0x409   : > { %v6477_v47 = vpop.eup %6476  ;;  %v4407_v2 = vpack.c.bf16 %v5802_v44, %v5801_v16  ;;  %v4210_v41 = vmul.f32 1.442695, %v4188_v29  ;;  %v3816_v40 = vsel %vm1420_vm0, %v3794_v54, 0.0 }
 0x40a   : > { %v6479_v52 = vpop.eup %6478  ;;  %v4275_v42 = vadd.f32 1.0, %v6477_v47  ;;  %v4278_v51 = vmul.f32 -0.5, %v6477_v47  ;;  %v3817_v26 = vrot.slane %v3816_v40, 4  ;;  %v4281_v22 = vand.u32 2147483647, %v6477_v47 }
 0x40b   : > { %v4268_v57 = vmul.f32 0.6931472, %v6479_v52  ;;  %6480 = vpow2.f32 %v4210_v41  ;;  %5840 = vmatmul.msk.bf16.gmra.mxu3 %vm1838_vm13, %v4407_v2  ;;  %v3814_v21 = vrot.slane %v3813_v10, 1 }
 0x40c   : > { %6482 = vlog2.f32 %v4275_v42  ;;  %v4143_v0 = vpop.f32.mrf.mxu1  ;;  %v3818_v27 = vadd.f32 %v3817_v26, %v3816_v40  ;;  %v4279_v19 = vadd.f32 1.0, %v4278_v51  ;;  %vm4282_vm5 = vcmp.lt.f32.partialorder %v4281_v22, 0.0004427343 }
 0x40d   : > { %v8125_v20 = vadd.f32 %v8048_v6, %v4143_v0  ;;  %v4274_v14 = vsel %vm4273_vm8, %v4271_v5, %v4268_v57  ;;  %v3815_v44 = vadd.f32 %v3814_v21, %v3813_v10 }
 0x40e   : > { %v3604_v36 = vpop.f32.mrf.mxu3  ;;  %v3819_v1 = vrot.slane %v3818_v27, 2  ;;  %v4378_v53 = vsel %vm4170_vm2, %v8097_v56, %v4274_v14  ;;  %v4280_v38 = vmul.f32 %v6477_v47, %v4279_v19 }
 0x40f   : > { %v4189_v17 = vmin.f32 %v8125_v20, 20.0  ;;  %v3795_v39 = vmul.f32 %v8109_v45, %v3604_v36  ;;  %v5803_v56 = vadd.f32 -0.6931472, %v4378_v53  ;;  %vm4173_vm2 = vcmp.gt.f32.partialorder %v8125_v20, 20.0 }
 0x410   : > { %v3820_v28 = vadd.f32 %v3819_v1, %v3818_v27 }
 0x411   : > { %v6481_v34 = vpop.eup %6480  ;;  %v4212_v43 = vmul.f32 1.442695, %v4189_v17  ;;  %v3823_v46 = vsel %vm1420_vm0, %v3795_v39, 0.0 }
 0x412   : > { %v6483_v8 = vpop.eup %6482  ;;  %v4284_v15 = vadd.f32 1.0, %v6481_v34  ;;  %v3821_v13 = vrot.slane %v3820_v28, 1  ;;  %v3824_v16 = vrot.slane %v3823_v46, 4  ;;  %v4287_v52 = vmul.f32 -0.5, %v6481_v34 }
 0x413   : > { %v4277_v23 = vmul.f32 0.6931472, %v6483_v8  ;;  %6484 = vpow2.f32 %v4212_v43  ;;  %v4290_v17 = vand.u32 2147483647, %v6481_v34 }
 0x414   : > { %6486 = vlog2.f32 %v4284_v15  ;;  %v4146_v29 = vpop.f32.mrf.mxu1  ;;  %v3822_v11 = vadd.f32 %v3821_v13, %v3820_v28  ;;  %v3825_v2 = vadd.f32 %v3824_v16, %v3823_v46  ;;  %v4288_v36 = vadd.f32 1.0, %v4287_v52 }
 0x415   : > { %v4283_v54 = vsel %vm4282_vm5, %v4280_v38, %v4277_v23  ;;  %v8134_v24 = vadd.f32 %v8048_v6, %v4146_v29  ;;  %vm8147_vm6 = vcmp.lt.f32.partialorder %v4290_v17, 0.0004427343 }
 0x416   : > { %v4379_v47 = vsel %vm4171_vm4, %v8103_v48, %v4283_v54  ;;  %v3606_v41 = vpop.f32.mrf.mxu3  ;;  %v3969_v9 = vsel %vm2640_vm9, %v3822_v11, %v3815_v44  ;;  %v3826_v42 = vrot.slane %v3825_v2, 2  ;;  %v4289_v38 = vmul.f32 %v6481_v34, %v4288_v36 }
 0x417   : > { %v5804_v40 = vadd.f32 -0.6931472, %v4379_v47  ;;  %v4190_v51 = vmin.f32 %v8134_v24, 20.0  ;;  %v3796_v57 = vmul.f32 %v8109_v45, %v3606_v41  ;;  %vm4174_vm5 = vcmp.gt.f32.partialorder %v8134_v24, 20.0 }
 0x418   : > { %v3827_v0 = vadd.f32 %v3826_v42, %v3825_v2 }
 0x419   : > { %v6485_v26 = vpop.eup %6484  ;;  %v4408_v10 = vpack.c.bf16 %v5804_v40, %v5803_v56  ;;  %v4214_v19 = vmul.f32 1.442695, %v4190_v51  ;;  %v3830_v48 = vsel %vm1420_vm0, %v3796_v57, 0.0 }
 0x41a   : > { %v6487_v5 = vpop.eup %6486  ;;  %v4293_v27 = vadd.f32 1.0, %v6485_v26  ;;  %v4296_v14 = vmul.f32 -0.5, %v6485_v26  ;;  %v3828_v1 = vrot.slane %v3827_v0, 1  ;;  %v3831_v22 = vrot.slane %v3830_v48, 4 }
 0x41b   : > { %5841 = vmatmul.msk.bf16.gmra.mxu3 %vm1838_vm13, %v4408_v10  ;;  %v4286_v39 = vmul.f32 0.6931472, %v6487_v5  ;;  %v4299_v16 = vand.u32 2147483647, %v6485_v26 }
 0x41c   : > { %6488 = vlog2.f32 %v4293_v27  ;;  %v4148_v21 = vpop.f32.mrf.mxu1  ;;  %v3829_v28 = vadd.f32 %v3828_v1, %v3827_v0  ;;  %v3832_v8 = vadd.f32 %v3831_v22, %v3830_v48  ;;  %v4297_v15 = vadd.f32 1.0, %v4296_v14  ;;  %v8161_v27 = vpop.f32.mrf.mxu0 }
 0x41d   : > { %6490 = vpow2.f32 %v4214_v19  ;;  %v8143_v43 = vadd.f32 %v8048_v6, %v4148_v21  ;;  %v4292_v54 = vsel %vm8147_vm6, %v4289_v38, %v4286_v39  ;;  %vm4300_vm8 = vcmp.lt.f32.partialorder %v4299_v16, 0.0004427343 }
 0x41e   : > { %v3609_v53 = vpop.f32.mrf.mxu3  ;;  %v3970_v46 = vsel %vm2642_vm10, %v3829_v28, %v3969_v9  ;;  %v3833_v44 = vrot.slane %v3832_v8, 2  ;;  %v4298_v40 = vmul.f32 %v6485_v26, %v4297_v15  ;;  %v4380_v9 = vsel %vm4172_vm7, %v8117_v58, %v4292_v54 }
 0x41f   : > { %v4191_v23 = vmin.f32 %v8143_v43, 20.0  ;;  %v3797_v29 = vmul.f32 %v8109_v45, %v3609_v53  ;;  %v5805_v14 = vadd.f32 -0.6931472, %v4380_v9  ;;  %vm4175_vm7 = vcmp.gt.f32.partialorder %v8143_v43, 20.0 }
 0x420   : > { %v3834_v34 = vadd.f32 %v3833_v44, %v3832_v8 }
 0x421   : > { %v4216_v11 = vmul.f32 1.442695, %v4191_v23  ;;  %v3837_v56 = vsel %vm1420_vm0, %v3797_v29, 0.0 }
 0x422   : > { %v6489_v2 = vpop.eup %6488  ;;  %v3838_v52 = vrot.slane %v3837_v56, 4  ;;  %v3835_v51 = vrot.slane %v3834_v34, 1 }
 0x423   : > { %v6491_v47 = vpop.eup %6490  ;;  %v4295_v41 = vmul.f32 0.6931472, %v6489_v2  ;;  %6492 = vpow2.f32 %v4216_v11 }
 0x424   : > { %v4302_v42 = vadd.f32 1.0, %v6491_v47  ;;  %v4151_v57 = vpop.f32.mrf.mxu1  ;;  %v3839_v0 = vadd.f32 %v3838_v52, %v3837_v56  ;;  %v4305_v26 = vmul.f32 -0.5, %v6491_v47  ;;  %v3836_v1 = vadd.f32 %v3835_v51, %v3834_v34  ;;  %v8178_v51 = vpop.f32.mrf.mxu0 }
 0x425   : > { %v4301_v10 = vsel %vm4300_vm8, %v4298_v40, %v4295_v41  ;;  %v8159_v5 = vadd.f32 %v8048_v6, %v4151_v57 }
 0x426   : > { %v4381_v19 = vsel %vm4173_vm2, %v8125_v20, %v4301_v10  ;;  %6494 = vlog2.f32 %v4302_v42  ;;  %v3611_v36 = vpop.f32.mrf.mxu3  ;;  %v3840_v48 = vrot.slane %v3839_v0, 2  ;;  %v3971_v28 = vsel %vm2644_vm11, %v3836_v1, %v3970_v46 }
 0x427   : > { %v5806_v58 = vadd.f32 -0.6931472, %v4381_v19  ;;  %v4192_v17 = vmin.f32 %v8159_v5, 20.0  ;;  %v3798_v22 = vmul.f32 %v8109_v45, %v3611_v36  ;;  %v4306_v53 = vadd.f32 1.0, %v4305_v26 }
 0x428   : > { %v3841_v8 = vadd.f32 %v3840_v48, %v3839_v0  ;;  %v4308_v20 = vand.u32 2147483647, %v6491_v47  ;;  %vm4176_vm2 = vcmp.gt.f32.partialorder %v8159_v5, 20.0 }
 0x429   : > { %v6493_v21 = vpop.eup %6492  ;;  %v4409_v39 = vpack.c.bf16 %v5806_v58, %v5805_v14  ;;  %v4218_v15 = vmul.f32 1.442695, %v4192_v17  ;;  %v3844_v16 = vsel %vm1420_vm0, %v3798_v22, 0.0  ;;  %v4307_v34 = vmul.f32 %v6491_v47, %v4306_v53 }
 0x42a   : > { %v4311_v38 = vadd.f32 1.0, %v6493_v21  ;;  %v4314_v23 = vmul.f32 -0.5, %v6493_v21  ;;  %v3842_v13 = vrot.slane %v3841_v8, 1  ;;  %v3845_v29 = vrot.slane %v3844_v16, 4 }
 0x42b   : > { %5842 = vmatmul.msk.bf16.gmra.mxu3 %vm1838_vm13, %v4409_v39  ;;  %vm8172_vm4 = vcmp.lt.f32.partialorder %v4308_v20, 0.0004427343  ;;  %v4317_v10 = vand.u32 2147483647, %v6493_v21 }
 0x42c   : > { %v6495_v44 = vpop.eup %6494  ;;  %6496 = vlog2.f32 %v4311_v38  ;;  %v4153_v54 = vpop.f32.mrf.mxu1  ;;  %v3843_v2 = vadd.f32 %v3842_v13, %v3841_v8  ;;  %v3846_v56 = vadd.f32 %v3845_v29, %v3844_v16  ;;  %v4315_v52 = vadd.f32 1.0, %v4314_v23 }
 0x42d   : > { %v4304_v11 = vmul.f32 0.6931472, %v6495_v44  ;;  %6498 = vpow2.f32 %v4218_v15  ;;  %v8170_v46 = vadd.f32 %v8048_v6, %v4153_v54  ;;  %vm4318_vm6 = vcmp.lt.f32.partialorder %v4317_v10, 0.0004427343 }
 0x42e   : > { %v3614_v41 = vpop.f32.mrf.mxu3  ;;  %v3847_v0 = vrot.slane %v3846_v56, 2  ;;  %v3972_v47 = vsel %vm2646_vm12, %v3843_v2, %v3971_v28  ;;  %v4316_v22 = vmul.f32 %v6493_v21, %v4315_v52 }
 0x42f   : > { %v4193_v9 = vmin.f32 %v8170_v46, 20.0  ;;  %v3799_v42 = vmul.f32 %v8109_v45, %v3614_v41  ;;  %v4310_v57 = vsel %vm8172_vm4, %v4307_v34, %v4304_v11 }
 0x430   : > { %v3848_v14 = vadd.f32 %v3847_v0, %v3846_v56  ;;  %v4382_v48 = vsel %vm4174_vm5, %v8134_v24, %v4310_v57  ;;  %v8193_v56 = vpop.f32.mrf.mxu0  ;;  %vm4177_vm5 = vcmp.gt.f32.partialorder %v8170_v46, 20.0 }
 0x431   : > { %v4220_v19 = vmul.f32 1.442695, %v4193_v9  ;;  %v3851_v26 = vsel %vm1420_vm0, %v3799_v42, 0.0  ;;  %v5807_v20 = vadd.f32 -0.6931472, %v4382_v48 }
 0x432   : > { %v6497_v36 = vpop.eup %6496  ;;  %v3852_v58 = vrot.slane %v3851_v26, 4  ;;  %v3849_v8 = vrot.slane %v3848_v14, 1 }
 0x433   : > { %v6499_v1 = vpop.eup %6498  ;;  %v4313_v17 = vmul.f32 0.6931472, %v6497_v36  ;;  %6500 = vpow2.f32 %v4220_v19 }
 0x434   : > { %v4320_v39 = vadd.f32 1.0, %v6499_v1  ;;  %v4156_v53 = vpop.f32.mrf.mxu1  ;;  %v3853_v38 = vadd.f32 %v3852_v58, %v3851_v26  ;;  %v4323_v16 = vmul.f32 -0.5, %v6499_v1  ;;  %v3850_v21 = vadd.f32 %v3849_v8, %v3848_v14 }
 0x435   : > { %v4319_v28 = vsel %vm4318_vm6, %v4316_v22, %v4313_v17  ;;  %v8188_v15 = vadd.f32 %v8048_v6, %v4156_v53  ;;  %v4326_v57 = vand.u32 2147483647, %v6499_v1 }
 0x436   : > { %v4383_v23 = vsel %vm4175_vm7, %v8143_v43, %v4319_v28  ;;  %6502 = vlog2.f32 %v4320_v39  ;;  %v3616_v13 = vpop.f32.mrf.mxu3  ;;  %v3854_v44 = vrot.slane %v3853_v38, 2  ;;  %v3973_v34 = vsel %vm2648_vm14, %v3850_v21, %v3972_v47 }
 0x437   : > { %v5808_v24 = vadd.f32 -0.6931472, %v4383_v23  ;;  %v4194_v29 = vmin.f32 %v8188_v15, 20.0  ;;  %v4324_v52 = vadd.f32 1.0, %v4323_v16  ;;  %v3800_v58 = vmul.f32 %v8109_v45, %v3616_v13 }
 0x438   : > { %v3855_v2 = vadd.f32 %v3854_v44, %v3853_v38  ;;  %vm4327_vm8 = vcmp.lt.f32.partialorder %v4326_v57, 0.0004427343  ;;  %v8208_v23 = vpop.f32.mrf.mxu0  ;;  %vm4178_vm7 = vcmp.gt.f32.partialorder %v8188_v15, 20.0 }
 0x439   : > { %v6501_v54 = vpop.eup %6500  ;;  %v4410_v11 = vpack.c.bf16 %v5808_v24, %v5807_v20  ;;  %v4222_v40 = vmul.f32 1.442695, %v4194_v29  ;;  %v4325_v36 = vmul.f32 %v6499_v1, %v4324_v52  ;;  %v3858_v1 = vsel %vm1420_vm0, %v3800_v58, 0.0 }
 0x43a   : > { %v4329_v41 = vadd.f32 1.0, %v6501_v54  ;;  %v4332_v9 = vmul.f32 -0.5, %v6501_v54  ;;  %v3856_v43 = vrot.slane %v3855_v2, 1  ;;  %v4335_v17 = vand.u32 2147483647, %v6501_v54 }
 0x43b   : > { %5843 = vmatmul.msk.bf16.gmra.mxu3 %vm1838_vm13, %v4410_v11  ;;  %v3859_v29 = vrot.slane %v3858_v1, 4 }
 0x43c   : > { %v6503_v42 = vpop.eup %6502  ;;  %6504 = vlog2.f32 %v4329_v41  ;;  %v4158_v10 = vpop.f32.mrf.mxu1  ;;  %v3857_v19 = vadd.f32 %v3856_v43, %v3855_v2  ;;  %v4333_v14 = vadd.f32 1.0, %v4332_v9  ;;  %vm4336_vm4 = vcmp.lt.f32.partialorder %v4335_v17, 0.0004427343 }
 0x43d   : > { %v4322_v0 = vmul.f32 0.6931472, %v6503_v42  ;;  %6506 = vpow2.f32 %v4222_v40  ;;  %v8197_v26 = vadd.f32 %v8048_v6, %v4158_v10 }
 0x43e   : > { %v8199_v47 = vpop.f32.mrf.mxu3  ;;  %v8204_v22 = vsel %vm2650_vm15, %v3857_v19, %v3973_v34  ;;  %v4334_v20 = vmul.f32 %v6501_v54, %v4333_v14 }
 0x43f   : > { %v4195_v48 = vmin.f32 %v8197_v26, 20.0  ;;  %v4328_v39 = vsel %vm4327_vm8, %v4325_v36, %v4322_v0 }
 0x440   : > { %v4384_v13 = vsel %vm4176_vm2, %v8159_v5, %v4328_v39  ;;  %v3860_v5 = vadd.f32 %v3859_v29, %v3858_v1  ;;  %v3200_v19 = vpop.f32.mrf.mxu0  ;;  %vm4179_vm2 = vcmp.gt.f32.partialorder %v8197_v26, 20.0 }
 0x441   : > { %v4224_v8 = vmul.f32 1.442695, %v4195_v48  ;;  %v5809_v2 = vadd.f32 -0.6931472, %v4384_v13 }
 0x442   : > { %v6505_v53 = vpop.eup %6504  ;;  %v3861_v36 = vrot.slane %v3860_v5, 2 }
 0x443   : > { %v6507_v28 = vpop.eup %6506  ;;  %v4331_v38 = vmul.f32 0.6931472, %v6505_v53  ;;  %6508 = vpow2.f32 %v4224_v8 }
 0x444   : > { %v4338_v24 = vadd.f32 1.0, %v6507_v28  ;;  %v4161_v16 = vpop.f32.mrf.mxu1  ;;  %v4341_v41 = vmul.f32 -0.5, %v6507_v28  ;;  %v4344_v10 = vand.u32 2147483647, %v6507_v28 }
 0x445   : > { %v4337_v21 = vsel %vm4336_vm4, %v4334_v20, %v4331_v38  ;;  %v8214_v11 = vadd.f32 %v8048_v6, %v4161_v16  ;;  %v3862_v38 = vadd.f32 %v3861_v36, %v3860_v5 }
 0x446   : > { %v4385_v44 = vsel %vm4177_vm5, %v8170_v46, %v4337_v21  ;;  %6510 = vlog2.f32 %v4338_v24  ;;  %v3621_v54 = vpop.f32.mrf.mxu3  ;;  %v4342_v42 = vadd.f32 1.0, %v4341_v41  ;;  %vm4345_vm6 = vcmp.lt.f32.partialorder %v4344_v10, 0.0004427343 }
 0x447   : > { %v5810_v34 = vadd.f32 -0.6931472, %v4385_v44  ;;  %v4196_v43 = vmin.f32 %v8214_v11, 20.0  ;;  %v3642_v20 = vpop.permute.xlu0 %3641  ;;  %v3802_v24 = vmul.f32 %v8109_v45, %v3621_v54  ;;  %v3649_v44 = vmul.f32 %v8161_v27, %v7574_v31 }
 0x448   : > { %v4343_v48 = vmul.f32 %v6507_v28, %v4342_v42  ;;  %v8224_v21 = vsel %vm1420_vm0, %v8055_v55, %v3642_v20  ;;  %v3863_v29 = vrot.slane %v3862_v38, 1  ;;  %v3651_v27 = vmul.f32 %v8193_v56, %v7597_v12  ;;  %v3202_v5 = vpop.f32.mrf.mxu0  ;;  %v5981_v56 = vld [vmem:[%s8727_s15 + $0x58] sm:$0xff] }
 0x449   : > { %v6509_v40 = vpop.eup %6508  ;;  %v4411_v52 = vpack.c.bf16 %v5810_v34, %v5809_v2  ;;  %v4226_v14 = vmul.f32 1.442695, %v4196_v43  ;;  %v3801_v34 = vmul.f32 %v8109_v45, %v8199_v47  ;;  %4046 = vmatpush.bf16.msra.mxu2 %v5981_v56  ;;  %vm4180_vm4 = vcmp.gt.f32.partialorder %v8214_v11, 20.0 }
 0x44a   : > { %v4347_v9 = vadd.f32 1.0, %v6509_v40  ;;  %v4350_v57 = vmul.f32 -0.5, %v6509_v40  ;;  %v4353_v39 = vand.u32 2147483647, %v6509_v40  ;;  %v3864_v42 = vadd.f32 %v3863_v29, %v3862_v38 }
 0x44b   : > { %5844 = vmatmul.msk.bf16.gmra.mxu3 %vm1838_vm13, %v4411_v52  ;;  %v3872_v52 = vsel %vm1420_vm0, %v3802_v24, 0.0 }
 0x44c   : > { %v6511_v46 = vpop.eup %6510  ;;  %6512 = vlog2.f32 %v4347_v9  ;;  %v4351_v17 = vadd.f32 1.0, %v4350_v57  ;;  %vm4354_vm8 = vcmp.lt.f32.partialorder %v4353_v39, 0.0004427343  ;;  %v4163_v9 = vpop.f32.mrf.mxu1  ;;  %v3865_v57 = vsel %vm1420_vm0, %v3801_v34, 0.0 }
 0x44d   : > { %v4340_v0 = vmul.f32 0.6931472, %v6511_v46  ;;  %6514 = vpow2.f32 %v4226_v14  ;;  %v3667_v46 = vmul.f32 %v3651_v27, %v8224_v21  ;;  %v3866_v14 = vrot.slane %v3865_v57, 4 }
 0x44e   : > { %v3624_v58 = vpop.f32.mrf.mxu3  ;;  %v4352_v13 = vmul.f32 %v6509_v40, %v4351_v17  ;;  %v3652_v39 = vmul.f32 %v8208_v23, %v7609_v50  ;;  %v8262_v38 = vsel %vm2652_vm1, %v3864_v42, %v8204_v22 }
 0x44f   : > { %v4346_v8 = vsel %vm4345_vm6, %v4343_v48, %v4340_v0  ;;  %v8246_v0 = vadd.f32 %v8048_v6, %v4163_v9  ;;  %v3695_v6 = vsel %vm1838_vm13, %v3667_v46, 0.0  ;;  %v3867_v23 = vadd.f32 %v3866_v14, %v3865_v57 }
 0x450   : > { %v4386_v16 = vsel %vm4178_vm7, %v8188_v15, %v4346_v8  ;;  %v3650_v15 = vmul.f32 %v8178_v51, %v7577_v7  ;;  %v3873_v51 = vrot.slane %v3872_v52, 4  ;;  %v3668_v24 = vmul.f32 %v3652_v39, %v8224_v21  ;;  %v3205_v29 = vpop.f32.mrf.mxu0 }
 0x451   : > { %v5811_v41 = vadd.f32 -0.6931472, %v4386_v16  ;;  %v4197_v17 = vmin.f32 %v8246_v0, 20.0  ;;  %v3868_v9 = vrot.slane %v3867_v23, 2  ;;  %vm4181_vm7 = vcmp.gt.f32.partialorder %v8246_v0, 20.0 }
 0x452   : > { %v6513_v53 = vpop.eup %6512  ;;  %v3666_v47 = vmul.f32 %v3650_v15, %v8224_v21  ;;  %v3874_v8 = vadd.f32 %v3873_v51, %v3872_v52 }
 0x453   : > { %v4349_v1 = vmul.f32 0.6931472, %v6513_v53  ;;  %v8236_v55 = vpop.eup %6514 }
 0x454   : > { %v4356_v10 = vadd.f32 1.0, %v8236_v55  ;;  %v3688_v48 = vsel %vm1838_vm13, %v3666_v47, 0.0  ;;  %v3875_v34 = vrot.slane %v3874_v8, 2 }
 0x455   : > { %v4355_v28 = vsel %vm4354_vm8, %v4352_v13, %v4349_v1  ;;  %v4228_v1 = vmul.f32 1.442695, %v4197_v17  ;;  %v3653_v13 = vmul.f32 %v3200_v19, %v7619_v3  ;;  %v3689_v16 = vrot.slane %v3688_v48, 4 }
 0x456   : > { %v4387_v2 = vsel %vm4179_vm2, %v8197_v26, %v4355_v28  ;;  %v8231_v54 = vpop.f32.mrf.mxu3  ;;  %v3665_v26 = vmul.f32 %v3649_v44, %v8224_v21  ;;  %6516 = vlog2.f32 %v4356_v10  ;;  %v3803_v28 = vmul.f32 %v8109_v45, %v3624_v58  ;;  %v5980_v58 = vld [vmem:[%s8727_s15 + $0x50] sm:$0xff] }
 0x457   : > { %v5812_v40 = vadd.f32 -0.6931472, %v4387_v2  ;;  %v3696_v44 = vrot.slane %v3695_v6, 4  ;;  %6518 = vpow2.f32 %v4228_v1  ;;  %v4359_v2 = vmul.f32 -0.5, %v8236_v55  ;;  %4047 = vmatpush.bf16.msra.mxu2 %v5980_v58 }
 0x458   : > { %v3681_v36 = vsel %vm1838_vm13, %v3665_v26, 0.0  ;;  %v3669_v22 = vmul.f32 %v3653_v13, %v8224_v21  ;;  %v3702_v19 = vsel %vm1838_vm13, %v3668_v24, 0.0  ;;  %v3879_v52 = vsel %vm1420_vm0, %v3803_v28, 0.0 }
 0x459   : > { %v4412_v43 = vpack.c.bf16 %v5812_v40, %v5811_v41  ;;  %v3682_v20 = vrot.slane %v3681_v36, 4  ;;  %v3654_v41 = vmul.f32 %v3202_v5, %v7633_v33  ;;  %v3690_v40 = vadd.f32 %v3689_v16, %v3688_v48 }
 0x45a   : > { %v3655_v26 = vmul.f32 %v3205_v29, %v7646_v60  ;;  %v4360_v47 = vadd.f32 1.0, %v4359_v2  ;;  %v8277_v42 = vadd.f32 %v3875_v34, %v3874_v8  ;;  %v3709_v57 = vsel %vm1838_vm13, %v3669_v22, 0.0 }
 0x45b   : > { %5845 = vmatmul.msk.bf16.gmra.mxu3 %vm1838_vm13, %v4412_v43  ;;  %v3683_v15 = vadd.f32 %v3682_v20, %v3681_v36  ;;  %v3697_v43 = vadd.f32 %v3696_v44, %v3695_v6  ;;  %v3670_v5 = vmul.f32 %v3654_v41, %v8224_v21  ;;  %v4362_v10 = vand.u32 2147483647, %v8236_v55 }
 0x45c   : > { %v6517_v27 = vpop.eup %6516  ;;  %v3703_v36 = vrot.slane %v3702_v19, 4  ;;  %v3880_v14 = vrot.slane %v3879_v52, 4  ;;  %v3691_v17 = vrot.slane %v3690_v40, 2  ;;  %v8282_v20 = vadd.f32 %v3868_v9, %v3867_v23 }
 0x45d   : > { %v6519_v46 = vpop.eup %6518  ;;  %v3684_v56 = vrot.slane %v3683_v15, 2  ;;  %v4358_v48 = vmul.f32 0.6931472, %v6517_v27  ;;  %v3698_v8 = vrot.slane %v3697_v43, 2  ;;  %v3710_v1 = vrot.slane %v3709_v57, 4 }
 0x45e   : > { %v8258_v53 = vpop.f32.mrf.mxu3  ;;  %v4365_v39 = vadd.f32 1.0, %v6519_v46  ;;  %v4368_v6 = vmul.f32 -0.5, %v6519_v46  ;;  %v3804_v13 = vmul.f32 %v8109_v45, %v8231_v54  ;;  %v4361_v24 = vmul.f32 %v8236_v55, %v4360_v47 }
 0x45f   : > { %v3671_v16 = vmul.f32 %v3655_v26, %v8224_v21  ;;  %v3716_v28 = vsel %vm1838_vm13, %v3670_v5, 0.0  ;;  %vm8289_vm5 = vcmp.lt.f32.partialorder %v4362_v10, 0.0004427343  ;;  %v8294_v23 = vadd.f32 %v3684_v56, %v3683_v15  ;;  %v5979_v10 = vld [vmem:[%s8727_s15 + $0x48] sm:$0xff] }
 0x460   : > { %6520 = vlog2.f32 %v4365_v39  ;;  %v3881_v2 = vadd.f32 %v3880_v14, %v3879_v52  ;;  %v4364_v34 = vsel %vm8289_vm5, %v4361_v24, %v4358_v48  ;;  %v8298_v54 = vadd.f32 %v3691_v17, %v3690_v40  ;;  %4048 = vmatpush.bf16.msra.mxu2 %v5979_v10 }
 0x461   : > { %v3704_v55 = vadd.f32 %v3703_v36, %v3702_v19  ;;  %v4369_v22 = vadd.f32 1.0, %v4368_v6  ;;  %v8300_v41 = vadd.f32 %v3698_v8, %v3697_v43  ;;  %v8302_v58 = vadd.f32 %v3710_v1, %v3709_v57  ;;  %v8319_v6 = vpop.f32.mrf.mxu0 }
 0x462   : > { %v3717_v27 = vrot.slane %v3716_v28, 4  ;;  %v3886_v26 = vsel %vm1420_vm0, %v3804_v13, 0.0  ;;  %v4371_v9 = vand.u32 2147483647, %v6519_v46  ;;  %v3805_v15 = vmul.f32 %v8109_v45, %v8258_v53 }
 0x463   : > { %v3887_v47 = vrot.slane %v3886_v26, 4  ;;  %v4388_v40 = vsel %vm4180_vm4, %v8214_v11, %v4364_v34  ;;  %v3723_v19 = vsel %vm1838_vm13, %v3671_v16, 0.0  ;;  %v3882_v43 = vrot.slane %v3881_v2, 2 }
 0x464   : > { %v4370_v36 = vmul.f32 %v6519_v46, %v4369_v22  ;;  %v3893_v53 = vsel %vm1420_vm0, %v3805_v15, 0.0  ;;  %v3724_v8 = vrot.slane %v3723_v19, 4  ;;  %vm4372_vm6 = vcmp.lt.f32.partialorder %v4371_v9, 0.0004427343 }
 0x465   : > { %v3888_v14 = vadd.f32 %v3887_v47, %v3886_v26  ;;  %v3894_v17 = vrot.slane %v3893_v53, 4  ;;  %v5813_v44 = vadd.f32 -0.6931472, %v4388_v40  ;;  %v3718_v34 = vadd.f32 %v3717_v27, %v3716_v28 }
 0x466   : > { %v3631_v51 = vpop.f32.mrf.mxu3  ;;  %v6521_v56 = vpop.eup %6520  ;;  %v3883_v15 = vadd.f32 %v3882_v43, %v3881_v2  ;;  %v3725_v29 = vadd.f32 %v3724_v8, %v3723_v19  ;;  %v3712_v61 = vrot.slane %v8302_v58, 2  ;;  %v3686_v28 = vrot.slane %v8294_v23, 1 }
 0x467   : > { %v3806_v52 = vmul.f32 %v8109_v45, %v3631_v51  ;;  %v4367_v48 = vmul.f32 0.6931472, %v6521_v56  ;;  %v3889_v1 = vrot.slane %v3888_v14, 2  ;;  %v3895_v24 = vadd.f32 %v3894_v17, %v3893_v53 }
 0x468   : > { %v3719_v40 = vrot.slane %v3718_v34, 2  ;;  %v3884_v2 = vrot.slane %v3883_v15, 1  ;;  %v3870_v19 = vrot.slane %v8282_v20, 1  ;;  %v3700_v8 = vrot.slane %v8300_v41, 1 }
 0x469   : > { %v3900_v51 = vsel %vm1420_vm0, %v3806_v52, 0.0  ;;  %v4373_v46 = vsel %vm4372_vm6, %v4370_v36, %v4367_v48  ;;  %v3896_v52 = vrot.slane %v3895_v24, 2  ;;  %v3890_v10 = vadd.f32 %v3889_v1, %v3888_v14 }
 0x46a   : > { %v3901_v39 = vrot.slane %v3900_v51, 4  ;;  %v4389_v22 = vsel %vm4181_vm7, %v8246_v0, %v4373_v46  ;;  %v3693_v0 = vrot.slane %v8298_v54, 1  ;;  %v3210_v46 = vpop.f32.mrf.mxu0 }
 0x46b   : > { %v5814_v47 = vadd.f32 -0.6931472, %v4389_v22  ;;  %v3897_v36 = vadd.f32 %v3896_v52, %v3895_v24  ;;  %v3891_v17 = vrot.slane %v3890_v10, 1  ;;  %v3871_v52 = vadd.f32 %v3870_v19, %v8282_v20 }
 0x46c   : > { %v3902_v16 = vadd.f32 %v3901_v39, %v3900_v51  ;;  %v3726_v51 = vrot.slane %v3725_v29, 2  ;;  %v3694_v22 = vadd.f32 %v3693_v0, %v8298_v54 }
 0x46d   : > { %v4413_v30 = vpack.c.bf16 %v5814_v47, %v5813_v44  ;;  %v3898_v1 = vrot.slane %v3897_v36, 1  ;;  %v3720_v44 = vadd.f32 %v3719_v40, %v3718_v34 }
 0x46e   : > { %v3634_v5 = vpop.f32.mrf.mxu3  ;;  %v3727_v47 = vadd.f32 %v3726_v51, %v3725_v29 }
 0x46f   : > { %v3807_v57 = vmul.f32 %v8109_v45, %v3634_v5  ;;  %v3903_v5 = vrot.slane %v3902_v16, 2  ;;  %5846 = vmatmul.msk.bf16.gmra.mxu3 %vm1838_vm13, %v4413_v30  ;;  %v3687_v30 = vadd.f32 %v3686_v28, %v8294_v23  ;;  %v3721_v28 = vrot.slane %v3720_v44, 1 }
 0x471   : > { %v3907_v11 = vsel %vm1420_vm0, %v3807_v57, 0.0  ;;  %v3705_v57 = vrot.slane %v3704_v55, 2  ;;  %v3904_v27 = vadd.f32 %v3903_v5, %v3902_v16  ;;  %v3892_v5 = vadd.f32 %v3891_v17, %v3890_v10 }
 0x472   : > { %v3908_v13 = vrot.slane %v3907_v11, 4  ;;  %v3937_v29 = vsel %vm2640_vm9, %v3694_v22, %v3687_v30  ;;  %v5976_v22 = vld [vmem:[%s8727_s15 + $0x30] sm:$0xff] }
 0x473   : > { %v3706_v48 = vadd.f32 %v3705_v57, %v3704_v55  ;;  %v3905_v24 = vrot.slane %v3904_v27, 1  ;;  %v3885_v55 = vadd.f32 %v3884_v2, %v3883_v15  ;;  %v3728_v15 = vrot.slane %v3727_v47, 1 }
 0x474   : > { %v3909_v26 = vadd.f32 %v3908_v13, %v3907_v11  ;;  %v3713_v13 = vadd.f32 %v3712_v61, %v8302_v58 }
 0x475   : > { %v3707_v57 = vrot.slane %v3706_v48, 1  ;;  %v3906_v23 = vadd.f32 %v3905_v24, %v3904_v27  ;;  %v3729_v19 = vadd.f32 %v3728_v15, %v3727_v47  ;;  %v5977_v24 = vld [vmem:[%s8727_s15 + $0x38] sm:$0xff] }
 0x476   : > { %v3910_v56 = vrot.slane %v3909_v26, 2  ;;  %v3636_v9 = vpop.f32.mrf.mxu3  ;;  %v3714_v61 = vrot.slane %v3713_v13, 1 }
 0x477   : > { %v3808_v53 = vmul.f32 %v8109_v45, %v3636_v9  ;;  %v8795_v45 = vrot.slane %v8277_v42, 1  ;;  %v3701_v9 = vadd.f32 %v3700_v8, %v8300_v41  ;;  %v3708_v0 = vadd.f32 %v3707_v57, %v3706_v48  ;;  %v5978_v8 = vld [vmem:[%s8727_s15 + $0x40] sm:$0xff] }
 0x478   : > { %v3911_v43 = vadd.f32 %v3910_v56, %v3909_v26  ;;  %v3899_v56 = vadd.f32 %v3898_v1, %v3897_v36  ;;  %v3715_v40 = vadd.f32 %v3714_v61, %v3713_v13  ;;  %4049 = vmatpush.bf16.msra.mxu2 %v5978_v8 }
 0x479   : > { %v3914_v14 = vsel %vm1420_vm0, %v3808_v53, 0.0  ;;  %v3878_v11 = vadd.f32 %v8795_v45, %v8277_v42  ;;  %v3938_v41 = vsel %vm2642_vm10, %v3701_v9, %v3937_v29 }
 0x47a   : > { %v3915_v39 = vrot.slane %v3914_v14, 4  ;;  %v3912_v26 = vrot.slane %v3911_v43, 1  ;;  %v3939_v51 = vsel %vm2644_vm11, %v3708_v0, %v3938_v41 }
 0x47b   : > { %v3976_v58 = vsel %vm2640_vm9, %v3878_v11, %v3871_v52  ;;  %v3940_v17 = vsel %vm2646_vm12, %v3715_v40, %v3939_v51 }
 0x47c   : > { %v3916_v16 = vadd.f32 %v3915_v39, %v3914_v14  ;;  %v3977_v34 = vsel %vm2642_vm10, %v3885_v55, %v3976_v58  ;;  %v3913_v54 = vadd.f32 %v3912_v26, %v3911_v43  ;;  %v3722_v14 = vadd.f32 %v3721_v28, %v3720_v44  ;;  %v3212_v39 = vpop.f32.mrf.mxu0  ;;  %4050 = vmatpush.bf16.msra.mxu2 %v5977_v24 }
 0x47d   : > { %v3978_v20 = vsel %vm2644_vm11, %v3892_v5, %v3977_v34  ;;  %v3657_v26 = vmul.f32 %v3210_v46, %v7574_v31  ;;  %v3658_v47 = vmul.f32 %v3212_v39, %v7577_v7 }
 0x47e   : > { %v3917_v42 = vrot.slane %v3916_v16, 2  ;;  %v3979_v36 = vsel %vm2646_vm12, %v3899_v56, %v3978_v20  ;;  %v3941_v48 = vsel %vm2648_vm14, %v3722_v14, %v3940_v17 }
 0x47f   : > { %v3980_v27 = vsel %vm2648_vm14, %v3906_v23, %v3979_v36  ;;  %v8356_v1 = vsel %vm2650_vm15, %v3729_v19, %v3941_v48 }
 0x480   : > { %v3918_v53 = vadd.f32 %v3917_v42, %v3916_v16  ;;  %v3981_v43 = vsel %vm2650_vm15, %v3913_v54, %v3980_v27  ;;  %4051 = vmatpush.bf16.msra.mxu2 %v5976_v22 }
 0x482   : > { %v3919_v10 = vrot.slane %v3918_v53, 1 }
 0x484   : > { %v3920_v2 = vadd.f32 %v3919_v10, %v3918_v53  ;;  %v3215_v13 = vpop.f32.mrf.mxu0 }
 0x485   : > { %v3659_v42 = vmul.f32 %v3215_v13, %v7597_v12 }
 0x486   : > { %v3982_v45 = vsel %vm2652_vm1, %v3920_v2, %v3981_v43  ;;  %v3656_v43 = vmul.f32 %v8319_v6, %v7654_v62  ;;  %v5991_v6 = vld [vmem:[%s8723_s11 + $0x28] sm:$0xff] }
 0x487   : > { %v6056_v11 = vpack.i.bf16 %v3982_v45, %v8262_v38  ;;  %v3644_v38 = vpop.permute.xlu1 %3643  ;;  %4548 = vmatpush.bf16.msrb.mxu2 %v5991_v6 }
 0x488   : > { %v3648_v55 = vsel %vm1420_vm0, %v8072_v25, %v3644_v38 }
 0x489   : > { %6057 = vrot.lane.b32.xlu2 %v6056_v11, %s8796_s25  ;;  %v3673_v52 = vmul.f32 %v3657_v26, %v3648_v55  ;;  %v3674_v5 = vmul.f32 %v3658_v47, %v3648_v55  ;;  %v3675_v57 = vmul.f32 %v3659_v42, %v3648_v55 }
 0x48b   : > { %v3737_v9 = vsel %vm1838_vm13, %v3673_v52, 0.0  ;;  %v3744_v61 = vsel %vm1838_vm13, %v3674_v5, 0.0  ;;  %v3751_v28 = vsel %vm1838_vm13, %v3675_v57, 0.0 }
 0x48c   : > { %v3217_v30 = vpop.f32.mrf.mxu0  ;;  %v3738_v53 = vrot.slane %v3737_v9, 4  ;;  %v3745_v25 = vrot.slane %v3744_v61, 4  ;;  %v3752_v34 = vrot.slane %v3751_v28, 4 }
 0x48d   : > { %v3660_v58 = vmul.f32 %v3217_v30, %v7609_v50  ;;  %v3672_v30 = vmul.f32 %v3656_v43, %v8224_v21 }
 0x48e   : > { %v3739_v15 = vadd.f32 %v3738_v53, %v3737_v9  ;;  %v3746_v29 = vadd.f32 %v3745_v25, %v3744_v61  ;;  %v3753_v40 = vadd.f32 %v3752_v34, %v3751_v28 }
 0x48f   : > { %v3676_v23 = vmul.f32 %v3660_v58, %v3648_v55  ;;  %v3730_v42 = vsel %vm1838_vm13, %v3672_v30, 0.0 }
 0x490   : > { %v3740_v27 = vrot.slane %v3739_v15, 2  ;;  %v3747_v14 = vrot.slane %v3746_v29, 2  ;;  %v3754_v39 = vrot.slane %v3753_v40, 2 }
 0x491   : > { %v3758_v20 = vsel %vm1838_vm13, %v3676_v23, 0.0  ;;  %v3731_v23 = vrot.slane %v3730_v42, 4 }
 0x492   : > { %v3759_v41 = vrot.slane %v3758_v20, 4  ;;  %v3741_v8 = vadd.f32 %v3740_v27, %v3739_v15  ;;  %v3748_v13 = vadd.f32 %v3747_v14, %v3746_v29  ;;  %v3755_v38 = vadd.f32 %v3754_v39, %v3753_v40 }
 0x494   : > { %v3220_v16 = vpop.f32.mrf.mxu0  ;;  %v3760_v45 = vadd.f32 %v3759_v41, %v3758_v20  ;;  %v3742_v47 = vrot.slane %v3741_v8, 1  ;;  %v3749_v52 = vrot.slane %v3748_v13, 1 }
 0x495   : > { %v3661_v46 = vmul.f32 %v3220_v16, %v7619_v3 }
 0x496   : > { %v3761_v22 = vrot.slane %v3760_v45, 2  ;;  %v3743_v61 = vadd.f32 %v3742_v47, %v3741_v8  ;;  %v3750_v58 = vadd.f32 %v3749_v52, %v3748_v13  ;;  %v5990_v8 = vld [vmem:[%s8723_s11 + $0x20] sm:$0xff] }
 0x497   : > { %v3677_v54 = vmul.f32 %v3661_v46, %v3648_v55  ;;  %4549 = vmatpush.bf16.msrb.mxu2 %v5990_v8 }
 0x498   : > { %v3944_v20 = vsel %vm2640_vm9, %v3750_v58, %v3743_v61 }
 0x499   : > { %v3765_v51 = vsel %vm1838_vm13, %v3677_v54, 0.0  ;;  %v3732_v54 = vadd.f32 %v3731_v23, %v3730_v42 }
 0x49a   : > { %v3766_v48 = vrot.slane %v3765_v51, 4 }
 0x49b   : > { %v3733_v41 = vrot.slane %v3732_v54, 2 }
 0x49c   : > { %v3222_v44 = vpop.f32.mrf.mxu0  ;;  %v3767_v26 = vadd.f32 %v3766_v48, %v3765_v51 }
 0x49d   : > { %v3662_v10 = vmul.f32 %v3222_v44, %v7633_v33 }
 0x49e   : > { %v3768_v9 = vrot.slane %v3767_v26, 2 }
 0x49f   : > { %v3678_v36 = vmul.f32 %v3662_v10, %v3648_v55 }
 0x4a0   : > { %v3769_v34 = vadd.f32 %v3768_v9, %v3767_v26 }
 0x4a1   : > { %v3772_v11 = vsel %vm1838_vm13, %v3678_v36, 0.0 }
 0x4a2   : > { %v3773_v16 = vrot.slane %v3772_v11, 4  ;;  %v3770_v36 = vrot.slane %v3769_v34, 1 }
 0x4a4   : > { %v3225_v56 = vpop.f32.mrf.mxu0  ;;  %v3774_v21 = vadd.f32 %v3773_v16, %v3772_v11 }
 0x4a5   : > { %v3663_v2 = vmul.f32 %v3225_v56, %v7646_v60  ;;  %v3762_v56 = vadd.f32 %v3761_v22, %v3760_v45 }
 0x4a6   : > { %v3775_v28 = vrot.slane %v3774_v21, 2 }
 0x4a7   : > { %v3679_v17 = vmul.f32 %v3663_v2, %v3648_v55  ;;  %v3763_v15 = vrot.slane %v3762_v56, 1 }
 0x4a9   : > { %v3779_v44 = vsel %vm1838_vm13, %v3679_v17, 0.0  ;;  %v3764_v2 = vadd.f32 %v3763_v15, %v3762_v56  ;;  %v3734_v17 = vadd.f32 %v3733_v41, %v3732_v54  ;;  %v8798_v56 = vld [vmem:[#allocation7_spill] sm:$0xff] }
 0x4aa   : > { %v3780_v5 = vrot.slane %v3779_v44, 4 }
 0x4ab   : > { %v3735_v13 = vrot.slane %v3734_v17, 1 }
 0x4ac   : > { %v3227_v0 = vpop.f32.mrf.mxu0  ;;  %v3781_v25 = vadd.f32 %v3780_v5, %v3779_v44 }
 0x4ad   : > { %v3664_v19 = vmul.f32 %v3227_v0, %v7654_v62  ;;  %v3776_v0 = vadd.f32 %v3775_v28, %v3774_v21  ;;  %v3736_v6 = vadd.f32 %v3735_v13, %v3734_v17  ;;  %v5993_v28 = vld [vmem:[%s8725_s13 + $0x28] sm:$0xff] }
 0x4ae   : > { %v3782_v10 = vrot.slane %v3781_v25, 2 }
 0x4af   : > { %v3680_v24 = vmul.f32 %v3664_v19, %v3648_v55  ;;  %v3756_v55 = vrot.slane %v3755_v38, 1  ;;  %v3777_v51 = vrot.slane %v3776_v0, 1  ;;  %v3771_v19 = vadd.f32 %v3770_v36, %v3769_v34 }
 0x4b0   : > { %v3783_v14 = vadd.f32 %v3782_v10, %v3781_v25  ;;  %v3943_v52 = vsel %vm2652_vm1, %v3736_v6, %v8356_v1  ;;  %v5982_v1 = vld [vmem:[%s8726_s14 + $0x20] sm:$0xff] }
 0x4b1   : > { %v3786_v57 = vsel %vm1838_vm13, %v3680_v24, 0.0  ;;  %v3757_v46 = vadd.f32 %v3756_v55, %v3755_v38  ;;  %v3778_v11 = vadd.f32 %v3777_v51, %v3776_v0  ;;  %v5983_v55 = vld [vmem:[%s8726_s14 + $0x28] sm:$0xff] }
 0x4b2   : > { %v3787_v53 = vrot.slane %v3786_v57, 4  ;;  %v3784_v45 = vrot.slane %v3783_v14, 1  ;;  %4087 = vmatpush.bf16.msrb.mxu0 %v5983_v55 }
 0x4b3   : > { %v3945_v40 = vsel %vm2642_vm10, %v3757_v46, %v3944_v20 }
 0x4b4   : > { %v3788_v29 = vadd.f32 %v3787_v53, %v3786_v57  ;;  %v3946_v43 = vsel %vm2644_vm11, %v3764_v2, %v3945_v40  ;;  %v3785_v16 = vadd.f32 %v3784_v45, %v3783_v14  ;;  %v5992_v40 = vld [vmem:[%s8725_s13 + $0x20] sm:$0xff] }
 0x4b5   : > { %v3947_v48 = vsel %vm2646_vm12, %v3771_v19, %v3946_v43 }
 0x4b6   : > { %v3789_v27 = vrot.slane %v3788_v29, 2  ;;  %v3948_v24 = vsel %vm2648_vm14, %v3778_v11, %v3947_v48  ;;  %4088 = vmatpush.bf16.msrb.mxu0 %v5982_v1 }
 0x4b7   : > { %v3949_v44 = vsel %vm2650_vm15, %v3785_v16, %v3948_v24 }
 0x4b8   : > { %v3790_v39 = vadd.f32 %v3789_v27, %v3788_v29 }
 0x4ba   : > { %v3791_v30 = vrot.slane %v3790_v39, 1  ;;  %4886 = vmatpush.bf16.msra.mxu0 %v5993_v28 }
 0x4bc   : > { %v3792_v38 = vadd.f32 %v3791_v30, %v3790_v39 }
 0x4be   : > { %v3950_v5 = vsel %vm2652_vm1, %v3792_v38, %v3949_v44  ;;  %4887 = vmatpush.bf16.msra.mxu0 %v5992_v40 }
 0x4e3   : > { %v6058_v22 = vpop.permute.xlu2 %6057 }
 0x4e4   : > { %v6060_v26 = vunpack.i.h.bf16 %v6058_v22  ;;  %v6059_v47 = vunpack.i.l.bf16 %v6058_v22 }
 0x4e6   : > { %v3990_v42 = vsel %vm1838_vm13, %v3950_v5, %v6060_v26  ;;  %v3989_v57 = vsel %vm1838_vm13, %v3943_v52, %v6059_v47 }
 0x4e7   : > { %v3991_v21 = vpack.c.bf16 %v3990_v42, %v3989_v57 }
 0x4e9   : > { %5764 = vmatmul.msk.bf16.vlgmr.msra.gmra.mxu2 %vm2750_vm3, %v3991_v21 }
 0x4f9   : > { %5860 = vmatmul.msk.bf16.vlgmr.msrb.gmra.mxu2 %vm1420_vm0, %v6921_v32 }
 0x509   : > { %5861 = vmatmul.msk.bf16.gmra.mxu2 %vm1420_vm0, %v6964_v18 }
 0x519   : > { %5862 = vmatmul.msk.bf16.gmra.mxu2 %vm1420_vm0, %v6990_v59  ;;  %v8797_v59 = vld [vmem:[#allocation6_spill] sm:$0xff] }
 0x529   : > { %5863 = vmatmul.msk.bf16.gmra.mxu2 %vm1420_vm0, %v7005_v37 }
 0x539   : > { %5864 = vmatmul.msk.bf16.gmra.mxu2 %vm1420_vm0, %v7018_v63 }
 0x549   : > { %5865 = vmatmul.msk.bf16.gmra.mxu2 %vm1420_vm0, %v7031_v35  ;;  %v8439_v35 = vld [vmem:[%s8724_s12 + $0x2] ss:$0 sm:$0xff] }
 0x559   : > { %5866 = vmatmul.msk.bf16.gmra.mxu2 %vm1420_vm0, %v7045_v4 }
 0x569   : > { %5867 = vmatmul.msk.bf16.gmra.mxu2 %vm1420_vm0, %v7062_v49 }
 0x56c   : > { %v4053_v32 = vpop.f32.mrf.mxu2 }
 0x56d   : > { %v8428_v37 = vadd.f32 %v4053_v32, %v8797_v59 }
 0x574   : > { %v4055_v18 = vpop.f32.mrf.mxu2 }
 0x575   : > { %v8431_v9 = vadd.f32 %v4055_v18, %v8798_v56 }
 0x577   : > { %v4060_v63 = vpack.c.bf16 %v8431_v9, %v8428_v37 }
 0x579   : > { %5777 = vmatmul.msk.bf16.vlgmr.msrb.gmra.mxu0 %vm1420_vm0, %v4060_v63 }
 0x57c   : > { %v4551_v4 = vpop.f32.mrf.mxu2 }
 0x57d   : > { %v4552_v49 = vadd.f32 %v8439_v35, %v4551_v4 }
 0x57f   : > { %v4607_v61 = vmin.f32 %v4552_v49, 20.0  ;;  %vm4591_vm2 = vcmp.gt.f32.partialorder %v4552_v49, 20.0 }
 0x581   : > { %v4623_v58 = vmul.f32 1.442695, %v4607_v61 }
 0x583   : > { %6522 = vpow2.f32 %v4623_v58 }
 0x584   : > { %v4553_v23 = vpop.f32.mrf.mxu2 }
 0x585   : > { %v4554_v53 = vadd.f32 %v8439_v35, %v4553_v23 }
 0x587   : > { %v4608_v25 = vmin.f32 %v4554_v53, 20.0  ;;  %vm4592_vm5 = vcmp.gt.f32.partialorder %v4554_v53, 20.0 }
 0x589   : > { %v6523_v46 = vpop.eup %6522  ;;  %v4625_v34 = vmul.f32 1.442695, %v4608_v25 }
 0x58a   : > { %v4655_v54 = vadd.f32 1.0, %v6523_v46  ;;  %v4658_v20 = vmul.f32 -0.5, %v6523_v46  ;;  %v4661_v51 = vand.u32 2147483647, %v6523_v46 }
 0x58b   : > { %6524 = vpow2.f32 %v4625_v34 }
 0x58c   : > { %6526 = vlog2.f32 %v4655_v54  ;;  %v4556_v15 = vpop.f32.mrf.mxu2  ;;  %v4659_v27 = vadd.f32 1.0, %v4658_v20  ;;  %vm4662_vm8 = vcmp.lt.f32.partialorder %v4661_v51, 0.0004427343 }
 0x58d   : > { %v8447_v29 = vadd.f32 %v8439_v35, %v4556_v15 }
 0x58e   : > { %v4660_v39 = vmul.f32 %v6523_v46, %v4659_v27 }
 0x58f   : > { %v4609_v10 = vmin.f32 %v8447_v29, 20.0  ;;  %vm4593_vm7 = vcmp.gt.f32.partialorder %v8447_v29, 20.0 }
 0x591   : > { %v6525_v0 = vpop.eup %6524  ;;  %v4627_v36 = vmul.f32 1.442695, %v4609_v10 }
 0x592   : > { %v6527_v41 = vpop.eup %6526  ;;  %v4664_v2 = vadd.f32 1.0, %v6525_v0  ;;  %v4667_v14 = vmul.f32 -0.5, %v6525_v0  ;;  %v4670_v11 = vand.u32 2147483647, %v6525_v0 }
 0x593   : > { %6528 = vpow2.f32 %v4627_v36  ;;  %v4657_v19 = vmul.f32 0.6931472, %v6527_v41 }
 0x594   : > { %6530 = vlog2.f32 %v4664_v2  ;;  %v4558_v43 = vpop.f32.mrf.mxu2  ;;  %v4668_v45 = vadd.f32 1.0, %v4667_v14  ;;  %vm4671_vm4 = vcmp.lt.f32.partialorder %v4670_v11, 0.0004427343 }
 0x595   : > { %v8454_v17 = vadd.f32 %v8439_v35, %v4558_v43  ;;  %v4663_v13 = vsel %vm4662_vm8, %v4660_v39, %v4657_v19 }
 0x596   : > { %v4669_v6 = vmul.f32 %v6525_v0, %v4668_v45  ;;  %v4799_v38 = vsel %vm4591_vm2, %v4552_v49, %v4663_v13 }
 0x597   : > { %v4610_v48 = vmin.f32 %v8454_v17, 20.0  ;;  %v5868_v5 = vadd.f32 -0.6931472, %v4799_v38  ;;  %vm4594_vm2 = vcmp.gt.f32.partialorder %v8454_v17, 20.0 }
 0x599   : > { %v6529_v8 = vpop.eup %6528  ;;  %v4629_v30 = vmul.f32 1.442695, %v4610_v48 }
 0x59a   : > { %v6531_v24 = vpop.eup %6530  ;;  %v4673_v16 = vadd.f32 1.0, %v6529_v8  ;;  %v4676_v57 = vmul.f32 -0.5, %v6529_v8  ;;  %v4679_v4 = vand.u32 2147483647, %v6529_v8 }
 0x59b   : > { %v4666_v44 = vmul.f32 0.6931472, %v6531_v24  ;;  %6532 = vpow2.f32 %v4629_v30 }
 0x59c   : > { %6534 = vlog2.f32 %v4673_v16  ;;  %v4561_v22 = vpop.f32.mrf.mxu2  ;;  %v4677_v56 = vadd.f32 1.0, %v4676_v57  ;;  %vm4680_vm6 = vcmp.lt.f32.partialorder %v4679_v4, 0.0004427343 }
 0x59d   : > { %v4672_v26 = vsel %vm4671_vm4, %v4669_v6, %v4666_v44  ;;  %v8458_v47 = vadd.f32 %v8439_v35, %v4561_v22 }
 0x59e   : > { %v4800_v52 = vsel %vm4592_vm5, %v4554_v53, %v4672_v26  ;;  %v4678_v23 = vmul.f32 %v6529_v8, %v4677_v56 }
 0x59f   : > { %v5869_v42 = vadd.f32 -0.6931472, %v4800_v52  ;;  %v4611_v21 = vmin.f32 %v8458_v47, 20.0  ;;  %vm4595_vm5 = vcmp.gt.f32.partialorder %v8458_v47, 20.0 }
 0x5a1   : > { %v6533_v55 = vpop.eup %6532  ;;  %v4831_v1 = vpack.c.bf16 %v5869_v42, %v5868_v5  ;;  %v4631_v32 = vmul.f32 1.442695, %v4611_v21 }
 0x5a2   : > { %v6535_v18 = vpop.eup %6534  ;;  %v4682_v59 = vadd.f32 1.0, %v6533_v55  ;;  %v4685_v63 = vmul.f32 -0.5, %v6533_v55  ;;  %v4688_v28 = vand.u32 2147483647, %v6533_v55 }
 0x5a3   : > { %6536 = vpow2.f32 %v4631_v32  ;;  %5896 = vmatmul.msk.bf16.vlgmr.msra.gmra.mxu0 %vm1420_vm0, %v4831_v1  ;;  %v4675_v61 = vmul.f32 0.6931472, %v6535_v18 }
 0x5a4   : > { %6538 = vlog2.f32 %v4682_v59  ;;  %v4563_v49 = vpop.f32.mrf.mxu2  ;;  %v4686_v53 = vadd.f32 1.0, %v4685_v63  ;;  %vm4689_vm8 = vcmp.lt.f32.partialorder %v4688_v28, 0.0004427343 }
 0x5a5   : > { %v8463_v58 = vadd.f32 %v8439_v35, %v4563_v49  ;;  %v4681_v34 = vsel %vm4680_vm6, %v4678_v23, %v4675_v61 }
 0x5a6   : > { %v4687_v0 = vmul.f32 %v6533_v55, %v4686_v53  ;;  %v4801_v36 = vsel %vm4593_vm7, %v8447_v29, %v4681_v34 }
 0x5a7   : > { %v4612_v25 = vmin.f32 %v8463_v58, 20.0  ;;  %v5870_v14 = vadd.f32 -0.6931472, %v4801_v36  ;;  %vm4596_vm7 = vcmp.gt.f32.partialorder %v8463_v58, 20.0 }
 0x5a9   : > { %v6537_v46 = vpop.eup %6536  ;;  %v4633_v54 = vmul.f32 1.442695, %v4612_v25 }
 0x5aa   : > { %v6539_v15 = vpop.eup %6538  ;;  %v4691_v20 = vadd.f32 1.0, %v6537_v46  ;;  %v4694_v43 = vmul.f32 -0.5, %v6537_v46  ;;  %v4697_v30 = vand.u32 2147483647, %v6537_v46 }
 0x5ab   : > { %v4684_v10 = vmul.f32 0.6931472, %v6539_v15  ;;  %6540 = vpow2.f32 %v4633_v54 }
 0x5ac   : > { %6542 = vlog2.f32 %v4691_v20  ;;  %v4566_v40 = vpop.f32.mrf.mxu2  ;;  %v4695_v8 = vadd.f32 1.0, %v4694_v43  ;;  %vm4698_vm4 = vcmp.lt.f32.partialorder %v4697_v30, 0.0004427343 }
 0x5ad   : > { %v4690_v41 = vsel %vm4689_vm8, %v4687_v0, %v4684_v10  ;;  %v8470_v2 = vadd.f32 %v8439_v35, %v4566_v40 }
 0x5ae   : > { %v4802_v27 = vsel %vm4594_vm2, %v8454_v17, %v4690_v41  ;;  %v4696_v44 = vmul.f32 %v6537_v46, %v4695_v8 }
 0x5af   : > { %v5871_v51 = vadd.f32 -0.6931472, %v4802_v27  ;;  %v4613_v19 = vmin.f32 %v8470_v2, 20.0  ;;  %vm4597_vm2 = vcmp.gt.f32.partialorder %v8470_v2, 20.0 }
 0x5b1   : > { %v6541_v39 = vpop.eup %6540  ;;  %v4832_v45 = vpack.c.bf16 %v5871_v51, %v5870_v14  ;;  %v4635_v48 = vmul.f32 1.442695, %v4613_v19 }
 0x5b2   : > { %v6543_v29 = vpop.eup %6542  ;;  %v4700_v11 = vadd.f32 1.0, %v6541_v39  ;;  %v4703_v13 = vmul.f32 -0.5, %v6541_v39  ;;  %v4706_v22 = vand.u32 2147483647, %v6541_v39 }
 0x5b3   : > { %6544 = vpow2.f32 %v4635_v48  ;;  %5897 = vmatmul.msk.bf16.gmra.mxu0 %vm1420_vm0, %v4832_v45  ;;  %v4693_v16 = vmul.f32 0.6931472, %v6543_v29 }
 0x5b4   : > { %6546 = vlog2.f32 %v4700_v11  ;;  %v4568_v24 = vpop.f32.mrf.mxu2  ;;  %v4704_v6 = vadd.f32 1.0, %v4703_v13  ;;  %vm4707_vm6 = vcmp.lt.f32.partialorder %v4706_v22, 0.0004427343 }
 0x5b5   : > { %v8476_v17 = vadd.f32 %v8439_v35, %v4568_v24  ;;  %v4699_v52 = vsel %vm4698_vm4, %v4696_v44, %v4693_v16 }
 0x5b6   : > { %v4705_v55 = vmul.f32 %v6541_v39, %v4704_v6  ;;  %v4803_v1 = vsel %vm4595_vm5, %v8458_v47, %v4699_v52 }
 0x5b7   : > { %v4614_v38 = vmin.f32 %v8476_v17, 20.0  ;;  %v5872_v63 = vadd.f32 -0.6931472, %v4803_v1  ;;  %vm4598_vm5 = vcmp.gt.f32.partialorder %v8476_v17, 20.0 }
 0x5b9   : > { %v6545_v26 = vpop.eup %6544  ;;  %v4637_v5 = vmul.f32 1.442695, %v4614_v38 }
 0x5ba   : > { %v6547_v42 = vpop.eup %6546  ;;  %v4709_v57 = vadd.f32 1.0, %v6545_v26  ;;  %v4712_v49 = vmul.f32 -0.5, %v6545_v26  ;;  %v4715_v54 = vand.u32 2147483647, %v6545_v26 }
 0x5bb   : > { %v4702_v21 = vmul.f32 0.6931472, %v6547_v42  ;;  %6548 = vpow2.f32 %v4637_v5 }
 0x5bc   : > { %6550 = vlog2.f32 %v4709_v57  ;;  %v4571_v32 = vpop.f32.mrf.mxu2  ;;  %v4713_v46 = vadd.f32 1.0, %v4712_v49  ;;  %vm4716_vm8 = vcmp.lt.f32.partialorder %v4715_v54, 0.0004427343 }
 0x5bd   : > { %v4708_v18 = vsel %vm4707_vm6, %v4705_v55, %v4702_v21  ;;  %v8483_v59 = vadd.f32 %v8439_v35, %v4571_v32 }
 0x5be   : > { %v4804_v56 = vsel %vm4596_vm7, %v8463_v58, %v4708_v18  ;;  %v4714_v10 = vmul.f32 %v6545_v26, %v4713_v46 }
 0x5bf   : > { %v5873_v4 = vadd.f32 -0.6931472, %v4804_v56  ;;  %v4615_v61 = vmin.f32 %v8483_v59, 20.0  ;;  %vm4599_vm7 = vcmp.gt.f32.partialorder %v8483_v59, 20.0 }
 0x5c1   : > { %v6549_v23 = vpop.eup %6548  ;;  %v4833_v53 = vpack.c.bf16 %v5873_v4, %v5872_v63  ;;  %v4639_v25 = vmul.f32 1.442695, %v4615_v61 }
 0x5c2   : > { %v6551_v47 = vpop.eup %6550  ;;  %v4718_v28 = vadd.f32 1.0, %v6549_v23  ;;  %v4721_v34 = vmul.f32 -0.5, %v6549_v23  ;;  %v4724_v40 = vand.u32 2147483647, %v6549_v23 }
 0x5c3   : > { %6552 = vpow2.f32 %v4639_v25  ;;  %5898 = vmatmul.msk.bf16.gmra.mxu0 %vm1420_vm0, %v4833_v53  ;;  %v4711_v20 = vmul.f32 0.6931472, %v6551_v47 }
 0x5c4   : > { %6554 = vlog2.f32 %v4718_v28  ;;  %v4573_v15 = vpop.f32.mrf.mxu2  ;;  %v4722_v0 = vadd.f32 1.0, %v4721_v34  ;;  %vm4725_vm4 = vcmp.lt.f32.partialorder %v4724_v40, 0.0004427343 }
 0x5c5   : > { %v8489_v58 = vadd.f32 %v8439_v35, %v4573_v15  ;;  %v4717_v27 = vsel %vm4716_vm8, %v4714_v10, %v4711_v20 }
 0x5c6   : > { %v4723_v39 = vmul.f32 %v6549_v23, %v4722_v0  ;;  %v4805_v45 = vsel %vm4597_vm2, %v8470_v2, %v4717_v27 }
 0x5c7   : > { %v4616_v36 = vmin.f32 %v8489_v58, 20.0  ;;  %v5874_v13 = vadd.f32 -0.6931472, %v4805_v45  ;;  %vm4600_vm2 = vcmp.gt.f32.partialorder %v8489_v58, 20.0 }
 0x5c9   : > { %v6553_v41 = vpop.eup %6552  ;;  %v4641_v14 = vmul.f32 1.442695, %v4616_v36 }
 0x5ca   : > { %v6555_v51 = vpop.eup %6554  ;;  %v4727_v43 = vadd.f32 1.0, %v6553_v41  ;;  %v4730_v24 = vmul.f32 -0.5, %v6553_v41  ;;  %v4733_v5 = vand.u32 2147483647, %v6553_v41 }
 0x5cb   : > { %v4720_v19 = vmul.f32 0.6931472, %v6555_v51  ;;  %6556 = vpow2.f32 %v4641_v14 }
 0x5cc   : > { %6558 = vlog2.f32 %v4727_v43  ;;  %v4576_v48 = vpop.f32.mrf.mxu2  ;;  %v4731_v26 = vadd.f32 1.0, %v4730_v24  ;;  %vm4734_vm6 = vcmp.lt.f32.partialorder %v4733_v5, 0.0004427343 }
 0x5cd   : > { %v4726_v29 = vsel %vm4725_vm4, %v4723_v39, %v4720_v19  ;;  %v8496_v11 = vadd.f32 %v8439_v35, %v4576_v48 }
 0x5ce   : > { %v4806_v8 = vsel %vm4598_vm5, %v8476_v17, %v4726_v29  ;;  %v4732_v21 = vmul.f32 %v6553_v41, %v4731_v26 }
 0x5cf   : > { %v5875_v30 = vadd.f32 -0.6931472, %v4806_v8  ;;  %v4617_v16 = vmin.f32 %v8496_v11, 20.0  ;;  %vm4601_vm5 = vcmp.gt.f32.partialorder %v8496_v11, 20.0 }
 0x5d1   : > { %v6557_v44 = vpop.eup %6556  ;;  %v4834_v6 = vpack.c.bf16 %v5875_v30, %v5874_v13  ;;  %v4643_v38 = vmul.f32 1.442695, %v4617_v16 }
 0x5d2   : > { %v6559_v2 = vpop.eup %6558  ;;  %v4736_v22 = vadd.f32 1.0, %v6557_v44  ;;  %v4739_v52 = vmul.f32 -0.5, %v6557_v44  ;;  %v4742_v32 = vand.u32 2147483647, %v6557_v44 }
 0x5d3   : > { %6560 = vpow2.f32 %v4643_v38  ;;  %5899 = vmatmul.msk.bf16.gmra.mxu0 %vm1420_vm0, %v4834_v6  ;;  %v4729_v57 = vmul.f32 0.6931472, %v6559_v2 }
 0x5d4   : > { %6562 = vlog2.f32 %v4736_v22  ;;  %v4578_v42 = vpop.f32.mrf.mxu2  ;;  %v4740_v55 = vadd.f32 1.0, %v4739_v52  ;;  %vm4743_vm8 = vcmp.lt.f32.partialorder %v4742_v32, 0.0004427343 }
 0x5d5   : > { %v8502_v17 = vadd.f32 %v8439_v35, %v4578_v42  ;;  %v4735_v56 = vsel %vm4734_vm6, %v4732_v21, %v4729_v57 }
 0x5d6   : > { %v4741_v23 = vmul.f32 %v6557_v44, %v4740_v55  ;;  %v4807_v53 = vsel %vm4599_vm7, %v8483_v59, %v4735_v56 }
 0x5d7   : > { %v4618_v1 = vmin.f32 %v8502_v17, 20.0  ;;  %v5876_v34 = vadd.f32 -0.6931472, %v4807_v53  ;;  %vm4602_vm7 = vcmp.gt.f32.partialorder %v8502_v17, 20.0 }
 0x5d9   : > { %v6561_v18 = vpop.eup %6560  ;;  %v4645_v63 = vmul.f32 1.442695, %v4618_v1 }
 0x5da   : > { %v6563_v4 = vpop.eup %6562  ;;  %v4745_v49 = vadd.f32 1.0, %v6561_v18  ;;  %v4748_v15 = vmul.f32 -0.5, %v6561_v18  ;;  %v4751_v14 = vand.u32 2147483647, %v6561_v18 }
 0x5db   : > { %v4738_v61 = vmul.f32 0.6931472, %v6563_v4  ;;  %6564 = vpow2.f32 %v4645_v63 }
 0x5dc   : > { %6566 = vlog2.f32 %v4745_v49  ;;  %v4581_v25 = vpop.f32.mrf.mxu2  ;;  %v4749_v41 = vadd.f32 1.0, %v4748_v15  ;;  %vm4752_vm4 = vcmp.lt.f32.partialorder %v4751_v14, 0.0004427343 }
 0x5dd   : > { %v4744_v47 = vsel %vm4743_vm8, %v4741_v23, %v4738_v61  ;;  %v8509_v28 = vadd.f32 %v8439_v35, %v4581_v25 }
 0x5de   : > { %v4808_v46 = vsel %vm4600_vm2, %v8489_v58, %v4744_v47  ;;  %v4750_v19 = vmul.f32 %v6561_v18, %v4749_v41 }
 0x5df   : > { %v5877_v54 = vadd.f32 -0.6931472, %v4808_v46  ;;  %v4619_v20 = vmin.f32 %v8509_v28, 20.0  ;;  %vm4603_vm2 = vcmp.gt.f32.partialorder %v8509_v28, 20.0 }
 0x5e1   : > { %v6565_v10 = vpop.eup %6564  ;;  %v4835_v0 = vpack.c.bf16 %v5877_v54, %v5876_v34  ;;  %v4647_v36 = vmul.f32 1.442695, %v4619_v20 }
 0x5e2   : > { %v6567_v59 = vpop.eup %6566  ;;  %v4754_v40 = vadd.f32 1.0, %v6565_v10  ;;  %v4757_v27 = vmul.f32 -0.5, %v6565_v10  ;;  %v4760_v48 = vand.u32 2147483647, %v6565_v10 }
 0x5e3   : > { %6568 = vpow2.f32 %v4647_v36  ;;  %5900 = vmatmul.msk.bf16.gmra.mxu0 %vm1420_vm0, %v4835_v0  ;;  %v4747_v43 = vmul.f32 0.6931472, %v6567_v59 }
 0x5e4   : > { %6570 = vlog2.f32 %v4754_v40  ;;  %v4583_v51 = vpop.f32.mrf.mxu2  ;;  %v4758_v39 = vadd.f32 1.0, %v4757_v27  ;;  %vm4761_vm6 = vcmp.lt.f32.partialorder %v4760_v48, 0.0004427343 }
 0x5e5   : > { %v8515_v58 = vadd.f32 %v8439_v35, %v4583_v51  ;;  %v4753_v8 = vsel %vm4752_vm4, %v4750_v19, %v4747_v43 }
 0x5e6   : > { %v4759_v44 = vmul.f32 %v6565_v10, %v4758_v39  ;;  %v4809_v6 = vsel %vm4601_vm5, %v8496_v11, %v4753_v8 }
 0x5e7   : > { %v4620_v45 = vmin.f32 %v8515_v58, 20.0  ;;  %v5878_v52 = vadd.f32 -0.6931472, %v4809_v6  ;;  %vm4604_vm5 = vcmp.gt.f32.partialorder %v8515_v58, 20.0 }
 0x5e9   : > { %v6569_v29 = vpop.eup %6568  ;;  %v4649_v13 = vmul.f32 1.442695, %v4620_v45 }
 0x5ea   : > { %v6571_v30 = vpop.eup %6570  ;;  %v4763_v24 = vadd.f32 1.0, %v6569_v29  ;;  %v4766_v42 = vmul.f32 -0.5, %v6569_v29  ;;  %v4769_v63 = vand.u32 2147483647, %v6569_v29 }
 0x5eb   : > { %v4756_v16 = vmul.f32 0.6931472, %v6571_v30  ;;  %6572 = vpow2.f32 %v4649_v13 }
 0x5ec   : > { %6574 = vlog2.f32 %v4763_v24  ;;  %v4586_v38 = vpop.f32.mrf.mxu2  ;;  %v4767_v18 = vadd.f32 1.0, %v4766_v42  ;;  %vm4770_vm8 = vcmp.lt.f32.partialorder %v4769_v63, 0.0004427343 }
 0x5ed   : > { %v4762_v2 = vsel %vm4761_vm6, %v4759_v44, %v4756_v16  ;;  %v8522_v22 = vadd.f32 %v8439_v35, %v4586_v38 }
 0x5ee   : > { %v4810_v26 = vsel %vm4602_vm7, %v8502_v17, %v4762_v2  ;;  %v4768_v23 = vmul.f32 %v6569_v29, %v4767_v18 }
 0x5ef   : > { %v5879_v5 = vadd.f32 -0.6931472, %v4810_v26  ;;  %v4621_v57 = vmin.f32 %v8522_v22, 20.0  ;;  %vm4605_vm7 = vcmp.gt.f32.partialorder %v8522_v22, 20.0 }
 0x5f1   : > { %v6573_v21 = vpop.eup %6572  ;;  %v4836_v55 = vpack.c.bf16 %v5879_v5, %v5878_v52  ;;  %v4651_v1 = vmul.f32 1.442695, %v4621_v57  ;;  %v8547_v57 = vld [vmem:[%s8717_s5] sm:$0xff] }
 0x5f2   : > { %v6575_v11 = vpop.eup %6574  ;;  %v4772_v32 = vadd.f32 1.0, %v6573_v21  ;;  %v4775_v56 = vmul.f32 -0.5, %v6573_v21  ;;  %v4778_v47 = vand.u32 2147483647, %v6573_v21 }
 0x5f3   : > { %6576 = vpow2.f32 %v4651_v1  ;;  %5901 = vmatmul.msk.bf16.gmra.mxu0 %vm1420_vm0, %v4836_v55  ;;  %v4765_v49 = vmul.f32 0.6931472, %v6575_v11 }
 0x5f4   : > { %6578 = vlog2.f32 %v4772_v32  ;;  %v4588_v4 = vpop.f32.mrf.mxu2  ;;  %v4776_v53 = vadd.f32 1.0, %v4775_v56  ;;  %vm4779_vm4 = vcmp.lt.f32.partialorder %v4778_v47, 0.0004427343 }
 0x5f5   : > { %v4589_v17 = vadd.f32 %v8439_v35, %v4588_v4  ;;  %v4771_v34 = vsel %vm4770_vm8, %v4768_v23, %v4765_v49 }
 0x5f6   : > { %v8528_v61 = vpop.f32.mrf.mxu0  ;;  %v4777_v0 = vmul.f32 %v6573_v21, %v4776_v53  ;;  %v4811_v35 = vsel %vm4603_vm2, %v8509_v28, %v4771_v34 }
 0x5f7   : > { %v4622_v25 = vmin.f32 %v4589_v17, 20.0  ;;  %4931 = vrot.lane.b32.xlu0 %v8528_v61, %s8788_s20  ;;  %v5880_v41 = vadd.f32 -0.6931472, %v4811_v35  ;;  %vm4606_vm2 = vcmp.gt.f32.partialorder %v4589_v17, 20.0 }
 0x5f9   : > { %v6577_v46 = vpop.eup %6576  ;;  %v4653_v54 = vmul.f32 1.442695, %v4622_v25 }
 0x5fa   : > { %v6579_v15 = vpop.eup %6578  ;;  %v4781_v20 = vadd.f32 1.0, %v6577_v46  ;;  %v4784_v14 = vmul.f32 -0.5, %v6577_v46  ;;  %v4787_v48 = vand.u32 2147483647, %v6577_v46 }
 0x5fb   : > { %v4774_v10 = vmul.f32 0.6931472, %v6579_v15  ;;  %6580 = vpow2.f32 %v4653_v54 }
 0x5fc   : > { %6582 = vlog2.f32 %v4781_v20  ;;  %v4785_v28 = vadd.f32 1.0, %v4784_v14  ;;  %vm4788_vm6 = vcmp.lt.f32.partialorder %v4787_v48, 0.0004427343 }
 0x5fd   : > { %v4780_v36 = vsel %vm4779_vm4, %v4777_v0, %v4774_v10  ;;  %v8555_v0 = vpop.f32.mrf.mxu3 }
 0x5fe   : > { %v4812_v59 = vsel %vm4604_vm5, %v8515_v58, %v4780_v36  ;;  %v8536_v40 = vpop.f32.mrf.mxu0  ;;  %v4786_v58 = vmul.f32 %v6577_v46, %v4785_v28 }
 0x5ff   : > { %v5881_v27 = vadd.f32 -0.6931472, %v4812_v59  ;;  %4933 = vrot.lane.b32.xlu1 %v8536_v40, %s8788_s20 }
 0x601   : > { %v6581_v51 = vpop.eup %6580  ;;  %v4837_v43 = vpack.c.bf16 %v5881_v27, %v5880_v41 }
 0x602   : > { %v6583_v19 = vpop.eup %6582  ;;  %v4790_v39 = vadd.f32 1.0, %v6581_v51  ;;  %v4793_v45 = vmul.f32 -0.5, %v6581_v51  ;;  %v4796_v13 = vand.u32 2147483647, %v6581_v51 }
 0x603   : > { %5902 = vmatmul.msk.bf16.gmra.mxu0 %vm1420_vm0, %v4837_v43  ;;  %v4783_v29 = vmul.f32 0.6931472, %v6583_v19 }
 0x604   : > { %6584 = vlog2.f32 %v4790_v39  ;;  %v4794_v8 = vadd.f32 1.0, %v4793_v45  ;;  %vm4797_vm8 = vcmp.lt.f32.partialorder %v4796_v13, 0.0004427343 }
 0x605   : > { %v4789_v30 = vsel %vm4788_vm6, %v4786_v58, %v4783_v29  ;;  %v4482_v58 = vpop.f32.mrf.mxu3 }
 0x606   : > { %v4795_v44 = vmul.f32 %v6581_v51, %v4794_v8  ;;  %v4813_v6 = vsel %vm4605_vm7, %v8522_v22, %v4789_v30 }
 0x607   : > { %v5882_v26 = vadd.f32 -0.6931472, %v4813_v6 }
 0x60a   : > { %v6585_v24 = vpop.eup %6584 }
 0x60b   : > { %v4792_v16 = vmul.f32 0.6931472, %v6585_v24 }
 0x60d   : > { %v4798_v38 = vsel %vm4797_vm8, %v4795_v44, %v4792_v16 }
 0x60e   : > { %v4814_v2 = vsel %vm4606_vm2, %v4589_v17, %v4798_v38 }
 0x60f   : > { %v5883_v52 = vadd.f32 -0.6931472, %v4814_v2 }
 0x611   : > { %v4838_v5 = vpack.c.bf16 %v5883_v52, %v5882_v26  ;;  %v4485_v26 = vpop.f32.mrf.mxu3 }
 0x613   : > { %5903 = vmatmul.msk.bf16.gmra.mxu0 %vm1420_vm0, %v4838_v5 }
 0x620   : > { %v4889_v42 = vpop.f32.mrf.mxu0 }
 0x621   : > { %v5083_v21 = vmul.f32 %v8547_v57, %v4889_v42 }
 0x623   : > { %v5099_v55 = vsel %vm1420_vm0, %v5083_v21, 0.0 }
 0x624   : > { %v5100_v22 = vrot.slane %v5099_v55, 4 }
 0x626   : > { %v5101_v1 = vadd.f32 %v5100_v22, %v5099_v55 }
 0x628   : > { %v4891_v11 = vpop.f32.mrf.mxu0  ;;  %v5102_v18 = vrot.slane %v5101_v1, 2 }
 0x629   : > { %v5084_v32 = vmul.f32 %v8547_v57, %v4891_v11 }
 0x62a   : > { %v5103_v4 = vadd.f32 %v5102_v18, %v5101_v1  ;;  %v4487_v1 = vpop.f32.mrf.mxu3 }
 0x62b   : > { %v5106_v56 = vsel %vm1420_vm0, %v5084_v32, 0.0 }
 0x62c   : > { %v5107_v63 = vrot.slane %v5106_v56, 4  ;;  %v5104_v25 = vrot.slane %v5103_v4, 1 }
 0x62e   : > { %v5108_v49 = vadd.f32 %v5107_v63, %v5106_v56  ;;  %v5105_v15 = vadd.f32 %v5104_v25, %v5103_v4 }
 0x630   : > { %v5109_v17 = vrot.slane %v5108_v49, 2  ;;  %v4894_v23 = vpop.f32.mrf.mxu0 }
 0x631   : > { %v5085_v53 = vmul.f32 %v8547_v57, %v4894_v23 }
 0x632   : > { %v5110_v47 = vadd.f32 %v5109_v17, %v5108_v49  ;;  %v4490_v25 = vpop.f32.mrf.mxu3 }
 0x633   : > { %v5113_v46 = vsel %vm1420_vm0, %v5085_v53, 0.0 }
 0x634   : > { %v5111_v34 = vrot.slane %v5110_v47, 1  ;;  %v5114_v54 = vrot.slane %v5113_v46, 4 }
 0x636   : > { %v5112_v20 = vadd.f32 %v5111_v34, %v5110_v47  ;;  %v5115_v10 = vadd.f32 %v5114_v54, %v5113_v46 }
 0x638   : > { %v5259_v35 = vsel %vm2640_vm9, %v5112_v20, %v5105_v15  ;;  %v5116_v36 = vrot.slane %v5115_v10, 2  ;;  %v4896_v59 = vpop.f32.mrf.mxu0 }
 0x639   : > { %v5086_v41 = vmul.f32 %v8547_v57, %v4896_v59 }
 0x63a   : > { %v5117_v27 = vadd.f32 %v5116_v36, %v5115_v10 }
 0x63b   : > { %v5120_v14 = vsel %vm1420_vm0, %v5086_v41, 0.0  ;;  %v4492_v41 = vpop.f32.mrf.mxu3 }
 0x63c   : > { %v5118_v51 = vrot.slane %v5117_v27, 1  ;;  %v5121_v43 = vrot.slane %v5120_v14, 4 }
 0x63e   : > { %v5119_v19 = vadd.f32 %v5118_v51, %v5117_v27  ;;  %v5122_v39 = vadd.f32 %v5121_v43, %v5120_v14 }
 0x640   : > { %v5260_v28 = vsel %vm2642_vm10, %v5119_v19, %v5259_v35  ;;  %v5123_v45 = vrot.slane %v5122_v39, 2  ;;  %v4899_v48 = vpop.f32.mrf.mxu0 }
 0x641   : > { %v5087_v29 = vmul.f32 %v8547_v57, %v4899_v48  ;;  %v4940_v48 = vmul.f32 %v4482_v58, %v7577_v7  ;;  %v4943_v58 = vmul.f32 %v4490_v25, %v7619_v3 }
 0x642   : > { %v5124_v8 = vadd.f32 %v5123_v45, %v5122_v39  ;;  %v4939_v45 = vmul.f32 %v8555_v0, %v7574_v31 }
 0x643   : > { %v5127_v30 = vsel %vm1420_vm0, %v5087_v29, 0.0  ;;  %v4495_v29 = vpop.f32.mrf.mxu3 }
 0x644   : > { %v5125_v13 = vrot.slane %v5124_v8, 1  ;;  %v5128_v16 = vrot.slane %v5127_v30, 4 }
 0x646   : > { %v5126_v24 = vadd.f32 %v5125_v13, %v5124_v8  ;;  %v5129_v2 = vadd.f32 %v5128_v16, %v5127_v30  ;;  %v4941_v30 = vmul.f32 %v4485_v26, %v7597_v12 }
 0x648   : > { %v5261_v44 = vsel %vm2644_vm11, %v5126_v24, %v5260_v28  ;;  %v4901_v6 = vpop.f32.mrf.mxu0  ;;  %v5130_v5 = vrot.slane %v5129_v2, 2 }
 0x649   : > { %v5088_v38 = vmul.f32 %v8547_v57, %v4901_v6  ;;  %v4942_v6 = vmul.f32 %v4487_v1, %v7609_v50 }
 0x64a   : > { %v5131_v55 = vadd.f32 %v5130_v5, %v5129_v2  ;;  %v4944_v5 = vmul.f32 %v4492_v41, %v7633_v33 }
 0x64b   : > { %v5134_v52 = vsel %vm1420_vm0, %v5088_v38, 0.0 }
 0x64c   : > { %v5135_v42 = vrot.slane %v5134_v52, 4  ;;  %v5132_v32 = vrot.slane %v5131_v55, 1 }
 0x64e   : > { %v5136_v22 = vadd.f32 %v5135_v42, %v5134_v52  ;;  %v5133_v4 = vadd.f32 %v5132_v32, %v5131_v55 }
 0x650   : > { %v4904_v21 = vpop.f32.mrf.mxu0  ;;  %v5137_v18 = vrot.slane %v5136_v22, 2  ;;  %v5262_v53 = vsel %vm2646_vm12, %v5133_v4, %v5261_v44  ;;  %v5999_v44 = vld [vmem:[%s8727_s15 + $0x88] sm:$0xff]  ;;  %v4945_v4 = vmul.f32 %v4495_v29, %v7646_v60 }
 0x651   : > { %v5089_v11 = vmul.f32 %v8547_v57, %v4904_v21  ;;  %5336 = vmatpush.bf16.msra.mxu1 %v5999_v44 }
 0x652   : > { %v5138_v49 = vadd.f32 %v5137_v18, %v5136_v22  ;;  %v4497_v18 = vpop.f32.mrf.mxu3 }
 0x653   : > { %v5141_v63 = vsel %vm1420_vm0, %v5089_v11, 0.0 }
 0x654   : > { %v5142_v17 = vrot.slane %v5141_v63, 4  ;;  %v5139_v23 = vrot.slane %v5138_v49, 1 }
 0x656   : > { %v5143_v46 = vadd.f32 %v5142_v17, %v5141_v63  ;;  %v5140_v54 = vadd.f32 %v5139_v23, %v5138_v49 }
 0x658   : > { %v4906_v56 = vpop.f32.mrf.mxu0  ;;  %v5144_v15 = vrot.slane %v5143_v46, 2  ;;  %v5263_v10 = vsel %vm2648_vm14, %v5140_v54, %v5262_v53 }
 0x659   : > { %v5090_v34 = vmul.f32 %v8547_v57, %v4906_v56 }
 0x65a   : > { %v5145_v59 = vadd.f32 %v5144_v15, %v5143_v46  ;;  %v4946_v15 = vmul.f32 %v4497_v18, %v7654_v62 }
 0x65b   : > { %v5148_v20 = vsel %vm1420_vm0, %v5090_v34, 0.0 }
 0x65c   : > { %v5149_v35 = vrot.slane %v5148_v20, 4  ;;  %v5146_v14 = vrot.slane %v5145_v59, 1 }
 0x65e   : > { %v5150_v27 = vadd.f32 %v5149_v35, %v5148_v20  ;;  %v5147_v39 = vadd.f32 %v5146_v14, %v5145_v59 }
 0x660   : > { %v4909_v47 = vpop.f32.mrf.mxu0  ;;  %v5151_v43 = vrot.slane %v5150_v27, 2  ;;  %v5264_v16 = vsel %vm2650_vm15, %v5147_v39, %v5263_v10 }
 0x661   : > { %v5091_v49 = vmul.f32 %v8547_v57, %v4909_v47 }
 0x662   : > { %v5152_v8 = vadd.f32 %v5151_v43, %v5150_v27 }
 0x663   : > { %v5155_v47 = vsel %vm1420_vm0, %v5091_v49, 0.0 }
 0x664   : > { %v5153_v38 = vrot.slane %v5152_v8, 1 }
 0x666   : > { %v5154_v22 = vadd.f32 %v5153_v38, %v5152_v8 }
 0x668   : > { %v4911_v36 = vpop.f32.mrf.mxu0  ;;  %v8595_v54 = vsel %vm2652_vm1, %v5154_v22, %v5264_v16 }
 0x669   : > { %v4932_v51 = vpop.permute.xlu0 %4931  ;;  %v5092_v56 = vmul.f32 %v8547_v57, %v4911_v36 }
 0x66a   : > { %v4937_v28 = vsel %vm1420_vm0, %v8528_v61, %v4932_v51 }
 0x66b   : > { %v4955_v13 = vmul.f32 %v4939_v45, %v4937_v28  ;;  %v4956_v24 = vmul.f32 %v4940_v48, %v4937_v28  ;;  %v4957_v61 = vmul.f32 %v4941_v30, %v4937_v28  ;;  %v4958_v52 = vmul.f32 %v4942_v6, %v4937_v28 }
 0x66c   : > { %v4959_v42 = vmul.f32 %v4943_v58, %v4937_v28  ;;  %v4960_v11 = vmul.f32 %v4944_v5, %v4937_v28  ;;  %v5162_v20 = vsel %vm1420_vm0, %v5092_v56, 0.0  ;;  %v4961_v10 = vmul.f32 %v4945_v4, %v4937_v28 }
 0x66d   : > { %v4971_v0 = vsel %vm1838_vm13, %v4955_v13, 0.0  ;;  %v4978_v26 = vsel %vm1838_vm13, %v4956_v24, 0.0  ;;  %v4985_v55 = vsel %vm1838_vm13, %v4957_v61, 0.0  ;;  %v4992_v32 = vsel %vm1838_vm13, %v4958_v52, 0.0  ;;  %v5998_v13 = vld [vmem:[%s8727_s15 + $0x80] sm:$0xff] }
 0x66e   : > { %v4972_v21 = vrot.slane %v4971_v0, 4  ;;  %v4979_v1 = vrot.slane %v4978_v26, 4  ;;  %v4986_v63 = vrot.slane %v4985_v55, 4  ;;  %v4999_v23 = vsel %vm1838_vm13, %v4959_v42, 0.0  ;;  %5337 = vmatpush.bf16.msra.mxu1 %v5998_v13 }
 0x66f   : > { %v4993_v25 = vrot.slane %v4992_v32, 4  ;;  %v5006_v46 = vsel %vm1838_vm13, %v4960_v11, 0.0  ;;  %v5000_v36 = vrot.slane %v4999_v23, 4  ;;  %v4962_v27 = vmul.f32 %v4946_v15, %v4937_v28 }
 0x670   : > { %v4914_v19 = vpop.f32.mrf.mxu0  ;;  %v4973_v17 = vadd.f32 %v4972_v21, %v4971_v0  ;;  %v4980_v53 = vadd.f32 %v4979_v1, %v4978_v26  ;;  %v4987_v35 = vadd.f32 %v4986_v63, %v4985_v55  ;;  %v5007_v59 = vrot.slane %v5006_v46, 4  ;;  %v5997_v1 = vld [vmem:[%s8727_s15 + $0x78] sm:$0xff] }
 0x671   : > { %v5093_v41 = vmul.f32 %v8547_v57, %v4914_v19  ;;  %v4994_v43 = vadd.f32 %v4993_v25, %v4992_v32  ;;  %v5163_v39 = vrot.slane %v5162_v20, 4  ;;  %v5001_v29 = vadd.f32 %v5000_v36, %v4999_v23  ;;  %v5996_v23 = vld [vmem:[%s8727_s15 + $0x70] sm:$0xff] }
 0x672   : > { %v4974_v14 = vrot.slane %v4973_v17, 2  ;;  %v4981_v51 = vrot.slane %v4980_v53, 2  ;;  %v4988_v48 = vrot.slane %v4987_v35, 2  ;;  %v5013_v30 = vsel %vm1838_vm13, %v4961_v10, 0.0  ;;  %5338 = vmatpush.bf16.msra.mxu1 %v5997_v1 }
 0x673   : > { %v5156_v24 = vrot.slane %v5155_v47, 4  ;;  %v5169_v19 = vsel %vm1420_vm0, %v5093_v41, 0.0  ;;  %v5008_v28 = vadd.f32 %v5007_v59, %v5006_v46  ;;  %v5014_v16 = vrot.slane %v5013_v30, 4 }
 0x674   : > { %v4975_v44 = vadd.f32 %v4974_v14, %v4973_v17  ;;  %v4982_v6 = vadd.f32 %v4981_v51, %v4980_v53  ;;  %v4995_v61 = vrot.slane %v4994_v43, 2  ;;  %v5020_v0 = vsel %vm1838_vm13, %v4962_v27, 0.0 }
 0x675   : > { %v5015_v52 = vadd.f32 %v5014_v16, %v5013_v30  ;;  %v5021_v26 = vrot.slane %v5020_v0, 4  ;;  %v5164_v5 = vadd.f32 %v5163_v39, %v5162_v20  ;;  %v4989_v42 = vadd.f32 %v4988_v48, %v4987_v35 }
 0x676   : > { %v5002_v55 = vrot.slane %v5001_v29, 2  ;;  %v5170_v22 = vrot.slane %v5169_v19, 4  ;;  %v5009_v32 = vrot.slane %v5008_v28, 2  ;;  %v4976_v56 = vrot.slane %v4975_v44, 1  ;;  %5339 = vmatpush.bf16.msra.mxu1 %v5996_v23 }
 0x677   : > { %v5022_v18 = vadd.f32 %v5021_v26, %v5020_v0  ;;  %v4983_v63 = vrot.slane %v4982_v6, 1  ;;  %v5016_v49 = vrot.slane %v5015_v52, 2  ;;  %v4996_v53 = vadd.f32 %v4995_v61, %v4994_v43  ;;  %v5995_v43 = vld [vmem:[%s8727_s15 + $0x68] sm:$0xff]  ;;  %v5994_v0 = vld [vmem:[%s8727_s15 + $0x60] sm:$0xff] }
 0x678   : > { %v4916_v2 = vpop.f32.mrf.mxu0  ;;  %v4990_v46 = vrot.slane %v4989_v42, 1  ;;  %v5003_v15 = vadd.f32 %v5002_v55, %v5001_v29  ;;  %v5157_v20 = vadd.f32 %v5156_v24, %v5155_v47  ;;  %v5165_v10 = vrot.slane %v5164_v5, 2 }
 0x679   : > { %v5094_v45 = vmul.f32 %v8547_v57, %v4916_v2  ;;  %v5023_v25 = vrot.slane %v5022_v18, 2  ;;  %v5171_v35 = vadd.f32 %v5170_v22, %v5169_v19  ;;  %v5010_v36 = vadd.f32 %v5009_v32, %v5008_v28 }
 0x67a   : > { %v4977_v59 = vadd.f32 %v4976_v56, %v4975_v44  ;;  %v4984_v41 = vadd.f32 %v4983_v63, %v4982_v6  ;;  %v5017_v51 = vadd.f32 %v5016_v49, %v5015_v52  ;;  %v4997_v48 = vrot.slane %v4996_v53, 1  ;;  %5340 = vmatpush.bf16.msra.mxu1 %v5995_v43 }
 0x67b   : > { %v5176_v2 = vsel %vm1420_vm0, %v5094_v45, 0.0  ;;  %v4991_v47 = vadd.f32 %v4990_v46, %v4989_v42  ;;  %v5004_v13 = vrot.slane %v5003_v15, 1  ;;  %v5158_v30 = vrot.slane %v5157_v20, 2 }
 0x67c   : > { %v5177_v4 = vrot.slane %v5176_v2, 4  ;;  %v5172_v24 = vrot.slane %v5171_v35, 2  ;;  %v5011_v28 = vrot.slane %v5010_v36, 1  ;;  %v5166_v16 = vadd.f32 %v5165_v10, %v5164_v5 }
 0x67d   : > { %v5018_v61 = vrot.slane %v5017_v51, 1  ;;  %v5227_v52 = vsel %vm2640_vm9, %v4984_v41, %v4977_v59  ;;  %v5159_v22 = vadd.f32 %v5158_v30, %v5157_v20 }
 0x67e   : > { %v5178_v27 = vadd.f32 %v5177_v4, %v5176_v2  ;;  %v4998_v2 = vadd.f32 %v4997_v48, %v4996_v53  ;;  %v5228_v55 = vsel %vm2642_vm10, %v4991_v47, %v5227_v52  ;;  %v5173_v5 = vadd.f32 %v5172_v24, %v5171_v35  ;;  %5341 = vmatpush.bf16.msra.mxu1 %v5994_v0 }
 0x67f   : > { %v5019_v63 = vadd.f32 %v5018_v61, %v5017_v51 }
 0x680   : > { %v4919_v34 = vpop.f32.mrf.mxu0  ;;  %v5179_v44 = vrot.slane %v5178_v27, 2  ;;  %v5229_v1 = vsel %vm2644_vm11, %v4998_v2, %v5228_v55  ;;  %v4934_v55 = vpop.permute.xlu1 %4933 }
 0x681   : > { %v5095_v8 = vmul.f32 %v8547_v57, %v4919_v34 }
 0x682   : > { %v5180_v32 = vadd.f32 %v5179_v44, %v5178_v27 }
 0x683   : > { %v5183_v21 = vsel %vm1420_vm0, %v5095_v8, 0.0  ;;  %v5024_v8 = vadd.f32 %v5023_v25, %v5022_v18  ;;  %v5167_v25 = vrot.slane %v5166_v16, 1 }
 0x684   : > { %v5184_v17 = vrot.slane %v5183_v21, 4  ;;  %v5181_v59 = vrot.slane %v5180_v32, 1 }
 0x686   : > { %v5185_v39 = vadd.f32 %v5184_v17, %v5183_v21  ;;  %v5005_v21 = vadd.f32 %v5004_v13, %v5003_v15  ;;  %v5174_v15 = vrot.slane %v5173_v5, 1 }
 0x688   : > { %v4921_v38 = vpop.f32.mrf.mxu0  ;;  %v5230_v4 = vsel %vm2646_vm12, %v5005_v21, %v5229_v1 }
 0x689   : > { %v5096_v58 = vmul.f32 %v8547_v57, %v4921_v38  ;;  %v5186_v38 = vrot.slane %v5185_v39, 2 }
 0x68b   : > { %v5190_v11 = vsel %vm1420_vm0, %v5096_v58, 0.0  ;;  %v5025_v58 = vrot.slane %v5024_v8, 1  ;;  %v5187_v49 = vadd.f32 %v5186_v38, %v5185_v39  ;;  %v4500_v39 = vpop.f32.mrf.mxu3 }
 0x68c   : > { %v5191_v34 = vrot.slane %v5190_v11, 4 }
 0x68d   : > { %v5026_v23 = vadd.f32 %v5025_v58, %v5024_v8  ;;  %v5188_v27 = vrot.slane %v5187_v49, 1  ;;  %v5182_v8 = vadd.f32 %v5181_v59, %v5180_v32 }
 0x68e   : > { %v5192_v29 = vadd.f32 %v5191_v34, %v5190_v11  ;;  %v5012_v11 = vadd.f32 %v5011_v28, %v5010_v36  ;;  %v5160_v36 = vrot.slane %v5159_v22, 1 }
 0x68f   : > { %v5189_v47 = vadd.f32 %v5188_v27, %v5187_v49 }
 0x690   : > { %v4924_v14 = vpop.f32.mrf.mxu0  ;;  %v5193_v26 = vrot.slane %v5192_v29, 2  ;;  %v5231_v53 = vsel %vm2648_vm14, %v5012_v11, %v5230_v4  ;;  %v5161_v48 = vadd.f32 %v5160_v36, %v5159_v22  ;;  %v4947_v11 = vmul.f32 %v4500_v39, %v7574_v31 }
 0x691   : > { %v5097_v45 = vmul.f32 %v8547_v57, %v4924_v14  ;;  %v5232_v34 = vsel %vm2650_vm15, %v5019_v63, %v5231_v53 }
 0x692   : > { %v5194_v46 = vadd.f32 %v5193_v26, %v5192_v29  ;;  %v8636_v35 = vsel %vm2652_vm1, %v5026_v23, %v5232_v34 }
 0x693   : > { %v5197_v19 = vsel %vm1420_vm0, %v5097_v45, 0.0  ;;  %v5175_v45 = vadd.f32 %v5174_v15, %v5173_v5  ;;  %v4502_v58 = vpop.f32.mrf.mxu3  ;;  %v4938_v5 = vsel %vm1420_vm0, %v8536_v40, %v4934_v55 }
 0x694   : > { %v5198_v6 = vrot.slane %v5197_v19, 4  ;;  %v5195_v14 = vrot.slane %v5194_v46, 1  ;;  %v4948_v1 = vmul.f32 %v4502_v58, %v7577_v7  ;;  %v4963_v32 = vmul.f32 %v4947_v11, %v4938_v5 }
 0x696   : > { %v5199_v42 = vadd.f32 %v5198_v6, %v5197_v19  ;;  %v5196_v30 = vadd.f32 %v5195_v14, %v5194_v46 }
 0x698   : > { %v5200_v18 = vrot.slane %v5199_v42, 2  ;;  %v4926_v56 = vpop.f32.mrf.mxu0 }
 0x699   : > { %v5098_v17 = vmul.f32 %v8547_v57, %v4926_v56  ;;  %v5168_v57 = vadd.f32 %v5167_v25, %v5166_v16 }
 0x69a   : > { %v5201_v20 = vadd.f32 %v5200_v18, %v5199_v42  ;;  %v4964_v18 = vmul.f32 %v4948_v1, %v4938_v5 }
 0x69b   : > { %v5204_v10 = vsel %vm1420_vm0, %v5098_v17, 0.0  ;;  %v5266_v13 = vsel %vm2640_vm9, %v5168_v57, %v5161_v48  ;;  %v4505_v26 = vpop.f32.mrf.mxu3 }
 0x69c   : > { %v5205_v41 = vrot.slane %v5204_v10, 4  ;;  %v5202_v43 = vrot.slane %v5201_v20, 1  ;;  %v5267_v19 = vsel %vm2642_vm10, %v5175_v45, %v5266_v13  ;;  %v4949_v56 = vmul.f32 %v4505_v26, %v7597_v12 }
 0x69d   : > { %v5268_v44 = vsel %vm2644_vm11, %v5182_v8, %v5267_v19  ;;  %v5034_v4 = vsel %vm1838_vm13, %v4964_v18, 0.0 }
 0x69e   : > { %v5206_v51 = vadd.f32 %v5205_v41, %v5204_v10  ;;  %v5203_v28 = vadd.f32 %v5202_v43, %v5201_v20  ;;  %v5269_v16 = vsel %vm2646_vm12, %v5189_v47, %v5268_v44  ;;  %v4965_v63 = vmul.f32 %v4949_v56, %v4938_v5 }
 0x69f   : > { %v5270_v38 = vsel %vm2648_vm14, %v5196_v30, %v5269_v16  ;;  %v5035_v53 = vrot.slane %v5034_v4, 4 }
 0x6a0   : > { %v5207_v29 = vrot.slane %v5206_v51, 2  ;;  %v5271_v0 = vsel %vm2650_vm15, %v5203_v28, %v5270_v38  ;;  %v5041_v40 = vsel %vm1838_vm13, %v4965_v63, 0.0 }
 0x6a1   : > { %v5042_v7 = vrot.slane %v5041_v40, 4  ;;  %v5036_v15 = vadd.f32 %v5035_v53, %v5034_v4 }
 0x6a2   : > { %v5208_v24 = vadd.f32 %v5207_v29, %v5206_v51 }
 0x6a3   : > { %v4507_v42 = vpop.f32.mrf.mxu3  ;;  %v5043_v59 = vadd.f32 %v5042_v7, %v5041_v40  ;;  %v5037_v27 = vrot.slane %v5036_v15, 2 }
 0x6a4   : > { %v5209_v6 = vrot.slane %v5208_v24, 1  ;;  %v4950_v17 = vmul.f32 %v4507_v42, %v7609_v50 }
 0x6a5   : > { %v5044_v39 = vrot.slane %v5043_v59, 2  ;;  %v5038_v48 = vadd.f32 %v5037_v27, %v5036_v15 }
 0x6a6   : > { %v5210_v61 = vadd.f32 %v5209_v6, %v5208_v24  ;;  %v4966_v25 = vmul.f32 %v4950_v17, %v4938_v5 }
 0x6a7   : > { %v5045_v13 = vadd.f32 %v5044_v39, %v5043_v59  ;;  %v5039_v19 = vrot.slane %v5038_v48, 1 }
 0x6a8   : > { %v5272_v2 = vsel %vm2652_vm1, %v5210_v61, %v5271_v0  ;;  %v5048_v20 = vsel %vm1838_vm13, %v4966_v25, 0.0 }
 0x6a9   : > { %v6061_v52 = vpack.i.bf16 %v5272_v2, %v8595_v54  ;;  %v5027_v54 = vsel %vm1838_vm13, %v4963_v32, 0.0  ;;  %v5049_v57 = vrot.slane %v5048_v20, 4  ;;  %v5046_v16 = vrot.slane %v5045_v13, 1 }
 0x6aa   : > { %v5028_v23 = vrot.slane %v5027_v54, 4  ;;  %v5040_v0 = vadd.f32 %v5039_v19, %v5038_v48 }
 0x6ab   : > { %6062 = vrot.lane.b32.xlu2 %v6061_v52, %s8796_s25  ;;  %v4510_v21 = vpop.f32.mrf.mxu3  ;;  %v5050_v8 = vadd.f32 %v5049_v57, %v5048_v20  ;;  %v5047_v42 = vadd.f32 %v5046_v16, %v5045_v13  ;;  %s529_s25 = sand.u32 1, %s6646_s22  }
 0x6ac   : > { %v4951_v31 = vmul.f32 %v4510_v21, %v7619_v3  ;;  %v5029_v34 = vadd.f32 %v5028_v23, %v5027_v54  ;;  %s5446_s20 = sshll.u32 %s529_s25, 4  ;;  %s5353_s2 = scalar_lea.sflag [#allocation3], %s529_s25 }
 0x6ad   : > { %v5051_v28 = vrot.slane %v5050_v8, 2  ;;  %s531_s1 = scalar_lea.vmem [#allocation2], %s5446_s20 }
 0x6ae   : > { %v4967_v46 = vmul.f32 %v4951_v31, %v4938_v5  ;;  %v5030_v41 = vrot.slane %v5029_v34, 2  ;;  %s5365_s19 = sshll.u32 %s531_s1, 4  ;;  %s5366_s19 = int_to_ptr.vmem [resolvable:$true] %s5365_s19 }
 0x6af   : > { %v5052_v2 = vadd.f32 %v5051_v28, %v5050_v8 }
 0x6b0   : > { %v5055_v14 = vsel %vm1838_vm13, %v4967_v46, 0.0 }
 0x6b1   : > { %v5056_v45 = vrot.slane %v5055_v14, 4  ;;  %v5053_v55 = vrot.slane %v5052_v2, 1 }
 0x6b3   : > { %v4512_v22 = vpop.f32.mrf.mxu3  ;;  %v5057_v30 = vadd.f32 %v5056_v45, %v5055_v14  ;;  %v5054_v56 = vadd.f32 %v5053_v55, %v5052_v2 }
 0x6b4   : > { %v4952_v12 = vmul.f32 %v4512_v22, %v7633_v33  ;;  %v5031_v33 = vadd.f32 %v5030_v41, %v5029_v34 }
 0x6b5   : > { %v5058_v61 = vrot.slane %v5057_v30, 2 }
 0x6b6   : > { %v4968_v36 = vmul.f32 %v4952_v12, %v4938_v5  ;;  %v5032_v24 = vrot.slane %v5031_v33, 1 }
 0x6b7   : > { %v5059_v21 = vadd.f32 %v5058_v61, %v5057_v30 }
 0x6b8   : > { %v5062_v43 = vsel %vm1838_vm13, %v4968_v36, 0.0  ;;  %v5033_v38 = vadd.f32 %v5032_v24, %v5031_v33 }
 0x6b9   : > { %v5060_v32 = vrot.slane %v5059_v21, 1 }
 0x6bb   : > { %v4515_v49 = vpop.f32.mrf.mxu3  ;;  %v5061_v17 = vadd.f32 %v5060_v32, %v5059_v21 }
 0x6bc   : > { %v4953_v10 = vmul.f32 %v4515_v49, %v7646_v60  ;;  %v5063_v60 = vrot.slane %v5062_v43, 4 }
 0x6be   : > { %v4969_v51 = vmul.f32 %v4953_v10, %v4938_v5 }
 0x6c0   : > { %v5069_v47 = vsel %vm1838_vm13, %v4969_v51, 0.0 }
 0x6c1   : > { %v5070_v44 = vrot.slane %v5069_v47, 4 }
 0x6c3   : > { %v4517_v50 = vpop.f32.mrf.mxu3  ;;  %v5071_v52 = vadd.f32 %v5070_v44, %v5069_v47 }
 0x6c4   : > { %v4954_v3 = vmul.f32 %v4517_v50, %v7654_v62  ;;  %v5064_v62 = vadd.f32 %v5063_v60, %v5062_v43 }
 0x6c5   : > { %v5072_v11 = vrot.slane %v5071_v52, 2 }
 0x6c6   : > { %v4970_v29 = vmul.f32 %v4954_v3, %v4938_v5  ;;  %v5065_v26 = vrot.slane %v5064_v62, 2  ;;  %v5234_v5 = vsel %vm2640_vm9, %v5040_v0, %v5033_v38 }
 0x6c7   : > { %v5235_v18 = vsel %vm2642_vm10, %v5047_v42, %v5234_v5  ;;  %v5073_v54 = vadd.f32 %v5072_v11, %v5071_v52 }
 0x6c8   : > { %v5076_v6 = vsel %vm1838_vm13, %v4970_v29, 0.0  ;;  %v5066_v1 = vadd.f32 %v5065_v26, %v5064_v62  ;;  %v5236_v49 = vsel %vm2644_vm11, %v5054_v56, %v5235_v18 }
 0x6c9   : > { %v5077_v58 = vrot.slane %v5076_v6, 4  ;;  %v5074_v53 = vrot.slane %v5073_v54, 1  ;;  %v5237_v40 = vsel %vm2646_vm12, %v5061_v17, %v5236_v49 }
 0x6ca   : > { %v5067_v4 = vrot.slane %v5066_v1, 1 }
 0x6cb   : > { %v5078_v22 = vadd.f32 %v5077_v58, %v5076_v6  ;;  %v5075_v46 = vadd.f32 %v5074_v53, %v5073_v54 }
 0x6cc   : > { %v5068_v25 = vadd.f32 %v5067_v4, %v5066_v1 }
 0x6cd   : > { %v5079_v63 = vrot.slane %v5078_v22, 2 }
 0x6ce   : > { %v5238_v7 = vsel %vm2648_vm14, %v5068_v25, %v5237_v40 }
 0x6cf   : > { %v5080_v23 = vadd.f32 %v5079_v63, %v5078_v22  ;;  %v5239_v34 = vsel %vm2650_vm15, %v5075_v46, %v5238_v7 }
 0x6d1   : > { %v5081_v31 = vrot.slane %v5080_v23, 1 }
 0x6d3   : > { %v5082_v15 = vadd.f32 %v5081_v31, %v5080_v23 }
 0x6d5   : > { %v5240_v36 = vsel %vm2652_vm1, %v5082_v15, %v5239_v34 }
 0x705   : > { %v6063_v12 = vpop.permute.xlu2 %6062 }
 0x706   : > { %v6065_v20 = vunpack.i.h.bf16 %v6063_v12  ;;  %v6064_v10 = vunpack.i.l.bf16 %v6063_v12 }
 0x708   : > { %v5280_v59 = vsel %vm1838_vm13, %v5240_v36, %v6065_v20  ;;  %v5279_v50 = vsel %vm1838_vm13, %v8636_v35, %v6064_v10 }
 0x709   : > { %v5281_v41 = vpack.c.bf16 %v5280_v59, %v5279_v50 }
 0x70b   : > { %5940 = vmatmul.msk.bf16.vlgmr.msra.gmra.mxu1 %vm2750_vm3, %v5281_v41 }
 0x788   : > { %v5343_v27 = vpop.f32.mrf.mxu1 }
 0x789   : > { %v5348_v57 = vadd.f32 %v5343_v27, %v8428_v37 }
 0x78b   : > { %5350 = vst.msk [vmem:[%s531_s1] sm:$0xff] %vm1420_vm0, %v5348_v57 }
 0x790   : > { %v5345_v35 = vpop.f32.mrf.mxu1 }
 0x791   : > { %v5349_v14 = vadd.f32 %v5345_v35, %v8431_v9 }
 0x793   : > { %5351 = vst.msk [vmem:[%s531_s1 + $0x8] sm:$0xff] %vm1420_vm0, %v5349_v14 }
 0x794   : > { %6619 = shalt.err (!%p6616_p3)
}
 0x795   : > { %s6659_s25 = smov 128   ;;  %s6660_s1 = smov 8  }
 0x796   : > { %6001 = dma.vmem_to_hbm [thread:$0]  (%p6781_p5), %s5366_s19, 256, %s5368_s29, %s5353_s2, %s6659_s25, %s6659_s25, %s6660_s1  }
 0x797 PF: > { %p6007_p4 = scmp.ge.s32.totalorder %s6654_s24, 2  ;;  %s5382_s20 = sand.u32 1, %s6642_s21  }
 0x798   : > { %s5383_s26 = scalar_lea.sflag [#allocation3], %s5382_s20 }
 0x799   : > { %p6004_p7 = pnand %p6007_p4, %p6785_p6 }
 0x79b   : > { %p6005_p8 = pneg %p6004_p7 }
 0x79d   : > { %6637 = dma.done.wait (%p6005_p8), %s5383_s26, 256  }
 0x79e   : > { %6639 = vsyncadd (%p6005_p8), %s5383_s26, 4294967040  ;;  %s8799_s3 = sld [smem:[#allocation5_spill]]  ;;  %p26_p9 = scmp.ge.s32.totalorder %s6769_s27, 4  }
 0x79f   : > { %s8800_s21 = smov %s6646_s22  ;;  %s8801_s22 = smov %s6650_s23 }
 0x7a0   : > { %s8803_s24 = smov %s6769_s27  ;;  %28 = sbr.rel (!%p26_p9) target bundleno = 9 (0x9), region = 138 }
 0x7a4   : > { %s8802_s23 = smov %s8799_s3 }
 0x7a5   :  { %5389 = vsyncpa [#allocation3], 1 }
 0x7a6   :  { %5391 = vsyncpa [#allocation3 + $0x1], 1 }

</bundles_post_ra>
